<compile_context>
chip_gen: v7x
topology: tpu7x:2x2x1
jax: 0.10.0
libtpu: 0.0.40
codegen_flags: <defaults>
</compile_context>

<pallas_src>
import functools
import math
from typing import Any, Dict, List, NamedTuple, Optional

import jax
import jax.numpy as jnp
import numpy as np
from jax import lax
from jax.experimental import pallas as pl
from jax.experimental.pallas import tpu as pltpu

# ---- configuration (small, deterministic, consistent with the module) ----
T = 8              # encoder frames
D = 32             # encoder / hidden dim
V = 128            # vocab size (lane-aligned, power of two)
BEAM = 4           # beam size
BEAM_PAD = 8       # beam rows padded to the f32 sublane tile
SOS = V - 1
EOS = V - 1
DEC_WEIGHT = 1.0   # weights["decoder"]
NEG_INF = float("-inf")
LOG2_V = V.bit_length() - 1
assert V == (1 << LOG2_V)


# ------------------------- Pallas kernel: fused decode loop -------------------------
def _fused_decode_kernel(emb_ref, w_ref, bias_ref, xbar_ref,   # inputs (VMEM-resident)
                         out_ref,                              # packed per-step output
                         tbl_ref):                             # VMEM scratch: logp table
    maxlen = out_ref.shape[0]

    # -------- one-time prologue: hoisted scorer --------
    # The synthetic full-scorer only depends on the last token, so the whole per-token
    # log-softmax table is computed once and kept resident in VMEM scratch.
    h = jnp.tanh(emb_ref[...] + xbar_ref[...])                              # (V, D)
    logits = jnp.dot(h, w_ref[...], preferred_element_type=jnp.float32) + bias_ref[...]
    m = jnp.max(logits, axis=-1, keepdims=True)
    lse = jnp.log(jnp.sum(jnp.exp(logits - m), axis=-1, keepdims=True)) + m
    tbl_ref[...] = logits - lse                                             # (V, V)

    # constant index helpers
    row8 = lax.broadcasted_iota(jnp.int32, (BEAM_PAD, 1), 0)
    row8V = lax.broadcasted_iota(jnp.int32, (BEAM_PAD, V), 0)
    col8V = lax.broadcasted_iota(jnp.int32, (BEAM_PAD, V), 1)
    flat_idx = row8V * V + col8V
    lane = lax.broadcasted_iota(jnp.int32, (1, V), 1)
    out_row_ids = lax.broadcasted_iota(jnp.int32, (maxlen, V), 0)
    sentinel = jnp.int32(BEAM_PAD * V)

    # initial beam state: row 0 = SOS hypothesis (score 0); all other rows are dead
    oh0 = jnp.where(jnp.logical_and(row8V == 0, col8V == SOS),
                    jnp.float32(1.0), jnp.float32(0.0))                    # (8, V)
    prev0 = (jnp.full((), 0.0, jnp.float32),) + tuple(
        jnp.full((), NEG_INF, jnp.float32) for _ in range(BEAM - 1))
    out0 = jnp.zeros((maxlen, V), jnp.float32)

    def step_body(step, carry):
        onehot, prevs, out_acc = carry

        # running-score column (padding rows stay -inf and can never win)
        prev_col = jnp.full((BEAM_PAD, 1), NEG_INF, jnp.float32)
        for j in range(BEAM):
            prev_col = jnp.where(row8 == j, prevs[j], prev_col)

        # gather the BEAM last-token rows of the resident table on the MXU
        logp_rows = jnp.dot(onehot, tbl_ref[...],
                            preferred_element_type=jnp.float32)            # (8, V)
        weighted = DEC_WEIGHT * logp_rows + prev_col                        # (8, V)

        # ---- statically unrolled exact top-BEAM over the flattened (beam, vocab) grid ----
        w_cur = weighted
        out_row = jnp.zeros((1, V), jnp.float32)
        new_oh = jnp.zeros((BEAM_PAD, V), jnp.float32)
        new_prevs = []
        for j in range(BEAM):
            v = jnp.max(w_cur)
            idx = jnp.min(jnp.where(w_cur == v, flat_idx, sentinel))
            finite = v > jnp.float32(NEG_INF)            # False for -inf and NaN
            tok = jnp.where(finite, idx & (V - 1), 0)    # idx % V   (V power of two)
            src = jnp.where(finite, idx >> LOG2_V, 0)    # idx // V
            score = jnp.where(finite, v, jnp.float32(NEG_INF))

            # prev[src] via a scalar select chain (no XLU reduction, no memory traffic)
            prev_src = prevs[BEAM - 1]
            for jj in range(BEAM - 2, -1, -1):
                prev_src = jnp.where(src == jj, prevs[jj], prev_src)
            lp = jnp.where(finite,
                           (v - prev_src) * jnp.float32(1.0 / DEC_WEIGHT),
                           jnp.float32(0.0))

            # pack into one lane-dense row: [score x4 | token x4 | src x4 | logp x4]
            out_row = jnp.where(lane == j, score, out_row)
            out_row = jnp.where(lane == BEAM + j, tok.astype(jnp.float32), out_row)
            out_row = jnp.where(lane == 2 * BEAM + j, src.astype(jnp.float32), out_row)
            out_row = jnp.where(lane == 3 * BEAM + j, lp, out_row)

            # carry: a candidate that selected EOS (or is dead) stops running next step
            dead = jnp.logical_or(tok == EOS, jnp.logical_not(finite))
            new_prevs.append(jnp.where(dead, jnp.float32(NEG_INF), score))
            new_oh = jnp.where(jnp.logical_and(row8V == j, col8V == tok),
                               jnp.float32(1.0), new_oh)

            # mask only the selected cell; equal values elsewhere stay eligible
            w_cur = jnp.where(flat_idx == idx, jnp.float32(NEG_INF), w_cur)

        out_acc = jnp.where(out_row_ids == step, out_row, out_acc)
        return (new_oh, tuple(new_prevs), out_acc)

    _, _, out_final = lax.fori_loop(0, maxlen, step_body, (oh0, prev0, out0),
                                    unroll=True)
    out_ref[...] = out_final     # single unmasked full-tile store


@functools.partial(jax.jit, static_argnames=("maxlen",))
def fused_beam_decode(emb, w, bias, xbar, maxlen):
    const2 = lambda i: (0, 0)   # resident blocks: same (full) block for the single step
    return pl.pallas_call(
        _fused_decode_kernel,
        out_shape=jax.ShapeDtypeStruct((maxlen, V), jnp.float32),
        grid=(1,),
        in_specs=[
            pl.BlockSpec((V, D), const2),   # emb table
            pl.BlockSpec((D, V), const2),   # output projection W
            pl.BlockSpec((1, V), const2),   # output bias
            pl.BlockSpec((1, D), const2),   # xbar = mean(x) (hoisted, loop-invariant)
        ],
        out_specs=pl.BlockSpec((maxlen, V), const2),
        scratch_shapes=[pltpu.VMEM((V, V), jnp.float32)],   # resident log-softmax table
        compiler_params=pltpu.CompilerParams(dimension_semantics=("arbitrary",)),
    )(emb, w, bias, xbar)


# ------------------------- host-side BeamSearch glue -------------------------
class Hypothesis(NamedTuple):
    yseq: Any                                   # tuple[int, ...] during search; jnp array in the n-best
    score: float = 0.0
    scores: Optional[Dict[str, float]] = None


class BeamSearch:
    """Beam search driver; the entire per-token hot path runs inside one Pallas kernel."""

    def __init__(self, emb, w, b, weights, beam_size, vocab_size, sos, eos):
        self.emb, self.w, self.b = emb, w, b
        self.weights = weights
        self.beam_size = beam_size
        self.n_vocab = vocab_size
        self.sos, self.eos = sos, eos
        # the kernel bakes the decoder weight / beam / vocab as compile-time constants
        assert abs(weights.get("decoder", 0.0) - DEC_WEIGHT) < 1e-12
        assert beam_size == BEAM and vocab_size == V

    def init_hyp(self, x) -> List[Hypothesis]:
        return [Hypothesis(yseq=(self.sos,), score=0.0, scores={"decoder": 0.0})]

    @staticmethod
    def append_token(xs, x: int):
        return tuple(xs) + (int(x),)

    def _post_process(self, i, maxlen, row_hyps, ended_hyps):
        # mirrors BeamSearch.post_process of the original module
        if i == maxlen - 1:
            row_hyps = [None if h is None
                        else h._replace(yseq=self.append_token(h.yseq, self.eos))
                        for h in row_hyps]
        out_rows: List[Optional[Hypothesis]] = []
        for h in row_hyps:
            if h is not None and h.yseq[-1] == self.eos:
                s_fin = 0.0   # ScorerInterface.final_score default
                new_scores = dict(h.scores)
                new_scores["decoder"] = new_scores["decoder"] + s_fin
                ended_hyps.append(h._replace(
                    score=h.score + self.weights["decoder"] * s_fin, scores=new_scores))
                out_rows.append(None)   # no longer running (kernel sets its prev to -inf too)
            else:
                out_rows.append(h)
        return out_rows

    def __call__(self, x: jnp.ndarray, maxlenratio: float = 0.0,
                 minlenratio: float = 0.0) -> List[Hypothesis]:
        if maxlenratio == 0:
            maxlen = x.shape[0]
        elif maxlenratio < 0:
            maxlen = -1 * int(maxlenratio)
        else:
            maxlen = max(1, int(maxlenratio * x.shape[0]))

        # loop-invariant encoder summary, computed once (hoisted out of the decode loop)
        xbar = jnp.mean(x, axis=0, keepdims=True)

        # one fused kernel call decodes ALL maxlen steps; ONE host sync pulls the packed
        # (maxlen, 128) candidate table for the traceback below.
        packed = fused_beam_decode(self.emb, self.w, self.b, xbar, maxlen=maxlen)
        packed = np.asarray(jax.device_get(packed))
        s = packed[:, 0:BEAM]
        t = packed[:, BEAM:2 * BEAM].astype(np.int64)        # small ints, exact in f32
        bsrc = packed[:, 2 * BEAM:3 * BEAM].astype(np.int64)
        lp = packed[:, 3 * BEAM:4 * BEAM]

        # ---- host-side traceback; mirrors the original search()/post_process() loop ----
        row_hyps: List[Optional[Hypothesis]] = [None] * self.beam_size
        row_hyps[0] = self.init_hyp(x)[0]
        ended_hyps: List[Hypothesis] = []
        for i in range(maxlen):
            new_rows: List[Optional[Hypothesis]] = [None] * self.beam_size
            for j in range(self.beam_size):
                sc = float(s[i, j])
                if not math.isfinite(sc):
                    continue                       # dead / padding candidate
                src, tok = int(bsrc[i, j]), int(t[i, j])
                hyp = row_hyps[src] if 0 <= src < self.beam_size else None
                if hyp is None:
                    continue                       # defensive; cannot happen for finite sc
                new_rows[j] = Hypothesis(
                    yseq=self.append_token(hyp.yseq, tok),
                    score=sc,
                    scores={"decoder": hyp.scores["decoder"] + float(lp[i, j])},
                )
            row_hyps = self._post_process(i, maxlen, new_rows, ended_hyps)
            # TODO(synk): end_detect() early-stopping heuristic (host-side, data-dependent
            # list logic) is not reproduced; the kernel always runs to maxlen (dead beams
            # carry -inf and cost ~nothing).
            if all(h is None for h in row_hyps):
                break

        if not ended_hyps:
            ended_hyps = [h for h in row_hyps if h is not None]
        nbest = sorted(ended_hyps, key=lambda h: h.score, reverse=True)[: self.beam_size]
        return [h._replace(yseq=jnp.asarray(h.yseq, dtype=jnp.int32)) for h in nbest]


# ------------------------------------ main ------------------------------------
if __name__ == "__main__":
    key = jax.random.PRNGKey(0)
    k1, k2, k3, k4 = jax.random.split(key, 4)

    # deterministic synthetic "decoder" full-scorer parameters
    emb = 0.1 * jax.random.normal(k1, (V, D), dtype=jnp.float32)   # token embedding
    w = 0.1 * jax.random.normal(k2, (D, V), dtype=jnp.float32)     # output projection
    b = 0.01 * jax.random.normal(k3, (1, V), dtype=jnp.float32)    # output bias
    x = jax.random.normal(k4, (T, D), dtype=jnp.float32)           # encoder output (T, D)

    maxlen = T
    xbar = jnp.mean(x, axis=0, keepdims=True)
    packed_d = fused_beam_decode(emb, w, b, xbar, maxlen=maxlen)
    jax.block_until_ready(packed_d)

    packed = np.asarray(jax.device_get(packed_d))
    S = packed[:, 0:BEAM]
    Tk = packed[:, BEAM:2 * BEAM].astype(np.int64)
    Bm = packed[:, 2 * BEAM:3 * BEAM].astype(np.int64)
    LP = packed[:, 3 * BEAM:4 * BEAM]

    # ---- correctness: teacher-forced pure-numpy reference driven by the kernel outputs ----
    E, W, Bias, X = (np.asarray(emb), np.asarray(w), np.asarray(b), np.asarray(xbar))
    prev = np.full((BEAM_PAD,), -np.inf, np.float32); prev[0] = 0.0
    last = np.full((BEAM_PAD,), SOS, np.int64)
    max_err = 0.0
    for i in range(maxlen):
        h_np = np.tanh(E[last] + X)
        logits_np = (h_np @ W + Bias).astype(np.float32)
        mm = logits_np.max(-1, keepdims=True)
        logp_np = logits_np - (np.log(np.exp(logits_np - mm).sum(-1, keepdims=True)) + mm)
        weighted_np = DEC_WEIGHT * logp_np + prev[:, None]
        if i == 0:
            ref_top = np.sort(weighted_np.reshape(-1))[::-1][:BEAM]
            assert np.allclose(S[0], ref_top, atol=1e-3), "step-0 top-k mismatch"
        new_prev = np.full((BEAM_PAD,), -np.inf, np.float32)
        new_last = last.copy()
        for j in range(BEAM):
            sc = float(S[i, j])
            if not math.isfinite(sc):
                continue
            src, tok = int(Bm[i, j]), int(Tk[i, j])
            max_err = max(max_err,
                          abs(sc - float(weighted_np[src, tok])),
                          abs(float(LP[i, j]) - float(logp_np[src, tok])))
            if tok != EOS:
                new_prev[j] = sc
            new_last[j] = tok
        prev, last = new_prev, new_last
        if not np.any(np.isfinite(prev)):
            break
    assert max_err < 5e-3, f"kernel vs reference mismatch: {max_err}"

    # ---- full beam-search forward pass ----
    bs = BeamSearch(emb, w, b, weights={"decoder": DEC_WEIGHT},
                    beam_size=BEAM, vocab_size=V, sos=SOS, eos=EOS)
    nbest = bs(x, maxlenratio=0.0, minlenratio=0.0)
    jax.block_until_ready(nbest[0].yseq)
    assert len(nbest) >= 1
    assert int(nbest[0].yseq[0]) == SOS and int(nbest[0].yseq[-1]) == EOS

    print("KERNEL_OK")
</pallas_src>

<mosaic_0001>
module attributes {stable_mosaic.version = 11 : i64} {
  func.func @_fused_decode_kernel(%arg0: i32, %arg1: memref<128x32xf32, #tpu.memory_space<vmem>>, %arg2: memref<32x128xf32, #tpu.memory_space<vmem>>, %arg3: memref<1x128xf32, #tpu.memory_space<vmem>>, %arg4: memref<1x32xf32, #tpu.memory_space<vmem>>, %arg5: memref<8x128xf32, #tpu.memory_space<vmem>>, %arg6: memref<128x128xf32, #tpu.memory_space<vmem>>) attributes {dimension_semantics = [#tpu.dimension_semantics<arbitrary>], iteration_bounds = array<i64: 1>, scalar_prefetch = 0 : i64, scratch_operands = 1 : i64, tpu.core_type = #tpu.core_type<tc>, window_params = [{pipeline_mode = #tpu.pipeline_mode<synchronous>, transform_indices = @transform_0, window_bounds = array<i64: 128, 32>}, {pipeline_mode = #tpu.pipeline_mode<synchronous>, transform_indices = @transform_1, window_bounds = array<i64: 32, 128>}, {pipeline_mode = #tpu.pipeline_mode<synchronous>, transform_indices = @transform_2, window_bounds = array<i64: 1, 128>}, {pipeline_mode = #tpu.pipeline_mode<synchronous>, transform_indices = @transform_3, window_bounds = array<i64: 1, 32>}, {pipeline_mode = #tpu.pipeline_mode<synchronous>, transform_indices = @transform_4, window_bounds = array<i64: 8, 128>}]} {
    %c0 = arith.constant 0 : index
    %c0_0 = arith.constant 0 : index
    %0 = vector.load %arg1[%c0, %c0_0] : memref<128x32xf32, #tpu.memory_space<vmem>>, vector<128x32xf32>
    %c0_1 = arith.constant 0 : index
    %c0_2 = arith.constant 0 : index
    %1 = vector.load %arg4[%c0_1, %c0_2] : memref<1x32xf32, #tpu.memory_space<vmem>>, vector<1x32xf32>
    %2 = vector.broadcast %1 : vector<1x32xf32> to vector<128x32xf32>
    %3 = arith.addf %0, %2 : vector<128x32xf32>
    %4 = math.tanh %3 : vector<128x32xf32>
    %c0_3 = arith.constant 0 : index
    %c0_4 = arith.constant 0 : index
    %5 = vector.load %arg2[%c0_3, %c0_4] : memref<32x128xf32, #tpu.memory_space<vmem>>, vector<32x128xf32>
    %cst = arith.constant dense<0.000000e+00> : vector<128x128xf32>
    %6 = tpu.matmul %4, %5, %cst {dimension_numbers = #tpu.dot_dimension_numbers<[1], [0], [0], [1], [0, 0, 1, 1], [], []>} : vector<128x32xf32>, vector<32x128xf32>, vector<128x128xf32> -> vector<128x128xf32>
    %c0_5 = arith.constant 0 : index
    %c0_6 = arith.constant 0 : index
    %7 = vector.load %arg3[%c0_5, %c0_6] : memref<1x128xf32, #tpu.memory_space<vmem>>, vector<1x128xf32>
    %8 = vector.broadcast %7 : vector<1x128xf32> to vector<128x128xf32>
    %9 = arith.addf %6, %8 : vector<128x128xf32>
    %cst_7 = arith.constant dense<0xFF800000> : vector<128xf32>
    %10 = vector.multi_reduction <maximumf>, %9, %cst_7 [1] : vector<128x128xf32> to vector<128xf32>
    %11 = vector.shape_cast %10 : vector<128xf32> to vector<128x1xf32>
    %12 = vector.broadcast %11 : vector<128x1xf32> to vector<128x128xf32>
    %13 = arith.subf %9, %12 : vector<128x128xf32>
    %14 = math.exp %13 : vector<128x128xf32>
    %cst_8 = arith.constant dense<0.000000e+00> : vector<128xf32>
    %15 = vector.multi_reduction <add>, %14, %cst_8 [1] : vector<128x128xf32> to vector<128xf32>
    %16 = vector.shape_cast %15 : vector<128xf32> to vector<128x1xf32>
    %17 = math.log %16 : vector<128x1xf32>
    %18 = arith.addf %17, %11 : vector<128x1xf32>
    %19 = vector.broadcast %18 : vector<128x1xf32> to vector<128x128xf32>
    %20 = arith.subf %9, %19 : vector<128x128xf32>
    %c0_9 = arith.constant 0 : index
    %c0_10 = arith.constant 0 : index
    %21 = vector.load %arg6[%c0_9, %c0_10] : memref<128x128xf32, #tpu.memory_space<vmem>>, vector<128x128xf32>
    tpu.vector_store %arg6[%c0_9, %c0_10], %20 {strides = array<i32>} : memref<128x128xf32, #tpu.memory_space<vmem>>, vector<128x128xf32>,
    %22 = tpu.iota {dimensions = array<i32: 0>} : vector<8x1xi32>
    %23 = tpu.iota {dimensions = array<i32: 0>} : vector<8x128xi32>
    %24 = tpu.iota {dimensions = array<i32: 1>} : vector<8x128xi32>
    %c128_i32 = arith.constant 128 : i32
    %25 = vector.broadcast %c128_i32 : i32 to vector<8x128xi32>
    %26 = arith.muli %23, %25 : vector<8x128xi32>
    %27 = arith.addi %26, %24 : vector<8x128xi32>
    %28 = tpu.iota {dimensions = array<i32: 1>} : vector<1x128xi32>
    %29 = tpu.iota {dimensions = array<i32: 0>} : vector<8x128xi32>
    %c0_i32 = arith.constant 0 : i32
    %30 = vector.broadcast %c0_i32 : i32 to vector<8x128xi32>
    %31 = arith.cmpi eq, %23, %30 : vector<8x128xi32>
    %c127_i32 = arith.constant 127 : i32
    %32 = vector.broadcast %c127_i32 : i32 to vector<8x128xi32>
    %33 = arith.cmpi eq, %24, %32 : vector<8x128xi32>
    %34 = arith.andi %31, %33 : vector<8x128xi1>
    %cst_11 = arith.constant 1.000000e+00 : f32
    %cst_12 = arith.constant 0.000000e+00 : f32
    %35 = vector.broadcast %cst_11 : f32 to vector<8x128xf32>
    %36 = vector.broadcast %cst_12 : f32 to vector<8x128xf32>
    %37 = arith.select %34, %35, %36 : vector<8x128xi1>, vector<8x128xf32>
    %cst_13 = arith.constant 0.000000e+00 : f32
    %38 = vector.broadcast %cst_13 : f32 to vector<8x128xf32>
    %c1024_i32 = arith.constant 1024 : i32
    %cst_14 = arith.constant 0.000000e+00 : f32
    %cst_15 = arith.constant 0xFF800000 : f32
    %cst_16 = arith.constant 0xFF800000 : f32
    %cst_17 = arith.constant 0xFF800000 : f32
    %c0_i32_18 = arith.constant 0 : i32
    %cst_19 = arith.constant 0xFF800000 : f32
    %39 = vector.broadcast %cst_19 : f32 to vector<8x1xf32>
    %c0_i32_20 = arith.constant 0 : i32
    %40 = vector.broadcast %c0_i32_20 : i32 to vector<8x1xi32>
    %41 = arith.cmpi eq, %22, %40 : vector<8x1xi32>
    %42 = vector.broadcast %cst_14 : f32 to vector<8x1xf32>
    %43 = arith.select %41, %42, %39 : vector<8x1xi1>, vector<8x1xf32>
    %c1_i32 = arith.constant 1 : i32
    %44 = vector.broadcast %c1_i32 : i32 to vector<8x1xi32>
    %45 = arith.cmpi eq, %22, %44 : vector<8x1xi32>
    %46 = vector.broadcast %cst_15 : f32 to vector<8x1xf32>
    %47 = arith.select %45, %46, %43 : vector<8x1xi1>, vector<8x1xf32>
    %c2_i32 = arith.constant 2 : i32
    %48 = vector.broadcast %c2_i32 : i32 to vector<8x1xi32>
    %49 = arith.cmpi eq, %22, %48 : vector<8x1xi32>
    %50 = vector.broadcast %cst_16 : f32 to vector<8x1xf32>
    %51 = arith.select %49, %50, %47 : vector<8x1xi1>, vector<8x1xf32>
    %c3_i32 = arith.constant 3 : i32
    %52 = vector.broadcast %c3_i32 : i32 to vector<8x1xi32>
    %53 = arith.cmpi eq, %22, %52 : vector<8x1xi32>
    %54 = vector.broadcast %cst_17 : f32 to vector<8x1xf32>
    %55 = arith.select %53, %54, %51 : vector<8x1xi1>, vector<8x1xf32>
    %c0_21 = arith.constant 0 : index
    %c0_22 = arith.constant 0 : index
    %56 = vector.load %arg6[%c0_21, %c0_22] : memref<128x128xf32, #tpu.memory_space<vmem>>, vector<128x128xf32>
    %cst_23 = arith.constant dense<0.000000e+00> : vector<8x128xf32>
    %57 = tpu.matmul %37, %56, %cst_23 {dimension_numbers = #tpu.dot_dimension_numbers<[1], [0], [0], [1], [0, 0, 1, 1], [], []>} : vector<8x128xf32>, vector<128x128xf32>, vector<8x128xf32> -> vector<8x128xf32>
    %cst_24 = arith.constant 1.000000e+00 : f32
    %58 = vector.broadcast %cst_24 : f32 to vector<8x128xf32>
    %59 = arith.mulf %58, %57 : vector<8x128xf32>
    %60 = vector.broadcast %55 : vector<8x1xf32> to vector<8x128xf32>
    %61 = arith.addf %59, %60 : vector<8x128xf32>
    %cst_25 = arith.constant 0.000000e+00 : f32
    %62 = vector.broadcast %cst_25 : f32 to vector<1x128xf32>
    %cst_26 = arith.constant 0.000000e+00 : f32
    %63 = vector.broadcast %cst_26 : f32 to vector<8x128xf32>
    %64 = vector.shape_cast %61 : vector<8x128xf32> to vector<1x8x128xf32>
    %cst_27 = arith.constant dense<0xFF800000> : vector<1xf32>
    %65 = vector.multi_reduction <maximumf>, %64, %cst_27 [1, 2] : vector<1x8x128xf32> to vector<1xf32>
    %66 = vector.shape_cast %65 : vector<1xf32> to vector<1x1x1xf32>
    %67 = vector.extract %66[0, 0, 0] : f32 from vector<1x1x1xf32>
    %68 = vector.broadcast %67 : f32 to vector<8x128xf32>
    %69 = arith.cmpf oeq, %61, %68 : vector<8x128xf32>
    %70 = vector.broadcast %c1024_i32 : i32 to vector<8x128xi32>
    %71 = arith.select %69, %27, %70 : vector<8x128xi1>, vector<8x128xi32>
    %72 = vector.shape_cast %71 : vector<8x128xi32> to vector<1x8x128xi32>
    %cst_28 = arith.constant dense<2147483647> : vector<1xi32>
    %73 = vector.multi_reduction <minsi>, %72, %cst_28 [1, 2] : vector<1x8x128xi32> to vector<1xi32>
    %74 = vector.shape_cast %73 : vector<1xi32> to vector<1x1x1xi32>
    %75 = vector.extract %74[0, 0, 0] : i32 from vector<1x1x1xi32>
    %cst_29 = arith.constant 0xFF800000 : f32
    %76 = arith.cmpf ogt, %67, %cst_29 : f32
    %c127_i32_30 = arith.constant 127 : i32
    %77 = arith.andi %75, %c127_i32_30 : i32
    %c0_i32_31 = arith.constant 0 : i32
    %78 = arith.select %76, %77, %c0_i32_31 : i32
    %c7_i32 = arith.constant 7 : i32
    %79 = arith.shrsi %75, %c7_i32 : i32
    %c0_i32_32 = arith.constant 0 : i32
    %80 = arith.select %76, %79, %c0_i32_32 : i32
    %cst_33 = arith.constant 0xFF800000 : f32
    %81 = arith.select %76, %67, %cst_33 : f32
    %c2_i32_34 = arith.constant 2 : i32
    %82 = arith.cmpi eq, %80, %c2_i32_34 : i32
    %83 = arith.select %82, %cst_16, %cst_17 : f32
    %c1_i32_35 = arith.constant 1 : i32
    %84 = arith.cmpi eq, %80, %c1_i32_35 : i32
    %85 = arith.select %84, %cst_15, %83 : f32
    %c0_i32_36 = arith.constant 0 : i32
    %86 = arith.cmpi eq, %80, %c0_i32_36 : i32
    %87 = arith.select %86, %cst_14, %85 : f32
    %88 = arith.subf %67, %87 : f32
    %cst_37 = arith.constant 1.000000e+00 : f32
    %89 = arith.mulf %88, %cst_37 : f32
    %cst_38 = arith.constant 0.000000e+00 : f32
    %90 = arith.select %76, %89, %cst_38 : f32
    %c0_i32_39 = arith.constant 0 : i32
    %91 = vector.broadcast %c0_i32_39 : i32 to vector<1x128xi32>
    %92 = arith.cmpi eq, %28, %91 : vector<1x128xi32>
    %93 = vector.broadcast %81 : f32 to vector<1x128xf32>
    %94 = arith.select %92, %93, %62 : vector<1x128xi1>, vector<1x128xf32>
    %c4_i32 = arith.constant 4 : i32
    %95 = vector.broadcast %c4_i32 : i32 to vector<1x128xi32>
    %96 = arith.cmpi eq, %28, %95 : vector<1x128xi32>
    %97 = arith.sitofp %78 : i32 to f32
    %98 = vector.broadcast %97 : f32 to vector<1x128xf32>
    %99 = arith.select %96, %98, %94 : vector<1x128xi1>, vector<1x128xf32>
    %c8_i32 = arith.constant 8 : i32
    %100 = vector.broadcast %c8_i32 : i32 to vector<1x128xi32>
    %101 = arith.cmpi eq, %28, %100 : vector<1x128xi32>
    %102 = arith.sitofp %80 : i32 to f32
    %103 = vector.broadcast %102 : f32 to vector<1x128xf32>
    %104 = arith.select %101, %103, %99 : vector<1x128xi1>, vector<1x128xf32>
    %c12_i32 = arith.constant 12 : i32
    %105 = vector.broadcast %c12_i32 : i32 to vector<1x128xi32>
    %106 = arith.cmpi eq, %28, %105 : vector<1x128xi32>
    %107 = vector.broadcast %90 : f32 to vector<1x128xf32>
    %108 = arith.select %106, %107, %104 : vector<1x128xi1>, vector<1x128xf32>
    %c127_i32_40 = arith.constant 127 : i32
    %109 = arith.cmpi eq, %78, %c127_i32_40 : i32
    %true = arith.constant true
    %110 = arith.xori %76, %true : i1
    %111 = arith.ori %109, %110 : i1
    %cst_41 = arith.constant 0xFF800000 : f32
    %112 = arith.select %111, %cst_41, %81 : f32
    %c0_i32_42 = arith.constant 0 : i32
    %113 = vector.broadcast %c0_i32_42 : i32 to vector<8x128xi32>
    %114 = arith.cmpi eq, %23, %113 : vector<8x128xi32>
    %115 = vector.broadcast %78 : i32 to vector<8x128xi32>
    %116 = arith.cmpi eq, %24, %115 : vector<8x128xi32>
    %117 = arith.andi %114, %116 : vector<8x128xi1>
    %cst_43 = arith.constant 1.000000e+00 : f32
    %118 = vector.broadcast %cst_43 : f32 to vector<8x128xf32>
    %119 = arith.select %117, %118, %63 : vector<8x128xi1>, vector<8x128xf32>
    %120 = vector.broadcast %75 : i32 to vector<8x128xi32>
    %121 = arith.cmpi eq, %27, %120 : vector<8x128xi32>
    %cst_44 = arith.constant 0xFF800000 : f32
    %122 = vector.broadcast %cst_44 : f32 to vector<8x128xf32>
    %123 = arith.select %121, %122, %61 : vector<8x128xi1>, vector<8x128xf32>
    %124 = vector.shape_cast %123 : vector<8x128xf32> to vector<1x8x128xf32>
    %cst_45 = arith.constant dense<0xFF800000> : vector<1xf32>
    %125 = vector.multi_reduction <maximumf>, %124, %cst_45 [1, 2] : vector<1x8x128xf32> to vector<1xf32>
    %126 = vector.shape_cast %125 : vector<1xf32> to vector<1x1x1xf32>
    %127 = vector.extract %126[0, 0, 0] : f32 from vector<1x1x1xf32>
    %128 = vector.broadcast %127 : f32 to vector<8x128xf32>
    %129 = arith.cmpf oeq, %123, %128 : vector<8x128xf32>
    %130 = vector.broadcast %c1024_i32 : i32 to vector<8x128xi32>
    %131 = arith.select %129, %27, %130 : vector<8x128xi1>, vector<8x128xi32>
    %132 = vector.shape_cast %131 : vector<8x128xi32> to vector<1x8x128xi32>
    %cst_46 = arith.constant dense<2147483647> : vector<1xi32>
    %133 = vector.multi_reduction <minsi>, %132, %cst_46 [1, 2] : vector<1x8x128xi32> to vector<1xi32>
    %134 = vector.shape_cast %133 : vector<1xi32> to vector<1x1x1xi32>
    %135 = vector.extract %134[0, 0, 0] : i32 from vector<1x1x1xi32>
    %cst_47 = arith.constant 0xFF800000 : f32
    %136 = arith.cmpf ogt, %127, %cst_47 : f32
    %c127_i32_48 = arith.constant 127 : i32
    %137 = arith.andi %135, %c127_i32_48 : i32
    %c0_i32_49 = arith.constant 0 : i32
    %138 = arith.select %136, %137, %c0_i32_49 : i32
    %c7_i32_50 = arith.constant 7 : i32
    %139 = arith.shrsi %135, %c7_i32_50 : i32
    %c0_i32_51 = arith.constant 0 : i32
    %140 = arith.select %136, %139, %c0_i32_51 : i32
    %cst_52 = arith.constant 0xFF800000 : f32
    %141 = arith.select %136, %127, %cst_52 : f32
    %c2_i32_53 = arith.constant 2 : i32
    %142 = arith.cmpi eq, %140, %c2_i32_53 : i32
    %143 = arith.select %142, %cst_16, %cst_17 : f32
    %c1_i32_54 = arith.constant 1 : i32
    %144 = arith.cmpi eq, %140, %c1_i32_54 : i32
    %145 = arith.select %144, %cst_15, %143 : f32
    %c0_i32_55 = arith.constant 0 : i32
    %146 = arith.cmpi eq, %140, %c0_i32_55 : i32
    %147 = arith.select %146, %cst_14, %145 : f32
    %148 = arith.subf %127, %147 : f32
    %cst_56 = arith.constant 1.000000e+00 : f32
    %149 = arith.mulf %148, %cst_56 : f32
    %cst_57 = arith.constant 0.000000e+00 : f32
    %150 = arith.select %136, %149, %cst_57 : f32
    %c1_i32_58 = arith.constant 1 : i32
    %151 = vector.broadcast %c1_i32_58 : i32 to vector<1x128xi32>
    %152 = arith.cmpi eq, %28, %151 : vector<1x128xi32>
    %153 = vector.broadcast %141 : f32 to vector<1x128xf32>
    %154 = arith.select %152, %153, %108 : vector<1x128xi1>, vector<1x128xf32>
    %c5_i32 = arith.constant 5 : i32
    %155 = vector.broadcast %c5_i32 : i32 to vector<1x128xi32>
    %156 = arith.cmpi eq, %28, %155 : vector<1x128xi32>
    %157 = arith.sitofp %138 : i32 to f32
    %158 = vector.broadcast %157 : f32 to vector<1x128xf32>
    %159 = arith.select %156, %158, %154 : vector<1x128xi1>, vector<1x128xf32>
    %c9_i32 = arith.constant 9 : i32
    %160 = vector.broadcast %c9_i32 : i32 to vector<1x128xi32>
    %161 = arith.cmpi eq, %28, %160 : vector<1x128xi32>
    %162 = arith.sitofp %140 : i32 to f32
    %163 = vector.broadcast %162 : f32 to vector<1x128xf32>
    %164 = arith.select %161, %163, %159 : vector<1x128xi1>, vector<1x128xf32>
    %c13_i32 = arith.constant 13 : i32
    %165 = vector.broadcast %c13_i32 : i32 to vector<1x128xi32>
    %166 = arith.cmpi eq, %28, %165 : vector<1x128xi32>
    %167 = vector.broadcast %150 : f32 to vector<1x128xf32>
    %168 = arith.select %166, %167, %164 : vector<1x128xi1>, vector<1x128xf32>
    %c127_i32_59 = arith.constant 127 : i32
    %169 = arith.cmpi eq, %138, %c127_i32_59 : i32
    %true_60 = arith.constant true
    %170 = arith.xori %136, %true_60 : i1
    %171 = arith.ori %169, %170 : i1
    %cst_61 = arith.constant 0xFF800000 : f32
    %172 = arith.select %171, %cst_61, %141 : f32
    %c1_i32_62 = arith.constant 1 : i32
    %173 = vector.broadcast %c1_i32_62 : i32 to vector<8x128xi32>
    %174 = arith.cmpi eq, %23, %173 : vector<8x128xi32>
    %175 = vector.broadcast %138 : i32 to vector<8x128xi32>
    %176 = arith.cmpi eq, %24, %175 : vector<8x128xi32>
    %177 = arith.andi %174, %176 : vector<8x128xi1>
    %cst_63 = arith.constant 1.000000e+00 : f32
    %178 = vector.broadcast %cst_63 : f32 to vector<8x128xf32>
    %179 = arith.select %177, %178, %119 : vector<8x128xi1>, vector<8x128xf32>
    %180 = vector.broadcast %135 : i32 to vector<8x128xi32>
    %181 = arith.cmpi eq, %27, %180 : vector<8x128xi32>
    %cst_64 = arith.constant 0xFF800000 : f32
    %182 = vector.broadcast %cst_64 : f32 to vector<8x128xf32>
    %183 = arith.select %181, %182, %123 : vector<8x128xi1>, vector<8x128xf32>
    %184 = vector.shape_cast %183 : vector<8x128xf32> to vector<1x8x128xf32>
    %cst_65 = arith.constant dense<0xFF800000> : vector<1xf32>
    %185 = vector.multi_reduction <maximumf>, %184, %cst_65 [1, 2] : vector<1x8x128xf32> to vector<1xf32>
    %186 = vector.shape_cast %185 : vector<1xf32> to vector<1x1x1xf32>
    %187 = vector.extract %186[0, 0, 0] : f32 from vector<1x1x1xf32>
    %188 = vector.broadcast %187 : f32 to vector<8x128xf32>
    %189 = arith.cmpf oeq, %183, %188 : vector<8x128xf32>
    %190 = vector.broadcast %c1024_i32 : i32 to vector<8x128xi32>
    %191 = arith.select %189, %27, %190 : vector<8x128xi1>, vector<8x128xi32>
    %192 = vector.shape_cast %191 : vector<8x128xi32> to vector<1x8x128xi32>
    %cst_66 = arith.constant dense<2147483647> : vector<1xi32>
    %193 = vector.multi_reduction <minsi>, %192, %cst_66 [1, 2] : vector<1x8x128xi32> to vector<1xi32>
    %194 = vector.shape_cast %193 : vector<1xi32> to vector<1x1x1xi32>
    %195 = vector.extract %194[0, 0, 0] : i32 from vector<1x1x1xi32>
    %cst_67 = arith.constant 0xFF800000 : f32
    %196 = arith.cmpf ogt, %187, %cst_67 : f32
    %c127_i32_68 = arith.constant 127 : i32
    %197 = arith.andi %195, %c127_i32_68 : i32
    %c0_i32_69 = arith.constant 0 : i32
    %198 = arith.select %196, %197, %c0_i32_69 : i32
    %c7_i32_70 = arith.constant 7 : i32
    %199 = arith.shrsi %195, %c7_i32_70 : i32
    %c0_i32_71 = arith.constant 0 : i32
    %200 = arith.select %196, %199, %c0_i32_71 : i32
    %cst_72 = arith.constant 0xFF800000 : f32
    %201 = arith.select %196, %187, %cst_72 : f32
    %c2_i32_73 = arith.constant 2 : i32
    %202 = arith.cmpi eq, %200, %c2_i32_73 : i32
    %203 = arith.select %202, %cst_16, %cst_17 : f32
    %c1_i32_74 = arith.constant 1 : i32
    %204 = arith.cmpi eq, %200, %c1_i32_74 : i32
    %205 = arith.select %204, %cst_15, %203 : f32
    %c0_i32_75 = arith.constant 0 : i32
    %206 = arith.cmpi eq, %200, %c0_i32_75 : i32
    %207 = arith.select %206, %cst_14, %205 : f32
    %208 = arith.subf %187, %207 : f32
    %cst_76 = arith.constant 1.000000e+00 : f32
    %209 = arith.mulf %208, %cst_76 : f32
    %cst_77 = arith.constant 0.000000e+00 : f32
    %210 = arith.select %196, %209, %cst_77 : f32
    %c2_i32_78 = arith.constant 2 : i32
    %211 = vector.broadcast %c2_i32_78 : i32 to vector<1x128xi32>
    %212 = arith.cmpi eq, %28, %211 : vector<1x128xi32>
    %213 = vector.broadcast %201 : f32 to vector<1x128xf32>
    %214 = arith.select %212, %213, %168 : vector<1x128xi1>, vector<1x128xf32>
    %c6_i32 = arith.constant 6 : i32
    %215 = vector.broadcast %c6_i32 : i32 to vector<1x128xi32>
    %216 = arith.cmpi eq, %28, %215 : vector<1x128xi32>
    %217 = arith.sitofp %198 : i32 to f32
    %218 = vector.broadcast %217 : f32 to vector<1x128xf32>
    %219 = arith.select %216, %218, %214 : vector<1x128xi1>, vector<1x128xf32>
    %c10_i32 = arith.constant 10 : i32
    %220 = vector.broadcast %c10_i32 : i32 to vector<1x128xi32>
    %221 = arith.cmpi eq, %28, %220 : vector<1x128xi32>
    %222 = arith.sitofp %200 : i32 to f32
    %223 = vector.broadcast %222 : f32 to vector<1x128xf32>
    %224 = arith.select %221, %223, %219 : vector<1x128xi1>, vector<1x128xf32>
    %c14_i32 = arith.constant 14 : i32
    %225 = vector.broadcast %c14_i32 : i32 to vector<1x128xi32>
    %226 = arith.cmpi eq, %28, %225 : vector<1x128xi32>
    %227 = vector.broadcast %210 : f32 to vector<1x128xf32>
    %228 = arith.select %226, %227, %224 : vector<1x128xi1>, vector<1x128xf32>
    %c127_i32_79 = arith.constant 127 : i32
    %229 = arith.cmpi eq, %198, %c127_i32_79 : i32
    %true_80 = arith.constant true
    %230 = arith.xori %196, %true_80 : i1
    %231 = arith.ori %229, %230 : i1
    %cst_81 = arith.constant 0xFF800000 : f32
    %232 = arith.select %231, %cst_81, %201 : f32
    %c2_i32_82 = arith.constant 2 : i32
    %233 = vector.broadcast %c2_i32_82 : i32 to vector<8x128xi32>
    %234 = arith.cmpi eq, %23, %233 : vector<8x128xi32>
    %235 = vector.broadcast %198 : i32 to vector<8x128xi32>
    %236 = arith.cmpi eq, %24, %235 : vector<8x128xi32>
    %237 = arith.andi %234, %236 : vector<8x128xi1>
    %cst_83 = arith.constant 1.000000e+00 : f32
    %238 = vector.broadcast %cst_83 : f32 to vector<8x128xf32>
    %239 = arith.select %237, %238, %179 : vector<8x128xi1>, vector<8x128xf32>
    %240 = vector.broadcast %195 : i32 to vector<8x128xi32>
    %241 = arith.cmpi eq, %27, %240 : vector<8x128xi32>
    %cst_84 = arith.constant 0xFF800000 : f32
    %242 = vector.broadcast %cst_84 : f32 to vector<8x128xf32>
    %243 = arith.select %241, %242, %183 : vector<8x128xi1>, vector<8x128xf32>
    %244 = vector.shape_cast %243 : vector<8x128xf32> to vector<1x8x128xf32>
    %cst_85 = arith.constant dense<0xFF800000> : vector<1xf32>
    %245 = vector.multi_reduction <maximumf>, %244, %cst_85 [1, 2] : vector<1x8x128xf32> to vector<1xf32>
    %246 = vector.shape_cast %245 : vector<1xf32> to vector<1x1x1xf32>
    %247 = vector.extract %246[0, 0, 0] : f32 from vector<1x1x1xf32>
    %248 = vector.broadcast %247 : f32 to vector<8x128xf32>
    %249 = arith.cmpf oeq, %243, %248 : vector<8x128xf32>
    %250 = vector.broadcast %c1024_i32 : i32 to vector<8x128xi32>
    %251 = arith.select %249, %27, %250 : vector<8x128xi1>, vector<8x128xi32>
    %252 = vector.shape_cast %251 : vector<8x128xi32> to vector<1x8x128xi32>
    %cst_86 = arith.constant dense<2147483647> : vector<1xi32>
    %253 = vector.multi_reduction <minsi>, %252, %cst_86 [1, 2] : vector<1x8x128xi32> to vector<1xi32>
    %254 = vector.shape_cast %253 : vector<1xi32> to vector<1x1x1xi32>
    %255 = vector.extract %254[0, 0, 0] : i32 from vector<1x1x1xi32>
    %cst_87 = arith.constant 0xFF800000 : f32
    %256 = arith.cmpf ogt, %247, %cst_87 : f32
    %c127_i32_88 = arith.constant 127 : i32
    %257 = arith.andi %255, %c127_i32_88 : i32
    %c0_i32_89 = arith.constant 0 : i32
    %258 = arith.select %256, %257, %c0_i32_89 : i32
    %c7_i32_90 = arith.constant 7 : i32
    %259 = arith.shrsi %255, %c7_i32_90 : i32
    %c0_i32_91 = arith.constant 0 : i32
    %260 = arith.select %256, %259, %c0_i32_91 : i32
    %cst_92 = arith.constant 0xFF800000 : f32
    %261 = arith.select %256, %247, %cst_92 : f32
    %c2_i32_93 = arith.constant 2 : i32
    %262 = arith.cmpi eq, %260, %c2_i32_93 : i32
    %263 = arith.select %262, %cst_16, %cst_17 : f32
    %c1_i32_94 = arith.constant 1 : i32
    %264 = arith.cmpi eq, %260, %c1_i32_94 : i32
    %265 = arith.select %264, %cst_15, %263 : f32
    %c0_i32_95 = arith.constant 0 : i32
    %266 = arith.cmpi eq, %260, %c0_i32_95 : i32
    %267 = arith.select %266, %cst_14, %265 : f32
    %268 = arith.subf %247, %267 : f32
    %cst_96 = arith.constant 1.000000e+00 : f32
    %269 = arith.mulf %268, %cst_96 : f32
    %cst_97 = arith.constant 0.000000e+00 : f32
    %270 = arith.select %256, %269, %cst_97 : f32
    %c3_i32_98 = arith.constant 3 : i32
    %271 = vector.broadcast %c3_i32_98 : i32 to vector<1x128xi32>
    %272 = arith.cmpi eq, %28, %271 : vector<1x128xi32>
    %273 = vector.broadcast %261 : f32 to vector<1x128xf32>
    %274 = arith.select %272, %273, %228 : vector<1x128xi1>, vector<1x128xf32>
    %c7_i32_99 = arith.constant 7 : i32
    %275 = vector.broadcast %c7_i32_99 : i32 to vector<1x128xi32>
    %276 = arith.cmpi eq, %28, %275 : vector<1x128xi32>
    %277 = arith.sitofp %258 : i32 to f32
    %278 = vector.broadcast %277 : f32 to vector<1x128xf32>
    %279 = arith.select %276, %278, %274 : vector<1x128xi1>, vector<1x128xf32>
    %c11_i32 = arith.constant 11 : i32
    %280 = vector.broadcast %c11_i32 : i32 to vector<1x128xi32>
    %281 = arith.cmpi eq, %28, %280 : vector<1x128xi32>
    %282 = arith.sitofp %260 : i32 to f32
    %283 = vector.broadcast %282 : f32 to vector<1x128xf32>
    %284 = arith.select %281, %283, %279 : vector<1x128xi1>, vector<1x128xf32>
    %c15_i32 = arith.constant 15 : i32
    %285 = vector.broadcast %c15_i32 : i32 to vector<1x128xi32>
    %286 = arith.cmpi eq, %28, %285 : vector<1x128xi32>
    %287 = vector.broadcast %270 : f32 to vector<1x128xf32>
    %288 = arith.select %286, %287, %284 : vector<1x128xi1>, vector<1x128xf32>
    %c127_i32_100 = arith.constant 127 : i32
    %289 = arith.cmpi eq, %258, %c127_i32_100 : i32
    %true_101 = arith.constant true
    %290 = arith.xori %256, %true_101 : i1
    %291 = arith.ori %289, %290 : i1
    %cst_102 = arith.constant 0xFF800000 : f32
    %292 = arith.select %291, %cst_102, %261 : f32
    %c3_i32_103 = arith.constant 3 : i32
    %293 = vector.broadcast %c3_i32_103 : i32 to vector<8x128xi32>
    %294 = arith.cmpi eq, %23, %293 : vector<8x128xi32>
    %295 = vector.broadcast %258 : i32 to vector<8x128xi32>
    %296 = arith.cmpi eq, %24, %295 : vector<8x128xi32>
    %297 = arith.andi %294, %296 : vector<8x128xi1>
    %cst_104 = arith.constant 1.000000e+00 : f32
    %298 = vector.broadcast %cst_104 : f32 to vector<8x128xf32>
    %299 = arith.select %297, %298, %239 : vector<8x128xi1>, vector<8x128xf32>
    %300 = vector.broadcast %c0_i32_18 : i32 to vector<8x128xi32>
    %301 = arith.cmpi eq, %29, %300 : vector<8x128xi32>
    %302 = vector.shape_cast %288 : vector<1x128xf32> to vector<1x128xf32>
    %303 = vector.broadcast %302 : vector<1x128xf32> to vector<8x128xf32>
    %304 = arith.select %301, %303, %38 : vector<8x128xi1>, vector<8x128xf32>
    %c1_i32_105 = arith.constant 1 : i32
    %cst_106 = arith.constant 0xFF800000 : f32
    %305 = vector.broadcast %cst_106 : f32 to vector<8x1xf32>
    %c0_i32_107 = arith.constant 0 : i32
    %306 = vector.broadcast %c0_i32_107 : i32 to vector<8x1xi32>
    %307 = arith.cmpi eq, %22, %306 : vector<8x1xi32>
    %308 = vector.broadcast %112 : f32 to vector<8x1xf32>
    %309 = arith.select %307, %308, %305 : vector<8x1xi1>, vector<8x1xf32>
    %c1_i32_108 = arith.constant 1 : i32
    %310 = vector.broadcast %c1_i32_108 : i32 to vector<8x1xi32>
    %311 = arith.cmpi eq, %22, %310 : vector<8x1xi32>
    %312 = vector.broadcast %172 : f32 to vector<8x1xf32>
    %313 = arith.select %311, %312, %309 : vector<8x1xi1>, vector<8x1xf32>
    %c2_i32_109 = arith.constant 2 : i32
    %314 = vector.broadcast %c2_i32_109 : i32 to vector<8x1xi32>
    %315 = arith.cmpi eq, %22, %314 : vector<8x1xi32>
    %316 = vector.broadcast %232 : f32 to vector<8x1xf32>
    %317 = arith.select %315, %316, %313 : vector<8x1xi1>, vector<8x1xf32>
    %c3_i32_110 = arith.constant 3 : i32
    %318 = vector.broadcast %c3_i32_110 : i32 to vector<8x1xi32>
    %319 = arith.cmpi eq, %22, %318 : vector<8x1xi32>
    %320 = vector.broadcast %292 : f32 to vector<8x1xf32>
    %321 = arith.select %319, %320, %317 : vector<8x1xi1>, vector<8x1xf32>
    %c0_111 = arith.constant 0 : index
    %c0_112 = arith.constant 0 : index
    %322 = vector.load %arg6[%c0_111, %c0_112] : memref<128x128xf32, #tpu.memory_space<vmem>>, vector<128x128xf32>
    %cst_113 = arith.constant dense<0.000000e+00> : vector<8x128xf32>
    %323 = tpu.matmul %299, %322, %cst_113 {dimension_numbers = #tpu.dot_dimension_numbers<[1], [0], [0], [1], [0, 0, 1, 1], [], []>} : vector<8x128xf32>, vector<128x128xf32>, vector<8x128xf32> -> vector<8x128xf32>
    %cst_114 = arith.constant 1.000000e+00 : f32
    %324 = vector.broadcast %cst_114 : f32 to vector<8x128xf32>
    %325 = arith.mulf %324, %323 : vector<8x128xf32>
    %326 = vector.broadcast %321 : vector<8x1xf32> to vector<8x128xf32>
    %327 = arith.addf %325, %326 : vector<8x128xf32>
    %cst_115 = arith.constant 0.000000e+00 : f32
    %328 = vector.broadcast %cst_115 : f32 to vector<1x128xf32>
    %cst_116 = arith.constant 0.000000e+00 : f32
    %329 = vector.broadcast %cst_116 : f32 to vector<8x128xf32>
    %330 = vector.shape_cast %327 : vector<8x128xf32> to vector<1x8x128xf32>
    %cst_117 = arith.constant dense<0xFF800000> : vector<1xf32>
    %331 = vector.multi_reduction <maximumf>, %330, %cst_117 [1, 2] : vector<1x8x128xf32> to vector<1xf32>
    %332 = vector.shape_cast %331 : vector<1xf32> to vector<1x1x1xf32>
    %333 = vector.extract %332[0, 0, 0] : f32 from vector<1x1x1xf32>
    %334 = vector.broadcast %333 : f32 to vector<8x128xf32>
    %335 = arith.cmpf oeq, %327, %334 : vector<8x128xf32>
    %336 = vector.broadcast %c1024_i32 : i32 to vector<8x128xi32>
    %337 = arith.select %335, %27, %336 : vector<8x128xi1>, vector<8x128xi32>
    %338 = vector.shape_cast %337 : vector<8x128xi32> to vector<1x8x128xi32>
    %cst_118 = arith.constant dense<2147483647> : vector<1xi32>
    %339 = vector.multi_reduction <minsi>, %338, %cst_118 [1, 2] : vector<1x8x128xi32> to vector<1xi32>
    %340 = vector.shape_cast %339 : vector<1xi32> to vector<1x1x1xi32>
    %341 = vector.extract %340[0, 0, 0] : i32 from vector<1x1x1xi32>
    %cst_119 = arith.constant 0xFF800000 : f32
    %342 = arith.cmpf ogt, %333, %cst_119 : f32
    %c127_i32_120 = arith.constant 127 : i32
    %343 = arith.andi %341, %c127_i32_120 : i32
    %c0_i32_121 = arith.constant 0 : i32
    %344 = arith.select %342, %343, %c0_i32_121 : i32
    %c7_i32_122 = arith.constant 7 : i32
    %345 = arith.shrsi %341, %c7_i32_122 : i32
    %c0_i32_123 = arith.constant 0 : i32
    %346 = arith.select %342, %345, %c0_i32_123 : i32
    %cst_124 = arith.constant 0xFF800000 : f32
    %347 = arith.select %342, %333, %cst_124 : f32
    %c2_i32_125 = arith.constant 2 : i32
    %348 = arith.cmpi eq, %346, %c2_i32_125 : i32
    %349 = arith.select %348, %232, %292 : f32
    %c1_i32_126 = arith.constant 1 : i32
    %350 = arith.cmpi eq, %346, %c1_i32_126 : i32
    %351 = arith.select %350, %172, %349 : f32
    %c0_i32_127 = arith.constant 0 : i32
    %352 = arith.cmpi eq, %346, %c0_i32_127 : i32
    %353 = arith.select %352, %112, %351 : f32
    %354 = arith.subf %333, %353 : f32
    %cst_128 = arith.constant 1.000000e+00 : f32
    %355 = arith.mulf %354, %cst_128 : f32
    %cst_129 = arith.constant 0.000000e+00 : f32
    %356 = arith.select %342, %355, %cst_129 : f32
    %c0_i32_130 = arith.constant 0 : i32
    %357 = vector.broadcast %c0_i32_130 : i32 to vector<1x128xi32>
    %358 = arith.cmpi eq, %28, %357 : vector<1x128xi32>
    %359 = vector.broadcast %347 : f32 to vector<1x128xf32>
    %360 = arith.select %358, %359, %328 : vector<1x128xi1>, vector<1x128xf32>
    %c4_i32_131 = arith.constant 4 : i32
    %361 = vector.broadcast %c4_i32_131 : i32 to vector<1x128xi32>
    %362 = arith.cmpi eq, %28, %361 : vector<1x128xi32>
    %363 = arith.sitofp %344 : i32 to f32
    %364 = vector.broadcast %363 : f32 to vector<1x128xf32>
    %365 = arith.select %362, %364, %360 : vector<1x128xi1>, vector<1x128xf32>
    %c8_i32_132 = arith.constant 8 : i32
    %366 = vector.broadcast %c8_i32_132 : i32 to vector<1x128xi32>
    %367 = arith.cmpi eq, %28, %366 : vector<1x128xi32>
    %368 = arith.sitofp %346 : i32 to f32
    %369 = vector.broadcast %368 : f32 to vector<1x128xf32>
    %370 = arith.select %367, %369, %365 : vector<1x128xi1>, vector<1x128xf32>
    %c12_i32_133 = arith.constant 12 : i32
    %371 = vector.broadcast %c12_i32_133 : i32 to vector<1x128xi32>
    %372 = arith.cmpi eq, %28, %371 : vector<1x128xi32>
    %373 = vector.broadcast %356 : f32 to vector<1x128xf32>
    %374 = arith.select %372, %373, %370 : vector<1x128xi1>, vector<1x128xf32>
    %c127_i32_134 = arith.constant 127 : i32
    %375 = arith.cmpi eq, %344, %c127_i32_134 : i32
    %true_135 = arith.constant true
    %376 = arith.xori %342, %true_135 : i1
    %377 = arith.ori %375, %376 : i1
    %cst_136 = arith.constant 0xFF800000 : f32
    %378 = arith.select %377, %cst_136, %347 : f32
    %c0_i32_137 = arith.constant 0 : i32
    %379 = vector.broadcast %c0_i32_137 : i32 to vector<8x128xi32>
    %380 = arith.cmpi eq, %23, %379 : vector<8x128xi32>
    %381 = vector.broadcast %344 : i32 to vector<8x128xi32>
    %382 = arith.cmpi eq, %24, %381 : vector<8x128xi32>
    %383 = arith.andi %380, %382 : vector<8x128xi1>
    %cst_138 = arith.constant 1.000000e+00 : f32
    %384 = vector.broadcast %cst_138 : f32 to vector<8x128xf32>
    %385 = arith.select %383, %384, %329 : vector<8x128xi1>, vector<8x128xf32>
    %386 = vector.broadcast %341 : i32 to vector<8x128xi32>
    %387 = arith.cmpi eq, %27, %386 : vector<8x128xi32>
    %cst_139 = arith.constant 0xFF800000 : f32
    %388 = vector.broadcast %cst_139 : f32 to vector<8x128xf32>
    %389 = arith.select %387, %388, %327 : vector<8x128xi1>, vector<8x128xf32>
    %390 = vector.shape_cast %389 : vector<8x128xf32> to vector<1x8x128xf32>
    %cst_140 = arith.constant dense<0xFF800000> : vector<1xf32>
    %391 = vector.multi_reduction <maximumf>, %390, %cst_140 [1, 2] : vector<1x8x128xf32> to vector<1xf32>
    %392 = vector.shape_cast %391 : vector<1xf32> to vector<1x1x1xf32>
    %393 = vector.extract %392[0, 0, 0] : f32 from vector<1x1x1xf32>
    %394 = vector.broadcast %393 : f32 to vector<8x128xf32>
    %395 = arith.cmpf oeq, %389, %394 : vector<8x128xf32>
    %396 = vector.broadcast %c1024_i32 : i32 to vector<8x128xi32>
    %397 = arith.select %395, %27, %396 : vector<8x128xi1>, vector<8x128xi32>
    %398 = vector.shape_cast %397 : vector<8x128xi32> to vector<1x8x128xi32>
    %cst_141 = arith.constant dense<2147483647> : vector<1xi32>
    %399 = vector.multi_reduction <minsi>, %398, %cst_141 [1, 2] : vector<1x8x128xi32> to vector<1xi32>
    %400 = vector.shape_cast %399 : vector<1xi32> to vector<1x1x1xi32>
    %401 = vector.extract %400[0, 0, 0] : i32 from vector<1x1x1xi32>
    %cst_142 = arith.constant 0xFF800000 : f32
    %402 = arith.cmpf ogt, %393, %cst_142 : f32
    %c127_i32_143 = arith.constant 127 : i32
    %403 = arith.andi %401, %c127_i32_143 : i32
    %c0_i32_144 = arith.constant 0 : i32
    %404 = arith.select %402, %403, %c0_i32_144 : i32
    %c7_i32_145 = arith.constant 7 : i32
    %405 = arith.shrsi %401, %c7_i32_145 : i32
    %c0_i32_146 = arith.constant 0 : i32
    %406 = arith.select %402, %405, %c0_i32_146 : i32
    %cst_147 = arith.constant 0xFF800000 : f32
    %407 = arith.select %402, %393, %cst_147 : f32
    %c2_i32_148 = arith.constant 2 : i32
    %408 = arith.cmpi eq, %406, %c2_i32_148 : i32
    %409 = arith.select %408, %232, %292 : f32
    %c1_i32_149 = arith.constant 1 : i32
    %410 = arith.cmpi eq, %406, %c1_i32_149 : i32
    %411 = arith.select %410, %172, %409 : f32
    %c0_i32_150 = arith.constant 0 : i32
    %412 = arith.cmpi eq, %406, %c0_i32_150 : i32
    %413 = arith.select %412, %112, %411 : f32
    %414 = arith.subf %393, %413 : f32
    %cst_151 = arith.constant 1.000000e+00 : f32
    %415 = arith.mulf %414, %cst_151 : f32
    %cst_152 = arith.constant 0.000000e+00 : f32
    %416 = arith.select %402, %415, %cst_152 : f32
    %c1_i32_153 = arith.constant 1 : i32
    %417 = vector.broadcast %c1_i32_153 : i32 to vector<1x128xi32>
    %418 = arith.cmpi eq, %28, %417 : vector<1x128xi32>
    %419 = vector.broadcast %407 : f32 to vector<1x128xf32>
    %420 = arith.select %418, %419, %374 : vector<1x128xi1>, vector<1x128xf32>
    %c5_i32_154 = arith.constant 5 : i32
    %421 = vector.broadcast %c5_i32_154 : i32 to vector<1x128xi32>
    %422 = arith.cmpi eq, %28, %421 : vector<1x128xi32>
    %423 = arith.sitofp %404 : i32 to f32
    %424 = vector.broadcast %423 : f32 to vector<1x128xf32>
    %425 = arith.select %422, %424, %420 : vector<1x128xi1>, vector<1x128xf32>
    %c9_i32_155 = arith.constant 9 : i32
    %426 = vector.broadcast %c9_i32_155 : i32 to vector<1x128xi32>
    %427 = arith.cmpi eq, %28, %426 : vector<1x128xi32>
    %428 = arith.sitofp %406 : i32 to f32
    %429 = vector.broadcast %428 : f32 to vector<1x128xf32>
    %430 = arith.select %427, %429, %425 : vector<1x128xi1>, vector<1x128xf32>
    %c13_i32_156 = arith.constant 13 : i32
    %431 = vector.broadcast %c13_i32_156 : i32 to vector<1x128xi32>
    %432 = arith.cmpi eq, %28, %431 : vector<1x128xi32>
    %433 = vector.broadcast %416 : f32 to vector<1x128xf32>
    %434 = arith.select %432, %433, %430 : vector<1x128xi1>, vector<1x128xf32>
    %c127_i32_157 = arith.constant 127 : i32
    %435 = arith.cmpi eq, %404, %c127_i32_157 : i32
    %true_158 = arith.constant true
    %436 = arith.xori %402, %true_158 : i1
    %437 = arith.ori %435, %436 : i1
    %cst_159 = arith.constant 0xFF800000 : f32
    %438 = arith.select %437, %cst_159, %407 : f32
    %c1_i32_160 = arith.constant 1 : i32
    %439 = vector.broadcast %c1_i32_160 : i32 to vector<8x128xi32>
    %440 = arith.cmpi eq, %23, %439 : vector<8x128xi32>
    %441 = vector.broadcast %404 : i32 to vector<8x128xi32>
    %442 = arith.cmpi eq, %24, %441 : vector<8x128xi32>
    %443 = arith.andi %440, %442 : vector<8x128xi1>
    %cst_161 = arith.constant 1.000000e+00 : f32
    %444 = vector.broadcast %cst_161 : f32 to vector<8x128xf32>
    %445 = arith.select %443, %444, %385 : vector<8x128xi1>, vector<8x128xf32>
    %446 = vector.broadcast %401 : i32 to vector<8x128xi32>
    %447 = arith.cmpi eq, %27, %446 : vector<8x128xi32>
    %cst_162 = arith.constant 0xFF800000 : f32
    %448 = vector.broadcast %cst_162 : f32 to vector<8x128xf32>
    %449 = arith.select %447, %448, %389 : vector<8x128xi1>, vector<8x128xf32>
    %450 = vector.shape_cast %449 : vector<8x128xf32> to vector<1x8x128xf32>
    %cst_163 = arith.constant dense<0xFF800000> : vector<1xf32>
    %451 = vector.multi_reduction <maximumf>, %450, %cst_163 [1, 2] : vector<1x8x128xf32> to vector<1xf32>
    %452 = vector.shape_cast %451 : vector<1xf32> to vector<1x1x1xf32>
    %453 = vector.extract %452[0, 0, 0] : f32 from vector<1x1x1xf32>
    %454 = vector.broadcast %453 : f32 to vector<8x128xf32>
    %455 = arith.cmpf oeq, %449, %454 : vector<8x128xf32>
    %456 = vector.broadcast %c1024_i32 : i32 to vector<8x128xi32>
    %457 = arith.select %455, %27, %456 : vector<8x128xi1>, vector<8x128xi32>
    %458 = vector.shape_cast %457 : vector<8x128xi32> to vector<1x8x128xi32>
    %cst_164 = arith.constant dense<2147483647> : vector<1xi32>
    %459 = vector.multi_reduction <minsi>, %458, %cst_164 [1, 2] : vector<1x8x128xi32> to vector<1xi32>
    %460 = vector.shape_cast %459 : vector<1xi32> to vector<1x1x1xi32>
    %461 = vector.extract %460[0, 0, 0] : i32 from vector<1x1x1xi32>
    %cst_165 = arith.constant 0xFF800000 : f32
    %462 = arith.cmpf ogt, %453, %cst_165 : f32
    %c127_i32_166 = arith.constant 127 : i32
    %463 = arith.andi %461, %c127_i32_166 : i32
    %c0_i32_167 = arith.constant 0 : i32
    %464 = arith.select %462, %463, %c0_i32_167 : i32
    %c7_i32_168 = arith.constant 7 : i32
    %465 = arith.shrsi %461, %c7_i32_168 : i32
    %c0_i32_169 = arith.constant 0 : i32
    %466 = arith.select %462, %465, %c0_i32_169 : i32
    %cst_170 = arith.constant 0xFF800000 : f32
    %467 = arith.select %462, %453, %cst_170 : f32
    %c2_i32_171 = arith.constant 2 : i32
    %468 = arith.cmpi eq, %466, %c2_i32_171 : i32
    %469 = arith.select %468, %232, %292 : f32
    %c1_i32_172 = arith.constant 1 : i32
    %470 = arith.cmpi eq, %466, %c1_i32_172 : i32
    %471 = arith.select %470, %172, %469 : f32
    %c0_i32_173 = arith.constant 0 : i32
    %472 = arith.cmpi eq, %466, %c0_i32_173 : i32
    %473 = arith.select %472, %112, %471 : f32
    %474 = arith.subf %453, %473 : f32
    %cst_174 = arith.constant 1.000000e+00 : f32
    %475 = arith.mulf %474, %cst_174 : f32
    %cst_175 = arith.constant 0.000000e+00 : f32
    %476 = arith.select %462, %475, %cst_175 : f32
    %c2_i32_176 = arith.constant 2 : i32
    %477 = vector.broadcast %c2_i32_176 : i32 to vector<1x128xi32>
    %478 = arith.cmpi eq, %28, %477 : vector<1x128xi32>
    %479 = vector.broadcast %467 : f32 to vector<1x128xf32>
    %480 = arith.select %478, %479, %434 : vector<1x128xi1>, vector<1x128xf32>
    %c6_i32_177 = arith.constant 6 : i32
    %481 = vector.broadcast %c6_i32_177 : i32 to vector<1x128xi32>
    %482 = arith.cmpi eq, %28, %481 : vector<1x128xi32>
    %483 = arith.sitofp %464 : i32 to f32
    %484 = vector.broadcast %483 : f32 to vector<1x128xf32>
    %485 = arith.select %482, %484, %480 : vector<1x128xi1>, vector<1x128xf32>
    %c10_i32_178 = arith.constant 10 : i32
    %486 = vector.broadcast %c10_i32_178 : i32 to vector<1x128xi32>
    %487 = arith.cmpi eq, %28, %486 : vector<1x128xi32>
    %488 = arith.sitofp %466 : i32 to f32
    %489 = vector.broadcast %488 : f32 to vector<1x128xf32>
    %490 = arith.select %487, %489, %485 : vector<1x128xi1>, vector<1x128xf32>
    %c14_i32_179 = arith.constant 14 : i32
    %491 = vector.broadcast %c14_i32_179 : i32 to vector<1x128xi32>
    %492 = arith.cmpi eq, %28, %491 : vector<1x128xi32>
    %493 = vector.broadcast %476 : f32 to vector<1x128xf32>
    %494 = arith.select %492, %493, %490 : vector<1x128xi1>, vector<1x128xf32>
    %c127_i32_180 = arith.constant 127 : i32
    %495 = arith.cmpi eq, %464, %c127_i32_180 : i32
    %true_181 = arith.constant true
    %496 = arith.xori %462, %true_181 : i1
    %497 = arith.ori %495, %496 : i1
    %cst_182 = arith.constant 0xFF800000 : f32
    %498 = arith.select %497, %cst_182, %467 : f32
    %c2_i32_183 = arith.constant 2 : i32
    %499 = vector.broadcast %c2_i32_183 : i32 to vector<8x128xi32>
    %500 = arith.cmpi eq, %23, %499 : vector<8x128xi32>
    %501 = vector.broadcast %464 : i32 to vector<8x128xi32>
    %502 = arith.cmpi eq, %24, %501 : vector<8x128xi32>
    %503 = arith.andi %500, %502 : vector<8x128xi1>
    %cst_184 = arith.constant 1.000000e+00 : f32
    %504 = vector.broadcast %cst_184 : f32 to vector<8x128xf32>
    %505 = arith.select %503, %504, %445 : vector<8x128xi1>, vector<8x128xf32>
    %506 = vector.broadcast %461 : i32 to vector<8x128xi32>
    %507 = arith.cmpi eq, %27, %506 : vector<8x128xi32>
    %cst_185 = arith.constant 0xFF800000 : f32
    %508 = vector.broadcast %cst_185 : f32 to vector<8x128xf32>
    %509 = arith.select %507, %508, %449 : vector<8x128xi1>, vector<8x128xf32>
    %510 = vector.shape_cast %509 : vector<8x128xf32> to vector<1x8x128xf32>
    %cst_186 = arith.constant dense<0xFF800000> : vector<1xf32>
    %511 = vector.multi_reduction <maximumf>, %510, %cst_186 [1, 2] : vector<1x8x128xf32> to vector<1xf32>
    %512 = vector.shape_cast %511 : vector<1xf32> to vector<1x1x1xf32>
    %513 = vector.extract %512[0, 0, 0] : f32 from vector<1x1x1xf32>
    %514 = vector.broadcast %513 : f32 to vector<8x128xf32>
    %515 = arith.cmpf oeq, %509, %514 : vector<8x128xf32>
    %516 = vector.broadcast %c1024_i32 : i32 to vector<8x128xi32>
    %517 = arith.select %515, %27, %516 : vector<8x128xi1>, vector<8x128xi32>
    %518 = vector.shape_cast %517 : vector<8x128xi32> to vector<1x8x128xi32>
    %cst_187 = arith.constant dense<2147483647> : vector<1xi32>
    %519 = vector.multi_reduction <minsi>, %518, %cst_187 [1, 2] : vector<1x8x128xi32> to vector<1xi32>
    %520 = vector.shape_cast %519 : vector<1xi32> to vector<1x1x1xi32>
    %521 = vector.extract %520[0, 0, 0] : i32 from vector<1x1x1xi32>
    %cst_188 = arith.constant 0xFF800000 : f32
    %522 = arith.cmpf ogt, %513, %cst_188 : f32
    %c127_i32_189 = arith.constant 127 : i32
    %523 = arith.andi %521, %c127_i32_189 : i32
    %c0_i32_190 = arith.constant 0 : i32
    %524 = arith.select %522, %523, %c0_i32_190 : i32
    %c7_i32_191 = arith.constant 7 : i32
    %525 = arith.shrsi %521, %c7_i32_191 : i32
    %c0_i32_192 = arith.constant 0 : i32
    %526 = arith.select %522, %525, %c0_i32_192 : i32
    %cst_193 = arith.constant 0xFF800000 : f32
    %527 = arith.select %522, %513, %cst_193 : f32
    %c2_i32_194 = arith.constant 2 : i32
    %528 = arith.cmpi eq, %526, %c2_i32_194 : i32
    %529 = arith.select %528, %232, %292 : f32
    %c1_i32_195 = arith.constant 1 : i32
    %530 = arith.cmpi eq, %526, %c1_i32_195 : i32
    %531 = arith.select %530, %172, %529 : f32
    %c0_i32_196 = arith.constant 0 : i32
    %532 = arith.cmpi eq, %526, %c0_i32_196 : i32
    %533 = arith.select %532, %112, %531 : f32
    %534 = arith.subf %513, %533 : f32
    %cst_197 = arith.constant 1.000000e+00 : f32
    %535 = arith.mulf %534, %cst_197 : f32
    %cst_198 = arith.constant 0.000000e+00 : f32
    %536 = arith.select %522, %535, %cst_198 : f32
    %c3_i32_199 = arith.constant 3 : i32
    %537 = vector.broadcast %c3_i32_199 : i32 to vector<1x128xi32>
    %538 = arith.cmpi eq, %28, %537 : vector<1x128xi32>
    %539 = vector.broadcast %527 : f32 to vector<1x128xf32>
    %540 = arith.select %538, %539, %494 : vector<1x128xi1>, vector<1x128xf32>
    %c7_i32_200 = arith.constant 7 : i32
    %541 = vector.broadcast %c7_i32_200 : i32 to vector<1x128xi32>
    %542 = arith.cmpi eq, %28, %541 : vector<1x128xi32>
    %543 = arith.sitofp %524 : i32 to f32
    %544 = vector.broadcast %543 : f32 to vector<1x128xf32>
    %545 = arith.select %542, %544, %540 : vector<1x128xi1>, vector<1x128xf32>
    %c11_i32_201 = arith.constant 11 : i32
    %546 = vector.broadcast %c11_i32_201 : i32 to vector<1x128xi32>
    %547 = arith.cmpi eq, %28, %546 : vector<1x128xi32>
    %548 = arith.sitofp %526 : i32 to f32
    %549 = vector.broadcast %548 : f32 to vector<1x128xf32>
    %550 = arith.select %547, %549, %545 : vector<1x128xi1>, vector<1x128xf32>
    %c15_i32_202 = arith.constant 15 : i32
    %551 = vector.broadcast %c15_i32_202 : i32 to vector<1x128xi32>
    %552 = arith.cmpi eq, %28, %551 : vector<1x128xi32>
    %553 = vector.broadcast %536 : f32 to vector<1x128xf32>
    %554 = arith.select %552, %553, %550 : vector<1x128xi1>, vector<1x128xf32>
    %c127_i32_203 = arith.constant 127 : i32
    %555 = arith.cmpi eq, %524, %c127_i32_203 : i32
    %true_204 = arith.constant true
    %556 = arith.xori %522, %true_204 : i1
    %557 = arith.ori %555, %556 : i1
    %cst_205 = arith.constant 0xFF800000 : f32
    %558 = arith.select %557, %cst_205, %527 : f32
    %c3_i32_206 = arith.constant 3 : i32
    %559 = vector.broadcast %c3_i32_206 : i32 to vector<8x128xi32>
    %560 = arith.cmpi eq, %23, %559 : vector<8x128xi32>
    %561 = vector.broadcast %524 : i32 to vector<8x128xi32>
    %562 = arith.cmpi eq, %24, %561 : vector<8x128xi32>
    %563 = arith.andi %560, %562 : vector<8x128xi1>
    %cst_207 = arith.constant 1.000000e+00 : f32
    %564 = vector.broadcast %cst_207 : f32 to vector<8x128xf32>
    %565 = arith.select %563, %564, %505 : vector<8x128xi1>, vector<8x128xf32>
    %566 = vector.broadcast %c1_i32_105 : i32 to vector<8x128xi32>
    %567 = arith.cmpi eq, %29, %566 : vector<8x128xi32>
    %568 = vector.shape_cast %554 : vector<1x128xf32> to vector<1x128xf32>
    %569 = vector.broadcast %568 : vector<1x128xf32> to vector<8x128xf32>
    %570 = arith.select %567, %569, %304 : vector<8x128xi1>, vector<8x128xf32>
    %c2_i32_208 = arith.constant 2 : i32
    %cst_209 = arith.constant 0xFF800000 : f32
    %571 = vector.broadcast %cst_209 : f32 to vector<8x1xf32>
    %c0_i32_210 = arith.constant 0 : i32
    %572 = vector.broadcast %c0_i32_210 : i32 to vector<8x1xi32>
    %573 = arith.cmpi eq, %22, %572 : vector<8x1xi32>
    %574 = vector.broadcast %378 : f32 to vector<8x1xf32>
    %575 = arith.select %573, %574, %571 : vector<8x1xi1>, vector<8x1xf32>
    %c1_i32_211 = arith.constant 1 : i32
    %576 = vector.broadcast %c1_i32_211 : i32 to vector<8x1xi32>
    %577 = arith.cmpi eq, %22, %576 : vector<8x1xi32>
    %578 = vector.broadcast %438 : f32 to vector<8x1xf32>
    %579 = arith.select %577, %578, %575 : vector<8x1xi1>, vector<8x1xf32>
    %c2_i32_212 = arith.constant 2 : i32
    %580 = vector.broadcast %c2_i32_212 : i32 to vector<8x1xi32>
    %581 = arith.cmpi eq, %22, %580 : vector<8x1xi32>
    %582 = vector.broadcast %498 : f32 to vector<8x1xf32>
    %583 = arith.select %581, %582, %579 : vector<8x1xi1>, vector<8x1xf32>
    %c3_i32_213 = arith.constant 3 : i32
    %584 = vector.broadcast %c3_i32_213 : i32 to vector<8x1xi32>
    %585 = arith.cmpi eq, %22, %584 : vector<8x1xi32>
    %586 = vector.broadcast %558 : f32 to vector<8x1xf32>
    %587 = arith.select %585, %586, %583 : vector<8x1xi1>, vector<8x1xf32>
    %c0_214 = arith.constant 0 : index
    %c0_215 = arith.constant 0 : index
    %588 = vector.load %arg6[%c0_214, %c0_215] : memref<128x128xf32, #tpu.memory_space<vmem>>, vector<128x128xf32>
    %cst_216 = arith.constant dense<0.000000e+00> : vector<8x128xf32>
    %589 = tpu.matmul %565, %588, %cst_216 {dimension_numbers = #tpu.dot_dimension_numbers<[1], [0], [0], [1], [0, 0, 1, 1], [], []>} : vector<8x128xf32>, vector<128x128xf32>, vector<8x128xf32> -> vector<8x128xf32>
    %cst_217 = arith.constant 1.000000e+00 : f32
    %590 = vector.broadcast %cst_217 : f32 to vector<8x128xf32>
    %591 = arith.mulf %590, %589 : vector<8x128xf32>
    %592 = vector.broadcast %587 : vector<8x1xf32> to vector<8x128xf32>
    %593 = arith.addf %591, %592 : vector<8x128xf32>
    %cst_218 = arith.constant 0.000000e+00 : f32
    %594 = vector.broadcast %cst_218 : f32 to vector<1x128xf32>
    %cst_219 = arith.constant 0.000000e+00 : f32
    %595 = vector.broadcast %cst_219 : f32 to vector<8x128xf32>
    %596 = vector.shape_cast %593 : vector<8x128xf32> to vector<1x8x128xf32>
    %cst_220 = arith.constant dense<0xFF800000> : vector<1xf32>
    %597 = vector.multi_reduction <maximumf>, %596, %cst_220 [1, 2] : vector<1x8x128xf32> to vector<1xf32>
    %598 = vector.shape_cast %597 : vector<1xf32> to vector<1x1x1xf32>
    %599 = vector.extract %598[0, 0, 0] : f32 from vector<1x1x1xf32>
    %600 = vector.broadcast %599 : f32 to vector<8x128xf32>
    %601 = arith.cmpf oeq, %593, %600 : vector<8x128xf32>
    %602 = vector.broadcast %c1024_i32 : i32 to vector<8x128xi32>
    %603 = arith.select %601, %27, %602 : vector<8x128xi1>, vector<8x128xi32>
    %604 = vector.shape_cast %603 : vector<8x128xi32> to vector<1x8x128xi32>
    %cst_221 = arith.constant dense<2147483647> : vector<1xi32>
    %605 = vector.multi_reduction <minsi>, %604, %cst_221 [1, 2] : vector<1x8x128xi32> to vector<1xi32>
    %606 = vector.shape_cast %605 : vector<1xi32> to vector<1x1x1xi32>
    %607 = vector.extract %606[0, 0, 0] : i32 from vector<1x1x1xi32>
    %cst_222 = arith.constant 0xFF800000 : f32
    %608 = arith.cmpf ogt, %599, %cst_222 : f32
    %c127_i32_223 = arith.constant 127 : i32
    %609 = arith.andi %607, %c127_i32_223 : i32
    %c0_i32_224 = arith.constant 0 : i32
    %610 = arith.select %608, %609, %c0_i32_224 : i32
    %c7_i32_225 = arith.constant 7 : i32
    %611 = arith.shrsi %607, %c7_i32_225 : i32
    %c0_i32_226 = arith.constant 0 : i32
    %612 = arith.select %608, %611, %c0_i32_226 : i32
    %cst_227 = arith.constant 0xFF800000 : f32
    %613 = arith.select %608, %599, %cst_227 : f32
    %c2_i32_228 = arith.constant 2 : i32
    %614 = arith.cmpi eq, %612, %c2_i32_228 : i32
    %615 = arith.select %614, %498, %558 : f32
    %c1_i32_229 = arith.constant 1 : i32
    %616 = arith.cmpi eq, %612, %c1_i32_229 : i32
    %617 = arith.select %616, %438, %615 : f32
    %c0_i32_230 = arith.constant 0 : i32
    %618 = arith.cmpi eq, %612, %c0_i32_230 : i32
    %619 = arith.select %618, %378, %617 : f32
    %620 = arith.subf %599, %619 : f32
    %cst_231 = arith.constant 1.000000e+00 : f32
    %621 = arith.mulf %620, %cst_231 : f32
    %cst_232 = arith.constant 0.000000e+00 : f32
    %622 = arith.select %608, %621, %cst_232 : f32
    %c0_i32_233 = arith.constant 0 : i32
    %623 = vector.broadcast %c0_i32_233 : i32 to vector<1x128xi32>
    %624 = arith.cmpi eq, %28, %623 : vector<1x128xi32>
    %625 = vector.broadcast %613 : f32 to vector<1x128xf32>
    %626 = arith.select %624, %625, %594 : vector<1x128xi1>, vector<1x128xf32>
    %c4_i32_234 = arith.constant 4 : i32
    %627 = vector.broadcast %c4_i32_234 : i32 to vector<1x128xi32>
    %628 = arith.cmpi eq, %28, %627 : vector<1x128xi32>
    %629 = arith.sitofp %610 : i32 to f32
    %630 = vector.broadcast %629 : f32 to vector<1x128xf32>
    %631 = arith.select %628, %630, %626 : vector<1x128xi1>, vector<1x128xf32>
    %c8_i32_235 = arith.constant 8 : i32
    %632 = vector.broadcast %c8_i32_235 : i32 to vector<1x128xi32>
    %633 = arith.cmpi eq, %28, %632 : vector<1x128xi32>
    %634 = arith.sitofp %612 : i32 to f32
    %635 = vector.broadcast %634 : f32 to vector<1x128xf32>
    %636 = arith.select %633, %635, %631 : vector<1x128xi1>, vector<1x128xf32>
    %c12_i32_236 = arith.constant 12 : i32
    %637 = vector.broadcast %c12_i32_236 : i32 to vector<1x128xi32>
    %638 = arith.cmpi eq, %28, %637 : vector<1x128xi32>
    %639 = vector.broadcast %622 : f32 to vector<1x128xf32>
    %640 = arith.select %638, %639, %636 : vector<1x128xi1>, vector<1x128xf32>
    %c127_i32_237 = arith.constant 127 : i32
    %641 = arith.cmpi eq, %610, %c127_i32_237 : i32
    %true_238 = arith.constant true
    %642 = arith.xori %608, %true_238 : i1
    %643 = arith.ori %641, %642 : i1
    %cst_239 = arith.constant 0xFF800000 : f32
    %644 = arith.select %643, %cst_239, %613 : f32
    %c0_i32_240 = arith.constant 0 : i32
    %645 = vector.broadcast %c0_i32_240 : i32 to vector<8x128xi32>
    %646 = arith.cmpi eq, %23, %645 : vector<8x128xi32>
    %647 = vector.broadcast %610 : i32 to vector<8x128xi32>
    %648 = arith.cmpi eq, %24, %647 : vector<8x128xi32>
    %649 = arith.andi %646, %648 : vector<8x128xi1>
    %cst_241 = arith.constant 1.000000e+00 : f32
    %650 = vector.broadcast %cst_241 : f32 to vector<8x128xf32>
    %651 = arith.select %649, %650, %595 : vector<8x128xi1>, vector<8x128xf32>
    %652 = vector.broadcast %607 : i32 to vector<8x128xi32>
    %653 = arith.cmpi eq, %27, %652 : vector<8x128xi32>
    %cst_242 = arith.constant 0xFF800000 : f32
    %654 = vector.broadcast %cst_242 : f32 to vector<8x128xf32>
    %655 = arith.select %653, %654, %593 : vector<8x128xi1>, vector<8x128xf32>
    %656 = vector.shape_cast %655 : vector<8x128xf32> to vector<1x8x128xf32>
    %cst_243 = arith.constant dense<0xFF800000> : vector<1xf32>
    %657 = vector.multi_reduction <maximumf>, %656, %cst_243 [1, 2] : vector<1x8x128xf32> to vector<1xf32>
    %658 = vector.shape_cast %657 : vector<1xf32> to vector<1x1x1xf32>
    %659 = vector.extract %658[0, 0, 0] : f32 from vector<1x1x1xf32>
    %660 = vector.broadcast %659 : f32 to vector<8x128xf32>
    %661 = arith.cmpf oeq, %655, %660 : vector<8x128xf32>
    %662 = vector.broadcast %c1024_i32 : i32 to vector<8x128xi32>
    %663 = arith.select %661, %27, %662 : vector<8x128xi1>, vector<8x128xi32>
    %664 = vector.shape_cast %663 : vector<8x128xi32> to vector<1x8x128xi32>
    %cst_244 = arith.constant dense<2147483647> : vector<1xi32>
    %665 = vector.multi_reduction <minsi>, %664, %cst_244 [1, 2] : vector<1x8x128xi32> to vector<1xi32>
    %666 = vector.shape_cast %665 : vector<1xi32> to vector<1x1x1xi32>
    %667 = vector.extract %666[0, 0, 0] : i32 from vector<1x1x1xi32>
    %cst_245 = arith.constant 0xFF800000 : f32
    %668 = arith.cmpf ogt, %659, %cst_245 : f32
    %c127_i32_246 = arith.constant 127 : i32
    %669 = arith.andi %667, %c127_i32_246 : i32
    %c0_i32_247 = arith.constant 0 : i32
    %670 = arith.select %668, %669, %c0_i32_247 : i32
    %c7_i32_248 = arith.constant 7 : i32
    %671 = arith.shrsi %667, %c7_i32_248 : i32
    %c0_i32_249 = arith.constant 0 : i32
    %672 = arith.select %668, %671, %c0_i32_249 : i32
    %cst_250 = arith.constant 0xFF800000 : f32
    %673 = arith.select %668, %659, %cst_250 : f32
    %c2_i32_251 = arith.constant 2 : i32
    %674 = arith.cmpi eq, %672, %c2_i32_251 : i32
    %675 = arith.select %674, %498, %558 : f32
    %c1_i32_252 = arith.constant 1 : i32
    %676 = arith.cmpi eq, %672, %c1_i32_252 : i32
    %677 = arith.select %676, %438, %675 : f32
    %c0_i32_253 = arith.constant 0 : i32
    %678 = arith.cmpi eq, %672, %c0_i32_253 : i32
    %679 = arith.select %678, %378, %677 : f32
    %680 = arith.subf %659, %679 : f32
    %cst_254 = arith.constant 1.000000e+00 : f32
    %681 = arith.mulf %680, %cst_254 : f32
    %cst_255 = arith.constant 0.000000e+00 : f32
    %682 = arith.select %668, %681, %cst_255 : f32
    %c1_i32_256 = arith.constant 1 : i32
    %683 = vector.broadcast %c1_i32_256 : i32 to vector<1x128xi32>
    %684 = arith.cmpi eq, %28, %683 : vector<1x128xi32>
    %685 = vector.broadcast %673 : f32 to vector<1x128xf32>
    %686 = arith.select %684, %685, %640 : vector<1x128xi1>, vector<1x128xf32>
    %c5_i32_257 = arith.constant 5 : i32
    %687 = vector.broadcast %c5_i32_257 : i32 to vector<1x128xi32>
    %688 = arith.cmpi eq, %28, %687 : vector<1x128xi32>
    %689 = arith.sitofp %670 : i32 to f32
    %690 = vector.broadcast %689 : f32 to vector<1x128xf32>
    %691 = arith.select %688, %690, %686 : vector<1x128xi1>, vector<1x128xf32>
    %c9_i32_258 = arith.constant 9 : i32
    %692 = vector.broadcast %c9_i32_258 : i32 to vector<1x128xi32>
    %693 = arith.cmpi eq, %28, %692 : vector<1x128xi32>
    %694 = arith.sitofp %672 : i32 to f32
    %695 = vector.broadcast %694 : f32 to vector<1x128xf32>
    %696 = arith.select %693, %695, %691 : vector<1x128xi1>, vector<1x128xf32>
    %c13_i32_259 = arith.constant 13 : i32
    %697 = vector.broadcast %c13_i32_259 : i32 to vector<1x128xi32>
    %698 = arith.cmpi eq, %28, %697 : vector<1x128xi32>
    %699 = vector.broadcast %682 : f32 to vector<1x128xf32>
    %700 = arith.select %698, %699, %696 : vector<1x128xi1>, vector<1x128xf32>
    %c127_i32_260 = arith.constant 127 : i32
    %701 = arith.cmpi eq, %670, %c127_i32_260 : i32
    %true_261 = arith.constant true
    %702 = arith.xori %668, %true_261 : i1
    %703 = arith.ori %701, %702 : i1
    %cst_262 = arith.constant 0xFF800000 : f32
    %704 = arith.select %703, %cst_262, %673 : f32
    %c1_i32_263 = arith.constant 1 : i32
    %705 = vector.broadcast %c1_i32_263 : i32 to vector<8x128xi32>
    %706 = arith.cmpi eq, %23, %705 : vector<8x128xi32>
    %707 = vector.broadcast %670 : i32 to vector<8x128xi32>
    %708 = arith.cmpi eq, %24, %707 : vector<8x128xi32>
    %709 = arith.andi %706, %708 : vector<8x128xi1>
    %cst_264 = arith.constant 1.000000e+00 : f32
    %710 = vector.broadcast %cst_264 : f32 to vector<8x128xf32>
    %711 = arith.select %709, %710, %651 : vector<8x128xi1>, vector<8x128xf32>
    %712 = vector.broadcast %667 : i32 to vector<8x128xi32>
    %713 = arith.cmpi eq, %27, %712 : vector<8x128xi32>
    %cst_265 = arith.constant 0xFF800000 : f32
    %714 = vector.broadcast %cst_265 : f32 to vector<8x128xf32>
    %715 = arith.select %713, %714, %655 : vector<8x128xi1>, vector<8x128xf32>
    %716 = vector.shape_cast %715 : vector<8x128xf32> to vector<1x8x128xf32>
    %cst_266 = arith.constant dense<0xFF800000> : vector<1xf32>
    %717 = vector.multi_reduction <maximumf>, %716, %cst_266 [1, 2] : vector<1x8x128xf32> to vector<1xf32>
    %718 = vector.shape_cast %717 : vector<1xf32> to vector<1x1x1xf32>
    %719 = vector.extract %718[0, 0, 0] : f32 from vector<1x1x1xf32>
    %720 = vector.broadcast %719 : f32 to vector<8x128xf32>
    %721 = arith.cmpf oeq, %715, %720 : vector<8x128xf32>
    %722 = vector.broadcast %c1024_i32 : i32 to vector<8x128xi32>
    %723 = arith.select %721, %27, %722 : vector<8x128xi1>, vector<8x128xi32>
    %724 = vector.shape_cast %723 : vector<8x128xi32> to vector<1x8x128xi32>
    %cst_267 = arith.constant dense<2147483647> : vector<1xi32>
    %725 = vector.multi_reduction <minsi>, %724, %cst_267 [1, 2] : vector<1x8x128xi32> to vector<1xi32>
    %726 = vector.shape_cast %725 : vector<1xi32> to vector<1x1x1xi32>
    %727 = vector.extract %726[0, 0, 0] : i32 from vector<1x1x1xi32>
    %cst_268 = arith.constant 0xFF800000 : f32
    %728 = arith.cmpf ogt, %719, %cst_268 : f32
    %c127_i32_269 = arith.constant 127 : i32
    %729 = arith.andi %727, %c127_i32_269 : i32
    %c0_i32_270 = arith.constant 0 : i32
    %730 = arith.select %728, %729, %c0_i32_270 : i32
    %c7_i32_271 = arith.constant 7 : i32
    %731 = arith.shrsi %727, %c7_i32_271 : i32
    %c0_i32_272 = arith.constant 0 : i32
    %732 = arith.select %728, %731, %c0_i32_272 : i32
    %cst_273 = arith.constant 0xFF800000 : f32
    %733 = arith.select %728, %719, %cst_273 : f32
    %c2_i32_274 = arith.constant 2 : i32
    %734 = arith.cmpi eq, %732, %c2_i32_274 : i32
    %735 = arith.select %734, %498, %558 : f32
    %c1_i32_275 = arith.constant 1 : i32
    %736 = arith.cmpi eq, %732, %c1_i32_275 : i32
    %737 = arith.select %736, %438, %735 : f32
    %c0_i32_276 = arith.constant 0 : i32
    %738 = arith.cmpi eq, %732, %c0_i32_276 : i32
    %739 = arith.select %738, %378, %737 : f32
    %740 = arith.subf %719, %739 : f32
    %cst_277 = arith.constant 1.000000e+00 : f32
    %741 = arith.mulf %740, %cst_277 : f32
    %cst_278 = arith.constant 0.000000e+00 : f32
    %742 = arith.select %728, %741, %cst_278 : f32
    %c2_i32_279 = arith.constant 2 : i32
    %743 = vector.broadcast %c2_i32_279 : i32 to vector<1x128xi32>
    %744 = arith.cmpi eq, %28, %743 : vector<1x128xi32>
    %745 = vector.broadcast %733 : f32 to vector<1x128xf32>
    %746 = arith.select %744, %745, %700 : vector<1x128xi1>, vector<1x128xf32>
    %c6_i32_280 = arith.constant 6 : i32
    %747 = vector.broadcast %c6_i32_280 : i32 to vector<1x128xi32>
    %748 = arith.cmpi eq, %28, %747 : vector<1x128xi32>
    %749 = arith.sitofp %730 : i32 to f32
    %750 = vector.broadcast %749 : f32 to vector<1x128xf32>
    %751 = arith.select %748, %750, %746 : vector<1x128xi1>, vector<1x128xf32>
    %c10_i32_281 = arith.constant 10 : i32
    %752 = vector.broadcast %c10_i32_281 : i32 to vector<1x128xi32>
    %753 = arith.cmpi eq, %28, %752 : vector<1x128xi32>
    %754 = arith.sitofp %732 : i32 to f32
    %755 = vector.broadcast %754 : f32 to vector<1x128xf32>
    %756 = arith.select %753, %755, %751 : vector<1x128xi1>, vector<1x128xf32>
    %c14_i32_282 = arith.constant 14 : i32
    %757 = vector.broadcast %c14_i32_282 : i32 to vector<1x128xi32>
    %758 = arith.cmpi eq, %28, %757 : vector<1x128xi32>
    %759 = vector.broadcast %742 : f32 to vector<1x128xf32>
    %760 = arith.select %758, %759, %756 : vector<1x128xi1>, vector<1x128xf32>
    %c127_i32_283 = arith.constant 127 : i32
    %761 = arith.cmpi eq, %730, %c127_i32_283 : i32
    %true_284 = arith.constant true
    %762 = arith.xori %728, %true_284 : i1
    %763 = arith.ori %761, %762 : i1
    %cst_285 = arith.constant 0xFF800000 : f32
    %764 = arith.select %763, %cst_285, %733 : f32
    %c2_i32_286 = arith.constant 2 : i32
    %765 = vector.broadcast %c2_i32_286 : i32 to vector<8x128xi32>
    %766 = arith.cmpi eq, %23, %765 : vector<8x128xi32>
    %767 = vector.broadcast %730 : i32 to vector<8x128xi32>
    %768 = arith.cmpi eq, %24, %767 : vector<8x128xi32>
    %769 = arith.andi %766, %768 : vector<8x128xi1>
    %cst_287 = arith.constant 1.000000e+00 : f32
    %770 = vector.broadcast %cst_287 : f32 to vector<8x128xf32>
    %771 = arith.select %769, %770, %711 : vector<8x128xi1>, vector<8x128xf32>
    %772 = vector.broadcast %727 : i32 to vector<8x128xi32>
    %773 = arith.cmpi eq, %27, %772 : vector<8x128xi32>
    %cst_288 = arith.constant 0xFF800000 : f32
    %774 = vector.broadcast %cst_288 : f32 to vector<8x128xf32>
    %775 = arith.select %773, %774, %715 : vector<8x128xi1>, vector<8x128xf32>
    %776 = vector.shape_cast %775 : vector<8x128xf32> to vector<1x8x128xf32>
    %cst_289 = arith.constant dense<0xFF800000> : vector<1xf32>
    %777 = vector.multi_reduction <maximumf>, %776, %cst_289 [1, 2] : vector<1x8x128xf32> to vector<1xf32>
    %778 = vector.shape_cast %777 : vector<1xf32> to vector<1x1x1xf32>
    %779 = vector.extract %778[0, 0, 0] : f32 from vector<1x1x1xf32>
    %780 = vector.broadcast %779 : f32 to vector<8x128xf32>
    %781 = arith.cmpf oeq, %775, %780 : vector<8x128xf32>
    %782 = vector.broadcast %c1024_i32 : i32 to vector<8x128xi32>
    %783 = arith.select %781, %27, %782 : vector<8x128xi1>, vector<8x128xi32>
    %784 = vector.shape_cast %783 : vector<8x128xi32> to vector<1x8x128xi32>
    %cst_290 = arith.constant dense<2147483647> : vector<1xi32>
    %785 = vector.multi_reduction <minsi>, %784, %cst_290 [1, 2] : vector<1x8x128xi32> to vector<1xi32>
    %786 = vector.shape_cast %785 : vector<1xi32> to vector<1x1x1xi32>
    %787 = vector.extract %786[0, 0, 0] : i32 from vector<1x1x1xi32>
    %cst_291 = arith.constant 0xFF800000 : f32
    %788 = arith.cmpf ogt, %779, %cst_291 : f32
    %c127_i32_292 = arith.constant 127 : i32
    %789 = arith.andi %787, %c127_i32_292 : i32
    %c0_i32_293 = arith.constant 0 : i32
    %790 = arith.select %788, %789, %c0_i32_293 : i32
    %c7_i32_294 = arith.constant 7 : i32
    %791 = arith.shrsi %787, %c7_i32_294 : i32
    %c0_i32_295 = arith.constant 0 : i32
    %792 = arith.select %788, %791, %c0_i32_295 : i32
    %cst_296 = arith.constant 0xFF800000 : f32
    %793 = arith.select %788, %779, %cst_296 : f32
    %c2_i32_297 = arith.constant 2 : i32
    %794 = arith.cmpi eq, %792, %c2_i32_297 : i32
    %795 = arith.select %794, %498, %558 : f32
    %c1_i32_298 = arith.constant 1 : i32
    %796 = arith.cmpi eq, %792, %c1_i32_298 : i32
    %797 = arith.select %796, %438, %795 : f32
    %c0_i32_299 = arith.constant 0 : i32
    %798 = arith.cmpi eq, %792, %c0_i32_299 : i32
    %799 = arith.select %798, %378, %797 : f32
    %800 = arith.subf %779, %799 : f32
    %cst_300 = arith.constant 1.000000e+00 : f32
    %801 = arith.mulf %800, %cst_300 : f32
    %cst_301 = arith.constant 0.000000e+00 : f32
    %802 = arith.select %788, %801, %cst_301 : f32
    %c3_i32_302 = arith.constant 3 : i32
    %803 = vector.broadcast %c3_i32_302 : i32 to vector<1x128xi32>
    %804 = arith.cmpi eq, %28, %803 : vector<1x128xi32>
    %805 = vector.broadcast %793 : f32 to vector<1x128xf32>
    %806 = arith.select %804, %805, %760 : vector<1x128xi1>, vector<1x128xf32>
    %c7_i32_303 = arith.constant 7 : i32
    %807 = vector.broadcast %c7_i32_303 : i32 to vector<1x128xi32>
    %808 = arith.cmpi eq, %28, %807 : vector<1x128xi32>
    %809 = arith.sitofp %790 : i32 to f32
    %810 = vector.broadcast %809 : f32 to vector<1x128xf32>
    %811 = arith.select %808, %810, %806 : vector<1x128xi1>, vector<1x128xf32>
    %c11_i32_304 = arith.constant 11 : i32
    %812 = vector.broadcast %c11_i32_304 : i32 to vector<1x128xi32>
    %813 = arith.cmpi eq, %28, %812 : vector<1x128xi32>
    %814 = arith.sitofp %792 : i32 to f32
    %815 = vector.broadcast %814 : f32 to vector<1x128xf32>
    %816 = arith.select %813, %815, %811 : vector<1x128xi1>, vector<1x128xf32>
    %c15_i32_305 = arith.constant 15 : i32
    %817 = vector.broadcast %c15_i32_305 : i32 to vector<1x128xi32>
    %818 = arith.cmpi eq, %28, %817 : vector<1x128xi32>
    %819 = vector.broadcast %802 : f32 to vector<1x128xf32>
    %820 = arith.select %818, %819, %816 : vector<1x128xi1>, vector<1x128xf32>
    %c127_i32_306 = arith.constant 127 : i32
    %821 = arith.cmpi eq, %790, %c127_i32_306 : i32
    %true_307 = arith.constant true
    %822 = arith.xori %788, %true_307 : i1
    %823 = arith.ori %821, %822 : i1
    %cst_308 = arith.constant 0xFF800000 : f32
    %824 = arith.select %823, %cst_308, %793 : f32
    %c3_i32_309 = arith.constant 3 : i32
    %825 = vector.broadcast %c3_i32_309 : i32 to vector<8x128xi32>
    %826 = arith.cmpi eq, %23, %825 : vector<8x128xi32>
    %827 = vector.broadcast %790 : i32 to vector<8x128xi32>
    %828 = arith.cmpi eq, %24, %827 : vector<8x128xi32>
    %829 = arith.andi %826, %828 : vector<8x128xi1>
    %cst_310 = arith.constant 1.000000e+00 : f32
    %830 = vector.broadcast %cst_310 : f32 to vector<8x128xf32>
    %831 = arith.select %829, %830, %771 : vector<8x128xi1>, vector<8x128xf32>
    %832 = vector.broadcast %c2_i32_208 : i32 to vector<8x128xi32>
    %833 = arith.cmpi eq, %29, %832 : vector<8x128xi32>
    %834 = vector.shape_cast %820 : vector<1x128xf32> to vector<1x128xf32>
    %835 = vector.broadcast %834 : vector<1x128xf32> to vector<8x128xf32>
    %836 = arith.select %833, %835, %570 : vector<8x128xi1>, vector<8x128xf32>
    %c3_i32_311 = arith.constant 3 : i32
    %cst_312 = arith.constant 0xFF800000 : f32
    %837 = vector.broadcast %cst_312 : f32 to vector<8x1xf32>
    %c0_i32_313 = arith.constant 0 : i32
    %838 = vector.broadcast %c0_i32_313 : i32 to vector<8x1xi32>
    %839 = arith.cmpi eq, %22, %838 : vector<8x1xi32>
    %840 = vector.broadcast %644 : f32 to vector<8x1xf32>
    %841 = arith.select %839, %840, %837 : vector<8x1xi1>, vector<8x1xf32>
    %c1_i32_314 = arith.constant 1 : i32
    %842 = vector.broadcast %c1_i32_314 : i32 to vector<8x1xi32>
    %843 = arith.cmpi eq, %22, %842 : vector<8x1xi32>
    %844 = vector.broadcast %704 : f32 to vector<8x1xf32>
    %845 = arith.select %843, %844, %841 : vector<8x1xi1>, vector<8x1xf32>
    %c2_i32_315 = arith.constant 2 : i32
    %846 = vector.broadcast %c2_i32_315 : i32 to vector<8x1xi32>
    %847 = arith.cmpi eq, %22, %846 : vector<8x1xi32>
    %848 = vector.broadcast %764 : f32 to vector<8x1xf32>
    %849 = arith.select %847, %848, %845 : vector<8x1xi1>, vector<8x1xf32>
    %c3_i32_316 = arith.constant 3 : i32
    %850 = vector.broadcast %c3_i32_316 : i32 to vector<8x1xi32>
    %851 = arith.cmpi eq, %22, %850 : vector<8x1xi32>
    %852 = vector.broadcast %824 : f32 to vector<8x1xf32>
    %853 = arith.select %851, %852, %849 : vector<8x1xi1>, vector<8x1xf32>
    %c0_317 = arith.constant 0 : index
    %c0_318 = arith.constant 0 : index
    %854 = vector.load %arg6[%c0_317, %c0_318] : memref<128x128xf32, #tpu.memory_space<vmem>>, vector<128x128xf32>
    %cst_319 = arith.constant dense<0.000000e+00> : vector<8x128xf32>
    %855 = tpu.matmul %831, %854, %cst_319 {dimension_numbers = #tpu.dot_dimension_numbers<[1], [0], [0], [1], [0, 0, 1, 1], [], []>} : vector<8x128xf32>, vector<128x128xf32>, vector<8x128xf32> -> vector<8x128xf32>
    %cst_320 = arith.constant 1.000000e+00 : f32
    %856 = vector.broadcast %cst_320 : f32 to vector<8x128xf32>
    %857 = arith.mulf %856, %855 : vector<8x128xf32>
    %858 = vector.broadcast %853 : vector<8x1xf32> to vector<8x128xf32>
    %859 = arith.addf %857, %858 : vector<8x128xf32>
    %cst_321 = arith.constant 0.000000e+00 : f32
    %860 = vector.broadcast %cst_321 : f32 to vector<1x128xf32>
    %cst_322 = arith.constant 0.000000e+00 : f32
    %861 = vector.broadcast %cst_322 : f32 to vector<8x128xf32>
    %862 = vector.shape_cast %859 : vector<8x128xf32> to vector<1x8x128xf32>
    %cst_323 = arith.constant dense<0xFF800000> : vector<1xf32>
    %863 = vector.multi_reduction <maximumf>, %862, %cst_323 [1, 2] : vector<1x8x128xf32> to vector<1xf32>
    %864 = vector.shape_cast %863 : vector<1xf32> to vector<1x1x1xf32>
    %865 = vector.extract %864[0, 0, 0] : f32 from vector<1x1x1xf32>
    %866 = vector.broadcast %865 : f32 to vector<8x128xf32>
    %867 = arith.cmpf oeq, %859, %866 : vector<8x128xf32>
    %868 = vector.broadcast %c1024_i32 : i32 to vector<8x128xi32>
    %869 = arith.select %867, %27, %868 : vector<8x128xi1>, vector<8x128xi32>
    %870 = vector.shape_cast %869 : vector<8x128xi32> to vector<1x8x128xi32>
    %cst_324 = arith.constant dense<2147483647> : vector<1xi32>
    %871 = vector.multi_reduction <minsi>, %870, %cst_324 [1, 2] : vector<1x8x128xi32> to vector<1xi32>
    %872 = vector.shape_cast %871 : vector<1xi32> to vector<1x1x1xi32>
    %873 = vector.extract %872[0, 0, 0] : i32 from vector<1x1x1xi32>
    %cst_325 = arith.constant 0xFF800000 : f32
    %874 = arith.cmpf ogt, %865, %cst_325 : f32
    %c127_i32_326 = arith.constant 127 : i32
    %875 = arith.andi %873, %c127_i32_326 : i32
    %c0_i32_327 = arith.constant 0 : i32
    %876 = arith.select %874, %875, %c0_i32_327 : i32
    %c7_i32_328 = arith.constant 7 : i32
    %877 = arith.shrsi %873, %c7_i32_328 : i32
    %c0_i32_329 = arith.constant 0 : i32
    %878 = arith.select %874, %877, %c0_i32_329 : i32
    %cst_330 = arith.constant 0xFF800000 : f32
    %879 = arith.select %874, %865, %cst_330 : f32
    %c2_i32_331 = arith.constant 2 : i32
    %880 = arith.cmpi eq, %878, %c2_i32_331 : i32
    %881 = arith.select %880, %764, %824 : f32
    %c1_i32_332 = arith.constant 1 : i32
    %882 = arith.cmpi eq, %878, %c1_i32_332 : i32
    %883 = arith.select %882, %704, %881 : f32
    %c0_i32_333 = arith.constant 0 : i32
    %884 = arith.cmpi eq, %878, %c0_i32_333 : i32
    %885 = arith.select %884, %644, %883 : f32
    %886 = arith.subf %865, %885 : f32
    %cst_334 = arith.constant 1.000000e+00 : f32
    %887 = arith.mulf %886, %cst_334 : f32
    %cst_335 = arith.constant 0.000000e+00 : f32
    %888 = arith.select %874, %887, %cst_335 : f32
    %c0_i32_336 = arith.constant 0 : i32
    %889 = vector.broadcast %c0_i32_336 : i32 to vector<1x128xi32>
    %890 = arith.cmpi eq, %28, %889 : vector<1x128xi32>
    %891 = vector.broadcast %879 : f32 to vector<1x128xf32>
    %892 = arith.select %890, %891, %860 : vector<1x128xi1>, vector<1x128xf32>
    %c4_i32_337 = arith.constant 4 : i32
    %893 = vector.broadcast %c4_i32_337 : i32 to vector<1x128xi32>
    %894 = arith.cmpi eq, %28, %893 : vector<1x128xi32>
    %895 = arith.sitofp %876 : i32 to f32
    %896 = vector.broadcast %895 : f32 to vector<1x128xf32>
    %897 = arith.select %894, %896, %892 : vector<1x128xi1>, vector<1x128xf32>
    %c8_i32_338 = arith.constant 8 : i32
    %898 = vector.broadcast %c8_i32_338 : i32 to vector<1x128xi32>
    %899 = arith.cmpi eq, %28, %898 : vector<1x128xi32>
    %900 = arith.sitofp %878 : i32 to f32
    %901 = vector.broadcast %900 : f32 to vector<1x128xf32>
    %902 = arith.select %899, %901, %897 : vector<1x128xi1>, vector<1x128xf32>
    %c12_i32_339 = arith.constant 12 : i32
    %903 = vector.broadcast %c12_i32_339 : i32 to vector<1x128xi32>
    %904 = arith.cmpi eq, %28, %903 : vector<1x128xi32>
    %905 = vector.broadcast %888 : f32 to vector<1x128xf32>
    %906 = arith.select %904, %905, %902 : vector<1x128xi1>, vector<1x128xf32>
    %c127_i32_340 = arith.constant 127 : i32
    %907 = arith.cmpi eq, %876, %c127_i32_340 : i32
    %true_341 = arith.constant true
    %908 = arith.xori %874, %true_341 : i1
    %909 = arith.ori %907, %908 : i1
    %cst_342 = arith.constant 0xFF800000 : f32
    %910 = arith.select %909, %cst_342, %879 : f32
    %c0_i32_343 = arith.constant 0 : i32
    %911 = vector.broadcast %c0_i32_343 : i32 to vector<8x128xi32>
    %912 = arith.cmpi eq, %23, %911 : vector<8x128xi32>
    %913 = vector.broadcast %876 : i32 to vector<8x128xi32>
    %914 = arith.cmpi eq, %24, %913 : vector<8x128xi32>
    %915 = arith.andi %912, %914 : vector<8x128xi1>
    %cst_344 = arith.constant 1.000000e+00 : f32
    %916 = vector.broadcast %cst_344 : f32 to vector<8x128xf32>
    %917 = arith.select %915, %916, %861 : vector<8x128xi1>, vector<8x128xf32>
    %918 = vector.broadcast %873 : i32 to vector<8x128xi32>
    %919 = arith.cmpi eq, %27, %918 : vector<8x128xi32>
    %cst_345 = arith.constant 0xFF800000 : f32
    %920 = vector.broadcast %cst_345 : f32 to vector<8x128xf32>
    %921 = arith.select %919, %920, %859 : vector<8x128xi1>, vector<8x128xf32>
    %922 = vector.shape_cast %921 : vector<8x128xf32> to vector<1x8x128xf32>
    %cst_346 = arith.constant dense<0xFF800000> : vector<1xf32>
    %923 = vector.multi_reduction <maximumf>, %922, %cst_346 [1, 2] : vector<1x8x128xf32> to vector<1xf32>
    %924 = vector.shape_cast %923 : vector<1xf32> to vector<1x1x1xf32>
    %925 = vector.extract %924[0, 0, 0] : f32 from vector<1x1x1xf32>
    %926 = vector.broadcast %925 : f32 to vector<8x128xf32>
    %927 = arith.cmpf oeq, %921, %926 : vector<8x128xf32>
    %928 = vector.broadcast %c1024_i32 : i32 to vector<8x128xi32>
    %929 = arith.select %927, %27, %928 : vector<8x128xi1>, vector<8x128xi32>
    %930 = vector.shape_cast %929 : vector<8x128xi32> to vector<1x8x128xi32>
    %cst_347 = arith.constant dense<2147483647> : vector<1xi32>
    %931 = vector.multi_reduction <minsi>, %930, %cst_347 [1, 2] : vector<1x8x128xi32> to vector<1xi32>
    %932 = vector.shape_cast %931 : vector<1xi32> to vector<1x1x1xi32>
    %933 = vector.extract %932[0, 0, 0] : i32 from vector<1x1x1xi32>
    %cst_348 = arith.constant 0xFF800000 : f32
    %934 = arith.cmpf ogt, %925, %cst_348 : f32
    %c127_i32_349 = arith.constant 127 : i32
    %935 = arith.andi %933, %c127_i32_349 : i32
    %c0_i32_350 = arith.constant 0 : i32
    %936 = arith.select %934, %935, %c0_i32_350 : i32
    %c7_i32_351 = arith.constant 7 : i32
    %937 = arith.shrsi %933, %c7_i32_351 : i32
    %c0_i32_352 = arith.constant 0 : i32
    %938 = arith.select %934, %937, %c0_i32_352 : i32
    %cst_353 = arith.constant 0xFF800000 : f32
    %939 = arith.select %934, %925, %cst_353 : f32
    %c2_i32_354 = arith.constant 2 : i32
    %940 = arith.cmpi eq, %938, %c2_i32_354 : i32
    %941 = arith.select %940, %764, %824 : f32
    %c1_i32_355 = arith.constant 1 : i32
    %942 = arith.cmpi eq, %938, %c1_i32_355 : i32
    %943 = arith.select %942, %704, %941 : f32
    %c0_i32_356 = arith.constant 0 : i32
    %944 = arith.cmpi eq, %938, %c0_i32_356 : i32
    %945 = arith.select %944, %644, %943 : f32
    %946 = arith.subf %925, %945 : f32
    %cst_357 = arith.constant 1.000000e+00 : f32
    %947 = arith.mulf %946, %cst_357 : f32
    %cst_358 = arith.constant 0.000000e+00 : f32
    %948 = arith.select %934, %947, %cst_358 : f32
    %c1_i32_359 = arith.constant 1 : i32
    %949 = vector.broadcast %c1_i32_359 : i32 to vector<1x128xi32>
    %950 = arith.cmpi eq, %28, %949 : vector<1x128xi32>
    %951 = vector.broadcast %939 : f32 to vector<1x128xf32>
    %952 = arith.select %950, %951, %906 : vector<1x128xi1>, vector<1x128xf32>
    %c5_i32_360 = arith.constant 5 : i32
    %953 = vector.broadcast %c5_i32_360 : i32 to vector<1x128xi32>
    %954 = arith.cmpi eq, %28, %953 : vector<1x128xi32>
    %955 = arith.sitofp %936 : i32 to f32
    %956 = vector.broadcast %955 : f32 to vector<1x128xf32>
    %957 = arith.select %954, %956, %952 : vector<1x128xi1>, vector<1x128xf32>
    %c9_i32_361 = arith.constant 9 : i32
    %958 = vector.broadcast %c9_i32_361 : i32 to vector<1x128xi32>
    %959 = arith.cmpi eq, %28, %958 : vector<1x128xi32>
    %960 = arith.sitofp %938 : i32 to f32
    %961 = vector.broadcast %960 : f32 to vector<1x128xf32>
    %962 = arith.select %959, %961, %957 : vector<1x128xi1>, vector<1x128xf32>
    %c13_i32_362 = arith.constant 13 : i32
    %963 = vector.broadcast %c13_i32_362 : i32 to vector<1x128xi32>
    %964 = arith.cmpi eq, %28, %963 : vector<1x128xi32>
    %965 = vector.broadcast %948 : f32 to vector<1x128xf32>
    %966 = arith.select %964, %965, %962 : vector<1x128xi1>, vector<1x128xf32>
    %c127_i32_363 = arith.constant 127 : i32
    %967 = arith.cmpi eq, %936, %c127_i32_363 : i32
    %true_364 = arith.constant true
    %968 = arith.xori %934, %true_364 : i1
    %969 = arith.ori %967, %968 : i1
    %cst_365 = arith.constant 0xFF800000 : f32
    %970 = arith.select %969, %cst_365, %939 : f32
    %c1_i32_366 = arith.constant 1 : i32
    %971 = vector.broadcast %c1_i32_366 : i32 to vector<8x128xi32>
    %972 = arith.cmpi eq, %23, %971 : vector<8x128xi32>
    %973 = vector.broadcast %936 : i32 to vector<8x128xi32>
    %974 = arith.cmpi eq, %24, %973 : vector<8x128xi32>
    %975 = arith.andi %972, %974 : vector<8x128xi1>
    %cst_367 = arith.constant 1.000000e+00 : f32
    %976 = vector.broadcast %cst_367 : f32 to vector<8x128xf32>
    %977 = arith.select %975, %976, %917 : vector<8x128xi1>, vector<8x128xf32>
    %978 = vector.broadcast %933 : i32 to vector<8x128xi32>
    %979 = arith.cmpi eq, %27, %978 : vector<8x128xi32>
    %cst_368 = arith.constant 0xFF800000 : f32
    %980 = vector.broadcast %cst_368 : f32 to vector<8x128xf32>
    %981 = arith.select %979, %980, %921 : vector<8x128xi1>, vector<8x128xf32>
    %982 = vector.shape_cast %981 : vector<8x128xf32> to vector<1x8x128xf32>
    %cst_369 = arith.constant dense<0xFF800000> : vector<1xf32>
    %983 = vector.multi_reduction <maximumf>, %982, %cst_369 [1, 2] : vector<1x8x128xf32> to vector<1xf32>
    %984 = vector.shape_cast %983 : vector<1xf32> to vector<1x1x1xf32>
    %985 = vector.extract %984[0, 0, 0] : f32 from vector<1x1x1xf32>
    %986 = vector.broadcast %985 : f32 to vector<8x128xf32>
    %987 = arith.cmpf oeq, %981, %986 : vector<8x128xf32>
    %988 = vector.broadcast %c1024_i32 : i32 to vector<8x128xi32>
    %989 = arith.select %987, %27, %988 : vector<8x128xi1>, vector<8x128xi32>
    %990 = vector.shape_cast %989 : vector<8x128xi32> to vector<1x8x128xi32>
    %cst_370 = arith.constant dense<2147483647> : vector<1xi32>
    %991 = vector.multi_reduction <minsi>, %990, %cst_370 [1, 2] : vector<1x8x128xi32> to vector<1xi32>
    %992 = vector.shape_cast %991 : vector<1xi32> to vector<1x1x1xi32>
    %993 = vector.extract %992[0, 0, 0] : i32 from vector<1x1x1xi32>
    %cst_371 = arith.constant 0xFF800000 : f32
    %994 = arith.cmpf ogt, %985, %cst_371 : f32
    %c127_i32_372 = arith.constant 127 : i32
    %995 = arith.andi %993, %c127_i32_372 : i32
    %c0_i32_373 = arith.constant 0 : i32
    %996 = arith.select %994, %995, %c0_i32_373 : i32
    %c7_i32_374 = arith.constant 7 : i32
    %997 = arith.shrsi %993, %c7_i32_374 : i32
    %c0_i32_375 = arith.constant 0 : i32
    %998 = arith.select %994, %997, %c0_i32_375 : i32
    %cst_376 = arith.constant 0xFF800000 : f32
    %999 = arith.select %994, %985, %cst_376 : f32
    %c2_i32_377 = arith.constant 2 : i32
    %1000 = arith.cmpi eq, %998, %c2_i32_377 : i32
    %1001 = arith.select %1000, %764, %824 : f32
    %c1_i32_378 = arith.constant 1 : i32
    %1002 = arith.cmpi eq, %998, %c1_i32_378 : i32
    %1003 = arith.select %1002, %704, %1001 : f32
    %c0_i32_379 = arith.constant 0 : i32
    %1004 = arith.cmpi eq, %998, %c0_i32_379 : i32
    %1005 = arith.select %1004, %644, %1003 : f32
    %1006 = arith.subf %985, %1005 : f32
    %cst_380 = arith.constant 1.000000e+00 : f32
    %1007 = arith.mulf %1006, %cst_380 : f32
    %cst_381 = arith.constant 0.000000e+00 : f32
    %1008 = arith.select %994, %1007, %cst_381 : f32
    %c2_i32_382 = arith.constant 2 : i32
    %1009 = vector.broadcast %c2_i32_382 : i32 to vector<1x128xi32>
    %1010 = arith.cmpi eq, %28, %1009 : vector<1x128xi32>
    %1011 = vector.broadcast %999 : f32 to vector<1x128xf32>
    %1012 = arith.select %1010, %1011, %966 : vector<1x128xi1>, vector<1x128xf32>
    %c6_i32_383 = arith.constant 6 : i32
    %1013 = vector.broadcast %c6_i32_383 : i32 to vector<1x128xi32>
    %1014 = arith.cmpi eq, %28, %1013 : vector<1x128xi32>
    %1015 = arith.sitofp %996 : i32 to f32
    %1016 = vector.broadcast %1015 : f32 to vector<1x128xf32>
    %1017 = arith.select %1014, %1016, %1012 : vector<1x128xi1>, vector<1x128xf32>
    %c10_i32_384 = arith.constant 10 : i32
    %1018 = vector.broadcast %c10_i32_384 : i32 to vector<1x128xi32>
    %1019 = arith.cmpi eq, %28, %1018 : vector<1x128xi32>
    %1020 = arith.sitofp %998 : i32 to f32
    %1021 = vector.broadcast %1020 : f32 to vector<1x128xf32>
    %1022 = arith.select %1019, %1021, %1017 : vector<1x128xi1>, vector<1x128xf32>
    %c14_i32_385 = arith.constant 14 : i32
    %1023 = vector.broadcast %c14_i32_385 : i32 to vector<1x128xi32>
    %1024 = arith.cmpi eq, %28, %1023 : vector<1x128xi32>
    %1025 = vector.broadcast %1008 : f32 to vector<1x128xf32>
    %1026 = arith.select %1024, %1025, %1022 : vector<1x128xi1>, vector<1x128xf32>
    %c127_i32_386 = arith.constant 127 : i32
    %1027 = arith.cmpi eq, %996, %c127_i32_386 : i32
    %true_387 = arith.constant true
    %1028 = arith.xori %994, %true_387 : i1
    %1029 = arith.ori %1027, %1028 : i1
    %cst_388 = arith.constant 0xFF800000 : f32
    %1030 = arith.select %1029, %cst_388, %999 : f32
    %c2_i32_389 = arith.constant 2 : i32
    %1031 = vector.broadcast %c2_i32_389 : i32 to vector<8x128xi32>
    %1032 = arith.cmpi eq, %23, %1031 : vector<8x128xi32>
    %1033 = vector.broadcast %996 : i32 to vector<8x128xi32>
    %1034 = arith.cmpi eq, %24, %1033 : vector<8x128xi32>
    %1035 = arith.andi %1032, %1034 : vector<8x128xi1>
    %cst_390 = arith.constant 1.000000e+00 : f32
    %1036 = vector.broadcast %cst_390 : f32 to vector<8x128xf32>
    %1037 = arith.select %1035, %1036, %977 : vector<8x128xi1>, vector<8x128xf32>
    %1038 = vector.broadcast %993 : i32 to vector<8x128xi32>
    %1039 = arith.cmpi eq, %27, %1038 : vector<8x128xi32>
    %cst_391 = arith.constant 0xFF800000 : f32
    %1040 = vector.broadcast %cst_391 : f32 to vector<8x128xf32>
    %1041 = arith.select %1039, %1040, %981 : vector<8x128xi1>, vector<8x128xf32>
    %1042 = vector.shape_cast %1041 : vector<8x128xf32> to vector<1x8x128xf32>
    %cst_392 = arith.constant dense<0xFF800000> : vector<1xf32>
    %1043 = vector.multi_reduction <maximumf>, %1042, %cst_392 [1, 2] : vector<1x8x128xf32> to vector<1xf32>
    %1044 = vector.shape_cast %1043 : vector<1xf32> to vector<1x1x1xf32>
    %1045 = vector.extract %1044[0, 0, 0] : f32 from vector<1x1x1xf32>
    %1046 = vector.broadcast %1045 : f32 to vector<8x128xf32>
    %1047 = arith.cmpf oeq, %1041, %1046 : vector<8x128xf32>
    %1048 = vector.broadcast %c1024_i32 : i32 to vector<8x128xi32>
    %1049 = arith.select %1047, %27, %1048 : vector<8x128xi1>, vector<8x128xi32>
    %1050 = vector.shape_cast %1049 : vector<8x128xi32> to vector<1x8x128xi32>
    %cst_393 = arith.constant dense<2147483647> : vector<1xi32>
    %1051 = vector.multi_reduction <minsi>, %1050, %cst_393 [1, 2] : vector<1x8x128xi32> to vector<1xi32>
    %1052 = vector.shape_cast %1051 : vector<1xi32> to vector<1x1x1xi32>
    %1053 = vector.extract %1052[0, 0, 0] : i32 from vector<1x1x1xi32>
    %cst_394 = arith.constant 0xFF800000 : f32
    %1054 = arith.cmpf ogt, %1045, %cst_394 : f32
    %c127_i32_395 = arith.constant 127 : i32
    %1055 = arith.andi %1053, %c127_i32_395 : i32
    %c0_i32_396 = arith.constant 0 : i32
    %1056 = arith.select %1054, %1055, %c0_i32_396 : i32
    %c7_i32_397 = arith.constant 7 : i32
    %1057 = arith.shrsi %1053, %c7_i32_397 : i32
    %c0_i32_398 = arith.constant 0 : i32
    %1058 = arith.select %1054, %1057, %c0_i32_398 : i32
    %cst_399 = arith.constant 0xFF800000 : f32
    %1059 = arith.select %1054, %1045, %cst_399 : f32
    %c2_i32_400 = arith.constant 2 : i32
    %1060 = arith.cmpi eq, %1058, %c2_i32_400 : i32
    %1061 = arith.select %1060, %764, %824 : f32
    %c1_i32_401 = arith.constant 1 : i32
    %1062 = arith.cmpi eq, %1058, %c1_i32_401 : i32
    %1063 = arith.select %1062, %704, %1061 : f32
    %c0_i32_402 = arith.constant 0 : i32
    %1064 = arith.cmpi eq, %1058, %c0_i32_402 : i32
    %1065 = arith.select %1064, %644, %1063 : f32
    %1066 = arith.subf %1045, %1065 : f32
    %cst_403 = arith.constant 1.000000e+00 : f32
    %1067 = arith.mulf %1066, %cst_403 : f32
    %cst_404 = arith.constant 0.000000e+00 : f32
    %1068 = arith.select %1054, %1067, %cst_404 : f32
    %c3_i32_405 = arith.constant 3 : i32
    %1069 = vector.broadcast %c3_i32_405 : i32 to vector<1x128xi32>
    %1070 = arith.cmpi eq, %28, %1069 : vector<1x128xi32>
    %1071 = vector.broadcast %1059 : f32 to vector<1x128xf32>
    %1072 = arith.select %1070, %1071, %1026 : vector<1x128xi1>, vector<1x128xf32>
    %c7_i32_406 = arith.constant 7 : i32
    %1073 = vector.broadcast %c7_i32_406 : i32 to vector<1x128xi32>
    %1074 = arith.cmpi eq, %28, %1073 : vector<1x128xi32>
    %1075 = arith.sitofp %1056 : i32 to f32
    %1076 = vector.broadcast %1075 : f32 to vector<1x128xf32>
    %1077 = arith.select %1074, %1076, %1072 : vector<1x128xi1>, vector<1x128xf32>
    %c11_i32_407 = arith.constant 11 : i32
    %1078 = vector.broadcast %c11_i32_407 : i32 to vector<1x128xi32>
    %1079 = arith.cmpi eq, %28, %1078 : vector<1x128xi32>
    %1080 = arith.sitofp %1058 : i32 to f32
    %1081 = vector.broadcast %1080 : f32 to vector<1x128xf32>
    %1082 = arith.select %1079, %1081, %1077 : vector<1x128xi1>, vector<1x128xf32>
    %c15_i32_408 = arith.constant 15 : i32
    %1083 = vector.broadcast %c15_i32_408 : i32 to vector<1x128xi32>
    %1084 = arith.cmpi eq, %28, %1083 : vector<1x128xi32>
    %1085 = vector.broadcast %1068 : f32 to vector<1x128xf32>
    %1086 = arith.select %1084, %1085, %1082 : vector<1x128xi1>, vector<1x128xf32>
    %c127_i32_409 = arith.constant 127 : i32
    %1087 = arith.cmpi eq, %1056, %c127_i32_409 : i32
    %true_410 = arith.constant true
    %1088 = arith.xori %1054, %true_410 : i1
    %1089 = arith.ori %1087, %1088 : i1
    %cst_411 = arith.constant 0xFF800000 : f32
    %1090 = arith.select %1089, %cst_411, %1059 : f32
    %c3_i32_412 = arith.constant 3 : i32
    %1091 = vector.broadcast %c3_i32_412 : i32 to vector<8x128xi32>
    %1092 = arith.cmpi eq, %23, %1091 : vector<8x128xi32>
    %1093 = vector.broadcast %1056 : i32 to vector<8x128xi32>
    %1094 = arith.cmpi eq, %24, %1093 : vector<8x128xi32>
    %1095 = arith.andi %1092, %1094 : vector<8x128xi1>
    %cst_413 = arith.constant 1.000000e+00 : f32
    %1096 = vector.broadcast %cst_413 : f32 to vector<8x128xf32>
    %1097 = arith.select %1095, %1096, %1037 : vector<8x128xi1>, vector<8x128xf32>
    %1098 = vector.broadcast %c3_i32_311 : i32 to vector<8x128xi32>
    %1099 = arith.cmpi eq, %29, %1098 : vector<8x128xi32>
    %1100 = vector.shape_cast %1086 : vector<1x128xf32> to vector<1x128xf32>
    %1101 = vector.broadcast %1100 : vector<1x128xf32> to vector<8x128xf32>
    %1102 = arith.select %1099, %1101, %836 : vector<8x128xi1>, vector<8x128xf32>
    %c4_i32_414 = arith.constant 4 : i32
    %cst_415 = arith.constant 0xFF800000 : f32
    %1103 = vector.broadcast %cst_415 : f32 to vector<8x1xf32>
    %c0_i32_416 = arith.constant 0 : i32
    %1104 = vector.broadcast %c0_i32_416 : i32 to vector<8x1xi32>
    %1105 = arith.cmpi eq, %22, %1104 : vector<8x1xi32>
    %1106 = vector.broadcast %910 : f32 to vector<8x1xf32>
    %1107 = arith.select %1105, %1106, %1103 : vector<8x1xi1>, vector<8x1xf32>
    %c1_i32_417 = arith.constant 1 : i32
    %1108 = vector.broadcast %c1_i32_417 : i32 to vector<8x1xi32>
    %1109 = arith.cmpi eq, %22, %1108 : vector<8x1xi32>
    %1110 = vector.broadcast %970 : f32 to vector<8x1xf32>
    %1111 = arith.select %1109, %1110, %1107 : vector<8x1xi1>, vector<8x1xf32>
    %c2_i32_418 = arith.constant 2 : i32
    %1112 = vector.broadcast %c2_i32_418 : i32 to vector<8x1xi32>
    %1113 = arith.cmpi eq, %22, %1112 : vector<8x1xi32>
    %1114 = vector.broadcast %1030 : f32 to vector<8x1xf32>
    %1115 = arith.select %1113, %1114, %1111 : vector<8x1xi1>, vector<8x1xf32>
    %c3_i32_419 = arith.constant 3 : i32
    %1116 = vector.broadcast %c3_i32_419 : i32 to vector<8x1xi32>
    %1117 = arith.cmpi eq, %22, %1116 : vector<8x1xi32>
    %1118 = vector.broadcast %1090 : f32 to vector<8x1xf32>
    %1119 = arith.select %1117, %1118, %1115 : vector<8x1xi1>, vector<8x1xf32>
    %c0_420 = arith.constant 0 : index
    %c0_421 = arith.constant 0 : index
    %1120 = vector.load %arg6[%c0_420, %c0_421] : memref<128x128xf32, #tpu.memory_space<vmem>>, vector<128x128xf32>
    %cst_422 = arith.constant dense<0.000000e+00> : vector<8x128xf32>
    %1121 = tpu.matmul %1097, %1120, %cst_422 {dimension_numbers = #tpu.dot_dimension_numbers<[1], [0], [0], [1], [0, 0, 1, 1], [], []>} : vector<8x128xf32>, vector<128x128xf32>, vector<8x128xf32> -> vector<8x128xf32>
    %cst_423 = arith.constant 1.000000e+00 : f32
    %1122 = vector.broadcast %cst_423 : f32 to vector<8x128xf32>
    %1123 = arith.mulf %1122, %1121 : vector<8x128xf32>
    %1124 = vector.broadcast %1119 : vector<8x1xf32> to vector<8x128xf32>
    %1125 = arith.addf %1123, %1124 : vector<8x128xf32>
    %cst_424 = arith.constant 0.000000e+00 : f32
    %1126 = vector.broadcast %cst_424 : f32 to vector<1x128xf32>
    %cst_425 = arith.constant 0.000000e+00 : f32
    %1127 = vector.broadcast %cst_425 : f32 to vector<8x128xf32>
    %1128 = vector.shape_cast %1125 : vector<8x128xf32> to vector<1x8x128xf32>
    %cst_426 = arith.constant dense<0xFF800000> : vector<1xf32>
    %1129 = vector.multi_reduction <maximumf>, %1128, %cst_426 [1, 2] : vector<1x8x128xf32> to vector<1xf32>
    %1130 = vector.shape_cast %1129 : vector<1xf32> to vector<1x1x1xf32>
    %1131 = vector.extract %1130[0, 0, 0] : f32 from vector<1x1x1xf32>
    %1132 = vector.broadcast %1131 : f32 to vector<8x128xf32>
    %1133 = arith.cmpf oeq, %1125, %1132 : vector<8x128xf32>
    %1134 = vector.broadcast %c1024_i32 : i32 to vector<8x128xi32>
    %1135 = arith.select %1133, %27, %1134 : vector<8x128xi1>, vector<8x128xi32>
    %1136 = vector.shape_cast %1135 : vector<8x128xi32> to vector<1x8x128xi32>
    %cst_427 = arith.constant dense<2147483647> : vector<1xi32>
    %1137 = vector.multi_reduction <minsi>, %1136, %cst_427 [1, 2] : vector<1x8x128xi32> to vector<1xi32>
    %1138 = vector.shape_cast %1137 : vector<1xi32> to vector<1x1x1xi32>
    %1139 = vector.extract %1138[0, 0, 0] : i32 from vector<1x1x1xi32>
    %cst_428 = arith.constant 0xFF800000 : f32
    %1140 = arith.cmpf ogt, %1131, %cst_428 : f32
    %c127_i32_429 = arith.constant 127 : i32
    %1141 = arith.andi %1139, %c127_i32_429 : i32
    %c0_i32_430 = arith.constant 0 : i32
    %1142 = arith.select %1140, %1141, %c0_i32_430 : i32
    %c7_i32_431 = arith.constant 7 : i32
    %1143 = arith.shrsi %1139, %c7_i32_431 : i32
    %c0_i32_432 = arith.constant 0 : i32
    %1144 = arith.select %1140, %1143, %c0_i32_432 : i32
    %cst_433 = arith.constant 0xFF800000 : f32
    %1145 = arith.select %1140, %1131, %cst_433 : f32
    %c2_i32_434 = arith.constant 2 : i32
    %1146 = arith.cmpi eq, %1144, %c2_i32_434 : i32
    %1147 = arith.select %1146, %1030, %1090 : f32
    %c1_i32_435 = arith.constant 1 : i32
    %1148 = arith.cmpi eq, %1144, %c1_i32_435 : i32
    %1149 = arith.select %1148, %970, %1147 : f32
    %c0_i32_436 = arith.constant 0 : i32
    %1150 = arith.cmpi eq, %1144, %c0_i32_436 : i32
    %1151 = arith.select %1150, %910, %1149 : f32
    %1152 = arith.subf %1131, %1151 : f32
    %cst_437 = arith.constant 1.000000e+00 : f32
    %1153 = arith.mulf %1152, %cst_437 : f32
    %cst_438 = arith.constant 0.000000e+00 : f32
    %1154 = arith.select %1140, %1153, %cst_438 : f32
    %c0_i32_439 = arith.constant 0 : i32
    %1155 = vector.broadcast %c0_i32_439 : i32 to vector<1x128xi32>
    %1156 = arith.cmpi eq, %28, %1155 : vector<1x128xi32>
    %1157 = vector.broadcast %1145 : f32 to vector<1x128xf32>
    %1158 = arith.select %1156, %1157, %1126 : vector<1x128xi1>, vector<1x128xf32>
    %c4_i32_440 = arith.constant 4 : i32
    %1159 = vector.broadcast %c4_i32_440 : i32 to vector<1x128xi32>
    %1160 = arith.cmpi eq, %28, %1159 : vector<1x128xi32>
    %1161 = arith.sitofp %1142 : i32 to f32
    %1162 = vector.broadcast %1161 : f32 to vector<1x128xf32>
    %1163 = arith.select %1160, %1162, %1158 : vector<1x128xi1>, vector<1x128xf32>
    %c8_i32_441 = arith.constant 8 : i32
    %1164 = vector.broadcast %c8_i32_441 : i32 to vector<1x128xi32>
    %1165 = arith.cmpi eq, %28, %1164 : vector<1x128xi32>
    %1166 = arith.sitofp %1144 : i32 to f32
    %1167 = vector.broadcast %1166 : f32 to vector<1x128xf32>
    %1168 = arith.select %1165, %1167, %1163 : vector<1x128xi1>, vector<1x128xf32>
    %c12_i32_442 = arith.constant 12 : i32
    %1169 = vector.broadcast %c12_i32_442 : i32 to vector<1x128xi32>
    %1170 = arith.cmpi eq, %28, %1169 : vector<1x128xi32>
    %1171 = vector.broadcast %1154 : f32 to vector<1x128xf32>
    %1172 = arith.select %1170, %1171, %1168 : vector<1x128xi1>, vector<1x128xf32>
    %c127_i32_443 = arith.constant 127 : i32
    %1173 = arith.cmpi eq, %1142, %c127_i32_443 : i32
    %true_444 = arith.constant true
    %1174 = arith.xori %1140, %true_444 : i1
    %1175 = arith.ori %1173, %1174 : i1
    %cst_445 = arith.constant 0xFF800000 : f32
    %1176 = arith.select %1175, %cst_445, %1145 : f32
    %c0_i32_446 = arith.constant 0 : i32
    %1177 = vector.broadcast %c0_i32_446 : i32 to vector<8x128xi32>
    %1178 = arith.cmpi eq, %23, %1177 : vector<8x128xi32>
    %1179 = vector.broadcast %1142 : i32 to vector<8x128xi32>
    %1180 = arith.cmpi eq, %24, %1179 : vector<8x128xi32>
    %1181 = arith.andi %1178, %1180 : vector<8x128xi1>
    %cst_447 = arith.constant 1.000000e+00 : f32
    %1182 = vector.broadcast %cst_447 : f32 to vector<8x128xf32>
    %1183 = arith.select %1181, %1182, %1127 : vector<8x128xi1>, vector<8x128xf32>
    %1184 = vector.broadcast %1139 : i32 to vector<8x128xi32>
    %1185 = arith.cmpi eq, %27, %1184 : vector<8x128xi32>
    %cst_448 = arith.constant 0xFF800000 : f32
    %1186 = vector.broadcast %cst_448 : f32 to vector<8x128xf32>
    %1187 = arith.select %1185, %1186, %1125 : vector<8x128xi1>, vector<8x128xf32>
    %1188 = vector.shape_cast %1187 : vector<8x128xf32> to vector<1x8x128xf32>
    %cst_449 = arith.constant dense<0xFF800000> : vector<1xf32>
    %1189 = vector.multi_reduction <maximumf>, %1188, %cst_449 [1, 2] : vector<1x8x128xf32> to vector<1xf32>
    %1190 = vector.shape_cast %1189 : vector<1xf32> to vector<1x1x1xf32>
    %1191 = vector.extract %1190[0, 0, 0] : f32 from vector<1x1x1xf32>
    %1192 = vector.broadcast %1191 : f32 to vector<8x128xf32>
    %1193 = arith.cmpf oeq, %1187, %1192 : vector<8x128xf32>
    %1194 = vector.broadcast %c1024_i32 : i32 to vector<8x128xi32>
    %1195 = arith.select %1193, %27, %1194 : vector<8x128xi1>, vector<8x128xi32>
    %1196 = vector.shape_cast %1195 : vector<8x128xi32> to vector<1x8x128xi32>
    %cst_450 = arith.constant dense<2147483647> : vector<1xi32>
    %1197 = vector.multi_reduction <minsi>, %1196, %cst_450 [1, 2] : vector<1x8x128xi32> to vector<1xi32>
    %1198 = vector.shape_cast %1197 : vector<1xi32> to vector<1x1x1xi32>
    %1199 = vector.extract %1198[0, 0, 0] : i32 from vector<1x1x1xi32>
    %cst_451 = arith.constant 0xFF800000 : f32
    %1200 = arith.cmpf ogt, %1191, %cst_451 : f32
    %c127_i32_452 = arith.constant 127 : i32
    %1201 = arith.andi %1199, %c127_i32_452 : i32
    %c0_i32_453 = arith.constant 0 : i32
    %1202 = arith.select %1200, %1201, %c0_i32_453 : i32
    %c7_i32_454 = arith.constant 7 : i32
    %1203 = arith.shrsi %1199, %c7_i32_454 : i32
    %c0_i32_455 = arith.constant 0 : i32
    %1204 = arith.select %1200, %1203, %c0_i32_455 : i32
    %cst_456 = arith.constant 0xFF800000 : f32
    %1205 = arith.select %1200, %1191, %cst_456 : f32
    %c2_i32_457 = arith.constant 2 : i32
    %1206 = arith.cmpi eq, %1204, %c2_i32_457 : i32
    %1207 = arith.select %1206, %1030, %1090 : f32
    %c1_i32_458 = arith.constant 1 : i32
    %1208 = arith.cmpi eq, %1204, %c1_i32_458 : i32
    %1209 = arith.select %1208, %970, %1207 : f32
    %c0_i32_459 = arith.constant 0 : i32
    %1210 = arith.cmpi eq, %1204, %c0_i32_459 : i32
    %1211 = arith.select %1210, %910, %1209 : f32
    %1212 = arith.subf %1191, %1211 : f32
    %cst_460 = arith.constant 1.000000e+00 : f32
    %1213 = arith.mulf %1212, %cst_460 : f32
    %cst_461 = arith.constant 0.000000e+00 : f32
    %1214 = arith.select %1200, %1213, %cst_461 : f32
    %c1_i32_462 = arith.constant 1 : i32
    %1215 = vector.broadcast %c1_i32_462 : i32 to vector<1x128xi32>
    %1216 = arith.cmpi eq, %28, %1215 : vector<1x128xi32>
    %1217 = vector.broadcast %1205 : f32 to vector<1x128xf32>
    %1218 = arith.select %1216, %1217, %1172 : vector<1x128xi1>, vector<1x128xf32>
    %c5_i32_463 = arith.constant 5 : i32
    %1219 = vector.broadcast %c5_i32_463 : i32 to vector<1x128xi32>
    %1220 = arith.cmpi eq, %28, %1219 : vector<1x128xi32>
    %1221 = arith.sitofp %1202 : i32 to f32
    %1222 = vector.broadcast %1221 : f32 to vector<1x128xf32>
    %1223 = arith.select %1220, %1222, %1218 : vector<1x128xi1>, vector<1x128xf32>
    %c9_i32_464 = arith.constant 9 : i32
    %1224 = vector.broadcast %c9_i32_464 : i32 to vector<1x128xi32>
    %1225 = arith.cmpi eq, %28, %1224 : vector<1x128xi32>
    %1226 = arith.sitofp %1204 : i32 to f32
    %1227 = vector.broadcast %1226 : f32 to vector<1x128xf32>
    %1228 = arith.select %1225, %1227, %1223 : vector<1x128xi1>, vector<1x128xf32>
    %c13_i32_465 = arith.constant 13 : i32
    %1229 = vector.broadcast %c13_i32_465 : i32 to vector<1x128xi32>
    %1230 = arith.cmpi eq, %28, %1229 : vector<1x128xi32>
    %1231 = vector.broadcast %1214 : f32 to vector<1x128xf32>
    %1232 = arith.select %1230, %1231, %1228 : vector<1x128xi1>, vector<1x128xf32>
    %c127_i32_466 = arith.constant 127 : i32
    %1233 = arith.cmpi eq, %1202, %c127_i32_466 : i32
    %true_467 = arith.constant true
    %1234 = arith.xori %1200, %true_467 : i1
    %1235 = arith.ori %1233, %1234 : i1
    %cst_468 = arith.constant 0xFF800000 : f32
    %1236 = arith.select %1235, %cst_468, %1205 : f32
    %c1_i32_469 = arith.constant 1 : i32
    %1237 = vector.broadcast %c1_i32_469 : i32 to vector<8x128xi32>
    %1238 = arith.cmpi eq, %23, %1237 : vector<8x128xi32>
    %1239 = vector.broadcast %1202 : i32 to vector<8x128xi32>
    %1240 = arith.cmpi eq, %24, %1239 : vector<8x128xi32>
    %1241 = arith.andi %1238, %1240 : vector<8x128xi1>
    %cst_470 = arith.constant 1.000000e+00 : f32
    %1242 = vector.broadcast %cst_470 : f32 to vector<8x128xf32>
    %1243 = arith.select %1241, %1242, %1183 : vector<8x128xi1>, vector<8x128xf32>
    %1244 = vector.broadcast %1199 : i32 to vector<8x128xi32>
    %1245 = arith.cmpi eq, %27, %1244 : vector<8x128xi32>
    %cst_471 = arith.constant 0xFF800000 : f32
    %1246 = vector.broadcast %cst_471 : f32 to vector<8x128xf32>
    %1247 = arith.select %1245, %1246, %1187 : vector<8x128xi1>, vector<8x128xf32>
    %1248 = vector.shape_cast %1247 : vector<8x128xf32> to vector<1x8x128xf32>
    %cst_472 = arith.constant dense<0xFF800000> : vector<1xf32>
    %1249 = vector.multi_reduction <maximumf>, %1248, %cst_472 [1, 2] : vector<1x8x128xf32> to vector<1xf32>
    %1250 = vector.shape_cast %1249 : vector<1xf32> to vector<1x1x1xf32>
    %1251 = vector.extract %1250[0, 0, 0] : f32 from vector<1x1x1xf32>
    %1252 = vector.broadcast %1251 : f32 to vector<8x128xf32>
    %1253 = arith.cmpf oeq, %1247, %1252 : vector<8x128xf32>
    %1254 = vector.broadcast %c1024_i32 : i32 to vector<8x128xi32>
    %1255 = arith.select %1253, %27, %1254 : vector<8x128xi1>, vector<8x128xi32>
    %1256 = vector.shape_cast %1255 : vector<8x128xi32> to vector<1x8x128xi32>
    %cst_473 = arith.constant dense<2147483647> : vector<1xi32>
    %1257 = vector.multi_reduction <minsi>, %1256, %cst_473 [1, 2] : vector<1x8x128xi32> to vector<1xi32>
    %1258 = vector.shape_cast %1257 : vector<1xi32> to vector<1x1x1xi32>
    %1259 = vector.extract %1258[0, 0, 0] : i32 from vector<1x1x1xi32>
    %cst_474 = arith.constant 0xFF800000 : f32
    %1260 = arith.cmpf ogt, %1251, %cst_474 : f32
    %c127_i32_475 = arith.constant 127 : i32
    %1261 = arith.andi %1259, %c127_i32_475 : i32
    %c0_i32_476 = arith.constant 0 : i32
    %1262 = arith.select %1260, %1261, %c0_i32_476 : i32
    %c7_i32_477 = arith.constant 7 : i32
    %1263 = arith.shrsi %1259, %c7_i32_477 : i32
    %c0_i32_478 = arith.constant 0 : i32
    %1264 = arith.select %1260, %1263, %c0_i32_478 : i32
    %cst_479 = arith.constant 0xFF800000 : f32
    %1265 = arith.select %1260, %1251, %cst_479 : f32
    %c2_i32_480 = arith.constant 2 : i32
    %1266 = arith.cmpi eq, %1264, %c2_i32_480 : i32
    %1267 = arith.select %1266, %1030, %1090 : f32
    %c1_i32_481 = arith.constant 1 : i32
    %1268 = arith.cmpi eq, %1264, %c1_i32_481 : i32
    %1269 = arith.select %1268, %970, %1267 : f32
    %c0_i32_482 = arith.constant 0 : i32
    %1270 = arith.cmpi eq, %1264, %c0_i32_482 : i32
    %1271 = arith.select %1270, %910, %1269 : f32
    %1272 = arith.subf %1251, %1271 : f32
    %cst_483 = arith.constant 1.000000e+00 : f32
    %1273 = arith.mulf %1272, %cst_483 : f32
    %cst_484 = arith.constant 0.000000e+00 : f32
    %1274 = arith.select %1260, %1273, %cst_484 : f32
    %c2_i32_485 = arith.constant 2 : i32
    %1275 = vector.broadcast %c2_i32_485 : i32 to vector<1x128xi32>
    %1276 = arith.cmpi eq, %28, %1275 : vector<1x128xi32>
    %1277 = vector.broadcast %1265 : f32 to vector<1x128xf32>
    %1278 = arith.select %1276, %1277, %1232 : vector<1x128xi1>, vector<1x128xf32>
    %c6_i32_486 = arith.constant 6 : i32
    %1279 = vector.broadcast %c6_i32_486 : i32 to vector<1x128xi32>
    %1280 = arith.cmpi eq, %28, %1279 : vector<1x128xi32>
    %1281 = arith.sitofp %1262 : i32 to f32
    %1282 = vector.broadcast %1281 : f32 to vector<1x128xf32>
    %1283 = arith.select %1280, %1282, %1278 : vector<1x128xi1>, vector<1x128xf32>
    %c10_i32_487 = arith.constant 10 : i32
    %1284 = vector.broadcast %c10_i32_487 : i32 to vector<1x128xi32>
    %1285 = arith.cmpi eq, %28, %1284 : vector<1x128xi32>
    %1286 = arith.sitofp %1264 : i32 to f32
    %1287 = vector.broadcast %1286 : f32 to vector<1x128xf32>
    %1288 = arith.select %1285, %1287, %1283 : vector<1x128xi1>, vector<1x128xf32>
    %c14_i32_488 = arith.constant 14 : i32
    %1289 = vector.broadcast %c14_i32_488 : i32 to vector<1x128xi32>
    %1290 = arith.cmpi eq, %28, %1289 : vector<1x128xi32>
    %1291 = vector.broadcast %1274 : f32 to vector<1x128xf32>
    %1292 = arith.select %1290, %1291, %1288 : vector<1x128xi1>, vector<1x128xf32>
    %c127_i32_489 = arith.constant 127 : i32
    %1293 = arith.cmpi eq, %1262, %c127_i32_489 : i32
    %true_490 = arith.constant true
    %1294 = arith.xori %1260, %true_490 : i1
    %1295 = arith.ori %1293, %1294 : i1
    %cst_491 = arith.constant 0xFF800000 : f32
    %1296 = arith.select %1295, %cst_491, %1265 : f32
    %c2_i32_492 = arith.constant 2 : i32
    %1297 = vector.broadcast %c2_i32_492 : i32 to vector<8x128xi32>
    %1298 = arith.cmpi eq, %23, %1297 : vector<8x128xi32>
    %1299 = vector.broadcast %1262 : i32 to vector<8x128xi32>
    %1300 = arith.cmpi eq, %24, %1299 : vector<8x128xi32>
    %1301 = arith.andi %1298, %1300 : vector<8x128xi1>
    %cst_493 = arith.constant 1.000000e+00 : f32
    %1302 = vector.broadcast %cst_493 : f32 to vector<8x128xf32>
    %1303 = arith.select %1301, %1302, %1243 : vector<8x128xi1>, vector<8x128xf32>
    %1304 = vector.broadcast %1259 : i32 to vector<8x128xi32>
    %1305 = arith.cmpi eq, %27, %1304 : vector<8x128xi32>
    %cst_494 = arith.constant 0xFF800000 : f32
    %1306 = vector.broadcast %cst_494 : f32 to vector<8x128xf32>
    %1307 = arith.select %1305, %1306, %1247 : vector<8x128xi1>, vector<8x128xf32>
    %1308 = vector.shape_cast %1307 : vector<8x128xf32> to vector<1x8x128xf32>
    %cst_495 = arith.constant dense<0xFF800000> : vector<1xf32>
    %1309 = vector.multi_reduction <maximumf>, %1308, %cst_495 [1, 2] : vector<1x8x128xf32> to vector<1xf32>
    %1310 = vector.shape_cast %1309 : vector<1xf32> to vector<1x1x1xf32>
    %1311 = vector.extract %1310[0, 0, 0] : f32 from vector<1x1x1xf32>
    %1312 = vector.broadcast %1311 : f32 to vector<8x128xf32>
    %1313 = arith.cmpf oeq, %1307, %1312 : vector<8x128xf32>
    %1314 = vector.broadcast %c1024_i32 : i32 to vector<8x128xi32>
    %1315 = arith.select %1313, %27, %1314 : vector<8x128xi1>, vector<8x128xi32>
    %1316 = vector.shape_cast %1315 : vector<8x128xi32> to vector<1x8x128xi32>
    %cst_496 = arith.constant dense<2147483647> : vector<1xi32>
    %1317 = vector.multi_reduction <minsi>, %1316, %cst_496 [1, 2] : vector<1x8x128xi32> to vector<1xi32>
    %1318 = vector.shape_cast %1317 : vector<1xi32> to vector<1x1x1xi32>
    %1319 = vector.extract %1318[0, 0, 0] : i32 from vector<1x1x1xi32>
    %cst_497 = arith.constant 0xFF800000 : f32
    %1320 = arith.cmpf ogt, %1311, %cst_497 : f32
    %c127_i32_498 = arith.constant 127 : i32
    %1321 = arith.andi %1319, %c127_i32_498 : i32
    %c0_i32_499 = arith.constant 0 : i32
    %1322 = arith.select %1320, %1321, %c0_i32_499 : i32
    %c7_i32_500 = arith.constant 7 : i32
    %1323 = arith.shrsi %1319, %c7_i32_500 : i32
    %c0_i32_501 = arith.constant 0 : i32
    %1324 = arith.select %1320, %1323, %c0_i32_501 : i32
    %cst_502 = arith.constant 0xFF800000 : f32
    %1325 = arith.select %1320, %1311, %cst_502 : f32
    %c2_i32_503 = arith.constant 2 : i32
    %1326 = arith.cmpi eq, %1324, %c2_i32_503 : i32
    %1327 = arith.select %1326, %1030, %1090 : f32
    %c1_i32_504 = arith.constant 1 : i32
    %1328 = arith.cmpi eq, %1324, %c1_i32_504 : i32
    %1329 = arith.select %1328, %970, %1327 : f32
    %c0_i32_505 = arith.constant 0 : i32
    %1330 = arith.cmpi eq, %1324, %c0_i32_505 : i32
    %1331 = arith.select %1330, %910, %1329 : f32
    %1332 = arith.subf %1311, %1331 : f32
    %cst_506 = arith.constant 1.000000e+00 : f32
    %1333 = arith.mulf %1332, %cst_506 : f32
    %cst_507 = arith.constant 0.000000e+00 : f32
    %1334 = arith.select %1320, %1333, %cst_507 : f32
    %c3_i32_508 = arith.constant 3 : i32
    %1335 = vector.broadcast %c3_i32_508 : i32 to vector<1x128xi32>
    %1336 = arith.cmpi eq, %28, %1335 : vector<1x128xi32>
    %1337 = vector.broadcast %1325 : f32 to vector<1x128xf32>
    %1338 = arith.select %1336, %1337, %1292 : vector<1x128xi1>, vector<1x128xf32>
    %c7_i32_509 = arith.constant 7 : i32
    %1339 = vector.broadcast %c7_i32_509 : i32 to vector<1x128xi32>
    %1340 = arith.cmpi eq, %28, %1339 : vector<1x128xi32>
    %1341 = arith.sitofp %1322 : i32 to f32
    %1342 = vector.broadcast %1341 : f32 to vector<1x128xf32>
    %1343 = arith.select %1340, %1342, %1338 : vector<1x128xi1>, vector<1x128xf32>
    %c11_i32_510 = arith.constant 11 : i32
    %1344 = vector.broadcast %c11_i32_510 : i32 to vector<1x128xi32>
    %1345 = arith.cmpi eq, %28, %1344 : vector<1x128xi32>
    %1346 = arith.sitofp %1324 : i32 to f32
    %1347 = vector.broadcast %1346 : f32 to vector<1x128xf32>
    %1348 = arith.select %1345, %1347, %1343 : vector<1x128xi1>, vector<1x128xf32>
    %c15_i32_511 = arith.constant 15 : i32
    %1349 = vector.broadcast %c15_i32_511 : i32 to vector<1x128xi32>
    %1350 = arith.cmpi eq, %28, %1349 : vector<1x128xi32>
    %1351 = vector.broadcast %1334 : f32 to vector<1x128xf32>
    %1352 = arith.select %1350, %1351, %1348 : vector<1x128xi1>, vector<1x128xf32>
    %c127_i32_512 = arith.constant 127 : i32
    %1353 = arith.cmpi eq, %1322, %c127_i32_512 : i32
    %true_513 = arith.constant true
    %1354 = arith.xori %1320, %true_513 : i1
    %1355 = arith.ori %1353, %1354 : i1
    %cst_514 = arith.constant 0xFF800000 : f32
    %1356 = arith.select %1355, %cst_514, %1325 : f32
    %c3_i32_515 = arith.constant 3 : i32
    %1357 = vector.broadcast %c3_i32_515 : i32 to vector<8x128xi32>
    %1358 = arith.cmpi eq, %23, %1357 : vector<8x128xi32>
    %1359 = vector.broadcast %1322 : i32 to vector<8x128xi32>
    %1360 = arith.cmpi eq, %24, %1359 : vector<8x128xi32>
    %1361 = arith.andi %1358, %1360 : vector<8x128xi1>
    %cst_516 = arith.constant 1.000000e+00 : f32
    %1362 = vector.broadcast %cst_516 : f32 to vector<8x128xf32>
    %1363 = arith.select %1361, %1362, %1303 : vector<8x128xi1>, vector<8x128xf32>
    %1364 = vector.broadcast %c4_i32_414 : i32 to vector<8x128xi32>
    %1365 = arith.cmpi eq, %29, %1364 : vector<8x128xi32>
    %1366 = vector.shape_cast %1352 : vector<1x128xf32> to vector<1x128xf32>
    %1367 = vector.broadcast %1366 : vector<1x128xf32> to vector<8x128xf32>
    %1368 = arith.select %1365, %1367, %1102 : vector<8x128xi1>, vector<8x128xf32>
    %c5_i32_517 = arith.constant 5 : i32
    %cst_518 = arith.constant 0xFF800000 : f32
    %1369 = vector.broadcast %cst_518 : f32 to vector<8x1xf32>
    %c0_i32_519 = arith.constant 0 : i32
    %1370 = vector.broadcast %c0_i32_519 : i32 to vector<8x1xi32>
    %1371 = arith.cmpi eq, %22, %1370 : vector<8x1xi32>
    %1372 = vector.broadcast %1176 : f32 to vector<8x1xf32>
    %1373 = arith.select %1371, %1372, %1369 : vector<8x1xi1>, vector<8x1xf32>
    %c1_i32_520 = arith.constant 1 : i32
    %1374 = vector.broadcast %c1_i32_520 : i32 to vector<8x1xi32>
    %1375 = arith.cmpi eq, %22, %1374 : vector<8x1xi32>
    %1376 = vector.broadcast %1236 : f32 to vector<8x1xf32>
    %1377 = arith.select %1375, %1376, %1373 : vector<8x1xi1>, vector<8x1xf32>
    %c2_i32_521 = arith.constant 2 : i32
    %1378 = vector.broadcast %c2_i32_521 : i32 to vector<8x1xi32>
    %1379 = arith.cmpi eq, %22, %1378 : vector<8x1xi32>
    %1380 = vector.broadcast %1296 : f32 to vector<8x1xf32>
    %1381 = arith.select %1379, %1380, %1377 : vector<8x1xi1>, vector<8x1xf32>
    %c3_i32_522 = arith.constant 3 : i32
    %1382 = vector.broadcast %c3_i32_522 : i32 to vector<8x1xi32>
    %1383 = arith.cmpi eq, %22, %1382 : vector<8x1xi32>
    %1384 = vector.broadcast %1356 : f32 to vector<8x1xf32>
    %1385 = arith.select %1383, %1384, %1381 : vector<8x1xi1>, vector<8x1xf32>
    %c0_523 = arith.constant 0 : index
    %c0_524 = arith.constant 0 : index
    %1386 = vector.load %arg6[%c0_523, %c0_524] : memref<128x128xf32, #tpu.memory_space<vmem>>, vector<128x128xf32>
    %cst_525 = arith.constant dense<0.000000e+00> : vector<8x128xf32>
    %1387 = tpu.matmul %1363, %1386, %cst_525 {dimension_numbers = #tpu.dot_dimension_numbers<[1], [0], [0], [1], [0, 0, 1, 1], [], []>} : vector<8x128xf32>, vector<128x128xf32>, vector<8x128xf32> -> vector<8x128xf32>
    %cst_526 = arith.constant 1.000000e+00 : f32
    %1388 = vector.broadcast %cst_526 : f32 to vector<8x128xf32>
    %1389 = arith.mulf %1388, %1387 : vector<8x128xf32>
    %1390 = vector.broadcast %1385 : vector<8x1xf32> to vector<8x128xf32>
    %1391 = arith.addf %1389, %1390 : vector<8x128xf32>
    %cst_527 = arith.constant 0.000000e+00 : f32
    %1392 = vector.broadcast %cst_527 : f32 to vector<1x128xf32>
    %cst_528 = arith.constant 0.000000e+00 : f32
    %1393 = vector.broadcast %cst_528 : f32 to vector<8x128xf32>
    %1394 = vector.shape_cast %1391 : vector<8x128xf32> to vector<1x8x128xf32>
    %cst_529 = arith.constant dense<0xFF800000> : vector<1xf32>
    %1395 = vector.multi_reduction <maximumf>, %1394, %cst_529 [1, 2] : vector<1x8x128xf32> to vector<1xf32>
    %1396 = vector.shape_cast %1395 : vector<1xf32> to vector<1x1x1xf32>
    %1397 = vector.extract %1396[0, 0, 0] : f32 from vector<1x1x1xf32>
    %1398 = vector.broadcast %1397 : f32 to vector<8x128xf32>
    %1399 = arith.cmpf oeq, %1391, %1398 : vector<8x128xf32>
    %1400 = vector.broadcast %c1024_i32 : i32 to vector<8x128xi32>
    %1401 = arith.select %1399, %27, %1400 : vector<8x128xi1>, vector<8x128xi32>
    %1402 = vector.shape_cast %1401 : vector<8x128xi32> to vector<1x8x128xi32>
    %cst_530 = arith.constant dense<2147483647> : vector<1xi32>
    %1403 = vector.multi_reduction <minsi>, %1402, %cst_530 [1, 2] : vector<1x8x128xi32> to vector<1xi32>
    %1404 = vector.shape_cast %1403 : vector<1xi32> to vector<1x1x1xi32>
    %1405 = vector.extract %1404[0, 0, 0] : i32 from vector<1x1x1xi32>
    %cst_531 = arith.constant 0xFF800000 : f32
    %1406 = arith.cmpf ogt, %1397, %cst_531 : f32
    %c127_i32_532 = arith.constant 127 : i32
    %1407 = arith.andi %1405, %c127_i32_532 : i32
    %c0_i32_533 = arith.constant 0 : i32
    %1408 = arith.select %1406, %1407, %c0_i32_533 : i32
    %c7_i32_534 = arith.constant 7 : i32
    %1409 = arith.shrsi %1405, %c7_i32_534 : i32
    %c0_i32_535 = arith.constant 0 : i32
    %1410 = arith.select %1406, %1409, %c0_i32_535 : i32
    %cst_536 = arith.constant 0xFF800000 : f32
    %1411 = arith.select %1406, %1397, %cst_536 : f32
    %c2_i32_537 = arith.constant 2 : i32
    %1412 = arith.cmpi eq, %1410, %c2_i32_537 : i32
    %1413 = arith.select %1412, %1296, %1356 : f32
    %c1_i32_538 = arith.constant 1 : i32
    %1414 = arith.cmpi eq, %1410, %c1_i32_538 : i32
    %1415 = arith.select %1414, %1236, %1413 : f32
    %c0_i32_539 = arith.constant 0 : i32
    %1416 = arith.cmpi eq, %1410, %c0_i32_539 : i32
    %1417 = arith.select %1416, %1176, %1415 : f32
    %1418 = arith.subf %1397, %1417 : f32
    %cst_540 = arith.constant 1.000000e+00 : f32
    %1419 = arith.mulf %1418, %cst_540 : f32
    %cst_541 = arith.constant 0.000000e+00 : f32
    %1420 = arith.select %1406, %1419, %cst_541 : f32
    %c0_i32_542 = arith.constant 0 : i32
    %1421 = vector.broadcast %c0_i32_542 : i32 to vector<1x128xi32>
    %1422 = arith.cmpi eq, %28, %1421 : vector<1x128xi32>
    %1423 = vector.broadcast %1411 : f32 to vector<1x128xf32>
    %1424 = arith.select %1422, %1423, %1392 : vector<1x128xi1>, vector<1x128xf32>
    %c4_i32_543 = arith.constant 4 : i32
    %1425 = vector.broadcast %c4_i32_543 : i32 to vector<1x128xi32>
    %1426 = arith.cmpi eq, %28, %1425 : vector<1x128xi32>
    %1427 = arith.sitofp %1408 : i32 to f32
    %1428 = vector.broadcast %1427 : f32 to vector<1x128xf32>
    %1429 = arith.select %1426, %1428, %1424 : vector<1x128xi1>, vector<1x128xf32>
    %c8_i32_544 = arith.constant 8 : i32
    %1430 = vector.broadcast %c8_i32_544 : i32 to vector<1x128xi32>
    %1431 = arith.cmpi eq, %28, %1430 : vector<1x128xi32>
    %1432 = arith.sitofp %1410 : i32 to f32
    %1433 = vector.broadcast %1432 : f32 to vector<1x128xf32>
    %1434 = arith.select %1431, %1433, %1429 : vector<1x128xi1>, vector<1x128xf32>
    %c12_i32_545 = arith.constant 12 : i32
    %1435 = vector.broadcast %c12_i32_545 : i32 to vector<1x128xi32>
    %1436 = arith.cmpi eq, %28, %1435 : vector<1x128xi32>
    %1437 = vector.broadcast %1420 : f32 to vector<1x128xf32>
    %1438 = arith.select %1436, %1437, %1434 : vector<1x128xi1>, vector<1x128xf32>
    %c127_i32_546 = arith.constant 127 : i32
    %1439 = arith.cmpi eq, %1408, %c127_i32_546 : i32
    %true_547 = arith.constant true
    %1440 = arith.xori %1406, %true_547 : i1
    %1441 = arith.ori %1439, %1440 : i1
    %cst_548 = arith.constant 0xFF800000 : f32
    %1442 = arith.select %1441, %cst_548, %1411 : f32
    %c0_i32_549 = arith.constant 0 : i32
    %1443 = vector.broadcast %c0_i32_549 : i32 to vector<8x128xi32>
    %1444 = arith.cmpi eq, %23, %1443 : vector<8x128xi32>
    %1445 = vector.broadcast %1408 : i32 to vector<8x128xi32>
    %1446 = arith.cmpi eq, %24, %1445 : vector<8x128xi32>
    %1447 = arith.andi %1444, %1446 : vector<8x128xi1>
    %cst_550 = arith.constant 1.000000e+00 : f32
    %1448 = vector.broadcast %cst_550 : f32 to vector<8x128xf32>
    %1449 = arith.select %1447, %1448, %1393 : vector<8x128xi1>, vector<8x128xf32>
    %1450 = vector.broadcast %1405 : i32 to vector<8x128xi32>
    %1451 = arith.cmpi eq, %27, %1450 : vector<8x128xi32>
    %cst_551 = arith.constant 0xFF800000 : f32
    %1452 = vector.broadcast %cst_551 : f32 to vector<8x128xf32>
    %1453 = arith.select %1451, %1452, %1391 : vector<8x128xi1>, vector<8x128xf32>
    %1454 = vector.shape_cast %1453 : vector<8x128xf32> to vector<1x8x128xf32>
    %cst_552 = arith.constant dense<0xFF800000> : vector<1xf32>
    %1455 = vector.multi_reduction <maximumf>, %1454, %cst_552 [1, 2] : vector<1x8x128xf32> to vector<1xf32>
    %1456 = vector.shape_cast %1455 : vector<1xf32> to vector<1x1x1xf32>
    %1457 = vector.extract %1456[0, 0, 0] : f32 from vector<1x1x1xf32>
    %1458 = vector.broadcast %1457 : f32 to vector<8x128xf32>
    %1459 = arith.cmpf oeq, %1453, %1458 : vector<8x128xf32>
    %1460 = vector.broadcast %c1024_i32 : i32 to vector<8x128xi32>
    %1461 = arith.select %1459, %27, %1460 : vector<8x128xi1>, vector<8x128xi32>
    %1462 = vector.shape_cast %1461 : vector<8x128xi32> to vector<1x8x128xi32>
    %cst_553 = arith.constant dense<2147483647> : vector<1xi32>
    %1463 = vector.multi_reduction <minsi>, %1462, %cst_553 [1, 2] : vector<1x8x128xi32> to vector<1xi32>
    %1464 = vector.shape_cast %1463 : vector<1xi32> to vector<1x1x1xi32>
    %1465 = vector.extract %1464[0, 0, 0] : i32 from vector<1x1x1xi32>
    %cst_554 = arith.constant 0xFF800000 : f32
    %1466 = arith.cmpf ogt, %1457, %cst_554 : f32
    %c127_i32_555 = arith.constant 127 : i32
    %1467 = arith.andi %1465, %c127_i32_555 : i32
    %c0_i32_556 = arith.constant 0 : i32
    %1468 = arith.select %1466, %1467, %c0_i32_556 : i32
    %c7_i32_557 = arith.constant 7 : i32
    %1469 = arith.shrsi %1465, %c7_i32_557 : i32
    %c0_i32_558 = arith.constant 0 : i32
    %1470 = arith.select %1466, %1469, %c0_i32_558 : i32
    %cst_559 = arith.constant 0xFF800000 : f32
    %1471 = arith.select %1466, %1457, %cst_559 : f32
    %c2_i32_560 = arith.constant 2 : i32
    %1472 = arith.cmpi eq, %1470, %c2_i32_560 : i32
    %1473 = arith.select %1472, %1296, %1356 : f32
    %c1_i32_561 = arith.constant 1 : i32
    %1474 = arith.cmpi eq, %1470, %c1_i32_561 : i32
    %1475 = arith.select %1474, %1236, %1473 : f32
    %c0_i32_562 = arith.constant 0 : i32
    %1476 = arith.cmpi eq, %1470, %c0_i32_562 : i32
    %1477 = arith.select %1476, %1176, %1475 : f32
    %1478 = arith.subf %1457, %1477 : f32
    %cst_563 = arith.constant 1.000000e+00 : f32
    %1479 = arith.mulf %1478, %cst_563 : f32
    %cst_564 = arith.constant 0.000000e+00 : f32
    %1480 = arith.select %1466, %1479, %cst_564 : f32
    %c1_i32_565 = arith.constant 1 : i32
    %1481 = vector.broadcast %c1_i32_565 : i32 to vector<1x128xi32>
    %1482 = arith.cmpi eq, %28, %1481 : vector<1x128xi32>
    %1483 = vector.broadcast %1471 : f32 to vector<1x128xf32>
    %1484 = arith.select %1482, %1483, %1438 : vector<1x128xi1>, vector<1x128xf32>
    %c5_i32_566 = arith.constant 5 : i32
    %1485 = vector.broadcast %c5_i32_566 : i32 to vector<1x128xi32>
    %1486 = arith.cmpi eq, %28, %1485 : vector<1x128xi32>
    %1487 = arith.sitofp %1468 : i32 to f32
    %1488 = vector.broadcast %1487 : f32 to vector<1x128xf32>
    %1489 = arith.select %1486, %1488, %1484 : vector<1x128xi1>, vector<1x128xf32>
    %c9_i32_567 = arith.constant 9 : i32
    %1490 = vector.broadcast %c9_i32_567 : i32 to vector<1x128xi32>
    %1491 = arith.cmpi eq, %28, %1490 : vector<1x128xi32>
    %1492 = arith.sitofp %1470 : i32 to f32
    %1493 = vector.broadcast %1492 : f32 to vector<1x128xf32>
    %1494 = arith.select %1491, %1493, %1489 : vector<1x128xi1>, vector<1x128xf32>
    %c13_i32_568 = arith.constant 13 : i32
    %1495 = vector.broadcast %c13_i32_568 : i32 to vector<1x128xi32>
    %1496 = arith.cmpi eq, %28, %1495 : vector<1x128xi32>
    %1497 = vector.broadcast %1480 : f32 to vector<1x128xf32>
    %1498 = arith.select %1496, %1497, %1494 : vector<1x128xi1>, vector<1x128xf32>
    %c127_i32_569 = arith.constant 127 : i32
    %1499 = arith.cmpi eq, %1468, %c127_i32_569 : i32
    %true_570 = arith.constant true
    %1500 = arith.xori %1466, %true_570 : i1
    %1501 = arith.ori %1499, %1500 : i1
    %cst_571 = arith.constant 0xFF800000 : f32
    %1502 = arith.select %1501, %cst_571, %1471 : f32
    %c1_i32_572 = arith.constant 1 : i32
    %1503 = vector.broadcast %c1_i32_572 : i32 to vector<8x128xi32>
    %1504 = arith.cmpi eq, %23, %1503 : vector<8x128xi32>
    %1505 = vector.broadcast %1468 : i32 to vector<8x128xi32>
    %1506 = arith.cmpi eq, %24, %1505 : vector<8x128xi32>
    %1507 = arith.andi %1504, %1506 : vector<8x128xi1>
    %cst_573 = arith.constant 1.000000e+00 : f32
    %1508 = vector.broadcast %cst_573 : f32 to vector<8x128xf32>
    %1509 = arith.select %1507, %1508, %1449 : vector<8x128xi1>, vector<8x128xf32>
    %1510 = vector.broadcast %1465 : i32 to vector<8x128xi32>
    %1511 = arith.cmpi eq, %27, %1510 : vector<8x128xi32>
    %cst_574 = arith.constant 0xFF800000 : f32
    %1512 = vector.broadcast %cst_574 : f32 to vector<8x128xf32>
    %1513 = arith.select %1511, %1512, %1453 : vector<8x128xi1>, vector<8x128xf32>
    %1514 = vector.shape_cast %1513 : vector<8x128xf32> to vector<1x8x128xf32>
    %cst_575 = arith.constant dense<0xFF800000> : vector<1xf32>
    %1515 = vector.multi_reduction <maximumf>, %1514, %cst_575 [1, 2] : vector<1x8x128xf32> to vector<1xf32>
    %1516 = vector.shape_cast %1515 : vector<1xf32> to vector<1x1x1xf32>
    %1517 = vector.extract %1516[0, 0, 0] : f32 from vector<1x1x1xf32>
    %1518 = vector.broadcast %1517 : f32 to vector<8x128xf32>
    %1519 = arith.cmpf oeq, %1513, %1518 : vector<8x128xf32>
    %1520 = vector.broadcast %c1024_i32 : i32 to vector<8x128xi32>
    %1521 = arith.select %1519, %27, %1520 : vector<8x128xi1>, vector<8x128xi32>
    %1522 = vector.shape_cast %1521 : vector<8x128xi32> to vector<1x8x128xi32>
    %cst_576 = arith.constant dense<2147483647> : vector<1xi32>
    %1523 = vector.multi_reduction <minsi>, %1522, %cst_576 [1, 2] : vector<1x8x128xi32> to vector<1xi32>
    %1524 = vector.shape_cast %1523 : vector<1xi32> to vector<1x1x1xi32>
    %1525 = vector.extract %1524[0, 0, 0] : i32 from vector<1x1x1xi32>
    %cst_577 = arith.constant 0xFF800000 : f32
    %1526 = arith.cmpf ogt, %1517, %cst_577 : f32
    %c127_i32_578 = arith.constant 127 : i32
    %1527 = arith.andi %1525, %c127_i32_578 : i32
    %c0_i32_579 = arith.constant 0 : i32
    %1528 = arith.select %1526, %1527, %c0_i32_579 : i32
    %c7_i32_580 = arith.constant 7 : i32
    %1529 = arith.shrsi %1525, %c7_i32_580 : i32
    %c0_i32_581 = arith.constant 0 : i32
    %1530 = arith.select %1526, %1529, %c0_i32_581 : i32
    %cst_582 = arith.constant 0xFF800000 : f32
    %1531 = arith.select %1526, %1517, %cst_582 : f32
    %c2_i32_583 = arith.constant 2 : i32
    %1532 = arith.cmpi eq, %1530, %c2_i32_583 : i32
    %1533 = arith.select %1532, %1296, %1356 : f32
    %c1_i32_584 = arith.constant 1 : i32
    %1534 = arith.cmpi eq, %1530, %c1_i32_584 : i32
    %1535 = arith.select %1534, %1236, %1533 : f32
    %c0_i32_585 = arith.constant 0 : i32
    %1536 = arith.cmpi eq, %1530, %c0_i32_585 : i32
    %1537 = arith.select %1536, %1176, %1535 : f32
    %1538 = arith.subf %1517, %1537 : f32
    %cst_586 = arith.constant 1.000000e+00 : f32
    %1539 = arith.mulf %1538, %cst_586 : f32
    %cst_587 = arith.constant 0.000000e+00 : f32
    %1540 = arith.select %1526, %1539, %cst_587 : f32
    %c2_i32_588 = arith.constant 2 : i32
    %1541 = vector.broadcast %c2_i32_588 : i32 to vector<1x128xi32>
    %1542 = arith.cmpi eq, %28, %1541 : vector<1x128xi32>
    %1543 = vector.broadcast %1531 : f32 to vector<1x128xf32>
    %1544 = arith.select %1542, %1543, %1498 : vector<1x128xi1>, vector<1x128xf32>
    %c6_i32_589 = arith.constant 6 : i32
    %1545 = vector.broadcast %c6_i32_589 : i32 to vector<1x128xi32>
    %1546 = arith.cmpi eq, %28, %1545 : vector<1x128xi32>
    %1547 = arith.sitofp %1528 : i32 to f32
    %1548 = vector.broadcast %1547 : f32 to vector<1x128xf32>
    %1549 = arith.select %1546, %1548, %1544 : vector<1x128xi1>, vector<1x128xf32>
    %c10_i32_590 = arith.constant 10 : i32
    %1550 = vector.broadcast %c10_i32_590 : i32 to vector<1x128xi32>
    %1551 = arith.cmpi eq, %28, %1550 : vector<1x128xi32>
    %1552 = arith.sitofp %1530 : i32 to f32
    %1553 = vector.broadcast %1552 : f32 to vector<1x128xf32>
    %1554 = arith.select %1551, %1553, %1549 : vector<1x128xi1>, vector<1x128xf32>
    %c14_i32_591 = arith.constant 14 : i32
    %1555 = vector.broadcast %c14_i32_591 : i32 to vector<1x128xi32>
    %1556 = arith.cmpi eq, %28, %1555 : vector<1x128xi32>
    %1557 = vector.broadcast %1540 : f32 to vector<1x128xf32>
    %1558 = arith.select %1556, %1557, %1554 : vector<1x128xi1>, vector<1x128xf32>
    %c127_i32_592 = arith.constant 127 : i32
    %1559 = arith.cmpi eq, %1528, %c127_i32_592 : i32
    %true_593 = arith.constant true
    %1560 = arith.xori %1526, %true_593 : i1
    %1561 = arith.ori %1559, %1560 : i1
    %cst_594 = arith.constant 0xFF800000 : f32
    %1562 = arith.select %1561, %cst_594, %1531 : f32
    %c2_i32_595 = arith.constant 2 : i32
    %1563 = vector.broadcast %c2_i32_595 : i32 to vector<8x128xi32>
    %1564 = arith.cmpi eq, %23, %1563 : vector<8x128xi32>
    %1565 = vector.broadcast %1528 : i32 to vector<8x128xi32>
    %1566 = arith.cmpi eq, %24, %1565 : vector<8x128xi32>
    %1567 = arith.andi %1564, %1566 : vector<8x128xi1>
    %cst_596 = arith.constant 1.000000e+00 : f32
    %1568 = vector.broadcast %cst_596 : f32 to vector<8x128xf32>
    %1569 = arith.select %1567, %1568, %1509 : vector<8x128xi1>, vector<8x128xf32>
    %1570 = vector.broadcast %1525 : i32 to vector<8x128xi32>
    %1571 = arith.cmpi eq, %27, %1570 : vector<8x128xi32>
    %cst_597 = arith.constant 0xFF800000 : f32
    %1572 = vector.broadcast %cst_597 : f32 to vector<8x128xf32>
    %1573 = arith.select %1571, %1572, %1513 : vector<8x128xi1>, vector<8x128xf32>
    %1574 = vector.shape_cast %1573 : vector<8x128xf32> to vector<1x8x128xf32>
    %cst_598 = arith.constant dense<0xFF800000> : vector<1xf32>
    %1575 = vector.multi_reduction <maximumf>, %1574, %cst_598 [1, 2] : vector<1x8x128xf32> to vector<1xf32>
    %1576 = vector.shape_cast %1575 : vector<1xf32> to vector<1x1x1xf32>
    %1577 = vector.extract %1576[0, 0, 0] : f32 from vector<1x1x1xf32>
    %1578 = vector.broadcast %1577 : f32 to vector<8x128xf32>
    %1579 = arith.cmpf oeq, %1573, %1578 : vector<8x128xf32>
    %1580 = vector.broadcast %c1024_i32 : i32 to vector<8x128xi32>
    %1581 = arith.select %1579, %27, %1580 : vector<8x128xi1>, vector<8x128xi32>
    %1582 = vector.shape_cast %1581 : vector<8x128xi32> to vector<1x8x128xi32>
    %cst_599 = arith.constant dense<2147483647> : vector<1xi32>
    %1583 = vector.multi_reduction <minsi>, %1582, %cst_599 [1, 2] : vector<1x8x128xi32> to vector<1xi32>
    %1584 = vector.shape_cast %1583 : vector<1xi32> to vector<1x1x1xi32>
    %1585 = vector.extract %1584[0, 0, 0] : i32 from vector<1x1x1xi32>
    %cst_600 = arith.constant 0xFF800000 : f32
    %1586 = arith.cmpf ogt, %1577, %cst_600 : f32
    %c127_i32_601 = arith.constant 127 : i32
    %1587 = arith.andi %1585, %c127_i32_601 : i32
    %c0_i32_602 = arith.constant 0 : i32
    %1588 = arith.select %1586, %1587, %c0_i32_602 : i32
    %c7_i32_603 = arith.constant 7 : i32
    %1589 = arith.shrsi %1585, %c7_i32_603 : i32
    %c0_i32_604 = arith.constant 0 : i32
    %1590 = arith.select %1586, %1589, %c0_i32_604 : i32
    %cst_605 = arith.constant 0xFF800000 : f32
    %1591 = arith.select %1586, %1577, %cst_605 : f32
    %c2_i32_606 = arith.constant 2 : i32
    %1592 = arith.cmpi eq, %1590, %c2_i32_606 : i32
    %1593 = arith.select %1592, %1296, %1356 : f32
    %c1_i32_607 = arith.constant 1 : i32
    %1594 = arith.cmpi eq, %1590, %c1_i32_607 : i32
    %1595 = arith.select %1594, %1236, %1593 : f32
    %c0_i32_608 = arith.constant 0 : i32
    %1596 = arith.cmpi eq, %1590, %c0_i32_608 : i32
    %1597 = arith.select %1596, %1176, %1595 : f32
    %1598 = arith.subf %1577, %1597 : f32
    %cst_609 = arith.constant 1.000000e+00 : f32
    %1599 = arith.mulf %1598, %cst_609 : f32
    %cst_610 = arith.constant 0.000000e+00 : f32
    %1600 = arith.select %1586, %1599, %cst_610 : f32
    %c3_i32_611 = arith.constant 3 : i32
    %1601 = vector.broadcast %c3_i32_611 : i32 to vector<1x128xi32>
    %1602 = arith.cmpi eq, %28, %1601 : vector<1x128xi32>
    %1603 = vector.broadcast %1591 : f32 to vector<1x128xf32>
    %1604 = arith.select %1602, %1603, %1558 : vector<1x128xi1>, vector<1x128xf32>
    %c7_i32_612 = arith.constant 7 : i32
    %1605 = vector.broadcast %c7_i32_612 : i32 to vector<1x128xi32>
    %1606 = arith.cmpi eq, %28, %1605 : vector<1x128xi32>
    %1607 = arith.sitofp %1588 : i32 to f32
    %1608 = vector.broadcast %1607 : f32 to vector<1x128xf32>
    %1609 = arith.select %1606, %1608, %1604 : vector<1x128xi1>, vector<1x128xf32>
    %c11_i32_613 = arith.constant 11 : i32
    %1610 = vector.broadcast %c11_i32_613 : i32 to vector<1x128xi32>
    %1611 = arith.cmpi eq, %28, %1610 : vector<1x128xi32>
    %1612 = arith.sitofp %1590 : i32 to f32
    %1613 = vector.broadcast %1612 : f32 to vector<1x128xf32>
    %1614 = arith.select %1611, %1613, %1609 : vector<1x128xi1>, vector<1x128xf32>
    %c15_i32_614 = arith.constant 15 : i32
    %1615 = vector.broadcast %c15_i32_614 : i32 to vector<1x128xi32>
    %1616 = arith.cmpi eq, %28, %1615 : vector<1x128xi32>
    %1617 = vector.broadcast %1600 : f32 to vector<1x128xf32>
    %1618 = arith.select %1616, %1617, %1614 : vector<1x128xi1>, vector<1x128xf32>
    %c127_i32_615 = arith.constant 127 : i32
    %1619 = arith.cmpi eq, %1588, %c127_i32_615 : i32
    %true_616 = arith.constant true
    %1620 = arith.xori %1586, %true_616 : i1
    %1621 = arith.ori %1619, %1620 : i1
    %cst_617 = arith.constant 0xFF800000 : f32
    %1622 = arith.select %1621, %cst_617, %1591 : f32
    %c3_i32_618 = arith.constant 3 : i32
    %1623 = vector.broadcast %c3_i32_618 : i32 to vector<8x128xi32>
    %1624 = arith.cmpi eq, %23, %1623 : vector<8x128xi32>
    %1625 = vector.broadcast %1588 : i32 to vector<8x128xi32>
    %1626 = arith.cmpi eq, %24, %1625 : vector<8x128xi32>
    %1627 = arith.andi %1624, %1626 : vector<8x128xi1>
    %cst_619 = arith.constant 1.000000e+00 : f32
    %1628 = vector.broadcast %cst_619 : f32 to vector<8x128xf32>
    %1629 = arith.select %1627, %1628, %1569 : vector<8x128xi1>, vector<8x128xf32>
    %1630 = vector.broadcast %c5_i32_517 : i32 to vector<8x128xi32>
    %1631 = arith.cmpi eq, %29, %1630 : vector<8x128xi32>
    %1632 = vector.shape_cast %1618 : vector<1x128xf32> to vector<1x128xf32>
    %1633 = vector.broadcast %1632 : vector<1x128xf32> to vector<8x128xf32>
    %1634 = arith.select %1631, %1633, %1368 : vector<8x128xi1>, vector<8x128xf32>
    %c6_i32_620 = arith.constant 6 : i32
    %cst_621 = arith.constant 0xFF800000 : f32
    %1635 = vector.broadcast %cst_621 : f32 to vector<8x1xf32>
    %c0_i32_622 = arith.constant 0 : i32
    %1636 = vector.broadcast %c0_i32_622 : i32 to vector<8x1xi32>
    %1637 = arith.cmpi eq, %22, %1636 : vector<8x1xi32>
    %1638 = vector.broadcast %1442 : f32 to vector<8x1xf32>
    %1639 = arith.select %1637, %1638, %1635 : vector<8x1xi1>, vector<8x1xf32>
    %c1_i32_623 = arith.constant 1 : i32
    %1640 = vector.broadcast %c1_i32_623 : i32 to vector<8x1xi32>
    %1641 = arith.cmpi eq, %22, %1640 : vector<8x1xi32>
    %1642 = vector.broadcast %1502 : f32 to vector<8x1xf32>
    %1643 = arith.select %1641, %1642, %1639 : vector<8x1xi1>, vector<8x1xf32>
    %c2_i32_624 = arith.constant 2 : i32
    %1644 = vector.broadcast %c2_i32_624 : i32 to vector<8x1xi32>
    %1645 = arith.cmpi eq, %22, %1644 : vector<8x1xi32>
    %1646 = vector.broadcast %1562 : f32 to vector<8x1xf32>
    %1647 = arith.select %1645, %1646, %1643 : vector<8x1xi1>, vector<8x1xf32>
    %c3_i32_625 = arith.constant 3 : i32
    %1648 = vector.broadcast %c3_i32_625 : i32 to vector<8x1xi32>
    %1649 = arith.cmpi eq, %22, %1648 : vector<8x1xi32>
    %1650 = vector.broadcast %1622 : f32 to vector<8x1xf32>
    %1651 = arith.select %1649, %1650, %1647 : vector<8x1xi1>, vector<8x1xf32>
    %c0_626 = arith.constant 0 : index
    %c0_627 = arith.constant 0 : index
    %1652 = vector.load %arg6[%c0_626, %c0_627] : memref<128x128xf32, #tpu.memory_space<vmem>>, vector<128x128xf32>
    %cst_628 = arith.constant dense<0.000000e+00> : vector<8x128xf32>
    %1653 = tpu.matmul %1629, %1652, %cst_628 {dimension_numbers = #tpu.dot_dimension_numbers<[1], [0], [0], [1], [0, 0, 1, 1], [], []>} : vector<8x128xf32>, vector<128x128xf32>, vector<8x128xf32> -> vector<8x128xf32>
    %cst_629 = arith.constant 1.000000e+00 : f32
    %1654 = vector.broadcast %cst_629 : f32 to vector<8x128xf32>
    %1655 = arith.mulf %1654, %1653 : vector<8x128xf32>
    %1656 = vector.broadcast %1651 : vector<8x1xf32> to vector<8x128xf32>
    %1657 = arith.addf %1655, %1656 : vector<8x128xf32>
    %cst_630 = arith.constant 0.000000e+00 : f32
    %1658 = vector.broadcast %cst_630 : f32 to vector<1x128xf32>
    %cst_631 = arith.constant 0.000000e+00 : f32
    %1659 = vector.broadcast %cst_631 : f32 to vector<8x128xf32>
    %1660 = vector.shape_cast %1657 : vector<8x128xf32> to vector<1x8x128xf32>
    %cst_632 = arith.constant dense<0xFF800000> : vector<1xf32>
    %1661 = vector.multi_reduction <maximumf>, %1660, %cst_632 [1, 2] : vector<1x8x128xf32> to vector<1xf32>
    %1662 = vector.shape_cast %1661 : vector<1xf32> to vector<1x1x1xf32>
    %1663 = vector.extract %1662[0, 0, 0] : f32 from vector<1x1x1xf32>
    %1664 = vector.broadcast %1663 : f32 to vector<8x128xf32>
    %1665 = arith.cmpf oeq, %1657, %1664 : vector<8x128xf32>
    %1666 = vector.broadcast %c1024_i32 : i32 to vector<8x128xi32>
    %1667 = arith.select %1665, %27, %1666 : vector<8x128xi1>, vector<8x128xi32>
    %1668 = vector.shape_cast %1667 : vector<8x128xi32> to vector<1x8x128xi32>
    %cst_633 = arith.constant dense<2147483647> : vector<1xi32>
    %1669 = vector.multi_reduction <minsi>, %1668, %cst_633 [1, 2] : vector<1x8x128xi32> to vector<1xi32>
    %1670 = vector.shape_cast %1669 : vector<1xi32> to vector<1x1x1xi32>
    %1671 = vector.extract %1670[0, 0, 0] : i32 from vector<1x1x1xi32>
    %cst_634 = arith.constant 0xFF800000 : f32
    %1672 = arith.cmpf ogt, %1663, %cst_634 : f32
    %c127_i32_635 = arith.constant 127 : i32
    %1673 = arith.andi %1671, %c127_i32_635 : i32
    %c0_i32_636 = arith.constant 0 : i32
    %1674 = arith.select %1672, %1673, %c0_i32_636 : i32
    %c7_i32_637 = arith.constant 7 : i32
    %1675 = arith.shrsi %1671, %c7_i32_637 : i32
    %c0_i32_638 = arith.constant 0 : i32
    %1676 = arith.select %1672, %1675, %c0_i32_638 : i32
    %cst_639 = arith.constant 0xFF800000 : f32
    %1677 = arith.select %1672, %1663, %cst_639 : f32
    %c2_i32_640 = arith.constant 2 : i32
    %1678 = arith.cmpi eq, %1676, %c2_i32_640 : i32
    %1679 = arith.select %1678, %1562, %1622 : f32
    %c1_i32_641 = arith.constant 1 : i32
    %1680 = arith.cmpi eq, %1676, %c1_i32_641 : i32
    %1681 = arith.select %1680, %1502, %1679 : f32
    %c0_i32_642 = arith.constant 0 : i32
    %1682 = arith.cmpi eq, %1676, %c0_i32_642 : i32
    %1683 = arith.select %1682, %1442, %1681 : f32
    %1684 = arith.subf %1663, %1683 : f32
    %cst_643 = arith.constant 1.000000e+00 : f32
    %1685 = arith.mulf %1684, %cst_643 : f32
    %cst_644 = arith.constant 0.000000e+00 : f32
    %1686 = arith.select %1672, %1685, %cst_644 : f32
    %c0_i32_645 = arith.constant 0 : i32
    %1687 = vector.broadcast %c0_i32_645 : i32 to vector<1x128xi32>
    %1688 = arith.cmpi eq, %28, %1687 : vector<1x128xi32>
    %1689 = vector.broadcast %1677 : f32 to vector<1x128xf32>
    %1690 = arith.select %1688, %1689, %1658 : vector<1x128xi1>, vector<1x128xf32>
    %c4_i32_646 = arith.constant 4 : i32
    %1691 = vector.broadcast %c4_i32_646 : i32 to vector<1x128xi32>
    %1692 = arith.cmpi eq, %28, %1691 : vector<1x128xi32>
    %1693 = arith.sitofp %1674 : i32 to f32
    %1694 = vector.broadcast %1693 : f32 to vector<1x128xf32>
    %1695 = arith.select %1692, %1694, %1690 : vector<1x128xi1>, vector<1x128xf32>
    %c8_i32_647 = arith.constant 8 : i32
    %1696 = vector.broadcast %c8_i32_647 : i32 to vector<1x128xi32>
    %1697 = arith.cmpi eq, %28, %1696 : vector<1x128xi32>
    %1698 = arith.sitofp %1676 : i32 to f32
    %1699 = vector.broadcast %1698 : f32 to vector<1x128xf32>
    %1700 = arith.select %1697, %1699, %1695 : vector<1x128xi1>, vector<1x128xf32>
    %c12_i32_648 = arith.constant 12 : i32
    %1701 = vector.broadcast %c12_i32_648 : i32 to vector<1x128xi32>
    %1702 = arith.cmpi eq, %28, %1701 : vector<1x128xi32>
    %1703 = vector.broadcast %1686 : f32 to vector<1x128xf32>
    %1704 = arith.select %1702, %1703, %1700 : vector<1x128xi1>, vector<1x128xf32>
    %c127_i32_649 = arith.constant 127 : i32
    %1705 = arith.cmpi eq, %1674, %c127_i32_649 : i32
    %true_650 = arith.constant true
    %1706 = arith.xori %1672, %true_650 : i1
    %1707 = arith.ori %1705, %1706 : i1
    %cst_651 = arith.constant 0xFF800000 : f32
    %1708 = arith.select %1707, %cst_651, %1677 : f32
    %c0_i32_652 = arith.constant 0 : i32
    %1709 = vector.broadcast %c0_i32_652 : i32 to vector<8x128xi32>
    %1710 = arith.cmpi eq, %23, %1709 : vector<8x128xi32>
    %1711 = vector.broadcast %1674 : i32 to vector<8x128xi32>
    %1712 = arith.cmpi eq, %24, %1711 : vector<8x128xi32>
    %1713 = arith.andi %1710, %1712 : vector<8x128xi1>
    %cst_653 = arith.constant 1.000000e+00 : f32
    %1714 = vector.broadcast %cst_653 : f32 to vector<8x128xf32>
    %1715 = arith.select %1713, %1714, %1659 : vector<8x128xi1>, vector<8x128xf32>
    %1716 = vector.broadcast %1671 : i32 to vector<8x128xi32>
    %1717 = arith.cmpi eq, %27, %1716 : vector<8x128xi32>
    %cst_654 = arith.constant 0xFF800000 : f32
    %1718 = vector.broadcast %cst_654 : f32 to vector<8x128xf32>
    %1719 = arith.select %1717, %1718, %1657 : vector<8x128xi1>, vector<8x128xf32>
    %1720 = vector.shape_cast %1719 : vector<8x128xf32> to vector<1x8x128xf32>
    %cst_655 = arith.constant dense<0xFF800000> : vector<1xf32>
    %1721 = vector.multi_reduction <maximumf>, %1720, %cst_655 [1, 2] : vector<1x8x128xf32> to vector<1xf32>
    %1722 = vector.shape_cast %1721 : vector<1xf32> to vector<1x1x1xf32>
    %1723 = vector.extract %1722[0, 0, 0] : f32 from vector<1x1x1xf32>
    %1724 = vector.broadcast %1723 : f32 to vector<8x128xf32>
    %1725 = arith.cmpf oeq, %1719, %1724 : vector<8x128xf32>
    %1726 = vector.broadcast %c1024_i32 : i32 to vector<8x128xi32>
    %1727 = arith.select %1725, %27, %1726 : vector<8x128xi1>, vector<8x128xi32>
    %1728 = vector.shape_cast %1727 : vector<8x128xi32> to vector<1x8x128xi32>
    %cst_656 = arith.constant dense<2147483647> : vector<1xi32>
    %1729 = vector.multi_reduction <minsi>, %1728, %cst_656 [1, 2] : vector<1x8x128xi32> to vector<1xi32>
    %1730 = vector.shape_cast %1729 : vector<1xi32> to vector<1x1x1xi32>
    %1731 = vector.extract %1730[0, 0, 0] : i32 from vector<1x1x1xi32>
    %cst_657 = arith.constant 0xFF800000 : f32
    %1732 = arith.cmpf ogt, %1723, %cst_657 : f32
    %c127_i32_658 = arith.constant 127 : i32
    %1733 = arith.andi %1731, %c127_i32_658 : i32
    %c0_i32_659 = arith.constant 0 : i32
    %1734 = arith.select %1732, %1733, %c0_i32_659 : i32
    %c7_i32_660 = arith.constant 7 : i32
    %1735 = arith.shrsi %1731, %c7_i32_660 : i32
    %c0_i32_661 = arith.constant 0 : i32
    %1736 = arith.select %1732, %1735, %c0_i32_661 : i32
    %cst_662 = arith.constant 0xFF800000 : f32
    %1737 = arith.select %1732, %1723, %cst_662 : f32
    %c2_i32_663 = arith.constant 2 : i32
    %1738 = arith.cmpi eq, %1736, %c2_i32_663 : i32
    %1739 = arith.select %1738, %1562, %1622 : f32
    %c1_i32_664 = arith.constant 1 : i32
    %1740 = arith.cmpi eq, %1736, %c1_i32_664 : i32
    %1741 = arith.select %1740, %1502, %1739 : f32
    %c0_i32_665 = arith.constant 0 : i32
    %1742 = arith.cmpi eq, %1736, %c0_i32_665 : i32
    %1743 = arith.select %1742, %1442, %1741 : f32
    %1744 = arith.subf %1723, %1743 : f32
    %cst_666 = arith.constant 1.000000e+00 : f32
    %1745 = arith.mulf %1744, %cst_666 : f32
    %cst_667 = arith.constant 0.000000e+00 : f32
    %1746 = arith.select %1732, %1745, %cst_667 : f32
    %c1_i32_668 = arith.constant 1 : i32
    %1747 = vector.broadcast %c1_i32_668 : i32 to vector<1x128xi32>
    %1748 = arith.cmpi eq, %28, %1747 : vector<1x128xi32>
    %1749 = vector.broadcast %1737 : f32 to vector<1x128xf32>
    %1750 = arith.select %1748, %1749, %1704 : vector<1x128xi1>, vector<1x128xf32>
    %c5_i32_669 = arith.constant 5 : i32
    %1751 = vector.broadcast %c5_i32_669 : i32 to vector<1x128xi32>
    %1752 = arith.cmpi eq, %28, %1751 : vector<1x128xi32>
    %1753 = arith.sitofp %1734 : i32 to f32
    %1754 = vector.broadcast %1753 : f32 to vector<1x128xf32>
    %1755 = arith.select %1752, %1754, %1750 : vector<1x128xi1>, vector<1x128xf32>
    %c9_i32_670 = arith.constant 9 : i32
    %1756 = vector.broadcast %c9_i32_670 : i32 to vector<1x128xi32>
    %1757 = arith.cmpi eq, %28, %1756 : vector<1x128xi32>
    %1758 = arith.sitofp %1736 : i32 to f32
    %1759 = vector.broadcast %1758 : f32 to vector<1x128xf32>
    %1760 = arith.select %1757, %1759, %1755 : vector<1x128xi1>, vector<1x128xf32>
    %c13_i32_671 = arith.constant 13 : i32
    %1761 = vector.broadcast %c13_i32_671 : i32 to vector<1x128xi32>
    %1762 = arith.cmpi eq, %28, %1761 : vector<1x128xi32>
    %1763 = vector.broadcast %1746 : f32 to vector<1x128xf32>
    %1764 = arith.select %1762, %1763, %1760 : vector<1x128xi1>, vector<1x128xf32>
    %c127_i32_672 = arith.constant 127 : i32
    %1765 = arith.cmpi eq, %1734, %c127_i32_672 : i32
    %true_673 = arith.constant true
    %1766 = arith.xori %1732, %true_673 : i1
    %1767 = arith.ori %1765, %1766 : i1
    %cst_674 = arith.constant 0xFF800000 : f32
    %1768 = arith.select %1767, %cst_674, %1737 : f32
    %c1_i32_675 = arith.constant 1 : i32
    %1769 = vector.broadcast %c1_i32_675 : i32 to vector<8x128xi32>
    %1770 = arith.cmpi eq, %23, %1769 : vector<8x128xi32>
    %1771 = vector.broadcast %1734 : i32 to vector<8x128xi32>
    %1772 = arith.cmpi eq, %24, %1771 : vector<8x128xi32>
    %1773 = arith.andi %1770, %1772 : vector<8x128xi1>
    %cst_676 = arith.constant 1.000000e+00 : f32
    %1774 = vector.broadcast %cst_676 : f32 to vector<8x128xf32>
    %1775 = arith.select %1773, %1774, %1715 : vector<8x128xi1>, vector<8x128xf32>
    %1776 = vector.broadcast %1731 : i32 to vector<8x128xi32>
    %1777 = arith.cmpi eq, %27, %1776 : vector<8x128xi32>
    %cst_677 = arith.constant 0xFF800000 : f32
    %1778 = vector.broadcast %cst_677 : f32 to vector<8x128xf32>
    %1779 = arith.select %1777, %1778, %1719 : vector<8x128xi1>, vector<8x128xf32>
    %1780 = vector.shape_cast %1779 : vector<8x128xf32> to vector<1x8x128xf32>
    %cst_678 = arith.constant dense<0xFF800000> : vector<1xf32>
    %1781 = vector.multi_reduction <maximumf>, %1780, %cst_678 [1, 2] : vector<1x8x128xf32> to vector<1xf32>
    %1782 = vector.shape_cast %1781 : vector<1xf32> to vector<1x1x1xf32>
    %1783 = vector.extract %1782[0, 0, 0] : f32 from vector<1x1x1xf32>
    %1784 = vector.broadcast %1783 : f32 to vector<8x128xf32>
    %1785 = arith.cmpf oeq, %1779, %1784 : vector<8x128xf32>
    %1786 = vector.broadcast %c1024_i32 : i32 to vector<8x128xi32>
    %1787 = arith.select %1785, %27, %1786 : vector<8x128xi1>, vector<8x128xi32>
    %1788 = vector.shape_cast %1787 : vector<8x128xi32> to vector<1x8x128xi32>
    %cst_679 = arith.constant dense<2147483647> : vector<1xi32>
    %1789 = vector.multi_reduction <minsi>, %1788, %cst_679 [1, 2] : vector<1x8x128xi32> to vector<1xi32>
    %1790 = vector.shape_cast %1789 : vector<1xi32> to vector<1x1x1xi32>
    %1791 = vector.extract %1790[0, 0, 0] : i32 from vector<1x1x1xi32>
    %cst_680 = arith.constant 0xFF800000 : f32
    %1792 = arith.cmpf ogt, %1783, %cst_680 : f32
    %c127_i32_681 = arith.constant 127 : i32
    %1793 = arith.andi %1791, %c127_i32_681 : i32
    %c0_i32_682 = arith.constant 0 : i32
    %1794 = arith.select %1792, %1793, %c0_i32_682 : i32
    %c7_i32_683 = arith.constant 7 : i32
    %1795 = arith.shrsi %1791, %c7_i32_683 : i32
    %c0_i32_684 = arith.constant 0 : i32
    %1796 = arith.select %1792, %1795, %c0_i32_684 : i32
    %cst_685 = arith.constant 0xFF800000 : f32
    %1797 = arith.select %1792, %1783, %cst_685 : f32
    %c2_i32_686 = arith.constant 2 : i32
    %1798 = arith.cmpi eq, %1796, %c2_i32_686 : i32
    %1799 = arith.select %1798, %1562, %1622 : f32
    %c1_i32_687 = arith.constant 1 : i32
    %1800 = arith.cmpi eq, %1796, %c1_i32_687 : i32
    %1801 = arith.select %1800, %1502, %1799 : f32
    %c0_i32_688 = arith.constant 0 : i32
    %1802 = arith.cmpi eq, %1796, %c0_i32_688 : i32
    %1803 = arith.select %1802, %1442, %1801 : f32
    %1804 = arith.subf %1783, %1803 : f32
    %cst_689 = arith.constant 1.000000e+00 : f32
    %1805 = arith.mulf %1804, %cst_689 : f32
    %cst_690 = arith.constant 0.000000e+00 : f32
    %1806 = arith.select %1792, %1805, %cst_690 : f32
    %c2_i32_691 = arith.constant 2 : i32
    %1807 = vector.broadcast %c2_i32_691 : i32 to vector<1x128xi32>
    %1808 = arith.cmpi eq, %28, %1807 : vector<1x128xi32>
    %1809 = vector.broadcast %1797 : f32 to vector<1x128xf32>
    %1810 = arith.select %1808, %1809, %1764 : vector<1x128xi1>, vector<1x128xf32>
    %c6_i32_692 = arith.constant 6 : i32
    %1811 = vector.broadcast %c6_i32_692 : i32 to vector<1x128xi32>
    %1812 = arith.cmpi eq, %28, %1811 : vector<1x128xi32>
    %1813 = arith.sitofp %1794 : i32 to f32
    %1814 = vector.broadcast %1813 : f32 to vector<1x128xf32>
    %1815 = arith.select %1812, %1814, %1810 : vector<1x128xi1>, vector<1x128xf32>
    %c10_i32_693 = arith.constant 10 : i32
    %1816 = vector.broadcast %c10_i32_693 : i32 to vector<1x128xi32>
    %1817 = arith.cmpi eq, %28, %1816 : vector<1x128xi32>
    %1818 = arith.sitofp %1796 : i32 to f32
    %1819 = vector.broadcast %1818 : f32 to vector<1x128xf32>
    %1820 = arith.select %1817, %1819, %1815 : vector<1x128xi1>, vector<1x128xf32>
    %c14_i32_694 = arith.constant 14 : i32
    %1821 = vector.broadcast %c14_i32_694 : i32 to vector<1x128xi32>
    %1822 = arith.cmpi eq, %28, %1821 : vector<1x128xi32>
    %1823 = vector.broadcast %1806 : f32 to vector<1x128xf32>
    %1824 = arith.select %1822, %1823, %1820 : vector<1x128xi1>, vector<1x128xf32>
    %c127_i32_695 = arith.constant 127 : i32
    %1825 = arith.cmpi eq, %1794, %c127_i32_695 : i32
    %true_696 = arith.constant true
    %1826 = arith.xori %1792, %true_696 : i1
    %1827 = arith.ori %1825, %1826 : i1
    %cst_697 = arith.constant 0xFF800000 : f32
    %1828 = arith.select %1827, %cst_697, %1797 : f32
    %c2_i32_698 = arith.constant 2 : i32
    %1829 = vector.broadcast %c2_i32_698 : i32 to vector<8x128xi32>
    %1830 = arith.cmpi eq, %23, %1829 : vector<8x128xi32>
    %1831 = vector.broadcast %1794 : i32 to vector<8x128xi32>
    %1832 = arith.cmpi eq, %24, %1831 : vector<8x128xi32>
    %1833 = arith.andi %1830, %1832 : vector<8x128xi1>
    %cst_699 = arith.constant 1.000000e+00 : f32
    %1834 = vector.broadcast %cst_699 : f32 to vector<8x128xf32>
    %1835 = arith.select %1833, %1834, %1775 : vector<8x128xi1>, vector<8x128xf32>
    %1836 = vector.broadcast %1791 : i32 to vector<8x128xi32>
    %1837 = arith.cmpi eq, %27, %1836 : vector<8x128xi32>
    %cst_700 = arith.constant 0xFF800000 : f32
    %1838 = vector.broadcast %cst_700 : f32 to vector<8x128xf32>
    %1839 = arith.select %1837, %1838, %1779 : vector<8x128xi1>, vector<8x128xf32>
    %1840 = vector.shape_cast %1839 : vector<8x128xf32> to vector<1x8x128xf32>
    %cst_701 = arith.constant dense<0xFF800000> : vector<1xf32>
    %1841 = vector.multi_reduction <maximumf>, %1840, %cst_701 [1, 2] : vector<1x8x128xf32> to vector<1xf32>
    %1842 = vector.shape_cast %1841 : vector<1xf32> to vector<1x1x1xf32>
    %1843 = vector.extract %1842[0, 0, 0] : f32 from vector<1x1x1xf32>
    %1844 = vector.broadcast %1843 : f32 to vector<8x128xf32>
    %1845 = arith.cmpf oeq, %1839, %1844 : vector<8x128xf32>
    %1846 = vector.broadcast %c1024_i32 : i32 to vector<8x128xi32>
    %1847 = arith.select %1845, %27, %1846 : vector<8x128xi1>, vector<8x128xi32>
    %1848 = vector.shape_cast %1847 : vector<8x128xi32> to vector<1x8x128xi32>
    %cst_702 = arith.constant dense<2147483647> : vector<1xi32>
    %1849 = vector.multi_reduction <minsi>, %1848, %cst_702 [1, 2] : vector<1x8x128xi32> to vector<1xi32>
    %1850 = vector.shape_cast %1849 : vector<1xi32> to vector<1x1x1xi32>
    %1851 = vector.extract %1850[0, 0, 0] : i32 from vector<1x1x1xi32>
    %cst_703 = arith.constant 0xFF800000 : f32
    %1852 = arith.cmpf ogt, %1843, %cst_703 : f32
    %c127_i32_704 = arith.constant 127 : i32
    %1853 = arith.andi %1851, %c127_i32_704 : i32
    %c0_i32_705 = arith.constant 0 : i32
    %1854 = arith.select %1852, %1853, %c0_i32_705 : i32
    %c7_i32_706 = arith.constant 7 : i32
    %1855 = arith.shrsi %1851, %c7_i32_706 : i32
    %c0_i32_707 = arith.constant 0 : i32
    %1856 = arith.select %1852, %1855, %c0_i32_707 : i32
    %cst_708 = arith.constant 0xFF800000 : f32
    %1857 = arith.select %1852, %1843, %cst_708 : f32
    %c2_i32_709 = arith.constant 2 : i32
    %1858 = arith.cmpi eq, %1856, %c2_i32_709 : i32
    %1859 = arith.select %1858, %1562, %1622 : f32
    %c1_i32_710 = arith.constant 1 : i32
    %1860 = arith.cmpi eq, %1856, %c1_i32_710 : i32
    %1861 = arith.select %1860, %1502, %1859 : f32
    %c0_i32_711 = arith.constant 0 : i32
    %1862 = arith.cmpi eq, %1856, %c0_i32_711 : i32
    %1863 = arith.select %1862, %1442, %1861 : f32
    %1864 = arith.subf %1843, %1863 : f32
    %cst_712 = arith.constant 1.000000e+00 : f32
    %1865 = arith.mulf %1864, %cst_712 : f32
    %cst_713 = arith.constant 0.000000e+00 : f32
    %1866 = arith.select %1852, %1865, %cst_713 : f32
    %c3_i32_714 = arith.constant 3 : i32
    %1867 = vector.broadcast %c3_i32_714 : i32 to vector<1x128xi32>
    %1868 = arith.cmpi eq, %28, %1867 : vector<1x128xi32>
    %1869 = vector.broadcast %1857 : f32 to vector<1x128xf32>
    %1870 = arith.select %1868, %1869, %1824 : vector<1x128xi1>, vector<1x128xf32>
    %c7_i32_715 = arith.constant 7 : i32
    %1871 = vector.broadcast %c7_i32_715 : i32 to vector<1x128xi32>
    %1872 = arith.cmpi eq, %28, %1871 : vector<1x128xi32>
    %1873 = arith.sitofp %1854 : i32 to f32
    %1874 = vector.broadcast %1873 : f32 to vector<1x128xf32>
    %1875 = arith.select %1872, %1874, %1870 : vector<1x128xi1>, vector<1x128xf32>
    %c11_i32_716 = arith.constant 11 : i32
    %1876 = vector.broadcast %c11_i32_716 : i32 to vector<1x128xi32>
    %1877 = arith.cmpi eq, %28, %1876 : vector<1x128xi32>
    %1878 = arith.sitofp %1856 : i32 to f32
    %1879 = vector.broadcast %1878 : f32 to vector<1x128xf32>
    %1880 = arith.select %1877, %1879, %1875 : vector<1x128xi1>, vector<1x128xf32>
    %c15_i32_717 = arith.constant 15 : i32
    %1881 = vector.broadcast %c15_i32_717 : i32 to vector<1x128xi32>
    %1882 = arith.cmpi eq, %28, %1881 : vector<1x128xi32>
    %1883 = vector.broadcast %1866 : f32 to vector<1x128xf32>
    %1884 = arith.select %1882, %1883, %1880 : vector<1x128xi1>, vector<1x128xf32>
    %c127_i32_718 = arith.constant 127 : i32
    %1885 = arith.cmpi eq, %1854, %c127_i32_718 : i32
    %true_719 = arith.constant true
    %1886 = arith.xori %1852, %true_719 : i1
    %1887 = arith.ori %1885, %1886 : i1
    %cst_720 = arith.constant 0xFF800000 : f32
    %1888 = arith.select %1887, %cst_720, %1857 : f32
    %c3_i32_721 = arith.constant 3 : i32
    %1889 = vector.broadcast %c3_i32_721 : i32 to vector<8x128xi32>
    %1890 = arith.cmpi eq, %23, %1889 : vector<8x128xi32>
    %1891 = vector.broadcast %1854 : i32 to vector<8x128xi32>
    %1892 = arith.cmpi eq, %24, %1891 : vector<8x128xi32>
    %1893 = arith.andi %1890, %1892 : vector<8x128xi1>
    %cst_722 = arith.constant 1.000000e+00 : f32
    %1894 = vector.broadcast %cst_722 : f32 to vector<8x128xf32>
    %1895 = arith.select %1893, %1894, %1835 : vector<8x128xi1>, vector<8x128xf32>
    %1896 = vector.broadcast %c6_i32_620 : i32 to vector<8x128xi32>
    %1897 = arith.cmpi eq, %29, %1896 : vector<8x128xi32>
    %1898 = vector.shape_cast %1884 : vector<1x128xf32> to vector<1x128xf32>
    %1899 = vector.broadcast %1898 : vector<1x128xf32> to vector<8x128xf32>
    %1900 = arith.select %1897, %1899, %1634 : vector<8x128xi1>, vector<8x128xf32>
    %c7_i32_723 = arith.constant 7 : i32
    %cst_724 = arith.constant 0xFF800000 : f32
    %1901 = vector.broadcast %cst_724 : f32 to vector<8x1xf32>
    %c0_i32_725 = arith.constant 0 : i32
    %1902 = vector.broadcast %c0_i32_725 : i32 to vector<8x1xi32>
    %1903 = arith.cmpi eq, %22, %1902 : vector<8x1xi32>
    %1904 = vector.broadcast %1708 : f32 to vector<8x1xf32>
    %1905 = arith.select %1903, %1904, %1901 : vector<8x1xi1>, vector<8x1xf32>
    %c1_i32_726 = arith.constant 1 : i32
    %1906 = vector.broadcast %c1_i32_726 : i32 to vector<8x1xi32>
    %1907 = arith.cmpi eq, %22, %1906 : vector<8x1xi32>
    %1908 = vector.broadcast %1768 : f32 to vector<8x1xf32>
    %1909 = arith.select %1907, %1908, %1905 : vector<8x1xi1>, vector<8x1xf32>
    %c2_i32_727 = arith.constant 2 : i32
    %1910 = vector.broadcast %c2_i32_727 : i32 to vector<8x1xi32>
    %1911 = arith.cmpi eq, %22, %1910 : vector<8x1xi32>
    %1912 = vector.broadcast %1828 : f32 to vector<8x1xf32>
    %1913 = arith.select %1911, %1912, %1909 : vector<8x1xi1>, vector<8x1xf32>
    %c3_i32_728 = arith.constant 3 : i32
    %1914 = vector.broadcast %c3_i32_728 : i32 to vector<8x1xi32>
    %1915 = arith.cmpi eq, %22, %1914 : vector<8x1xi32>
    %1916 = vector.broadcast %1888 : f32 to vector<8x1xf32>
    %1917 = arith.select %1915, %1916, %1913 : vector<8x1xi1>, vector<8x1xf32>
    %c0_729 = arith.constant 0 : index
    %c0_730 = arith.constant 0 : index
    %1918 = vector.load %arg6[%c0_729, %c0_730] : memref<128x128xf32, #tpu.memory_space<vmem>>, vector<128x128xf32>
    %cst_731 = arith.constant dense<0.000000e+00> : vector<8x128xf32>
    %1919 = tpu.matmul %1895, %1918, %cst_731 {dimension_numbers = #tpu.dot_dimension_numbers<[1], [0], [0], [1], [0, 0, 1, 1], [], []>} : vector<8x128xf32>, vector<128x128xf32>, vector<8x128xf32> -> vector<8x128xf32>
    %cst_732 = arith.constant 1.000000e+00 : f32
    %1920 = vector.broadcast %cst_732 : f32 to vector<8x128xf32>
    %1921 = arith.mulf %1920, %1919 : vector<8x128xf32>
    %1922 = vector.broadcast %1917 : vector<8x1xf32> to vector<8x128xf32>
    %1923 = arith.addf %1921, %1922 : vector<8x128xf32>
    %cst_733 = arith.constant 0.000000e+00 : f32
    %1924 = vector.broadcast %cst_733 : f32 to vector<1x128xf32>
    %cst_734 = arith.constant 0.000000e+00 : f32
    %1925 = vector.broadcast %cst_734 : f32 to vector<8x128xf32>
    %1926 = vector.shape_cast %1923 : vector<8x128xf32> to vector<1x8x128xf32>
    %cst_735 = arith.constant dense<0xFF800000> : vector<1xf32>
    %1927 = vector.multi_reduction <maximumf>, %1926, %cst_735 [1, 2] : vector<1x8x128xf32> to vector<1xf32>
    %1928 = vector.shape_cast %1927 : vector<1xf32> to vector<1x1x1xf32>
    %1929 = vector.extract %1928[0, 0, 0] : f32 from vector<1x1x1xf32>
    %1930 = vector.broadcast %1929 : f32 to vector<8x128xf32>
    %1931 = arith.cmpf oeq, %1923, %1930 : vector<8x128xf32>
    %1932 = vector.broadcast %c1024_i32 : i32 to vector<8x128xi32>
    %1933 = arith.select %1931, %27, %1932 : vector<8x128xi1>, vector<8x128xi32>
    %1934 = vector.shape_cast %1933 : vector<8x128xi32> to vector<1x8x128xi32>
    %cst_736 = arith.constant dense<2147483647> : vector<1xi32>
    %1935 = vector.multi_reduction <minsi>, %1934, %cst_736 [1, 2] : vector<1x8x128xi32> to vector<1xi32>
    %1936 = vector.shape_cast %1935 : vector<1xi32> to vector<1x1x1xi32>
    %1937 = vector.extract %1936[0, 0, 0] : i32 from vector<1x1x1xi32>
    %cst_737 = arith.constant 0xFF800000 : f32
    %1938 = arith.cmpf ogt, %1929, %cst_737 : f32
    %c127_i32_738 = arith.constant 127 : i32
    %1939 = arith.andi %1937, %c127_i32_738 : i32
    %c0_i32_739 = arith.constant 0 : i32
    %1940 = arith.select %1938, %1939, %c0_i32_739 : i32
    %c7_i32_740 = arith.constant 7 : i32
    %1941 = arith.shrsi %1937, %c7_i32_740 : i32
    %c0_i32_741 = arith.constant 0 : i32
    %1942 = arith.select %1938, %1941, %c0_i32_741 : i32
    %cst_742 = arith.constant 0xFF800000 : f32
    %1943 = arith.select %1938, %1929, %cst_742 : f32
    %c2_i32_743 = arith.constant 2 : i32
    %1944 = arith.cmpi eq, %1942, %c2_i32_743 : i32
    %1945 = arith.select %1944, %1828, %1888 : f32
    %c1_i32_744 = arith.constant 1 : i32
    %1946 = arith.cmpi eq, %1942, %c1_i32_744 : i32
    %1947 = arith.select %1946, %1768, %1945 : f32
    %c0_i32_745 = arith.constant 0 : i32
    %1948 = arith.cmpi eq, %1942, %c0_i32_745 : i32
    %1949 = arith.select %1948, %1708, %1947 : f32
    %1950 = arith.subf %1929, %1949 : f32
    %cst_746 = arith.constant 1.000000e+00 : f32
    %1951 = arith.mulf %1950, %cst_746 : f32
    %cst_747 = arith.constant 0.000000e+00 : f32
    %1952 = arith.select %1938, %1951, %cst_747 : f32
    %c0_i32_748 = arith.constant 0 : i32
    %1953 = vector.broadcast %c0_i32_748 : i32 to vector<1x128xi32>
    %1954 = arith.cmpi eq, %28, %1953 : vector<1x128xi32>
    %1955 = vector.broadcast %1943 : f32 to vector<1x128xf32>
    %1956 = arith.select %1954, %1955, %1924 : vector<1x128xi1>, vector<1x128xf32>
    %c4_i32_749 = arith.constant 4 : i32
    %1957 = vector.broadcast %c4_i32_749 : i32 to vector<1x128xi32>
    %1958 = arith.cmpi eq, %28, %1957 : vector<1x128xi32>
    %1959 = arith.sitofp %1940 : i32 to f32
    %1960 = vector.broadcast %1959 : f32 to vector<1x128xf32>
    %1961 = arith.select %1958, %1960, %1956 : vector<1x128xi1>, vector<1x128xf32>
    %c8_i32_750 = arith.constant 8 : i32
    %1962 = vector.broadcast %c8_i32_750 : i32 to vector<1x128xi32>
    %1963 = arith.cmpi eq, %28, %1962 : vector<1x128xi32>
    %1964 = arith.sitofp %1942 : i32 to f32
    %1965 = vector.broadcast %1964 : f32 to vector<1x128xf32>
    %1966 = arith.select %1963, %1965, %1961 : vector<1x128xi1>, vector<1x128xf32>
    %c12_i32_751 = arith.constant 12 : i32
    %1967 = vector.broadcast %c12_i32_751 : i32 to vector<1x128xi32>
    %1968 = arith.cmpi eq, %28, %1967 : vector<1x128xi32>
    %1969 = vector.broadcast %1952 : f32 to vector<1x128xf32>
    %1970 = arith.select %1968, %1969, %1966 : vector<1x128xi1>, vector<1x128xf32>
    %c127_i32_752 = arith.constant 127 : i32
    %1971 = arith.cmpi eq, %1940, %c127_i32_752 : i32
    %true_753 = arith.constant true
    %1972 = arith.xori %1938, %true_753 : i1
    %1973 = arith.ori %1971, %1972 : i1
    %cst_754 = arith.constant 0xFF800000 : f32
    %1974 = arith.select %1973, %cst_754, %1943 : f32
    %c0_i32_755 = arith.constant 0 : i32
    %1975 = vector.broadcast %c0_i32_755 : i32 to vector<8x128xi32>
    %1976 = arith.cmpi eq, %23, %1975 : vector<8x128xi32>
    %1977 = vector.broadcast %1940 : i32 to vector<8x128xi32>
    %1978 = arith.cmpi eq, %24, %1977 : vector<8x128xi32>
    %1979 = arith.andi %1976, %1978 : vector<8x128xi1>
    %cst_756 = arith.constant 1.000000e+00 : f32
    %1980 = vector.broadcast %cst_756 : f32 to vector<8x128xf32>
    %1981 = arith.select %1979, %1980, %1925 : vector<8x128xi1>, vector<8x128xf32>
    %1982 = vector.broadcast %1937 : i32 to vector<8x128xi32>
    %1983 = arith.cmpi eq, %27, %1982 : vector<8x128xi32>
    %cst_757 = arith.constant 0xFF800000 : f32
    %1984 = vector.broadcast %cst_757 : f32 to vector<8x128xf32>
    %1985 = arith.select %1983, %1984, %1923 : vector<8x128xi1>, vector<8x128xf32>
    %1986 = vector.shape_cast %1985 : vector<8x128xf32> to vector<1x8x128xf32>
    %cst_758 = arith.constant dense<0xFF800000> : vector<1xf32>
    %1987 = vector.multi_reduction <maximumf>, %1986, %cst_758 [1, 2] : vector<1x8x128xf32> to vector<1xf32>
    %1988 = vector.shape_cast %1987 : vector<1xf32> to vector<1x1x1xf32>
    %1989 = vector.extract %1988[0, 0, 0] : f32 from vector<1x1x1xf32>
    %1990 = vector.broadcast %1989 : f32 to vector<8x128xf32>
    %1991 = arith.cmpf oeq, %1985, %1990 : vector<8x128xf32>
    %1992 = vector.broadcast %c1024_i32 : i32 to vector<8x128xi32>
    %1993 = arith.select %1991, %27, %1992 : vector<8x128xi1>, vector<8x128xi32>
    %1994 = vector.shape_cast %1993 : vector<8x128xi32> to vector<1x8x128xi32>
    %cst_759 = arith.constant dense<2147483647> : vector<1xi32>
    %1995 = vector.multi_reduction <minsi>, %1994, %cst_759 [1, 2] : vector<1x8x128xi32> to vector<1xi32>
    %1996 = vector.shape_cast %1995 : vector<1xi32> to vector<1x1x1xi32>
    %1997 = vector.extract %1996[0, 0, 0] : i32 from vector<1x1x1xi32>
    %cst_760 = arith.constant 0xFF800000 : f32
    %1998 = arith.cmpf ogt, %1989, %cst_760 : f32
    %c127_i32_761 = arith.constant 127 : i32
    %1999 = arith.andi %1997, %c127_i32_761 : i32
    %c0_i32_762 = arith.constant 0 : i32
    %2000 = arith.select %1998, %1999, %c0_i32_762 : i32
    %c7_i32_763 = arith.constant 7 : i32
    %2001 = arith.shrsi %1997, %c7_i32_763 : i32
    %c0_i32_764 = arith.constant 0 : i32
    %2002 = arith.select %1998, %2001, %c0_i32_764 : i32
    %cst_765 = arith.constant 0xFF800000 : f32
    %2003 = arith.select %1998, %1989, %cst_765 : f32
    %c2_i32_766 = arith.constant 2 : i32
    %2004 = arith.cmpi eq, %2002, %c2_i32_766 : i32
    %2005 = arith.select %2004, %1828, %1888 : f32
    %c1_i32_767 = arith.constant 1 : i32
    %2006 = arith.cmpi eq, %2002, %c1_i32_767 : i32
    %2007 = arith.select %2006, %1768, %2005 : f32
    %c0_i32_768 = arith.constant 0 : i32
    %2008 = arith.cmpi eq, %2002, %c0_i32_768 : i32
    %2009 = arith.select %2008, %1708, %2007 : f32
    %2010 = arith.subf %1989, %2009 : f32
    %cst_769 = arith.constant 1.000000e+00 : f32
    %2011 = arith.mulf %2010, %cst_769 : f32
    %cst_770 = arith.constant 0.000000e+00 : f32
    %2012 = arith.select %1998, %2011, %cst_770 : f32
    %c1_i32_771 = arith.constant 1 : i32
    %2013 = vector.broadcast %c1_i32_771 : i32 to vector<1x128xi32>
    %2014 = arith.cmpi eq, %28, %2013 : vector<1x128xi32>
    %2015 = vector.broadcast %2003 : f32 to vector<1x128xf32>
    %2016 = arith.select %2014, %2015, %1970 : vector<1x128xi1>, vector<1x128xf32>
    %c5_i32_772 = arith.constant 5 : i32
    %2017 = vector.broadcast %c5_i32_772 : i32 to vector<1x128xi32>
    %2018 = arith.cmpi eq, %28, %2017 : vector<1x128xi32>
    %2019 = arith.sitofp %2000 : i32 to f32
    %2020 = vector.broadcast %2019 : f32 to vector<1x128xf32>
    %2021 = arith.select %2018, %2020, %2016 : vector<1x128xi1>, vector<1x128xf32>
    %c9_i32_773 = arith.constant 9 : i32
    %2022 = vector.broadcast %c9_i32_773 : i32 to vector<1x128xi32>
    %2023 = arith.cmpi eq, %28, %2022 : vector<1x128xi32>
    %2024 = arith.sitofp %2002 : i32 to f32
    %2025 = vector.broadcast %2024 : f32 to vector<1x128xf32>
    %2026 = arith.select %2023, %2025, %2021 : vector<1x128xi1>, vector<1x128xf32>
    %c13_i32_774 = arith.constant 13 : i32
    %2027 = vector.broadcast %c13_i32_774 : i32 to vector<1x128xi32>
    %2028 = arith.cmpi eq, %28, %2027 : vector<1x128xi32>
    %2029 = vector.broadcast %2012 : f32 to vector<1x128xf32>
    %2030 = arith.select %2028, %2029, %2026 : vector<1x128xi1>, vector<1x128xf32>
    %c127_i32_775 = arith.constant 127 : i32
    %2031 = arith.cmpi eq, %2000, %c127_i32_775 : i32
    %true_776 = arith.constant true
    %2032 = arith.xori %1998, %true_776 : i1
    %2033 = arith.ori %2031, %2032 : i1
    %cst_777 = arith.constant 0xFF800000 : f32
    %2034 = arith.select %2033, %cst_777, %2003 : f32
    %c1_i32_778 = arith.constant 1 : i32
    %2035 = vector.broadcast %c1_i32_778 : i32 to vector<8x128xi32>
    %2036 = arith.cmpi eq, %23, %2035 : vector<8x128xi32>
    %2037 = vector.broadcast %2000 : i32 to vector<8x128xi32>
    %2038 = arith.cmpi eq, %24, %2037 : vector<8x128xi32>
    %2039 = arith.andi %2036, %2038 : vector<8x128xi1>
    %cst_779 = arith.constant 1.000000e+00 : f32
    %2040 = vector.broadcast %cst_779 : f32 to vector<8x128xf32>
    %2041 = arith.select %2039, %2040, %1981 : vector<8x128xi1>, vector<8x128xf32>
    %2042 = vector.broadcast %1997 : i32 to vector<8x128xi32>
    %2043 = arith.cmpi eq, %27, %2042 : vector<8x128xi32>
    %cst_780 = arith.constant 0xFF800000 : f32
    %2044 = vector.broadcast %cst_780 : f32 to vector<8x128xf32>
    %2045 = arith.select %2043, %2044, %1985 : vector<8x128xi1>, vector<8x128xf32>
    %2046 = vector.shape_cast %2045 : vector<8x128xf32> to vector<1x8x128xf32>
    %cst_781 = arith.constant dense<0xFF800000> : vector<1xf32>
    %2047 = vector.multi_reduction <maximumf>, %2046, %cst_781 [1, 2] : vector<1x8x128xf32> to vector<1xf32>
    %2048 = vector.shape_cast %2047 : vector<1xf32> to vector<1x1x1xf32>
    %2049 = vector.extract %2048[0, 0, 0] : f32 from vector<1x1x1xf32>
    %2050 = vector.broadcast %2049 : f32 to vector<8x128xf32>
    %2051 = arith.cmpf oeq, %2045, %2050 : vector<8x128xf32>
    %2052 = vector.broadcast %c1024_i32 : i32 to vector<8x128xi32>
    %2053 = arith.select %2051, %27, %2052 : vector<8x128xi1>, vector<8x128xi32>
    %2054 = vector.shape_cast %2053 : vector<8x128xi32> to vector<1x8x128xi32>
    %cst_782 = arith.constant dense<2147483647> : vector<1xi32>
    %2055 = vector.multi_reduction <minsi>, %2054, %cst_782 [1, 2] : vector<1x8x128xi32> to vector<1xi32>
    %2056 = vector.shape_cast %2055 : vector<1xi32> to vector<1x1x1xi32>
    %2057 = vector.extract %2056[0, 0, 0] : i32 from vector<1x1x1xi32>
    %cst_783 = arith.constant 0xFF800000 : f32
    %2058 = arith.cmpf ogt, %2049, %cst_783 : f32
    %c127_i32_784 = arith.constant 127 : i32
    %2059 = arith.andi %2057, %c127_i32_784 : i32
    %c0_i32_785 = arith.constant 0 : i32
    %2060 = arith.select %2058, %2059, %c0_i32_785 : i32
    %c7_i32_786 = arith.constant 7 : i32
    %2061 = arith.shrsi %2057, %c7_i32_786 : i32
    %c0_i32_787 = arith.constant 0 : i32
    %2062 = arith.select %2058, %2061, %c0_i32_787 : i32
    %cst_788 = arith.constant 0xFF800000 : f32
    %2063 = arith.select %2058, %2049, %cst_788 : f32
    %c2_i32_789 = arith.constant 2 : i32
    %2064 = arith.cmpi eq, %2062, %c2_i32_789 : i32
    %2065 = arith.select %2064, %1828, %1888 : f32
    %c1_i32_790 = arith.constant 1 : i32
    %2066 = arith.cmpi eq, %2062, %c1_i32_790 : i32
    %2067 = arith.select %2066, %1768, %2065 : f32
    %c0_i32_791 = arith.constant 0 : i32
    %2068 = arith.cmpi eq, %2062, %c0_i32_791 : i32
    %2069 = arith.select %2068, %1708, %2067 : f32
    %2070 = arith.subf %2049, %2069 : f32
    %cst_792 = arith.constant 1.000000e+00 : f32
    %2071 = arith.mulf %2070, %cst_792 : f32
    %cst_793 = arith.constant 0.000000e+00 : f32
    %2072 = arith.select %2058, %2071, %cst_793 : f32
    %c2_i32_794 = arith.constant 2 : i32
    %2073 = vector.broadcast %c2_i32_794 : i32 to vector<1x128xi32>
    %2074 = arith.cmpi eq, %28, %2073 : vector<1x128xi32>
    %2075 = vector.broadcast %2063 : f32 to vector<1x128xf32>
    %2076 = arith.select %2074, %2075, %2030 : vector<1x128xi1>, vector<1x128xf32>
    %c6_i32_795 = arith.constant 6 : i32
    %2077 = vector.broadcast %c6_i32_795 : i32 to vector<1x128xi32>
    %2078 = arith.cmpi eq, %28, %2077 : vector<1x128xi32>
    %2079 = arith.sitofp %2060 : i32 to f32
    %2080 = vector.broadcast %2079 : f32 to vector<1x128xf32>
    %2081 = arith.select %2078, %2080, %2076 : vector<1x128xi1>, vector<1x128xf32>
    %c10_i32_796 = arith.constant 10 : i32
    %2082 = vector.broadcast %c10_i32_796 : i32 to vector<1x128xi32>
    %2083 = arith.cmpi eq, %28, %2082 : vector<1x128xi32>
    %2084 = arith.sitofp %2062 : i32 to f32
    %2085 = vector.broadcast %2084 : f32 to vector<1x128xf32>
    %2086 = arith.select %2083, %2085, %2081 : vector<1x128xi1>, vector<1x128xf32>
    %c14_i32_797 = arith.constant 14 : i32
    %2087 = vector.broadcast %c14_i32_797 : i32 to vector<1x128xi32>
    %2088 = arith.cmpi eq, %28, %2087 : vector<1x128xi32>
    %2089 = vector.broadcast %2072 : f32 to vector<1x128xf32>
    %2090 = arith.select %2088, %2089, %2086 : vector<1x128xi1>, vector<1x128xf32>
    %c127_i32_798 = arith.constant 127 : i32
    %2091 = arith.cmpi eq, %2060, %c127_i32_798 : i32
    %true_799 = arith.constant true
    %2092 = arith.xori %2058, %true_799 : i1
    %2093 = arith.ori %2091, %2092 : i1
    %cst_800 = arith.constant 0xFF800000 : f32
    %2094 = arith.select %2093, %cst_800, %2063 : f32
    %c2_i32_801 = arith.constant 2 : i32
    %2095 = vector.broadcast %c2_i32_801 : i32 to vector<8x128xi32>
    %2096 = arith.cmpi eq, %23, %2095 : vector<8x128xi32>
    %2097 = vector.broadcast %2060 : i32 to vector<8x128xi32>
    %2098 = arith.cmpi eq, %24, %2097 : vector<8x128xi32>
    %2099 = arith.andi %2096, %2098 : vector<8x128xi1>
    %cst_802 = arith.constant 1.000000e+00 : f32
    %2100 = vector.broadcast %cst_802 : f32 to vector<8x128xf32>
    %2101 = arith.select %2099, %2100, %2041 : vector<8x128xi1>, vector<8x128xf32>
    %2102 = vector.broadcast %2057 : i32 to vector<8x128xi32>
    %2103 = arith.cmpi eq, %27, %2102 : vector<8x128xi32>
    %cst_803 = arith.constant 0xFF800000 : f32
    %2104 = vector.broadcast %cst_803 : f32 to vector<8x128xf32>
    %2105 = arith.select %2103, %2104, %2045 : vector<8x128xi1>, vector<8x128xf32>
    %2106 = vector.shape_cast %2105 : vector<8x128xf32> to vector<1x8x128xf32>
    %cst_804 = arith.constant dense<0xFF800000> : vector<1xf32>
    %2107 = vector.multi_reduction <maximumf>, %2106, %cst_804 [1, 2] : vector<1x8x128xf32> to vector<1xf32>
    %2108 = vector.shape_cast %2107 : vector<1xf32> to vector<1x1x1xf32>
    %2109 = vector.extract %2108[0, 0, 0] : f32 from vector<1x1x1xf32>
    %2110 = vector.broadcast %2109 : f32 to vector<8x128xf32>
    %2111 = arith.cmpf oeq, %2105, %2110 : vector<8x128xf32>
    %2112 = vector.broadcast %c1024_i32 : i32 to vector<8x128xi32>
    %2113 = arith.select %2111, %27, %2112 : vector<8x128xi1>, vector<8x128xi32>
    %2114 = vector.shape_cast %2113 : vector<8x128xi32> to vector<1x8x128xi32>
    %cst_805 = arith.constant dense<2147483647> : vector<1xi32>
    %2115 = vector.multi_reduction <minsi>, %2114, %cst_805 [1, 2] : vector<1x8x128xi32> to vector<1xi32>
    %2116 = vector.shape_cast %2115 : vector<1xi32> to vector<1x1x1xi32>
    %2117 = vector.extract %2116[0, 0, 0] : i32 from vector<1x1x1xi32>
    %cst_806 = arith.constant 0xFF800000 : f32
    %2118 = arith.cmpf ogt, %2109, %cst_806 : f32
    %c127_i32_807 = arith.constant 127 : i32
    %2119 = arith.andi %2117, %c127_i32_807 : i32
    %c0_i32_808 = arith.constant 0 : i32
    %2120 = arith.select %2118, %2119, %c0_i32_808 : i32
    %c7_i32_809 = arith.constant 7 : i32
    %2121 = arith.shrsi %2117, %c7_i32_809 : i32
    %c0_i32_810 = arith.constant 0 : i32
    %2122 = arith.select %2118, %2121, %c0_i32_810 : i32
    %cst_811 = arith.constant 0xFF800000 : f32
    %2123 = arith.select %2118, %2109, %cst_811 : f32
    %c2_i32_812 = arith.constant 2 : i32
    %2124 = arith.cmpi eq, %2122, %c2_i32_812 : i32
    %2125 = arith.select %2124, %1828, %1888 : f32
    %c1_i32_813 = arith.constant 1 : i32
    %2126 = arith.cmpi eq, %2122, %c1_i32_813 : i32
    %2127 = arith.select %2126, %1768, %2125 : f32
    %c0_i32_814 = arith.constant 0 : i32
    %2128 = arith.cmpi eq, %2122, %c0_i32_814 : i32
    %2129 = arith.select %2128, %1708, %2127 : f32
    %2130 = arith.subf %2109, %2129 : f32
    %cst_815 = arith.constant 1.000000e+00 : f32
    %2131 = arith.mulf %2130, %cst_815 : f32
    %cst_816 = arith.constant 0.000000e+00 : f32
    %2132 = arith.select %2118, %2131, %cst_816 : f32
    %c3_i32_817 = arith.constant 3 : i32
    %2133 = vector.broadcast %c3_i32_817 : i32 to vector<1x128xi32>
    %2134 = arith.cmpi eq, %28, %2133 : vector<1x128xi32>
    %2135 = vector.broadcast %2123 : f32 to vector<1x128xf32>
    %2136 = arith.select %2134, %2135, %2090 : vector<1x128xi1>, vector<1x128xf32>
    %c7_i32_818 = arith.constant 7 : i32
    %2137 = vector.broadcast %c7_i32_818 : i32 to vector<1x128xi32>
    %2138 = arith.cmpi eq, %28, %2137 : vector<1x128xi32>
    %2139 = arith.sitofp %2120 : i32 to f32
    %2140 = vector.broadcast %2139 : f32 to vector<1x128xf32>
    %2141 = arith.select %2138, %2140, %2136 : vector<1x128xi1>, vector<1x128xf32>
    %c11_i32_819 = arith.constant 11 : i32
    %2142 = vector.broadcast %c11_i32_819 : i32 to vector<1x128xi32>
    %2143 = arith.cmpi eq, %28, %2142 : vector<1x128xi32>
    %2144 = arith.sitofp %2122 : i32 to f32
    %2145 = vector.broadcast %2144 : f32 to vector<1x128xf32>
    %2146 = arith.select %2143, %2145, %2141 : vector<1x128xi1>, vector<1x128xf32>
    %c15_i32_820 = arith.constant 15 : i32
    %2147 = vector.broadcast %c15_i32_820 : i32 to vector<1x128xi32>
    %2148 = arith.cmpi eq, %28, %2147 : vector<1x128xi32>
    %2149 = vector.broadcast %2132 : f32 to vector<1x128xf32>
    %2150 = arith.select %2148, %2149, %2146 : vector<1x128xi1>, vector<1x128xf32>
    %c127_i32_821 = arith.constant 127 : i32
    %2151 = arith.cmpi eq, %2120, %c127_i32_821 : i32
    %true_822 = arith.constant true
    %2152 = arith.xori %2118, %true_822 : i1
    %2153 = arith.ori %2151, %2152 : i1
    %cst_823 = arith.constant 0xFF800000 : f32
    %2154 = arith.select %2153, %cst_823, %2123 : f32
    %c3_i32_824 = arith.constant 3 : i32
    %2155 = vector.broadcast %c3_i32_824 : i32 to vector<8x128xi32>
    %2156 = arith.cmpi eq, %23, %2155 : vector<8x128xi32>
    %2157 = vector.broadcast %2120 : i32 to vector<8x128xi32>
    %2158 = arith.cmpi eq, %24, %2157 : vector<8x128xi32>
    %2159 = arith.andi %2156, %2158 : vector<8x128xi1>
    %cst_825 = arith.constant 1.000000e+00 : f32
    %2160 = vector.broadcast %cst_825 : f32 to vector<8x128xf32>
    %2161 = arith.select %2159, %2160, %2101 : vector<8x128xi1>, vector<8x128xf32>
    %2162 = vector.broadcast %c7_i32_723 : i32 to vector<8x128xi32>
    %2163 = arith.cmpi eq, %29, %2162 : vector<8x128xi32>
    %2164 = vector.shape_cast %2150 : vector<1x128xf32> to vector<1x128xf32>
    %2165 = vector.broadcast %2164 : vector<1x128xf32> to vector<8x128xf32>
    %2166 = arith.select %2163, %2165, %1900 : vector<8x128xi1>, vector<8x128xf32>
    %c8_i32_826 = arith.constant 8 : i32
    %c0_827 = arith.constant 0 : index
    %c0_828 = arith.constant 0 : index
    %2167 = vector.load %arg5[%c0_827, %c0_828] : memref<8x128xf32, #tpu.memory_space<vmem>>, vector<8x128xf32>
    tpu.vector_store %arg5[%c0_827, %c0_828], %2166 {strides = array<i32>} : memref<8x128xf32, #tpu.memory_space<vmem>>, vector<8x128xf32>,
    return
  }
  func.func @transform_0(%arg0: i32) -> (i32, i32) {
    %c0_i32 = arith.constant 0 : i32
    %c0_i32_0 = arith.constant 0 : i32
    %c0_i32_1 = arith.constant 0 : i32
    return %c0_i32, %c0_i32_0 : i32, i32
  }
  func.func @transform_1(%arg0: i32) -> (i32, i32) {
    %c0_i32 = arith.constant 0 : i32
    %c0_i32_0 = arith.constant 0 : i32
    %c0_i32_1 = arith.constant 0 : i32
    return %c0_i32, %c0_i32_0 : i32, i32
  }
  func.func @transform_2(%arg0: i32) -> (i32, i32) {
    %c0_i32 = arith.constant 0 : i32
    %c0_i32_0 = arith.constant 0 : i32
    %c0_i32_1 = arith.constant 0 : i32
    return %c0_i32, %c0_i32_0 : i32, i32
  }
  func.func @transform_3(%arg0: i32) -> (i32, i32) {
    %c0_i32 = arith.constant 0 : i32
    %c0_i32_0 = arith.constant 0 : i32
    %c0_i32_1 = arith.constant 0 : i32
    return %c0_i32, %c0_i32_0 : i32, i32
  }
  func.func @transform_4(%arg0: i32) -> (i32, i32) {
    %c0_i32 = arith.constant 0 : i32
    %c0_i32_0 = arith.constant 0 : i32
    %c0_i32_1 = arith.constant 0 : i32
    return %c0_i32, %c0_i32_0 : i32, i32
  }
}

</mosaic_0001>

<bundles_post_ra>
// kernel: fused_beam_decode.1
= control target key start
LH: loop header
LB: loop body
LE: loop exit
PB: predicated region body
PF: predicated region fallthrough
CT: control target
= control target key end

     0   :  { %s6536_s0 = inlined_call_operand.vmem [shape: f32[128,32], index: 0, kind: input, shape index: {}]   ;;  %s6537_s1 = inlined_call_operand.vmem [shape: f32[32,128], index: 1, kind: input, shape index: {}]   ;;  %s6538_s2 = inlined_call_operand.vmem [shape: f32[1,128], index: 2, kind: input, shape index: {}]   ;;  %s6539_s3 = inlined_call_operand.vmem [shape: f32[1,32], index: 3, kind: input, shape index: {}]   ;;  %s6540_s4 = inlined_call_operand.hbm [shape: f32[8,128], index: 4, kind: output, shape index: {}]  }
   0x1   :  { %v73_v0 = vld [vmem:[%s6537_s1] sm:$0xff]  ;;  %v74_v1 = vld [vmem:[%s6537_s1 + $0x8] sm:$0xff]  ;;  %v75_v2 = vld [vmem:[%s6537_s1 + $0x10] sm:$0xff] }
   0x2   :  { %v3849_v3 = vpack.c.bf16 %v74_v1, %v73_v0  ;;  %v76_v4 = vld [vmem:[%s6537_s1 + $0x18] sm:$0xff]  ;;  %v18_v5 = vld [vmem:[%s6536_s0] sm:$0xff]  ;;  %v19_v9 = vld [vmem:[%s6536_s0 + $0x8] sm:$0xff] }
   0x3   :  { %v4352_v6 = vld [vmem:[%s6539_s3] ss:$0 sm:$0xff]  ;;  %v3853_v7 = vpack.c.bf16 %v76_v4, %v75_v2  ;;  %v20_v10 = vld [vmem:[%s6536_s0 + $0x10] sm:$0xff]  ;;  %v21_v11 = vld [vmem:[%s6536_s0 + $0x18] sm:$0xff] }
   0x4   :  { %v41_v8 = vadd.f32 %v4352_v6, %v18_v5  ;;  %3850 = vmatprep.subr.bf16.mxu0 %v3849_v3  ;;  %v42_v12 = vadd.f32 %v4352_v6, %v19_v9  ;;  %v43_v13 = vadd.f32 %v4352_v6, %v20_v10  ;;  %v44_v14 = vadd.f32 %v4352_v6, %v21_v11  ;;  %v22_v15 = vld [vmem:[%s6536_s0 + $0x20] sm:$0xff]  ;;  %v23_v17 = vld [vmem:[%s6536_s0 + $0x28] sm:$0xff]  ;;  %v24_v18 = vld [vmem:[%s6536_s0 + $0x30] sm:$0xff] }
   0x5   :  { %3852 = vmatpush3.bf16.msra.mxu0 %v3849_v3  ;;  %v45_v16 = vadd.f32 %v4352_v6, %v22_v15  ;;  %v46_v19 = vadd.f32 %v4352_v6, %v23_v17 }
   0x6   :  { %4183 = vtanh.f32 %v41_v8  ;;  %3854 = vmatprep.subr.bf16.mxu0 %v3853_v7 }
   0x7   :  { %4185 = vtanh.f32 %v42_v12 }
   0x8   :  { %4187 = vtanh.f32 %v43_v13 }
   0x9   :  { %4189 = vtanh.f32 %v44_v14 }
   0xa   :  { %9 = vsyncpa [#allocation4], 0  ;;  %3856 = vmatpush3.bf16.msra.mxu0 %v3853_v7  ;;  %4191 = vtanh.f32 %v45_v16  ;;  %v47_v20 = vadd.f32 %v4352_v6, %v24_v18  ;;  %v25_v21 = vld [vmem:[%s6536_s0 + $0x38] sm:$0xff]  ;;  %v26_v22 = vld [vmem:[%s6536_s0 + $0x40] sm:$0xff]  ;;  %vm84_vm0 = vcmask 261120   ;;  %vm4304_vm1 = vmmov 0  }
   0xb   :  { %4193 = vtanh.f32 %v46_v19  ;;  %v48_v23 = vadd.f32 %v4352_v6, %v25_v21  ;;  %v49_v24 = vadd.f32 %v4352_v6, %v26_v22  ;;  %v27_v25 = vld [vmem:[%s6536_s0 + $0x48] sm:$0xff]  ;;  %v28_v26 = vld [vmem:[%s6536_s0 + $0x50] sm:$0xff]  ;;  %v29_v32 = vld [vmem:[%s6536_s0 + $0x58] sm:$0xff] }
   0xc   :  { %4195 = vtanh.f32 %v47_v20  ;;  %v50_v29 = vadd.f32 %v4352_v6, %v27_v25  ;;  %v51_v31 = vadd.f32 %v4352_v6, %v28_v26  ;;  %v30_v34 = vld [vmem:[%s6536_s0 + $0x60] sm:$0xff]  ;;  %v52_v36 = vadd.f32 %v4352_v6, %v29_v32  ;;  %v31_v38 = vld [vmem:[%s6536_s0 + $0x68] sm:$0xff]  ;;  %v32_v40 = vld [vmem:[%s6536_s0 + $0x70] sm:$0xff] }
   0xd   :  { %4197 = vtanh.f32 %v48_v23  ;;  %v53_v37 = vadd.f32 %v4352_v6, %v30_v34  ;;  %v54_v42 = vadd.f32 %v4352_v6, %v31_v38  ;;  %v55_v43 = vadd.f32 %v4352_v6, %v32_v40  ;;  %v33_v44 = vld [vmem:[%s6536_s0 + $0x78] sm:$0xff]  ;;  %v3363_v55 = vld [vmem:[%s6538_s2] ss:$0 sm:$0xff] }
   0xe   :  { %4199 = vtanh.f32 %v49_v24  ;;  %v56_v47 = vadd.f32 %v4352_v6, %v33_v44 }
   0xf   :  { %4201 = vtanh.f32 %v50_v29 }
  0x10   :  { %v4184_v27 = vpop.eup %4183  ;;  %4203 = vtanh.f32 %v51_v31 }
  0x11   :  { %v4186_v28 = vpop.eup %4185  ;;  %3545 = vmatprep.mubr.msk.f32.mxu0 %vm84_vm0, %v4184_v27  ;;  %4205 = vtanh.f32 %v52_v36 }
  0x12   :  { %v4188_v30 = vpop.eup %4187  ;;  %3546 = vmatmul.mubr.msk.f32.vlgmr.msra.gmra.mrb[0].mxu0 %vm84_vm0, %v4186_v28  ;;  %4207 = vtanh.f32 %v53_v37 }
  0x13   :  { %v4190_v33 = vpop.eup %4189  ;;  %3548 = vmatprep.mubr.msk.f32.mxu0 %vm84_vm0, %v4188_v30  ;;  %4209 = vtanh.f32 %v54_v42 }
  0x14   :  { %v4192_v35 = vpop.eup %4191  ;;  %4211 = vtanh.f32 %v55_v43 }
  0x15   :  { %v4194_v39 = vpop.eup %4193  ;;  %4213 = vtanh.f32 %v56_v47 }
  0x16   :  { %3549 = vmatmul.mubr.msk.f32.gmra.mrb[2].mxu0 %vm84_vm0, %v4190_v33  ;;  %v4196_v41 = vpop.eup %4195 }
  0x17   :  { %3551 = vmatprep.mubr.msk.f32.mxu0 %vm84_vm0, %v4192_v35  ;;  %v4198_v45 = vpop.eup %4197 }
  0x18   :  { %v4200_v46 = vpop.eup %4199 }
  0x19   :  { %v4202_v48 = vpop.eup %4201 }
  0x1a   :  { %3552 = vmatmul.mubr.msk.f32.gmra.mrb[4].mxu0 %vm84_vm0, %v4194_v39  ;;  %v4204_v49 = vpop.eup %4203 }
  0x1b   :  { %3554 = vmatprep.mubr.msk.f32.mxu0 %vm84_vm0, %v4196_v41  ;;  %v4206_v50 = vpop.eup %4205 }
  0x1c   :  { %v4208_v51 = vpop.eup %4207 }
  0x1d   :  { %v4210_v52 = vpop.eup %4209 }
  0x1e   :  { %3555 = vmatmul.mubr.msk.f32.gmra.mrb[6].mxu0 %vm84_vm0, %v4198_v45  ;;  %v4212_v53 = vpop.eup %4211 }
  0x1f   :  { %3557 = vmatprep.mubr.msk.f32.mxu0 %vm84_vm0, %v4200_v46  ;;  %v4214_v54 = vpop.eup %4213 }
  0x22   :  { %3558 = vmatmul.mubr.msk.f32.gmra.mrb[8].mxu0 %vm84_vm0, %v4202_v48 }
  0x23   :  { %3560 = vmatprep.mubr.msk.f32.mxu0 %vm84_vm0, %v4204_v49 }
  0x26   :  { %3561 = vmatmul.mubr.msk.f32.gmra.mrb[10].mxu0 %vm84_vm0, %v4206_v50 }
  0x27   :  { %3563 = vmatprep.mubr.msk.f32.mxu0 %vm84_vm0, %v4208_v51 }
  0x2a   :  { %3564 = vmatmul.mubr.msk.f32.gmra.mrb[12].mxu0 %vm84_vm0, %v4210_v52 }
  0x2b   :  { %3566 = vmatprep.mubr.msk.f32.mxu0 %vm84_vm0, %v4212_v53 }
  0x2e   :  { %3567 = vmatmul.mubr.msk.f32.gmra.mrb[14].mxu0 %vm84_vm0, %v4214_v54 }
  0xe5   :  { %v3547_v56 = vpop.f32.mrb[0].mxu0 }
  0xe6   :  { %v199_v57 = vpop.f32.mrb[1].mxu0  ;;  %v4439_v62 = vadd.f32 %v3547_v56, %v3363_v55 }
  0xe7   :  { %v4434_v58 = vadd.f32 %v3363_v55, %v199_v57 }
  0xe9   :  { %v3550_v59 = vpop.f32.mrb[2].mxu0  ;;  %278 = vmax.xlane.f32.xlu0 %v4434_v58 }
  0xea   :  { %v4437_v60 = vadd.f32 %v3550_v59, %v3363_v55  ;;  %v209_v61 = vpop.f32.mrb[3].mxu0 }
  0xeb   :  { %v4443_v0 = vadd.f32 %v3363_v55, %v209_v61 }
  0xec   :  { %284 = vmax.xlane.f32.xlu1 %v4437_v60 }
  0xed   :  { %v3553_v63 = vpop.f32.mrb[4].mxu0  ;;  %280 = vmax.xlane.f32.xlu0 %v4439_v62 }
  0xee   :  { %v219_v1 = vpop.f32.mrb[5].mxu0  ;;  %v4447_v3 = vadd.f32 %v3553_v63, %v3363_v55 }
  0xef   :  { %v4445_v2 = vadd.f32 %v3363_v55, %v219_v1 }
  0xf0   :  { %282 = vmax.xlane.f32.xlu1 %v4443_v0 }
  0xf1   :  { %v3556_v4 = vpop.f32.mrb[6].mxu0  ;;  %286 = vmax.xlane.f32.xlu0 %v4445_v2 }
  0xf2   :  { %v229_v5 = vpop.f32.mrb[7].mxu0  ;;  %v4453_v7 = vadd.f32 %v3556_v4, %v3363_v55 }
  0xf3   :  { %v4451_v6 = vadd.f32 %v3363_v55, %v229_v5 }
  0xf4   :  { %288 = vmax.xlane.f32.xlu1 %v4447_v3 }
  0xf5   :  { %v3559_v8 = vpop.f32.mrb[8].mxu0  ;;  %290 = vmax.xlane.f32.xlu0 %v4451_v6 }
  0xf6   :  { %v239_v9 = vpop.f32.mrb[9].mxu0  ;;  %v4459_v11 = vadd.f32 %v3559_v8, %v3363_v55 }
  0xf7   :  { %v4457_v10 = vadd.f32 %v3363_v55, %v239_v9 }
  0xf8   :  { %292 = vmax.xlane.f32.xlu1 %v4453_v7 }
  0xf9   :  { %v3562_v12 = vpop.f32.mrb[10].mxu0  ;;  %294 = vmax.xlane.f32.xlu0 %v4457_v10 }
  0xfa   :  { %v249_v13 = vpop.f32.mrb[11].mxu0  ;;  %v4465_v15 = vadd.f32 %v3562_v12, %v3363_v55 }
  0xfb   :  { %v4463_v14 = vadd.f32 %v3363_v55, %v249_v13 }
  0xfc   :  { %296 = vmax.xlane.f32.xlu1 %v4459_v11 }
  0xfd   :  { %v3565_v16 = vpop.f32.mrb[12].mxu0  ;;  %298 = vmax.xlane.f32.xlu0 %v4463_v14 }
  0xfe   :  { %v259_v17 = vpop.f32.mrb[13].mxu0  ;;  %v4471_v19 = vadd.f32 %v3565_v16, %v3363_v55 }
  0xff   :  { %v4469_v18 = vadd.f32 %v3363_v55, %v259_v17 }
 0x100   :  { %300 = vmax.xlane.f32.xlu1 %v4465_v15 }
 0x101   :  { %v3568_v20 = vpop.f32.mrb[14].mxu0  ;;  %302 = vmax.xlane.f32.xlu0 %v4469_v18 }
 0x102   :  { %v269_v21 = vpop.f32.mrb[15].mxu0  ;;  %v4477_v23 = vadd.f32 %v3568_v20, %v3363_v55 }
 0x103   :  { %v4475_v22 = vadd.f32 %v3363_v55, %v269_v21 }
 0x104   :  { %304 = vmax.xlane.f32.xlu1 %v4471_v19 }
 0x105   :  { %306 = vmax.xlane.f32.xlu0 %v4475_v22 }
 0x108   :  { %308 = vmax.xlane.f32.xlu1 %v4477_v23 }
 0x176   :  { %v4482_v24 = vpop.xlane.xlu0 %278 }
 0x177   :  { %v310_v25 = vsub.f32 %v4434_v58, %v4482_v24 }
 0x179   :  { %v326_v26 = vmul.f32 1.442695, %v310_v25  ;;  %v4486_v27 = vpop.xlane.xlu1 %284 }
 0x17a   :  { %v4488_v28 = vpop.xlane.xlu0 %280  ;;  %v313_v29 = vsub.f32 %v4437_v60, %v4486_v27 }
 0x17b   :  { %4215 = vpow2.f32 %v326_v26  ;;  %v311_v30 = vsub.f32 %v4439_v62, %v4488_v28 }
 0x17c   :  { %v332_v35 = vmul.f32 1.442695, %v313_v29 }
 0x17d   :  { %v328_v31 = vmul.f32 1.442695, %v311_v30  ;;  %v4494_v32 = vpop.xlane.xlu1 %282 }
 0x17e   :  { %v312_v33 = vsub.f32 %v4443_v0, %v4494_v32  ;;  %v4498_v34 = vpop.xlane.xlu0 %286 }
 0x17f   :  { %4217 = vpow2.f32 %v328_v31  ;;  %v314_v36 = vsub.f32 %v4445_v2, %v4498_v34 }
 0x180   :  { %v330_v37 = vmul.f32 1.442695, %v312_v33 }
 0x181   :  { %v334_v38 = vmul.f32 1.442695, %v314_v36  ;;  %v4502_v39 = vpop.xlane.xlu1 %288 }
 0x182   :  { %4219 = vpow2.f32 %v330_v37  ;;  %v315_v40 = vsub.f32 %v4447_v3, %v4502_v39  ;;  %v4506_v41 = vpop.xlane.xlu0 %290 }
 0x183   :  { %4221 = vpow2.f32 %v332_v35  ;;  %v316_v42 = vsub.f32 %v4451_v6, %v4506_v41 }
 0x184   :  { %v336_v43 = vmul.f32 1.442695, %v315_v40  ;;  %4223 = vpow2.f32 %v334_v38 }
 0x185   :  { %v4216_v44 = vpop.eup %4215  ;;  %v338_v45 = vmul.f32 1.442695, %v316_v42  ;;  %v4510_v46 = vpop.xlane.xlu1 %292 }
 0x186   :  { %4225 = vpow2.f32 %v336_v43  ;;  %v317_v47 = vsub.f32 %v4453_v7, %v4510_v46  ;;  %358 = vadd.xlane.f32.xlu0 %v4216_v44  ;;  %v4514_v48 = vpop.xlane.xlu0 %294 }
 0x187   :  { %v318_v49 = vsub.f32 %v4457_v10, %v4514_v48  ;;  %4227 = vpow2.f32 %v338_v45 }
 0x188   :  { %v340_v50 = vmul.f32 1.442695, %v317_v47 }
 0x189   :  { %v4218_v51 = vpop.eup %4217  ;;  %v342_v52 = vmul.f32 1.442695, %v318_v49  ;;  %v4518_v53 = vpop.xlane.xlu1 %296  ;;  %v4303_v49 = vmov 0.0|0.0  }
 0x18a   :  { %4229 = vpow2.f32 %v340_v50  ;;  %v319_v54 = vsub.f32 %v4459_v11, %v4518_v53  ;;  %360 = vadd.xlane.f32.xlu1 %v4218_v51  ;;  %v4522_v55 = vpop.xlane.xlu0 %298  ;;  %3857 = vmatprep.subr.bf16.mxu1 %v4303_v49  ;;  %v4305_v50 = vmov 0.0  }
 0x18b   :  { %v320_v56 = vsub.f32 %v4463_v14, %v4522_v55  ;;  %4231 = vpow2.f32 %v342_v52  ;;  %3881 = vmatprep.subr.bf16.mxu0 %v4303_v49  ;;  %3601 = vmatprep.mubr.msk.f32.mxu1 %vm4304_vm1, %v4305_v50 }
 0x18c   :  { %v4220_v57 = vpop.eup %4219  ;;  %v344_v59 = vmul.f32 1.442695, %v319_v54  ;;  %3636 = vmatprep.mubr.msk.f32.mxu0 %vm4304_vm1, %v4305_v50 }
 0x18d   :  { %v4222_v61 = vpop.eup %4221  ;;  %v346_v63 = vmul.f32 1.442695, %v320_v56  ;;  %v4526_v1 = vpop.xlane.xlu1 %300  ;;  %362 = vadd.xlane.f32.xlu0 %v4220_v57 }
 0x18e   :  { %4233 = vpow2.f32 %v344_v59  ;;  %v321_v4 = vsub.f32 %v4465_v15, %v4526_v1  ;;  %364 = vadd.xlane.f32.xlu1 %v4222_v61  ;;  %v4530_v5 = vpop.xlane.xlu0 %302  ;;  %v4224_v8 = vpop.eup %4223 }
 0x18f   :  { %v322_v9 = vsub.f32 %v4469_v18, %v4530_v5  ;;  %4235 = vpow2.f32 %v346_v63 }
 0x190   :  { %v4226_v12 = vpop.eup %4225  ;;  %v348_v13 = vmul.f32 1.442695, %v321_v4 }
 0x191   :  { %v350_v16 = vmul.f32 1.442695, %v322_v9  ;;  %v4534_v17 = vpop.xlane.xlu1 %304  ;;  %366 = vadd.xlane.f32.xlu0 %v4224_v8  ;;  %v4228_v25 = vpop.eup %4227 }
 0x192   :  { %4237 = vpow2.f32 %v348_v13  ;;  %v323_v20 = vsub.f32 %v4471_v19, %v4534_v17  ;;  %368 = vadd.xlane.f32.xlu1 %v4226_v12  ;;  %v4538_v21 = vpop.xlane.xlu0 %306 }
 0x193   :  { %v324_v26 = vsub.f32 %v4475_v22, %v4538_v21  ;;  %4239 = vpow2.f32 %v350_v16 }
 0x194   :  { %v4230_v29 = vpop.eup %4229  ;;  %v352_v30 = vmul.f32 1.442695, %v323_v20 }
 0x195   :  { %v354_v31 = vmul.f32 1.442695, %v324_v26  ;;  %v4542_v33 = vpop.xlane.xlu1 %308  ;;  %370 = vadd.xlane.f32.xlu0 %v4228_v25  ;;  %v4232_v36 = vpop.eup %4231 }
 0x196   :  { %4241 = vpow2.f32 %v352_v30  ;;  %v325_v35 = vsub.f32 %v4477_v23, %v4542_v33  ;;  %372 = vadd.xlane.f32.xlu1 %v4230_v29 }
 0x197   :  { %4243 = vpow2.f32 %v354_v31 }
 0x198   :  { %v4234_v37 = vpop.eup %4233  ;;  %v356_v38 = vmul.f32 1.442695, %v325_v35 }
 0x199   :  { %374 = vadd.xlane.f32.xlu0 %v4232_v36  ;;  %v4236_v40 = vpop.eup %4235 }
 0x19a   :  { %4245 = vpow2.f32 %v356_v38  ;;  %376 = vadd.xlane.f32.xlu1 %v4234_v37 }
 0x19c   :  { %v4238_v42 = vpop.eup %4237 }
 0x19d   :  { %378 = vadd.xlane.f32.xlu0 %v4236_v40  ;;  %v4240_v43 = vpop.eup %4239 }
 0x19e   :  { %380 = vadd.xlane.f32.xlu1 %v4238_v42 }
 0x1a0   :  { %v4242_v44 = vpop.eup %4241 }
 0x1a1   :  { %382 = vadd.xlane.f32.xlu0 %v4240_v43  ;;  %v4244_v45 = vpop.eup %4243 }
 0x1a2   :  { %384 = vadd.xlane.f32.xlu1 %v4242_v44 }
 0x1a4   :  { %v4246_v47 = vpop.eup %4245 }
 0x1a5   :  { %386 = vadd.xlane.f32.xlu0 %v4244_v45 }
 0x1a6   :  { %388 = vadd.xlane.f32.xlu1 %v4246_v47 }
 0x213   :  { %v359_v51 = vpop.xlane.xlu0 %358 }
 0x214   :  { %4247 = vlog2.f32 %v359_v51 }
 0x217   :  { %v361_v52 = vpop.xlane.xlu1 %360 }
 0x218   :  { %4249 = vlog2.f32 %v361_v52 }
 0x21a   :  { %v363_v54 = vpop.xlane.xlu0 %362 }
 0x21b   :  { %4251 = vlog2.f32 %v363_v54  ;;  %v365_v56 = vpop.xlane.xlu1 %364 }
 0x21c   :  { %4253 = vlog2.f32 %v365_v56 }
 0x21e   :  { %v4248_v57 = vpop.eup %4247  ;;  %v367_v59 = vpop.xlane.xlu0 %366 }
 0x21f   :  { %v391_v61 = vmul.f32 0.6931472, %v4248_v57  ;;  %4255 = vlog2.f32 %v367_v59  ;;  %v369_v63 = vpop.xlane.xlu1 %368 }
 0x220   :  { %4257 = vlog2.f32 %v369_v63 }
 0x221   :  { %v422_v9 = vadd.f32 %v391_v61, %v4482_v24 }
 0x222   :  { %v4250_v4 = vpop.eup %4249  ;;  %v371_v8 = vpop.xlane.xlu0 %370 }
 0x223   :  { %v393_v12 = vmul.f32 0.6931472, %v4250_v4  ;;  %4259 = vlog2.f32 %v371_v8  ;;  %v373_v13 = vpop.xlane.xlu1 %372  ;;  %v438_v30 = vsub.f32 %v4434_v58, %v422_v9 }
 0x224   :  { %4261 = vlog2.f32 %v373_v13 }
 0x225   :  { %v4252_v16 = vpop.eup %4251  ;;  %v423_v20 = vadd.f32 %v393_v12, %v4488_v28 }
 0x226   :  { %v4254_v25 = vpop.eup %4253  ;;  %v395_v26 = vmul.f32 0.6931472, %v4252_v16  ;;  %v375_v29 = vpop.xlane.xlu0 %374 }
 0x227   :  { %v439_v31 = vsub.f32 %v4439_v62, %v423_v20  ;;  %v397_v35 = vmul.f32 0.6931472, %v4254_v25  ;;  %4263 = vlog2.f32 %v375_v29  ;;  %v377_v36 = vpop.xlane.xlu1 %376 }
 0x228   :  { %v424_v37 = vadd.f32 %v395_v26, %v4494_v32  ;;  %4265 = vlog2.f32 %v377_v36 }
 0x229   :  { %v4256_v24 = vpop.eup %4255  ;;  %v4557_v38 = vpack.c.bf16 %v439_v31, %v438_v30  ;;  %v425_v40 = vadd.f32 %v397_v35, %v4486_v27 }
 0x22a   :  { %v4258_v42 = vpop.eup %4257  ;;  %v440_v28 = vsub.f32 %v4443_v0, %v424_v37  ;;  %v399_v43 = vmul.f32 0.6931472, %v4256_v24  ;;  %v379_v44 = vpop.xlane.xlu0 %378  ;;  %v470_v24 = vlaneseq }
 0x22b   :  { %v441_v58 = vsub.f32 %v4437_v60, %v425_v40  ;;  %v401_v45 = vmul.f32 0.6931472, %v4258_v42  ;;  %4267 = vlog2.f32 %v379_v44  ;;  %v381_v62 = vpop.xlane.xlu1 %380  ;;  %3859 = vmatpush3.bf16.msra.mxu1 %v4557_v38  ;;  %3883 = vmatpush3.bf16.msra.mxu0 %v4557_v38 }
 0x22c   :  { %v426_v32 = vadd.f32 %v399_v43, %v4498_v34  ;;  %4269 = vlog2.f32 %v381_v62  ;;  %3860 = vmatprep.subr.bf16.mxu1 %v4303_v49  ;;  %3884 = vmatprep.subr.bf16.mxu0 %v4303_v49 }
 0x22d   :  { %v4260_v27 = vpop.eup %4259  ;;  %v4567_v0 = vpack.c.bf16 %v441_v58, %v440_v28  ;;  %v427_v47 = vadd.f32 %v401_v45, %v4502_v39  ;;  %v4617_v58 = vshrl.u32 %v470_v24, 7 }
 0x22e   :  { %v4262_v60 = vpop.eup %4261  ;;  %v442_v51 = vsub.f32 %v4445_v2, %v426_v32  ;;  %v403_v52 = vmul.f32 0.6931472, %v4260_v27  ;;  %v383_v54 = vpop.xlane.xlu0 %382 }
 0x22f   :  { %v443_v56 = vsub.f32 %v4447_v3, %v427_v47  ;;  %v405_v57 = vmul.f32 0.6931472, %v4262_v60  ;;  %4271 = vlog2.f32 %v383_v54  ;;  %v385_v34 = vpop.xlane.xlu1 %384  ;;  %3862 = vmatpush3.bf16.msra.mxu1 %v4567_v0  ;;  %3886 = vmatpush3.bf16.msra.mxu0 %v4567_v0  ;;  %vm476_vm2 = vcmp.eq.s32.totalorder %v4617_v58, 0 }
 0x230   :  { %v428_v59 = vadd.f32 %v403_v52, %v4506_v41  ;;  %4273 = vlog2.f32 %v385_v34  ;;  %3863 = vmatprep.subr.bf16.mxu1 %v4303_v49  ;;  %3887 = vmatprep.subr.bf16.mxu0 %v4303_v49  ;;  %vm481_vm5 = vcmp.eq.s32.totalorder %v4617_v58, 1  ;;  %vm483_vm6 = vcmp.eq.s32.totalorder %v4617_v58, 2 }
 0x231   :  { %v4264_v39 = vpop.eup %4263  ;;  %v4577_v2 = vpack.c.bf16 %v443_v56, %v442_v51  ;;  %v429_v61 = vadd.f32 %v405_v57, %v4510_v46  ;;  %vm485_vm7 = vcmp.eq.s32.totalorder %v4617_v58, 3 }
 0x232   :  { %v4266_v3 = vpop.eup %4265  ;;  %v444_v63 = vsub.f32 %v4451_v6, %v428_v59  ;;  %v407_v4 = vmul.f32 0.6931472, %v4264_v39  ;;  %v387_v8 = vpop.xlane.xlu0 %386 }
 0x233   :  { %v445_v9 = vsub.f32 %v4453_v7, %v429_v61  ;;  %v409_v12 = vmul.f32 0.6931472, %v4266_v3  ;;  %4275 = vlog2.f32 %v387_v8  ;;  %v389_v41 = vpop.xlane.xlu1 %388  ;;  %3865 = vmatpush3.bf16.msra.mxu1 %v4577_v2  ;;  %3889 = vmatpush3.bf16.msra.mxu0 %v4577_v2  ;;  %v474_v3 = vmul.u32 128, %v4617_v58 }
 0x234   :  { %v430_v13 = vadd.f32 %v407_v4, %v4514_v48  ;;  %4277 = vlog2.f32 %v389_v41  ;;  %3866 = vmatprep.subr.bf16.mxu1 %v4303_v49  ;;  %3890 = vmatprep.subr.bf16.mxu0 %v4303_v49 }
 0x235   :  { %v4268_v46 = vpop.eup %4267  ;;  %v4587_v6 = vpack.c.bf16 %v445_v9, %v444_v63  ;;  %v431_v16 = vadd.f32 %v409_v12, %v4518_v53 }
 0x236   :  { %v4270_v7 = vpop.eup %4269  ;;  %v446_v20 = vsub.f32 %v4457_v10, %v430_v13  ;;  %v411_v25 = vmul.f32 0.6931472, %v4268_v46 }
 0x237   :  { %v447_v26 = vsub.f32 %v4459_v11, %v431_v16  ;;  %v413_v29 = vmul.f32 0.6931472, %v4270_v7  ;;  %3868 = vmatpush3.bf16.msra.mxu1 %v4587_v6  ;;  %3892 = vmatpush3.bf16.msra.mxu0 %v4587_v6 }
 0x238   :  { %v432_v48 = vadd.f32 %v411_v25, %v4522_v55  ;;  %3869 = vmatprep.subr.bf16.mxu1 %v4303_v49  ;;  %3893 = vmatprep.subr.bf16.mxu0 %v4303_v49 }
 0x239   :  { %v4272_v30 = vpop.eup %4271  ;;  %v4597_v31 = vpack.c.bf16 %v447_v26, %v446_v20  ;;  %v433_v53 = vadd.f32 %v413_v29, %v4526_v1 }
 0x23a   :  { %v4274_v10 = vpop.eup %4273  ;;  %v448_v35 = vsub.f32 %v4463_v14, %v432_v48  ;;  %v415_v11 = vmul.f32 0.6931472, %v4272_v30 }
 0x23b   :  { %v449_v36 = vsub.f32 %v4465_v15, %v433_v53  ;;  %v417_v37 = vmul.f32 0.6931472, %v4274_v10  ;;  %3871 = vmatpush3.bf16.msra.mxu1 %v4597_v31  ;;  %3895 = vmatpush3.bf16.msra.mxu0 %v4597_v31 }
 0x23c   :  { %v434_v55 = vadd.f32 %v415_v11, %v4530_v5  ;;  %3872 = vmatprep.subr.bf16.mxu1 %v4303_v49  ;;  %3896 = vmatprep.subr.bf16.mxu0 %v4303_v49 }
 0x23d   :  { %v4276_v40 = vpop.eup %4275  ;;  %v4607_v1 = vpack.c.bf16 %v449_v36, %v448_v35  ;;  %v435_v14 = vadd.f32 %v417_v37, %v4534_v17  ;;  %v4619_v17 = vand.u32 127, %v470_v24 }
 0x23e   :  { %v4278_v42 = vpop.eup %4277  ;;  %v450_v15 = vsub.f32 %v4469_v18, %v434_v55  ;;  %v419_v28 = vmul.f32 0.6931472, %v4276_v40 }
 0x23f   :  { %v451_v43 = vsub.f32 %v4471_v19, %v435_v14  ;;  %v421_v44 = vmul.f32 0.6931472, %v4278_v42  ;;  %3874 = vmatpush3.bf16.msra.mxu1 %v4607_v1  ;;  %3898 = vmatpush3.bf16.msra.mxu0 %v4607_v1  ;;  %vm477_vm3 = vcmp.eq.s32.totalorder %v4619_v17, 127  ;;  %v4671_v63 = vadd.s32 %v474_v3, %v4619_v17 }
 0x240   :  { %v436_v5 = vadd.f32 %v419_v28, %v4538_v21  ;;  %3875 = vmatprep.subr.bf16.mxu1 %v4303_v49  ;;  %3899 = vmatprep.subr.bf16.mxu0 %v4303_v49  ;;  %vm478_vm4 = vmand %vm476_vm2, %vm477_vm3 }
 0x241   :  { %v4621_v45 = vpack.c.bf16 %v451_v43, %v450_v15  ;;  %v437_v18 = vadd.f32 %v421_v44, %v4542_v33 }
 0x242   :  { %v452_v19 = vsub.f32 %v4475_v22, %v436_v5  ;;  %v4306_v22 = vmov 1.0  }
 0x243   :  { %v453_v62 = vsub.f32 %v4477_v23, %v437_v18  ;;  %3877 = vmatpush3.bf16.msra.mxu1 %v4621_v45  ;;  %3901 = vmatpush3.bf16.msra.mxu0 %v4621_v45  ;;  %v4307_v23 = vmov -inf  }
 0x244   :  { %3878 = vmatprep.subr.bf16.mxu1 %v4303_v49  ;;  %3902 = vmatprep.subr.bf16.mxu0 %v4303_v49  ;;  %v480_v33 = vsel %vm476_vm2, 0.0, %v4307_v23 }
 0x245   :  { %v4632_v21 = vpack.c.bf16 %v453_v62, %v452_v19  ;;  %v482_v32 = vsel %vm481_vm5, -inf, %v480_v33 }
 0x246   :  { %v484_v27 = vsel %vm483_vm6, -inf, %v482_v32 }
 0x247   :  { %3880 = vmatpush3.bf16.msra.mxu1 %v4632_v21  ;;  %3904 = vmatpush3.bf16.msra.mxu0 %v4632_v21  ;;  %v486_v47 = vsel %vm485_vm7, -inf, %v484_v27 }
 0x248   :  { %3905 = vmatprep.subr.bf16.mxu1 %v4303_v49  ;;  %3929 = vmatprep.subr.bf16.mxu0 %v4303_v49 }
 0x24a   :  { %3602 = vmatmul.mubr.msk.f32.vlgmr.msra.gmra.mrb[0].mxu1 %vm478_vm4, %v4306_v22 }
 0x24b   :  { %3907 = vmatpush3.bf16.msra.mxu1 %v4557_v38  ;;  %3671 = vmatprep.mubr.msk.f32.mxu1 %vm4304_vm1, %v4305_v50 }
 0x24c   :  { %3908 = vmatprep.subr.bf16.mxu1 %v4303_v49 }
 0x24f   :  { %3910 = vmatpush3.bf16.msra.mxu1 %v4567_v0 }
 0x250   :  { %3911 = vmatprep.subr.bf16.mxu1 %v4303_v49 }
 0x253   :  { %3913 = vmatpush3.bf16.msra.mxu1 %v4577_v2 }
 0x254   :  { %3914 = vmatprep.subr.bf16.mxu1 %v4303_v49 }
 0x257   :  { %3916 = vmatpush3.bf16.msra.mxu1 %v4587_v6 }
 0x258   :  { %3917 = vmatprep.subr.bf16.mxu1 %v4303_v49 }
 0x25b   :  { %3919 = vmatpush3.bf16.msra.mxu1 %v4597_v31 }
 0x25c   :  { %3920 = vmatprep.subr.bf16.mxu1 %v4303_v49 }
 0x25f   :  { %3922 = vmatpush3.bf16.msra.mxu1 %v4607_v1 }
 0x260   :  { %3923 = vmatprep.subr.bf16.mxu1 %v4303_v49 }
 0x263   :  { %3925 = vmatpush3.bf16.msra.mxu1 %v4621_v45 }
 0x264   :  { %3926 = vmatprep.subr.bf16.mxu1 %v4303_v49 }
 0x267   :  { %3928 = vmatpush3.bf16.msra.mxu1 %v4632_v21 }
 0x268   :  { %3953 = vmatprep.subr.bf16.mxu1 %v4303_v49 }
 0x31d   :  { %v569_v60 = vpop.f32.mrb[0].mxu1 }
 0x31e   :  { %v570_v51 = vadd.f32 %v569_v60, %v486_v47  ;;  %v3603_v52 = vpop.f32.mrb[1].mxu1 }
 0x320   :  { %573 = vmax.xlane.f32.xlu0 %v570_v51 }
 0x3ad   :  { %v574_v54 = vpop.xlane.xlu0 %573 }
 0x3ae   :  { %v575_v56 = vrot.slane %v574_v54, 4 }
 0x3b0   :  { %v576_v57 = vmax.f32 %v574_v54, %v575_v56 }
 0x3b2   :  { %v577_v34 = vrot.slane %v576_v57, 2 }
 0x3b4   :  { %v578_v59 = vmax.f32 %v576_v57, %v577_v34 }
 0x3b6   :  { %v579_v39 = vrot.slane %v578_v59, 1 }
 0x3b8   :  { %v580_v61 = vmax.f32 %v578_v59, %v579_v39 }
 0x3ba   :  { %4049 = vpush %v580_v61 }
 0x3eb   :  { %s4673_s2 = spop %4049 }
 0x3ec   :  { %v582_v4 = vstv %s4673_s2  ;;  %p609_p0 = scmp.gt.f32.partialorder %s4673_s2, -inf }
 0x3ed   :  { %vm583_vm8 = vcmp.eq.f32.partialorder %v570_v51, %v582_v4 }
 0x3ee   :  { %v584_v8 = vsel %vm583_vm8, %v4671_v63, 1024  ;;  %s4701_s7 = scalar_select %p609_p0, %s4673_s2, -inf  ;;  %vm619_vm8 = vcmp.eq.s32.totalorder %v4619_v17, 0 }
 0x3ef   :  { %v586_v9 = vshra.s32 %v584_v8, 16  ;;  %v585_v41 = vand.u32 65535, %v584_v8  ;;  %p634_p9 = pneg %p609_p0 }
 0x3f0   :  { %v620_v59 = vstv %s4701_s7 }
 0x3f1   :  { %v588_v12 = vcvt.s32.f32 %v586_v9  ;;  %v587_v46 = vcvt.s32.f32 %v585_v41  ;;  %v621_v61 = vsel %vm619_vm8, %v620_v59, 0.0 }
 0x3f3   :  { %589 = vmin.xlane.f32.xlu1 %v588_v12 }
 0x480   :  { %v590_v13 = vpop.xlane.xlu1 %589 }
 0x481   :  { %vm591_vm9 = vcmp.eq.f32.partialorder %v588_v12, %v590_v13  ;;  %v596_v7 = vcvt.f32.s32 %v590_v13 }
 0x482   :  { %v592_v16 = vsel %vm591_vm9, %v587_v46, inf  ;;  %vm6550_vm9 = vcmp.eq.s32.totalorder %v4619_v17, 4 }
 0x483   :  { %593 = vmin.xlane.f32.xlu0 %v592_v16  ;;  %v597_v25 = vshll.u32 %v596_v7, 16 }
 0x510   :  { %v594_v20 = vpop.xlane.xlu0 %593 }
 0x511   :  { %v595_v26 = vcvt.f32.s32 %v594_v20 }
 0x513   :  { %v598_v29 = vadd.s32 %v597_v25, %v595_v26 }
 0x515   :  { %v599_v48 = vrot.slane %v598_v29, 4 }
 0x517   :  { %vm600_vm10 = vcmp.lt.s32.totalorder %v598_v29, %v599_v48 }
 0x518   :  { %v601_v30 = vsel %vm600_vm10, %v598_v29, %v599_v48  ;;  %vm6548_vm10 = vcmp.eq.s32.totalorder %v4619_v17, 8 }
 0x519   :  { %v602_v53 = vrot.slane %v601_v30, 2 }
 0x51b   :  { %vm603_vm11 = vcmp.lt.s32.totalorder %v601_v30, %v602_v53 }
 0x51c   :  { %v604_v10 = vsel %vm603_vm11, %v601_v30, %v602_v53  ;;  %vm6547_vm11 = vcmp.eq.s32.totalorder %v4619_v17, 12 }
 0x51d   :  { %v605_v35 = vrot.slane %v604_v10, 1 }
 0x51f   :  { %vm606_vm12 = vcmp.lt.s32.totalorder %v604_v10, %v605_v35 }
 0x520   :  { %v607_v11 = vsel %vm606_vm12, %v604_v10, %v605_v35 }
 0x521   :  { %4051 = vpush %v607_v11 }
 0x552   :  { %s4677_s30 = spop %4051 }
 0x553   :  { %v641_v36 = vstv %s4677_s30  ;;  %s612_s5 = sshra.s32 %s4677_s30, 7  ;;  %s610_s3 = sand.u32 127, %s4677_s30 }
 0x554   :  { %vm642_vm13 = vcmp.eq.s32.totalorder %v4671_v63, %v641_v36  ;;  %s6631_s5 = smov (!%p609_p0, %s612_s5), 0  ;;  %s6633_s3 = smov (!%p609_p0, %s610_s3), 0 }
 0x555   :  { %v4681_v37 = vsel %vm642_vm13, -inf, %v570_v51  ;;  %p615_p1 = scmp.eq.s32.totalorder %s6631_s5, 0  ;;  %s623_s9 = scvt.s32.f32 %s6633_s3  ;;  %vm6546_vm13 = vcmp.eq.s32.totalorder %v4619_v17, 1 }
 0x556   :  { %644 = vmax.xlane.f32.xlu1 %v4681_v37  ;;  %s627_s10 = scvt.s32.f32 %s6631_s5  ;;  %p633_p7 = scmp.eq.s32.totalorder %s6633_s3, 127 }
 0x557   :  { %s616_s6 = scalar_select %p615_p1, 0.0, -inf  ;;  %v624_v39 = vstv %s623_s9 }
 0x558   :  { %v625_v3 = vsel %vm6550_vm9, %v624_v39, %v621_v61  ;;  %v628_v4 = vstv %s627_s10  ;;  %p635_p13 = por %p634_p9, %p633_p7 }
 0x559   :  { %s617_s8 = ssub.f32 %s4673_s2, %s616_s6  ;;  %v629_v13 = vsel %vm6548_vm10, %v628_v4, %v625_v3 }
 0x55a   :  { %s6651_s7 = smov (%p635_p13, %s4701_s7), -inf }
 0x55b   :  { %s6635_s8 = smov (!%p609_p0, %s617_s8), 0.0 }
 0x55c   :  { %v631_v9 = vstv %s6635_s8 }
 0x55d   :  { %v632_v46 = vsel %vm6547_vm11, %v631_v9, %v629_v13  ;;  %vm832_vm11 = vcmp.eq.s32.totalorder %v4619_v17, 3 }
 0x5e3   :  { %v645_v55 = vpop.xlane.xlu1 %644 }
 0x5e4   :  { %v646_v24 = vrot.slane %v645_v55, 4 }
 0x5e6   :  { %v647_v40 = vmax.f32 %v645_v55, %v646_v24 }
 0x5e8   :  { %v648_v14 = vrot.slane %v647_v40, 2 }
 0x5ea   :  { %v649_v42 = vmax.f32 %v647_v40, %v648_v14 }
 0x5ec   :  { %v650_v15 = vrot.slane %v649_v42, 1 }
 0x5ee   :  { %v651_v28 = vmax.f32 %v649_v42, %v650_v15 }
 0x5f0   :  { %4053 = vpush %v651_v28 }
 0x621   :  { %s4684_s1 = spop %4053 }
 0x622   :  { %v653_v43 = vstv %s4684_s1  ;;  %p680_p2 = scmp.gt.f32.partialorder %s4684_s1, -inf }
 0x623   :  { %vm654_vm14 = vcmp.eq.f32.partialorder %v4681_v37, %v653_v43 }
 0x624   :  { %v655_v44 = vsel %vm654_vm14, %v4671_v63, 1024  ;;  %s4714_s11 = scalar_select %p680_p2, %s4684_s1, -inf  ;;  %vm6545_vm14 = vcmp.eq.s32.totalorder %v4619_v17, 5 }
 0x625   :  { %v657_v5 = vshra.s32 %v655_v44, 16  ;;  %v656_v19 = vand.u32 65535, %v655_v44  ;;  %p705_p11 = pneg %p680_p2 }
 0x626   :  { %v691_v12 = vstv %s4714_s11 }
 0x627   :  { %v659_v18 = vcvt.s32.f32 %v657_v5  ;;  %v658_v22 = vcvt.s32.f32 %v656_v19  ;;  %v692_v16 = vsel %vm6546_vm13, %v691_v12, %v632_v46 }
 0x629   :  { %660 = vmin.xlane.f32.xlu0 %v659_v18 }
 0x6b6   :  { %v661_v62 = vpop.xlane.xlu0 %660 }
 0x6b7   :  { %vm662_vm15 = vcmp.eq.f32.partialorder %v659_v18, %v661_v62  ;;  %v667_v33 = vcvt.f32.s32 %v661_v62 }
 0x6b8   :  { %v663_v23 = vsel %vm662_vm15, %v658_v22, inf }
 0x6b9   :  { %664 = vmin.xlane.f32.xlu1 %v663_v23  ;;  %v668_v27 = vshll.u32 %v667_v33, 16 }
 0x746   :  { %v665_v32 = vpop.xlane.xlu1 %664 }
 0x747   :  { %v666_v47 = vcvt.f32.s32 %v665_v32 }
 0x749   :  { %v669_v60 = vadd.s32 %v668_v27, %v666_v47 }
 0x74b   :  { %v670_v51 = vrot.slane %v669_v60, 4 }
 0x74d   :  { %vm671_vm0 = vcmp.lt.s32.totalorder %v669_v60, %v670_v51 }
 0x74e   :  { %v672_v52 = vsel %vm671_vm0, %v669_v60, %v670_v51 }
 0x74f   :  { %v673_v54 = vrot.slane %v672_v52, 2 }
 0x751   :  { %vm674_vm3 = vcmp.lt.s32.totalorder %v672_v52, %v673_v54 }
 0x752   :  { %v675_v56 = vsel %vm674_vm3, %v672_v52, %v673_v54 }
 0x753   :  { %v676_v57 = vrot.slane %v675_v56, 1 }
 0x755   :  { %vm677_vm4 = vcmp.lt.s32.totalorder %v675_v56, %v676_v57 }
 0x756   :  { %v678_v34 = vsel %vm677_vm4, %v675_v56, %v676_v57 }
 0x757   :  { %4055 = vpush %v678_v34 }
 0x788   :  { %s4718_s12 = spop %4055 }
 0x789   :  { %s681_s13 = sand.u32 127, %s4718_s12  ;;  %v712_v8 = vstv %s4718_s12  ;;  %s683_s16 = sshra.s32 %s4718_s12, 7 }
 0x78a   :  { %s6637_s13 = smov (!%p680_p2, %s681_s13), 0  ;;  %vm713_vm12 = vcmp.eq.s32.totalorder %v4671_v63, %v712_v8  ;;  %s6639_s16 = smov (!%p680_p2, %s683_s16), 0 }
 0x78b   :  { %v4734_v41 = vsel %vm713_vm12, -inf, %v4681_v37  ;;  %s694_s14 = scvt.s32.f32 %s6637_s13  ;;  %p686_p3 = scmp.eq.s32.totalorder %s6639_s16, 0 }
 0x78c   :  { %715 = vmax.xlane.f32.xlu0 %v4734_v41  ;;  %s698_s19 = scvt.s32.f32 %s6639_s16  ;;  %p704_p8 = scmp.eq.s32.totalorder %s6637_s13, 127 }
 0x78d   :  { %v695_v7 = vstv %s694_s14  ;;  %s687_s17 = scalar_select %p686_p3, 0.0, -inf }
 0x78e   :  { %v696_v20 = vsel %vm6545_vm14, %v695_v7, %v692_v16  ;;  %v699_v33 = vstv %s698_s19  ;;  %vm772_vm14 = vcmp.eq.s32.totalorder %v4619_v17, 14  ;;  %p706_p3 = por %p705_p11, %p704_p8 }
 0x78f   :  { %s688_s18 = ssub.f32 %s4684_s1, %s687_s17 }
 0x790   :  { %s6653_s11 = smov (%p706_p3, %s4714_s11), -inf }
 0x791   :  { %s6641_s18 = smov (!%p680_p2, %s688_s18), 0.0 }
 0x792   :  { %v702_v27 = vstv %s6641_s18 }
 0x819   :  { %v716_v25 = vpop.xlane.xlu0 %715 }
 0x81a   :  { %v717_v26 = vrot.slane %v716_v25, 4 }
 0x81c   :  { %v718_v29 = vmax.f32 %v716_v25, %v717_v26 }
 0x81e   :  { %v719_v48 = vrot.slane %v718_v29, 2 }
 0x820   :  { %v720_v30 = vmax.f32 %v718_v29, %v719_v48 }
 0x822   :  { %v721_v53 = vrot.slane %v720_v30, 1 }
 0x824   :  { %v722_v10 = vmax.f32 %v720_v30, %v721_v53 }
 0x826   :  { %4057 = vpush %v722_v10 }
 0x857   :  { %s4747_s15 = spop %4057 }
 0x858   :  { %v724_v35 = vstv %s4747_s15  ;;  %p751_p4 = scmp.gt.f32.partialorder %s4747_s15, -inf }
 0x859   :  { %vm725_vm15 = vcmp.eq.f32.partialorder %v4734_v41, %v724_v35 }
 0x85a   :  { %v726_v11 = vsel %vm725_vm15, %v4671_v63, 1024  ;;  %s4762_s20 = scalar_select %p751_p4, %s4747_s15, -inf  ;;  %vm6544_vm15 = vcmp.eq.s32.totalorder %v4619_v17, 9 }
 0x85b   :  { %v728_v36 = vshra.s32 %v726_v11, 16  ;;  %v727_v55 = vand.u32 65535, %v726_v11  ;;  %v700_v51 = vsel %vm6544_vm15, %v699_v33, %v696_v20  ;;  %p776_p1 = pneg %p751_p4 }
 0x85c   :  { %v762_v47 = vstv %s4762_s20 }
 0x85d   :  { %v730_v37 = vcvt.s32.f32 %v728_v36  ;;  %v729_v40 = vcvt.s32.f32 %v727_v55  ;;  %v637_v55 = vstv %s6633_s3 }
 0x85f   :  { %731 = vmin.xlane.f32.xlu1 %v730_v37 }
 0x8ec   :  { %v732_v24 = vpop.xlane.xlu1 %731 }
 0x8ed   :  { %vm733_vm0 = vcmp.eq.f32.partialorder %v730_v37, %v732_v24  ;;  %v738_v42 = vcvt.f32.s32 %v732_v24  ;;  %v708_v24 = vstv %s6637_s13 }
 0x8ee   :  { %v734_v14 = vsel %vm733_vm0, %v729_v40, inf  ;;  %vm6543_vm0 = vcmp.eq.s32.totalorder %v4619_v17, 13 }
 0x8ef   :  { %735 = vmin.xlane.f32.xlu0 %v734_v14  ;;  %v739_v28 = vshll.u32 %v738_v42, 16  ;;  %v703_v52 = vsel %vm6543_vm0, %v702_v27, %v700_v51  ;;  %vm768_vm0 = vcmp.eq.s32.totalorder %v4619_v17, 10  ;;  %v857_v27 = vstv %s6653_s11 }
 0x97c   :  { %v736_v15 = vpop.xlane.xlu0 %735 }
 0x97d   :  { %v737_v43 = vcvt.f32.s32 %v736_v15 }
 0x97f   :  { %v740_v44 = vadd.s32 %v739_v28, %v737_v43 }
 0x981   :  { %v741_v5 = vrot.slane %v740_v44, 4 }
 0x983   :  { %vm742_vm3 = vcmp.lt.s32.totalorder %v740_v44, %v741_v5 }
 0x984   :  { %v743_v18 = vsel %vm742_vm3, %v740_v44, %v741_v5 }
 0x985   :  { %v744_v19 = vrot.slane %v743_v18, 2 }
 0x987   :  { %vm745_vm4 = vcmp.lt.s32.totalorder %v743_v18, %v744_v19 }
 0x988   :  { %v746_v62 = vsel %vm745_vm4, %v743_v18, %v744_v19  ;;  %vm6542_vm4 = vcmp.eq.s32.totalorder %v4619_v17, 2 }
 0x989   :  { %v747_v22 = vrot.slane %v746_v62, 1  ;;  %v763_v54 = vsel %vm6542_vm4, %v762_v47, %v703_v52 }
 0x98b   :  { %vm748_vm12 = vcmp.lt.s32.totalorder %v746_v62, %v747_v22 }
 0x98c   :  { %v749_v23 = vsel %vm748_vm12, %v746_v62, %v747_v22  ;;  %vm6541_vm12 = vcmp.eq.s32.totalorder %v4619_v17, 6 }
 0x98d   :  { %4059 = vpush %v749_v23 }
 0x9be   :  { %s4764_s21 = spop %4059 }
 0x9bf   :  { %s752_s22 = sand.u32 127, %s4764_s21  ;;  %v783_v32 = vstv %s4764_s21  ;;  %s754_s25 = sshra.s32 %s4764_s21, 7 }
 0x9c0   :  { %s6643_s22 = smov (!%p751_p4, %s752_s22), 0  ;;  %vm784_vm3 = vcmp.eq.s32.totalorder %v4671_v63, %v783_v32  ;;  %s6645_s25 = smov (!%p751_p4, %s754_s25), 0  ;;  %v855_v32 = vstv %s6651_s7 }
 0x9c1   :  { %v785_v60 = vsel %vm784_vm3, -inf, %v4734_v41  ;;  %s765_s23 = scvt.s32.f32 %s6643_s22  ;;  %p757_p5 = scmp.eq.s32.totalorder %s6645_s25, 0  ;;  %v779_v40 = vstv %s6643_s22 }
 0x9c2   :  { %786 = vmax.xlane.f32.xlu1 %v785_v60  ;;  %s769_s28 = scvt.s32.f32 %s6645_s25  ;;  %p775_p10 = scmp.eq.s32.totalorder %s6643_s22, 127 }
 0x9c3   :  { %v766_v56 = vstv %s765_s23  ;;  %s758_s26 = scalar_select %p757_p5, 0.0, -inf }
 0x9c4   :  { %v4788_v57 = vsel %vm6541_vm12, %v766_v56, %v763_v54  ;;  %v770_v14 = vstv %s769_s28  ;;  %p777_p0 = por %p776_p1, %p775_p10 }
 0x9c5   :  { %s759_s27 = ssub.f32 %s4747_s15, %s758_s26  ;;  %v771_v28 = vsel %vm768_vm0, %v770_v14, %v4788_v57 }
 0x9c6   :  { %s6655_s20 = smov (%p777_p0, %s4762_s20), -inf }
 0x9c7   :  { %s6647_s27 = smov (!%p751_p4, %s759_s27), 0.0  ;;  %v859_v47 = vstv %s6655_s20 }
 0x9c8   :  { %v773_v42 = vstv %s6647_s27 }
 0x9c9   :  { %v774_v5 = vsel %vm772_vm14, %v773_v42, %v771_v28 }
 0xa4f   :  { %v787_v34 = vpop.xlane.xlu1 %786 }
 0xa50   :  { %v788_v59 = vrot.slane %v787_v34, 4 }
 0xa52   :  { %v789_v39 = vmax.f32 %v787_v34, %v788_v59 }
 0xa54   :  { %v790_v61 = vrot.slane %v789_v39, 2 }
 0xa56   :  { %v791_v3 = vmax.f32 %v789_v39, %v790_v61 }
 0xa58   :  { %v792_v4 = vrot.slane %v791_v3, 1 }
 0xa5a   :  { %v793_v8 = vmax.f32 %v791_v3, %v792_v4 }
 0xa5c   :  { %4061 = vpush %v793_v8 }
 0xa8d   :  { %s4790_s24 = spop %4061 }
 0xa8e   :  { %v795_v9 = vstv %s4790_s24  ;;  %p822_p6 = scmp.gt.f32.partialorder %s4790_s24, -inf }
 0xa8f   :  { %vm796_vm3 = vcmp.eq.f32.partialorder %v785_v60, %v795_v9  ;;  %v856_v60 = vsel %vm476_vm2, %v855_v32, -inf }
 0xa90   :  { %v797_v12 = vsel %vm796_vm3, %v4671_v63, 1024  ;;  %s4808_s0 = scalar_select %p822_p6, %s4790_s24, -inf  ;;  %v858_v52 = vsel %vm481_vm5, %v857_v27, %v856_v60 }
 0xa91   :  { %v799_v41 = vshra.s32 %v797_v12, 16  ;;  %v798_v46 = vand.u32 65535, %v797_v12  ;;  %p847_p5 = pneg %p822_p6  ;;  %v860_v54 = vsel %vm483_vm6, %v859_v47, %v858_v52 }
 0xa92   :  { %v833_v15 = vstv %s4808_s0 }
 0xa93   :  { %v801_v13 = vcvt.s32.f32 %v799_v41  ;;  %v800_v7 = vcvt.s32.f32 %v798_v46  ;;  %v834_v19 = vsel %vm832_vm11, %v833_v15, %v774_v5 }
 0xa95   :  { %802 = vmin.xlane.f32.xlu0 %v801_v13 }
 0xb22   :  { %v803_v16 = vpop.xlane.xlu0 %802 }
 0xb23   :  { %vm804_vm12 = vcmp.eq.f32.partialorder %v801_v13, %v803_v16  ;;  %v809_v25 = vcvt.f32.s32 %v803_v16 }
 0xb24   :  { %v805_v20 = vsel %vm804_vm12, %v800_v7, inf }
 0xb25   :  { %806 = vmin.xlane.f32.xlu1 %v805_v20  ;;  %v810_v29 = vshll.u32 %v809_v25, 16 }
 0xbb2   :  { %v807_v26 = vpop.xlane.xlu1 %806 }
 0xbb3   :  { %v808_v48 = vcvt.f32.s32 %v807_v26 }
 0xbb5   :  { %v811_v30 = vadd.s32 %v810_v29, %v808_v48 }
 0xbb7   :  { %v812_v53 = vrot.slane %v811_v30, 4 }
 0xbb9   :  { %vm813_vm3 = vcmp.lt.s32.totalorder %v811_v30, %v812_v53 }
 0xbba   :  { %v814_v10 = vsel %vm813_vm3, %v811_v30, %v812_v53  ;;  %vm709_vm3 = vcmp.eq.s32.totalorder %v4619_v17, %v708_v24 }
 0xbbb   :  { %v815_v35 = vrot.slane %v814_v10, 2  ;;  %vm710_vm13 = vmand %vm481_vm5, %vm709_vm3 }
 0xbbd   :  { %vm816_vm4 = vcmp.lt.s32.totalorder %v814_v10, %v815_v35 }
 0xbbe   :  { %v817_v11 = vsel %vm816_vm4, %v814_v10, %v815_v35  ;;  %vm638_vm4 = vcmp.eq.s32.totalorder %v4619_v17, %v637_v55 }
 0xbbf   :  { %v818_v36 = vrot.slane %v817_v11, 1  ;;  %vm639_vm15 = vmand %vm476_vm2, %vm638_vm4  ;;  %vm835_vm4 = vcmp.eq.s32.totalorder %v4619_v17, 7 }
 0xbc0   :  { %v640_v44 = vsel %vm639_vm15, 1.0, %v4305_v50 }
 0xbc1   :  { %vm819_vm12 = vcmp.lt.s32.totalorder %v817_v11, %v818_v36  ;;  %v711_v18 = vsel %vm710_vm13, 1.0, %v640_v44 }
 0xbc2   :  { %v820_v37 = vsel %vm819_vm12, %v817_v11, %v818_v36  ;;  %vm780_vm12 = vcmp.eq.s32.totalorder %v4619_v17, %v779_v40 }
 0xbc3   :  { %4063 = vpush %v820_v37  ;;  %vm781_vm10 = vmand %vm483_vm6, %vm780_vm12 }
 0xbc4   :  { %v782_v22 = vsel %vm781_vm10, 1.0, %v711_v18 }
 0xbf4   :  { %s4811_s29 = spop %4063 }
 0xbf5   :  { %s823_s30 = sand.u32 127, %s4811_s29 }
 0xbf6   :  { %s6649_s30 = smov (!%p822_p6, %s823_s30), 0 }
 0xbf7   :  { %s836_s5 = scvt.s32.f32 %s6649_s30  ;;  %v850_v43 = vstv %s6649_s30  ;;  %p846_p12 = scmp.eq.s32.totalorder %s6649_s30, 127 }
 0xbf8   :  { %vm851_vm3 = vcmp.eq.s32.totalorder %v4619_v17, %v850_v43 }
 0xbf9   :  { %v837_v62 = vstv %s836_s5  ;;  %vm852_vm12 = vmand %vm485_vm7, %vm851_vm3  ;;  %p848_p2 = por %p847_p5, %p846_p12 }
 0xbfa   :  { %v4845_v23 = vsel %vm835_vm4, %v837_v62, %v834_v19  ;;  %v853_v33 = vsel %vm852_vm12, 1.0, %v782_v22 }
 0xbfb   :  { %3637 = vmatmul.mubr.f32.vlgmr.msra.gmra.mrb[16].mxu0 %v853_v33  ;;  %s6657_s0 = smov (%p848_p2, %s4808_s0), -inf }
 0xbfc   :  { %3931 = vmatpush3.bf16.msra.mxu0 %v4557_v38  ;;  %3706 = vmatprep.mubr.msk.f32.mxu0 %vm4304_vm1, %v4305_v50  ;;  %v861_v51 = vstv %s6657_s0 }
 0xbfd   :  { %3932 = vmatprep.subr.bf16.mxu0 %v4303_v49  ;;  %v862_v56 = vsel %vm485_vm7, %v861_v51, %v860_v54 }
 0xc00   :  { %3934 = vmatpush3.bf16.msra.mxu0 %v4567_v0 }
 0xc01   :  { %3935 = vmatprep.subr.bf16.mxu0 %v4303_v49 }
 0xc04   :  { %3937 = vmatpush3.bf16.msra.mxu0 %v4577_v2 }
 0xc05   :  { %3938 = vmatprep.subr.bf16.mxu0 %v4303_v49 }
 0xc08   :  { %3940 = vmatpush3.bf16.msra.mxu0 %v4587_v6 }
 0xc09   :  { %3941 = vmatprep.subr.bf16.mxu0 %v4303_v49 }
 0xc0c   :  { %3943 = vmatpush3.bf16.msra.mxu0 %v4597_v31 }
 0xc0d   :  { %3944 = vmatprep.subr.bf16.mxu0 %v4303_v49 }
 0xc10   :  { %3946 = vmatpush3.bf16.msra.mxu0 %v4607_v1 }
 0xc11   :  { %3947 = vmatprep.subr.bf16.mxu0 %v4303_v49 }
 0xc14   :  { %3949 = vmatpush3.bf16.msra.mxu0 %v4621_v45 }
 0xc15   :  { %3950 = vmatprep.subr.bf16.mxu0 %v4303_v49 }
 0xc18   :  { %3952 = vmatpush3.bf16.msra.mxu0 %v4632_v21 }
 0xc19   :  { %3977 = vmatprep.subr.bf16.mxu0 %v4303_v49 }
 0xcce   :  { %v929_v57 = vpop.f32.mrb[16].mxu0 }
 0xccf   :  { %v930_v34 = vadd.f32 %v929_v57, %v862_v56  ;;  %v3638_v59 = vpop.f32.mrb[17].mxu0 }
 0xcd1   :  { %933 = vmax.xlane.f32.xlu0 %v930_v34 }
 0xd5e   :  { %v934_v39 = vpop.xlane.xlu0 %933 }
 0xd5f   :  { %v935_v61 = vrot.slane %v934_v39, 4 }
 0xd61   :  { %v936_v3 = vmax.f32 %v934_v39, %v935_v61 }
 0xd63   :  { %v937_v4 = vrot.slane %v936_v3, 2 }
 0xd65   :  { %v938_v8 = vmax.f32 %v936_v3, %v937_v4 }
 0xd67   :  { %v939_v9 = vrot.slane %v938_v8, 1 }
 0xd69   :  { %v940_v12 = vmax.f32 %v938_v8, %v939_v9 }
 0xd6b   :  { %4065 = vpush %v940_v12 }
 0xd9c   :  { %s4901_s2 = spop %4065 }
 0xd9d   :  { %v942_v41 = vstv %s4901_s2  ;;  %p969_p4 = scmp.gt.f32.partialorder %s4901_s2, -inf }
 0xd9e   :  { %vm943_vm10 = vcmp.eq.f32.partialorder %v930_v34, %v942_v41 }
 0xd9f   :  { %v944_v13 = vsel %vm943_vm10, %v4671_v63, 1024  ;;  %s4933_s13 = scalar_select %p969_p4, %s4901_s2, -inf }
 0xda0   :  { %v946_v46 = vshra.s32 %v944_v13, 16  ;;  %v945_v7 = vand.u32 65535, %v944_v13 }
 0xda1   :  { %v983_v8 = vstv %s4933_s13 }
 0xda2   :  { %v948_v16 = vcvt.s32.f32 %v946_v46  ;;  %v947_v25 = vcvt.s32.f32 %v945_v7  ;;  %v984_v12 = vsel %vm619_vm8, %v983_v8, 0.0 }
 0xda4   :  { %949 = vmin.xlane.f32.xlu1 %v948_v16 }
 0xe31   :  { %v950_v20 = vpop.xlane.xlu1 %949 }
 0xe32   :  { %vm951_vm13 = vcmp.eq.f32.partialorder %v948_v16, %v950_v20  ;;  %v956_v29 = vcvt.f32.s32 %v950_v20 }
 0xe33   :  { %v952_v26 = vsel %vm951_vm13, %v947_v25, inf }
 0xe34   :  { %953 = vmin.xlane.f32.xlu0 %v952_v26  ;;  %v957_v30 = vshll.u32 %v956_v29, 16 }
 0xec1   :  { %v954_v48 = vpop.xlane.xlu0 %953 }
 0xec2   :  { %v955_v53 = vcvt.f32.s32 %v954_v48 }
 0xec4   :  { %v958_v10 = vadd.s32 %v957_v30, %v955_v53 }
 0xec6   :  { %v959_v35 = vrot.slane %v958_v10, 4 }
 0xec8   :  { %vm960_vm15 = vcmp.lt.s32.totalorder %v958_v10, %v959_v35 }
 0xec9   :  { %v961_v11 = vsel %vm960_vm15, %v958_v10, %v959_v35 }
 0xeca   :  { %v962_v36 = vrot.slane %v961_v11, 2 }
 0xecc   :  { %vm963_vm3 = vcmp.lt.s32.totalorder %v961_v11, %v962_v36 }
 0xecd   :  { %v964_v37 = vsel %vm963_vm3, %v961_v11, %v962_v36 }
 0xece   :  { %v965_v55 = vrot.slane %v964_v37, 1 }
 0xed0   :  { %vm966_vm12 = vcmp.lt.s32.totalorder %v964_v37, %v965_v55 }
 0xed1   :  { %v967_v24 = vsel %vm966_vm12, %v964_v37, %v965_v55 }
 0xed2   :  { %4067 = vpush %v967_v24 }
 0xf03   :  { %s4905_s1 = spop %4067 }
 0xf04   :  { %v1001_v40 = vstv %s4905_s1  ;;  %s972_s6 = sshra.s32 %s4905_s1, 7  ;;  %s970_s9 = sand.u32 127, %s4905_s1 }
 0xf05   :  { %vm1002_vm10 = vcmp.eq.s32.totalorder %v4671_v63, %v1001_v40  ;;  %s6659_s6 = smov (!%p969_p4, %s972_s6), 0  ;;  %s6661_s9 = smov (!%p969_p4, %s970_s9), 0 }
 0xf06   :  { %v4909_v14 = vsel %vm1002_vm10, -inf, %v930_v34  ;;  %p975_p7 = scmp.eq.s32.totalorder %s6659_s6, 2  ;;  %p977_p8 = scmp.eq.s32.totalorder %s6659_s6, 1 }
 0xf07   :  { %1004 = vmax.xlane.f32.xlu1 %v4909_v14  ;;  %p979_p9 = scmp.eq.s32.totalorder %s6659_s6, 0  ;;  %s985_s14 = scvt.s32.f32 %s6661_s9 }
 0xf08   :  { %s976_s8 = scalar_select %p975_p7, %s6655_s20, %s6657_s0 }
 0xf09   :  { %s988_s16 = scvt.s32.f32 %s6659_s6  ;;  %v986_v9 = vstv %s985_s14  ;;  %s825_s14 = sshra.s32 %s4811_s29, 7 }
 0xf0a   :  { %s978_s10 = scalar_select %p977_p8, %s6653_s11, %s976_s8  ;;  %v987_v41 = vsel %vm6550_vm9, %v986_v9, %v984_v12 }
 0xf0b   :  { %v989_v13 = vstv %s988_s16  ;;  %s6675_s14 = smov (!%p822_p6, %s825_s14), 0 }
 0xf0c   :  { %s980_s12 = scalar_select %p979_p9, %s6651_s7, %s978_s10 }
 0xf0d   :  { %p828_p5 = scmp.eq.s32.totalorder %s6675_s14, 0 }
 0xf0e   :  { %s981_s15 = ssub.f32 %s4901_s2, %s980_s12 }
 0xf10   :  { %s6663_s15 = smov (!%p969_p4, %s981_s15), 0.0 }
 0xf11   :  { %v991_v16 = vstv %s6663_s15 }
 0xf94   :  { %v1005_v42 = vpop.xlane.xlu1 %1004 }
 0xf95   :  { %v1006_v15 = vrot.slane %v1005_v42, 4 }
 0xf97   :  { %v1007_v28 = vmax.f32 %v1005_v42, %v1006_v15 }
 0xf99   :  { %v1008_v43 = vrot.slane %v1007_v28, 2 }
 0xf9b   :  { %v1009_v44 = vmax.f32 %v1007_v28, %v1008_v43 }
 0xf9d   :  { %v1010_v5 = vrot.slane %v1009_v44, 1 }
 0xf9f   :  { %v1011_v18 = vmax.f32 %v1009_v44, %v1010_v5 }
 0xfa1   :  { %4069 = vpush %v1011_v18 }
 0xfd2   :  { %s4912_s3 = spop %4069 }
 0xfd3   :  { %v1013_v19 = vstv %s4912_s3  ;;  %p1040_p10 = scmp.gt.f32.partialorder %s4912_s3, -inf }
 0xfd4   :  { %vm1014_vm13 = vcmp.eq.f32.partialorder %v4909_v14, %v1013_v19 }
 0xfd5   :  { %v1015_v62 = vsel %vm1014_vm13, %v4671_v63, 1024  ;;  %s4944_s17 = scalar_select %p1040_p10, %s4912_s3, -inf }
 0xfd6   :  { %v1017_v22 = vshra.s32 %v1015_v62, 16  ;;  %v1016_v32 = vand.u32 65535, %v1015_v62 }
 0xfd7   :  { %v1054_v7 = vstv %s4944_s17 }
 0xfd8   :  { %v1019_v33 = vcvt.s32.f32 %v1017_v22  ;;  %v1018_v47 = vcvt.s32.f32 %v1016_v32 }
 0xfda   :  { %1020 = vmin.xlane.f32.xlu0 %v1019_v33 }
0x1067   :  { %v1021_v27 = vpop.xlane.xlu0 %1020 }
0x1068   :  { %vm1022_vm15 = vcmp.eq.f32.partialorder %v1019_v33, %v1021_v27  ;;  %v1027_v51 = vcvt.f32.s32 %v1021_v27 }
0x1069   :  { %v1023_v60 = vsel %vm1022_vm15, %v1018_v47, inf  ;;  %vm6551_vm15 = vcmp.eq.s32.totalorder %v4619_v17, 8 }
0x106a   :  { %1024 = vmin.xlane.f32.xlu1 %v1023_v60  ;;  %v1028_v54 = vshll.u32 %v1027_v51, 16  ;;  %v990_v25 = vsel %vm6551_vm15, %v989_v13, %v987_v41 }
0x10f7   :  { %v1025_v52 = vpop.xlane.xlu1 %1024 }
0x10f8   :  { %v1026_v56 = vcvt.f32.s32 %v1025_v52 }
0x10fa   :  { %v1029_v57 = vadd.s32 %v1028_v54, %v1026_v56 }
0x10fc   :  { %v1030_v34 = vrot.slane %v1029_v57, 4 }
0x10fe   :  { %vm1031_vm3 = vcmp.lt.s32.totalorder %v1029_v57, %v1030_v34 }
0x10ff   :  { %v1032_v59 = vsel %vm1031_vm3, %v1029_v57, %v1030_v34  ;;  %vm6552_vm3 = vcmp.eq.s32.totalorder %v4619_v17, 12 }
0x1100   :  { %v1033_v39 = vrot.slane %v1032_v59, 2  ;;  %v992_v26 = vsel %vm6552_vm3, %v991_v16, %v990_v25 }
0x1102   :  { %vm1034_vm12 = vcmp.lt.s32.totalorder %v1032_v59, %v1033_v39 }
0x1103   :  { %v1035_v61 = vsel %vm1034_vm12, %v1032_v59, %v1033_v39  ;;  %vm6553_vm12 = vcmp.eq.s32.totalorder %v4619_v17, 1 }
0x1104   :  { %v1036_v3 = vrot.slane %v1035_v61, 1  ;;  %v1055_v29 = vsel %vm6553_vm12, %v1054_v7, %v992_v26 }
0x1106   :  { %vm1037_vm10 = vcmp.lt.s32.totalorder %v1035_v61, %v1036_v3 }
0x1107   :  { %v1038_v4 = vsel %vm1037_vm10, %v1035_v61, %v1036_v3  ;;  %vm6554_vm10 = vcmp.eq.s32.totalorder %v4619_v17, 5 }
0x1108   :  { %4071 = vpush %v1038_v4 }
0x1139   :  { %s4948_s18 = spop %4071 }
0x113a   :  { %s1041_s19 = sand.u32 127, %s4948_s18  ;;  %v1072_v46 = vstv %s4948_s18  ;;  %s1043_s23 = sshra.s32 %s4948_s18, 7 }
0x113b   :  { %s6665_s19 = smov (!%p1040_p10, %s1041_s19), 0  ;;  %vm1073_vm13 = vcmp.eq.s32.totalorder %v4671_v63, %v1072_v46  ;;  %s6667_s23 = smov (!%p1040_p10, %s1043_s23), 0 }
0x113c   :  { %v4961_v20 = vsel %vm1073_vm13, -inf, %v4909_v14  ;;  %s1056_s21 = scvt.s32.f32 %s6665_s19  ;;  %p1046_p11 = scmp.eq.s32.totalorder %s6667_s23, 2 }
0x113d   :  { %1075 = vmax.xlane.f32.xlu0 %v4961_v20  ;;  %p1048_p12 = scmp.eq.s32.totalorder %s6667_s23, 1  ;;  %p1050_p13 = scmp.eq.s32.totalorder %s6667_s23, 0 }
0x113e   :  { %v1057_v48 = vstv %s1056_s21  ;;  %s1047_s25 = scalar_select %p1046_p11, %s6655_s20, %s6657_s0 }
0x113f   :  { %v1058_v30 = vsel %vm6554_vm10, %v1057_v48, %v1055_v29  ;;  %s1059_s30 = scvt.s32.f32 %s6667_s23  ;;  %p993_p11 = scmp.eq.s32.totalorder %s6661_s9, 127 }
0x1140   :  { %s1049_s26 = scalar_select %p1048_p12, %s6653_s11, %s1047_s25 }
0x1141   :  { %v1060_v52 = vstv %s1059_s30  ;;  %s829_s18 = scalar_select %p828_p5, 0.0, -inf }
0x1142   :  { %s1051_s27 = scalar_select %p1050_p13, %s6651_s7, %s1049_s26 }
0x1143   :  { %s830_s23 = ssub.f32 %s4790_s24, %s829_s18  ;;  %p1064_p12 = scmp.eq.s32.totalorder %s6665_s19, 127 }
0x1144   :  { %s1052_s28 = ssub.f32 %s4912_s3, %s1051_s27  ;;  %p994_p13 = pneg %p969_p4 }
0x1145   :  { %s6677_s23 = smov (!%p822_p6, %s830_s23), 0.0  ;;  %p1065_p5 = pneg %p1040_p10 }
0x1146   :  { %s6669_s28 = smov (!%p1040_p10, %s1052_s28), 0.0 }
0x1147   :  { %v1062_v56 = vstv %s6669_s28 }
0x11ca   :  { %v1076_v53 = vpop.xlane.xlu0 %1075 }
0x11cb   :  { %v1077_v10 = vrot.slane %v1076_v53, 4 }
0x11cd   :  { %v1078_v35 = vmax.f32 %v1076_v53, %v1077_v10 }
0x11cf   :  { %v1079_v11 = vrot.slane %v1078_v35, 2 }
0x11d1   :  { %v1080_v36 = vmax.f32 %v1078_v35, %v1079_v11 }
0x11d3   :  { %v1081_v37 = vrot.slane %v1080_v36, 1 }
0x11d5   :  { %v1082_v55 = vmax.f32 %v1080_v36, %v1081_v37 }
0x11d7   :  { %4073 = vpush %v1082_v55 }
0x1208   :  { %s4973_s22 = spop %4073 }
0x1209   :  { %v1084_v24 = vstv %s4973_s22  ;;  %p1111_p1 = scmp.gt.f32.partialorder %s4973_s22, -inf }
0x120a   :  { %vm1085_vm13 = vcmp.eq.f32.partialorder %v4961_v20, %v1084_v24 }
0x120b   :  { %v1086_v40 = vsel %vm1085_vm13, %v4671_v63, 1024  ;;  %s4992_s5 = scalar_select %p1111_p1, %s4973_s22, -inf }
0x120c   :  { %v1088_v14 = vshra.s32 %v1086_v40, 16  ;;  %v1087_v15 = vand.u32 65535, %v1086_v40 }
0x120d   :  { %v1125_v57 = vstv %s4992_s5 }
0x120e   :  { %v1090_v42 = vcvt.s32.f32 %v1088_v14  ;;  %v1089_v43 = vcvt.s32.f32 %v1087_v15 }
0x1210   :  { %1091 = vmin.xlane.f32.xlu1 %v1090_v42 }
0x129d   :  { %v1092_v28 = vpop.xlane.xlu1 %1091 }
0x129e   :  { %vm1093_vm15 = vcmp.eq.f32.partialorder %v1090_v42, %v1092_v28  ;;  %v1098_v5 = vcvt.f32.s32 %v1092_v28  ;;  %v997_v28 = vstv %s6661_s9 }
0x129f   :  { %v1094_v44 = vsel %vm1093_vm15, %v1089_v43, inf  ;;  %vm6555_vm15 = vcmp.eq.s32.totalorder %v4619_v17, 9  ;;  %v1068_v43 = vstv %s6665_s19 }
0x12a0   :  { %1095 = vmin.xlane.f32.xlu0 %v1094_v44  ;;  %v1099_v19 = vshll.u32 %v1098_v5, 16  ;;  %v1061_v59 = vsel %vm6555_vm15, %v1060_v52, %v1058_v30 }
0x132d   :  { %v1096_v18 = vpop.xlane.xlu0 %1095 }
0x132e   :  { %v1097_v62 = vcvt.f32.s32 %v1096_v18 }
0x1330   :  { %v1100_v22 = vadd.s32 %v1099_v19, %v1097_v62 }
0x1332   :  { %v1101_v33 = vrot.slane %v1100_v22, 4 }
0x1334   :  { %vm1102_vm3 = vcmp.lt.s32.totalorder %v1100_v22, %v1101_v33 }
0x1335   :  { %v1103_v32 = vsel %vm1102_vm3, %v1100_v22, %v1101_v33  ;;  %vm6556_vm3 = vcmp.eq.s32.totalorder %v4619_v17, 13 }
0x1336   :  { %v1104_v27 = vrot.slane %v1103_v32, 2  ;;  %v1063_v39 = vsel %vm6556_vm3, %v1062_v56, %v1061_v59 }
0x1338   :  { %vm1105_vm12 = vcmp.lt.s32.totalorder %v1103_v32, %v1104_v27 }
0x1339   :  { %v1106_v47 = vsel %vm1105_vm12, %v1103_v32, %v1104_v27  ;;  %vm6557_vm12 = vcmp.eq.s32.totalorder %v4619_v17, 2 }
0x133a   :  { %v1107_v60 = vrot.slane %v1106_v47, 1  ;;  %v1126_v61 = vsel %vm6557_vm12, %v1125_v57, %v1063_v39 }
0x133c   :  { %vm1108_vm10 = vcmp.lt.s32.totalorder %v1106_v47, %v1107_v60 }
0x133d   :  { %v1109_v51 = vsel %vm1108_vm10, %v1106_v47, %v1107_v60  ;;  %vm6558_vm10 = vcmp.eq.s32.totalorder %v4619_v17, 6 }
0x133e   :  { %4075 = vpush %v1109_v51 }
0x136f   :  { %s4994_s1 = spop %4075 }
0x1370   :  { %s1112_s6 = sand.u32 127, %s4994_s1  ;;  %v1143_v54 = vstv %s4994_s1  ;;  %s1114_s12 = sshra.s32 %s4994_s1, 7 }
0x1371   :  { %s6671_s6 = smov (!%p1111_p1, %s1112_s6), 0  ;;  %vm1144_vm13 = vcmp.eq.s32.totalorder %v4671_v63, %v1143_v54  ;;  %s6673_s12 = smov (!%p1111_p1, %s1114_s12), 0 }
0x1372   :  { %v1145_v34 = vsel %vm1144_vm13, -inf, %v4961_v20  ;;  %s1127_s8 = scvt.s32.f32 %s6671_s6  ;;  %p1117_p3 = scmp.eq.s32.totalorder %s6673_s12, 2  ;;  %v1139_v44 = vstv %s6671_s6 }
0x1373   :  { %1146 = vmax.xlane.f32.xlu1 %v1145_v34  ;;  %p1119_p0 = scmp.eq.s32.totalorder %s6673_s12, 1  ;;  %p1121_p2 = scmp.eq.s32.totalorder %s6673_s12, 0 }
0x1374   :  { %v1128_v3 = vstv %s1127_s8  ;;  %s1118_s15 = scalar_select %p1117_p3, %s6655_s20, %s6657_s0 }
0x1375   :  { %v5014_v4 = vsel %vm6558_vm10, %v1128_v3, %v1126_v61  ;;  %s1130_s29 = scvt.s32.f32 %s6673_s12  ;;  %s840_s1 = scvt.s32.f32 %s6675_s14 }
0x1376   :  { %s1120_s16 = scalar_select %p1119_p0, %s6653_s11, %s1118_s15 }
0x1377   :  { %v1131_v5 = vstv %s1130_s29  ;;  %v841_v57 = vstv %s840_s1  ;;  %p1135_p3 = scmp.eq.s32.totalorder %s6671_s6, 127 }
0x1378   :  { %s1122_s21 = scalar_select %p1121_p2, %s6651_s7, %s1120_s16  ;;  %v1132_v22 = vsel %vm768_vm0, %v1131_v5, %v5014_v4 }
0x1379   :  { %p995_p2 = por %p994_p13, %p993_p11 }
0x137a   :  { %s1123_s25 = ssub.f32 %s4973_s22, %s1122_s21 }
0x137b   :  { %s6693_s13 = smov (%p995_p2, %s4933_s13), -inf }
0x137c   :  { %s6679_s25 = smov (!%p1111_p1, %s1123_s25), 0.0 }
0x137d   :  { %v1133_v18 = vstv %s6679_s25 }
0x137e   :  { %v1134_v27 = vsel %vm772_vm14, %v1133_v18, %v1132_v22 }
0x1400   :  { %v1147_v8 = vpop.xlane.xlu1 %1146 }
0x1401   :  { %v1148_v9 = vrot.slane %v1147_v8, 4 }
0x1403   :  { %v1149_v12 = vmax.f32 %v1147_v8, %v1148_v9 }
0x1405   :  { %v1150_v41 = vrot.slane %v1149_v12, 2 }
0x1407   :  { %v1151_v13 = vmax.f32 %v1149_v12, %v1150_v41  ;;  %v1215_v12 = vstv %s6693_s13 }
0x1409   :  { %v1152_v46 = vrot.slane %v1151_v13, 1 }
0x140b   :  { %v1153_v16 = vmax.f32 %v1151_v13, %v1152_v46  ;;  %v1216_v46 = vsel %vm476_vm2, %v1215_v12, -inf }
0x140d   :  { %4077 = vpush %v1153_v16 }
0x143e   :  { %s5016_s10 = spop %4077 }
0x143f   :  { %v1155_v7 = vstv %s5016_s10  ;;  %p1182_p7 = scmp.gt.f32.partialorder %s5016_s10, -inf }
0x1440   :  { %vm1156_vm13 = vcmp.eq.f32.partialorder %v1145_v34, %v1155_v7  ;;  %v844_v34 = vstv %s6677_s23 }
0x1441   :  { %v1157_v20 = vsel %vm1156_vm13, %v4671_v63, 1024  ;;  %vm998_vm13 = vcmp.eq.s32.totalorder %v4619_v17, %v997_v28  ;;  %s5049_s26 = scalar_select %p1182_p7, %s5016_s10, -inf }
0x1442   :  { %v1159_v25 = vshra.s32 %v1157_v20, 16  ;;  %v1158_v29 = vand.u32 65535, %v1157_v20 }
0x1443   :  { %v1196_v62 = vstv %s5049_s26 }
0x1444   :  { %v1161_v26 = vcvt.s32.f32 %v1159_v25  ;;  %v1160_v30 = vcvt.s32.f32 %v1158_v29  ;;  %v1197_v60 = vsel %vm832_vm11, %v1196_v62, %v1134_v27 }
0x1446   :  { %1162 = vmin.xlane.f32.xlu0 %v1161_v26 }
0x14d3   :  { %v1163_v48 = vpop.xlane.xlu0 %1162 }
0x14d4   :  { %vm1164_vm15 = vcmp.eq.f32.partialorder %v1161_v26, %v1163_v48  ;;  %v1169_v10 = vcvt.f32.s32 %v1163_v48 }
0x14d5   :  { %v1165_v53 = vsel %vm1164_vm15, %v1160_v30, inf  ;;  %vm1069_vm15 = vcmp.eq.s32.totalorder %v4619_v17, %v1068_v43 }
0x14d6   :  { %1166 = vmin.xlane.f32.xlu1 %v1165_v53  ;;  %v1170_v11 = vshll.u32 %v1169_v10, 16 }
0x1563   :  { %v1167_v35 = vpop.xlane.xlu1 %1166 }
0x1564   :  { %v1168_v36 = vcvt.f32.s32 %v1167_v35 }
0x1566   :  { %v1171_v37 = vadd.s32 %v1170_v11, %v1168_v36 }
0x1568   :  { %v1172_v55 = vrot.slane %v1171_v37, 4 }
0x156a   :  { %vm1173_vm3 = vcmp.lt.s32.totalorder %v1171_v37, %v1172_v55 }
0x156b   :  { %v1174_v24 = vsel %vm1173_vm3, %v1171_v37, %v1172_v55  ;;  %vm1140_vm3 = vcmp.eq.s32.totalorder %v4619_v17, %v1139_v44 }
0x156c   :  { %v1175_v40 = vrot.slane %v1174_v24, 2 }
0x156e   :  { %vm1176_vm12 = vcmp.lt.s32.totalorder %v1174_v24, %v1175_v40 }
0x156f   :  { %v1177_v14 = vsel %vm1176_vm12, %v1174_v24, %v1175_v40  ;;  %vm999_vm12 = vmand %vm476_vm2, %vm998_vm13 }
0x1570   :  { %v1178_v42 = vrot.slane %v1177_v14, 1  ;;  %vm1141_vm13 = vmand %vm483_vm6, %vm1140_vm3  ;;  %v1000_v33 = vsel %vm999_vm12, 1.0, %v4305_v50  ;;  %vm839_vm12 = vcmp.eq.s32.totalorder %v4619_v17, 11 }
0x1571   :  { %v842_v59 = vsel %vm839_vm12, %v841_v57, %v4845_v23 }
0x1572   :  { %vm1179_vm10 = vcmp.lt.s32.totalorder %v1177_v14, %v1178_v42 }
0x1573   :  { %v1180_v15 = vsel %vm1179_vm10, %v1177_v14, %v1178_v42  ;;  %vm5061_vm10 = vmand %vm481_vm5, %vm1069_vm15 }
0x1574   :  { %4079 = vpush %v1180_v15  ;;  %v1071_v47 = vsel %vm5061_vm10, 1.0, %v1000_v33  ;;  %vm6549_vm10 = vcmp.eq.s32.totalorder %v4619_v17, 15 }
0x1575   :  { %v1142_v52 = vsel %vm1141_vm13, 1.0, %v1071_v47  ;;  %v845_v61 = vsel %vm6549_vm10, %v844_v34, %v842_v59 }
0x1576   :  { %v854_v8 = vsel %vm476_vm2, %v845_v61, 0.0 }
0x15a5   :  { %s4080_s27 = spop %4079 }
0x15a6   :  { %s1183_s24 = sand.u32 127, %s4080_s27  ;;  %s1185_s28 = sshra.s32 %s4080_s27, 7 }
0x15a7   :  { %s6681_s24 = smov (!%p1182_p7, %s1183_s24), 0  ;;  %s6683_s28 = smov (!%p1182_p7, %s1185_s28), 0 }
0x15a8   :  { %s1198_s30 = scvt.s32.f32 %s6681_s24  ;;  %v1210_v32 = vstv %s6681_s24  ;;  %p1188_p6 = scmp.eq.s32.totalorder %s6683_s28, 2 }
0x15a9   :  { %vm1211_vm15 = vcmp.eq.s32.totalorder %v4619_v17, %v1210_v32  ;;  %p1190_p8 = scmp.eq.s32.totalorder %s6683_s28, 1  ;;  %p1192_p9 = scmp.eq.s32.totalorder %s6683_s28, 0 }
0x15aa   :  { %v1199_v51 = vstv %s1198_s30  ;;  %vm1212_vm3 = vmand %vm485_vm7, %vm1211_vm15  ;;  %s6685_s20 = smov (!%p1188_p6, %s6655_s20), %s6657_s0  ;;  %s1201_s8 = scvt.s32.f32 %s6683_s28 }
0x15ab   :  { %v1200_v54 = vsel %vm835_vm4, %v1199_v51, %v1197_v60  ;;  %v1213_v56 = vsel %vm1212_vm3, 1.0, %v1142_v52  ;;  %s6687_s11 = smov (!%p1190_p8, %s6653_s11), %s6685_s20  ;;  %p1206_p0 = scmp.eq.s32.totalorder %s6681_s24, 127 }
0x15ac   :  { %3672 = vmatmul.mubr.f32.vlgmr.msra.gmra.mrb[2].mxu1 %v1213_v56  ;;  %s6689_s7 = smov (!%p1192_p9, %s6651_s7), %s6687_s11  ;;  %v1202_v39 = vstv %s1201_s8  ;;  %p1136_p6 = pneg %p1111_p1 }
0x15ad   :  { %3955 = vmatpush3.bf16.msra.mxu1 %v4557_v38  ;;  %3741 = vmatprep.mubr.msk.f32.mxu1 %vm4304_vm1, %v4305_v50  ;;  %s1194_s0 = ssub.f32 %s5016_s10, %s6689_s7  ;;  %v1203_v3 = vsel %vm839_vm12, %v1202_v39, %v1200_v54  ;;  %p1066_p8 = por %p1065_p5, %p1064_p12 }
0x15ae   :  { %3956 = vmatprep.subr.bf16.mxu1 %v4303_v49  ;;  %p1207_p9 = pneg %p1182_p7  ;;  %p1137_p4 = por %p1136_p6, %p1135_p3 }
0x15af   :  { %s6691_s0 = smov (!%p1182_p7, %s1194_s0), 0.0  ;;  %s6695_s17 = smov (%p1066_p8, %s4944_s17), -inf }
0x15b0   :  { %v1204_v4 = vstv %s6691_s0  ;;  %p1208_p10 = por %p1207_p9, %p1206_p0  ;;  %s6697_s5 = smov (%p1137_p4, %s4992_s5), -inf  ;;  %v1217_v41 = vstv %s6695_s17 }
0x15b1   :  { %3958 = vmatpush3.bf16.msra.mxu1 %v4567_v0  ;;  %v1205_v23 = vsel %vm6549_vm10, %v1204_v4, %v1203_v3  ;;  %v1219_v13 = vstv %s6697_s5  ;;  %v1218_v7 = vsel %vm481_vm5, %v1217_v41, %v1216_v46 }
0x15b2   :  { %3959 = vmatprep.subr.bf16.mxu1 %v4303_v49  ;;  %v5125_v9 = vsel %vm481_vm5, %v1205_v23, %v854_v8  ;;  %s6699_s26 = smov (%p1208_p10, %s5049_s26), -inf  ;;  %v1220_v20 = vsel %vm483_vm6, %v1219_v13, %v1218_v7 }
0x15b3   :  { %v1221_v16 = vstv %s6699_s26 }
0x15b4   :  { %v1222_v25 = vsel %vm485_vm7, %v1221_v16, %v1220_v20 }
0x15b5   :  { %3961 = vmatpush3.bf16.msra.mxu1 %v4577_v2 }
0x15b6   :  { %3962 = vmatprep.subr.bf16.mxu1 %v4303_v49 }
0x15b9   :  { %3964 = vmatpush3.bf16.msra.mxu1 %v4587_v6 }
0x15ba   :  { %3965 = vmatprep.subr.bf16.mxu1 %v4303_v49 }
0x15bd   :  { %3967 = vmatpush3.bf16.msra.mxu1 %v4597_v31 }
0x15be   :  { %3968 = vmatprep.subr.bf16.mxu1 %v4303_v49 }
0x15c1   :  { %3970 = vmatpush3.bf16.msra.mxu1 %v4607_v1 }
0x15c2   :  { %3971 = vmatprep.subr.bf16.mxu1 %v4303_v49 }
0x15c5   :  { %3973 = vmatpush3.bf16.msra.mxu1 %v4621_v45 }
0x15c6   :  { %3974 = vmatprep.subr.bf16.mxu1 %v4303_v49 }
0x15c9   :  { %3976 = vmatpush3.bf16.msra.mxu1 %v4632_v21 }
0x15ca   :  { %4001 = vmatprep.subr.bf16.mxu1 %v4303_v49 }
0x167f   :  { %v1289_v26 = vpop.f32.mrb[2].mxu1 }
0x1680   :  { %v1290_v29 = vadd.f32 %v1289_v26, %v1222_v25  ;;  %v3673_v48 = vpop.f32.mrb[3].mxu1 }
0x1682   :  { %1293 = vmax.xlane.f32.xlu0 %v1290_v29 }
0x170f   :  { %v1294_v30 = vpop.xlane.xlu0 %1293 }
0x1710   :  { %v1295_v53 = vrot.slane %v1294_v30, 4 }
0x1712   :  { %v1296_v10 = vmax.f32 %v1294_v30, %v1295_v53 }
0x1714   :  { %v1297_v35 = vrot.slane %v1296_v10, 2 }
0x1716   :  { %v1298_v11 = vmax.f32 %v1296_v10, %v1297_v35 }
0x1718   :  { %v1299_v36 = vrot.slane %v1298_v11, 1 }
0x171a   :  { %v1300_v37 = vmax.f32 %v1298_v11, %v1299_v36 }
0x171c   :  { %4081 = vpush %v1300_v37 }
0x174d   :  { %s5173_s7 = spop %4081 }
0x174e   :  { %v1302_v55 = vstv %s5173_s7  ;;  %p1329_p1 = scmp.gt.f32.partialorder %s5173_s7, -inf }
0x174f   :  { %vm1303_vm13 = vcmp.eq.f32.partialorder %v1290_v29, %v1302_v55 }
0x1750   :  { %v1304_v24 = vsel %vm1303_vm13, %v4671_v63, 1024  ;;  %s5205_s6 = scalar_select %p1329_p1, %s5173_s7, -inf }
0x1751   :  { %v1306_v40 = vshra.s32 %v1304_v24, 16  ;;  %v1305_v42 = vand.u32 65535, %v1304_v24 }
0x1752   :  { %v1343_v11 = vstv %s5205_s6 }
0x1753   :  { %v1308_v14 = vcvt.s32.f32 %v1306_v40  ;;  %v1307_v28 = vcvt.s32.f32 %v1305_v42  ;;  %v1344_v37 = vsel %vm619_vm8, %v1343_v11, 0.0 }
0x1755   :  { %1309 = vmin.xlane.f32.xlu1 %v1308_v14 }
0x17e2   :  { %v1310_v15 = vpop.xlane.xlu1 %1309 }
0x17e3   :  { %vm1311_vm15 = vcmp.eq.f32.partialorder %v1308_v14, %v1310_v15  ;;  %v1316_v44 = vcvt.f32.s32 %v1310_v15 }
0x17e4   :  { %v1312_v43 = vsel %vm1311_vm15, %v1307_v28, inf }
0x17e5   :  { %1313 = vmin.xlane.f32.xlu0 %v1312_v43  ;;  %v1317_v18 = vshll.u32 %v1316_v44, 16 }
0x1872   :  { %v1314_v5 = vpop.xlane.xlu0 %1313 }
0x1873   :  { %v1315_v19 = vcvt.f32.s32 %v1314_v5 }
0x1875   :  { %v1318_v62 = vadd.s32 %v1317_v18, %v1315_v19 }
0x1877   :  { %v1319_v22 = vrot.slane %v1318_v62, 4 }
0x1879   :  { %vm1320_vm3 = vcmp.lt.s32.totalorder %v1318_v62, %v1319_v22 }
0x187a   :  { %v1321_v33 = vsel %vm1320_vm3, %v1318_v62, %v1319_v22 }
0x187b   :  { %v1322_v32 = vrot.slane %v1321_v33, 2 }
0x187d   :  { %vm1323_vm10 = vcmp.lt.s32.totalorder %v1321_v33, %v1322_v32 }
0x187e   :  { %v1324_v27 = vsel %vm1323_vm10, %v1321_v33, %v1322_v32 }
0x187f   :  { %v1325_v47 = vrot.slane %v1324_v27, 1 }
0x1881   :  { %vm1326_vm13 = vcmp.lt.s32.totalorder %v1324_v27, %v1325_v47 }
0x1882   :  { %v1327_v60 = vsel %vm1326_vm13, %v1324_v27, %v1325_v47 }
0x1883   :  { %4083 = vpush %v1327_v60 }
0x18b4   :  { %s5177_s11 = spop %4083 }
0x18b5   :  { %v1361_v51 = vstv %s5177_s11  ;;  %s1332_s2 = sshra.s32 %s5177_s11, 7  ;;  %s1330_s9 = sand.u32 127, %s5177_s11 }
0x18b6   :  { %vm1362_vm15 = vcmp.eq.s32.totalorder %v4671_v63, %v1361_v51  ;;  %s6701_s2 = smov (!%p1329_p1, %s1332_s2), 0  ;;  %s6703_s9 = smov (!%p1329_p1, %s1330_s9), 0 }
0x18b7   :  { %v5181_v52 = vsel %vm1362_vm15, -inf, %v1290_v29  ;;  %p1335_p7 = scmp.eq.s32.totalorder %s6701_s2, 2  ;;  %p1337_p11 = scmp.eq.s32.totalorder %s6701_s2, 1 }
0x18b8   :  { %1364 = vmax.xlane.f32.xlu1 %v5181_v52  ;;  %p1339_p12 = scmp.eq.s32.totalorder %s6701_s2, 0  ;;  %s1345_s10 = scvt.s32.f32 %s6703_s9 }
0x18b9   :  { %s1336_s3 = scalar_select %p1335_p7, %s6697_s5, %s6699_s26 }
0x18ba   :  { %s1348_s14 = scvt.s32.f32 %s6701_s2  ;;  %v1346_v36 = vstv %s1345_s10 }
0x18bb   :  { %s1338_s19 = scalar_select %p1337_p11, %s6695_s17, %s1336_s3  ;;  %v1347_v55 = vsel %vm6550_vm9, %v1346_v36, %v1344_v37  ;;  %vm6564_vm9 = vcmp.eq.s32.totalorder %v4619_v17, 5 }
0x18bc   :  { %v1349_v24 = vstv %s1348_s14 }
0x18bd   :  { %s1340_s22 = scalar_select %p1339_p12, %s6693_s13, %s1338_s19 }
0x18be   :  { %p1353_p12 = scmp.eq.s32.totalorder %s6703_s9, 127 }
0x18bf   :  { %s1341_s12 = ssub.f32 %s5173_s7, %s1340_s22 }
0x18c1   :  { %s6705_s12 = smov (!%p1329_p1, %s1341_s12), 0.0 }
0x18c2   :  { %v1351_v14 = vstv %s6705_s12 }
0x1945   :  { %v1365_v54 = vpop.xlane.xlu1 %1364 }
0x1946   :  { %v1366_v56 = vrot.slane %v1365_v54, 4 }
0x1948   :  { %v1367_v57 = vmax.f32 %v1365_v54, %v1366_v56 }
0x194a   :  { %v1368_v34 = vrot.slane %v1367_v57, 2 }
0x194c   :  { %v1369_v59 = vmax.f32 %v1367_v57, %v1368_v34 }
0x194e   :  { %v1370_v39 = vrot.slane %v1369_v59, 1 }
0x1950   :  { %v1371_v61 = vmax.f32 %v1369_v59, %v1370_v39 }
0x1952   :  { %4085 = vpush %v1371_v61 }
0x1983   :  { %s5184_s20 = spop %4085 }
0x1984   :  { %v1373_v3 = vstv %s5184_s20  ;;  %p1400_p13 = scmp.gt.f32.partialorder %s5184_s20, -inf }
0x1985   :  { %vm1374_vm10 = vcmp.eq.f32.partialorder %v5181_v52, %v1373_v3 }
0x1986   :  { %v1375_v4 = vsel %vm1374_vm10, %v4671_v63, 1024  ;;  %s5216_s15 = scalar_select %p1400_p13, %s5184_s20, -inf }
0x1987   :  { %v1377_v8 = vshra.s32 %v1375_v4, 16  ;;  %v1376_v12 = vand.u32 65535, %v1375_v4 }
0x1988   :  { %v1414_v42 = vstv %s5216_s15 }
0x1989   :  { %v1379_v23 = vcvt.s32.f32 %v1377_v8  ;;  %v1378_v13 = vcvt.s32.f32 %v1376_v12 }
0x198b   :  { %1380 = vmin.xlane.f32.xlu0 %v1379_v23 }
0x1a18   :  { %v1381_v41 = vpop.xlane.xlu0 %1380 }
0x1a19   :  { %vm1382_vm3 = vcmp.eq.f32.partialorder %v1379_v23, %v1381_v41  ;;  %v1387_v16 = vcvt.f32.s32 %v1381_v41 }
0x1a1a   :  { %v1383_v46 = vsel %vm1382_vm3, %v1378_v13, inf }
0x1a1b   :  { %1384 = vmin.xlane.f32.xlu1 %v1383_v46  ;;  %v1388_v20 = vshll.u32 %v1387_v16, 16 }
0x1aa8   :  { %v1385_v7 = vpop.xlane.xlu1 %1384 }
0x1aa9   :  { %v1386_v25 = vcvt.f32.s32 %v1385_v7 }
0x1aab   :  { %v1389_v26 = vadd.s32 %v1388_v20, %v1386_v25 }
0x1aad   :  { %v1390_v29 = vrot.slane %v1389_v26, 4 }
0x1aaf   :  { %vm1391_vm13 = vcmp.lt.s32.totalorder %v1389_v26, %v1390_v29 }
0x1ab0   :  { %v1392_v48 = vsel %vm1391_vm13, %v1389_v26, %v1390_v29  ;;  %vm6561_vm13 = vcmp.eq.s32.totalorder %v4619_v17, 8 }
0x1ab1   :  { %v1393_v30 = vrot.slane %v1392_v48, 2  ;;  %v1350_v28 = vsel %vm6561_vm13, %v1349_v24, %v1347_v55 }
0x1ab3   :  { %vm1394_vm15 = vcmp.lt.s32.totalorder %v1392_v48, %v1393_v30 }
0x1ab4   :  { %v1395_v53 = vsel %vm1394_vm15, %v1392_v48, %v1393_v30  ;;  %vm6562_vm15 = vcmp.eq.s32.totalorder %v4619_v17, 12 }
0x1ab5   :  { %v1396_v10 = vrot.slane %v1395_v53, 1  ;;  %v1352_v43 = vsel %vm6562_vm15, %v1351_v14, %v1350_v28 }
0x1ab7   :  { %vm1397_vm10 = vcmp.lt.s32.totalorder %v1395_v53, %v1396_v10 }
0x1ab8   :  { %v1398_v35 = vsel %vm1397_vm10, %v1395_v53, %v1396_v10  ;;  %vm6563_vm10 = vcmp.eq.s32.totalorder %v4619_v17, 1 }
0x1ab9   :  { %4087 = vpush %v1398_v35  ;;  %v1415_v44 = vsel %vm6563_vm10, %v1414_v42, %v1352_v43 }
0x1aea   :  { %s5220_s16 = spop %4087 }
0x1aeb   :  { %s1401_s18 = sand.u32 127, %s5220_s16  ;;  %v1432_v40 = vstv %s5220_s16  ;;  %s1403_s25 = sshra.s32 %s5220_s16, 7 }
0x1aec   :  { %s6707_s18 = smov (!%p1400_p13, %s1401_s18), 0  ;;  %vm1433_vm3 = vcmp.eq.s32.totalorder %v4671_v63, %v1432_v40  ;;  %s6709_s25 = smov (!%p1400_p13, %s1403_s25), 0 }
0x1aed   :  { %v5233_v15 = vsel %vm1433_vm3, -inf, %v5181_v52  ;;  %s1416_s21 = scvt.s32.f32 %s6707_s18  ;;  %p1406_p3 = scmp.eq.s32.totalorder %s6709_s25, 2 }
0x1aee   :  { %1435 = vmax.xlane.f32.xlu0 %v5233_v15  ;;  %p1408_p5 = scmp.eq.s32.totalorder %s6709_s25, 1  ;;  %p1410_p0 = scmp.eq.s32.totalorder %s6709_s25, 0 }
0x1aef   :  { %v1417_v5 = vstv %s1416_s21  ;;  %s1407_s29 = scalar_select %p1406_p3, %s6697_s5, %s6699_s26 }
0x1af0   :  { %v1418_v18 = vsel %vm6564_vm9, %v1417_v5, %v1415_v44  ;;  %s1419_s30 = scvt.s32.f32 %s6709_s25  ;;  %p1424_p3 = scmp.eq.s32.totalorder %s6707_s18, 127 }
0x1af1   :  { %s1409_s27 = scalar_select %p1408_p5, %s6695_s17, %s1407_s29 }
0x1af2   :  { %v1420_v7 = vstv %s1419_s30  ;;  %p1354_p5 = pneg %p1329_p1 }
0x1af3   :  { %s1411_s24 = scalar_select %p1410_p0, %s6693_s13, %s1409_s27 }
0x1af5   :  { %s1412_s28 = ssub.f32 %s5184_s20, %s1411_s24 }
0x1af7   :  { %s6711_s28 = smov (!%p1400_p13, %s1412_s28), 0.0 }
0x1af8   :  { %v1422_v25 = vstv %s6711_s28 }
0x1b7b   :  { %v1436_v19 = vpop.xlane.xlu0 %1435 }
0x1b7c   :  { %v1437_v62 = vrot.slane %v1436_v19, 4 }
0x1b7e   :  { %v1438_v22 = vmax.f32 %v1436_v19, %v1437_v62 }
0x1b80   :  { %v1439_v33 = vrot.slane %v1438_v22, 2 }
0x1b82   :  { %v1440_v32 = vmax.f32 %v1438_v22, %v1439_v33 }
0x1b84   :  { %v1441_v27 = vrot.slane %v1440_v32, 1 }
0x1b86   :  { %v1442_v47 = vmax.f32 %v1440_v32, %v1441_v27 }
0x1b88   :  { %4089 = vpush %v1442_v47 }
0x1bb9   :  { %s5245_s23 = spop %4089 }
0x1bba   :  { %v1444_v60 = vstv %s5245_s23  ;;  %p1471_p2 = scmp.gt.f32.partialorder %s5245_s23, -inf }
0x1bbb   :  { %vm1445_vm3 = vcmp.eq.f32.partialorder %v5233_v15, %v1444_v60 }
0x1bbc   :  { %v1446_v51 = vsel %vm1445_vm3, %v4671_v63, 1024  ;;  %s5264_s1 = scalar_select %p1471_p2, %s5245_s23, -inf }
0x1bbd   :  { %v1448_v52 = vshra.s32 %v1446_v51, 16  ;;  %v1447_v56 = vand.u32 65535, %v1446_v51 }
0x1bbe   :  { %v1485_v26 = vstv %s5264_s1 }
0x1bbf   :  { %v1450_v54 = vcvt.s32.f32 %v1448_v52  ;;  %v1449_v34 = vcvt.s32.f32 %v1447_v56 }
0x1bc1   :  { %1451 = vmin.xlane.f32.xlu1 %v1450_v54 }
0x1c4e   :  { %v1452_v57 = vpop.xlane.xlu1 %1451 }
0x1c4f   :  { %vm1453_vm9 = vcmp.eq.f32.partialorder %v1450_v54, %v1452_v57  ;;  %v1458_v39 = vcvt.f32.s32 %v1452_v57  ;;  %v1357_v57 = vstv %s6703_s9 }
0x1c50   :  { %v1454_v59 = vsel %vm1453_vm9, %v1449_v34, inf  ;;  %vm6565_vm9 = vcmp.eq.s32.totalorder %v4619_v17, 9  ;;  %v1428_v34 = vstv %s6707_s18 }
0x1c51   :  { %1455 = vmin.xlane.f32.xlu0 %v1454_v59  ;;  %v1459_v3 = vshll.u32 %v1458_v39, 16  ;;  %v1421_v48 = vsel %vm6565_vm9, %v1420_v7, %v1418_v18 }
0x1cde   :  { %v1456_v61 = vpop.xlane.xlu0 %1455 }
0x1cdf   :  { %v1457_v4 = vcvt.f32.s32 %v1456_v61 }
0x1ce1   :  { %v1460_v8 = vadd.s32 %v1459_v3, %v1457_v4 }
0x1ce3   :  { %v1461_v23 = vrot.slane %v1460_v8, 4 }
0x1ce5   :  { %vm1462_vm13 = vcmp.lt.s32.totalorder %v1460_v8, %v1461_v23 }
0x1ce6   :  { %v1463_v12 = vsel %vm1462_vm13, %v1460_v8, %v1461_v23  ;;  %vm6566_vm13 = vcmp.eq.s32.totalorder %v4619_v17, 13 }
0x1ce7   :  { %v1464_v41 = vrot.slane %v1463_v12, 2  ;;  %v1423_v30 = vsel %vm6566_vm13, %v1422_v25, %v1421_v48 }
0x1ce9   :  { %vm1465_vm15 = vcmp.lt.s32.totalorder %v1463_v12, %v1464_v41 }
0x1cea   :  { %v1466_v13 = vsel %vm1465_vm15, %v1463_v12, %v1464_v41  ;;  %vm6567_vm15 = vcmp.eq.s32.totalorder %v4619_v17, 2 }
0x1ceb   :  { %v1467_v46 = vrot.slane %v1466_v13, 1  ;;  %v1486_v53 = vsel %vm6567_vm15, %v1485_v26, %v1423_v30 }
0x1ced   :  { %vm1468_vm10 = vcmp.lt.s32.totalorder %v1466_v13, %v1467_v46 }
0x1cee   :  { %v1469_v16 = vsel %vm1468_vm10, %v1466_v13, %v1467_v46  ;;  %vm6568_vm10 = vcmp.eq.s32.totalorder %v4619_v17, 6 }
0x1cef   :  { %4091 = vpush %v1469_v16 }
0x1d20   :  { %s5266_s8 = spop %4091 }
0x1d21   :  { %s1472_s0 = sand.u32 127, %s5266_s8  ;;  %v1503_v20 = vstv %s5266_s8  ;;  %s1474_s3 = sshra.s32 %s5266_s8, 7 }
0x1d22   :  { %s6713_s0 = smov (!%p1471_p2, %s1472_s0), 0  ;;  %vm1504_vm3 = vcmp.eq.s32.totalorder %v4671_v63, %v1503_v20  ;;  %s6715_s3 = smov (!%p1471_p2, %s1474_s3), 0 }
0x1d23   :  { %v1505_v29 = vsel %vm1504_vm3, -inf, %v5233_v15  ;;  %s1487_s11 = scvt.s32.f32 %s6713_s0  ;;  %p1477_p6 = scmp.eq.s32.totalorder %s6715_s3, 2  ;;  %v1499_v59 = vstv %s6713_s0 }
0x1d24   :  { %1506 = vmax.xlane.f32.xlu1 %v1505_v29  ;;  %p1479_p8 = scmp.eq.s32.totalorder %s6715_s3, 1  ;;  %p1481_p9 = scmp.eq.s32.totalorder %s6715_s3, 0 }
0x1d25   :  { %v1488_v10 = vstv %s1487_s11  ;;  %s1478_s19 = scalar_select %p1477_p6, %s6697_s5, %s6699_s26 }
0x1d26   :  { %v5286_v35 = vsel %vm6568_vm10, %v1488_v10, %v1486_v53  ;;  %s1490_s14 = scvt.s32.f32 %s6715_s3  ;;  %p1495_p0 = scmp.eq.s32.totalorder %s6713_s0, 127 }
0x1d27   :  { %s1480_s22 = scalar_select %p1479_p8, %s6695_s17, %s1478_s19 }
0x1d28   :  { %v1491_v39 = vstv %s1490_s14  ;;  %p1425_p6 = pneg %p1400_p13 }
0x1d29   :  { %s1482_s10 = scalar_select %p1481_p9, %s6693_s13, %s1480_s22  ;;  %v1492_v8 = vsel %vm768_vm0, %v1491_v39, %v5286_v35 }
0x1d2a   :  { %p1355_p9 = por %p1354_p5, %p1353_p12 }
0x1d2b   :  { %s1483_s12 = ssub.f32 %s5245_s23, %s1482_s10 }
0x1d2c   :  { %s6731_s6 = smov (%p1355_p9, %s5205_s6), -inf }
0x1d2d   :  { %s6717_s12 = smov (!%p1471_p2, %s1483_s12), 0.0 }
0x1d2e   :  { %v1493_v61 = vstv %s6717_s12 }
0x1d2f   :  { %v1494_v41 = vsel %vm772_vm14, %v1493_v61, %v1492_v8 }
0x1db1   :  { %v1507_v11 = vpop.xlane.xlu1 %1506 }
0x1db2   :  { %v1508_v36 = vrot.slane %v1507_v11, 4 }
0x1db4   :  { %v1509_v37 = vmax.f32 %v1507_v11, %v1508_v36 }
0x1db6   :  { %v1510_v55 = vrot.slane %v1509_v37, 2 }
0x1db8   :  { %v1511_v24 = vmax.f32 %v1509_v37, %v1510_v55 }
0x1dba   :  { %v1512_v40 = vrot.slane %v1511_v24, 1 }
0x1dbc   :  { %v1513_v14 = vmax.f32 %v1511_v24, %v1512_v40 }
0x1dbe   :  { %4093 = vpush %v1513_v14 }
0x1def   :  { %s5288_s2 = spop %4093 }
0x1df0   :  { %v1515_v42 = vstv %s5288_s2  ;;  %p1542_p4 = scmp.gt.f32.partialorder %s5288_s2, -inf }
0x1df1   :  { %vm1516_vm3 = vcmp.eq.f32.partialorder %v1505_v29, %v1515_v42 }
0x1df2   :  { %v1517_v15 = vsel %vm1516_vm3, %v4671_v63, 1024  ;;  %vm1358_vm3 = vcmp.eq.s32.totalorder %v4619_v17, %v1357_v57  ;;  %s5310_s16 = scalar_select %p1542_p4, %s5288_s2, -inf }
0x1df3   :  { %v1519_v28 = vshra.s32 %v1517_v15, 16  ;;  %v1518_v44 = vand.u32 65535, %v1517_v15 }
0x1df4   :  { %v1556_v4 = vstv %s5310_s16 }
0x1df5   :  { %v1521_v43 = vcvt.s32.f32 %v1519_v28  ;;  %v1520_v18 = vcvt.s32.f32 %v1518_v44  ;;  %v1557_v46 = vsel %vm832_vm11, %v1556_v4, %v1494_v41 }
0x1df7   :  { %1522 = vmin.xlane.f32.xlu0 %v1521_v43 }
0x1e84   :  { %v1523_v5 = vpop.xlane.xlu0 %1522 }
0x1e85   :  { %vm1524_vm9 = vcmp.eq.f32.partialorder %v1521_v43, %v1523_v5  ;;  %v1529_v62 = vcvt.f32.s32 %v1523_v5 }
0x1e86   :  { %v1525_v19 = vsel %vm1524_vm9, %v1520_v18, inf  ;;  %vm1429_vm9 = vcmp.eq.s32.totalorder %v4619_v17, %v1428_v34 }
0x1e87   :  { %1526 = vmin.xlane.f32.xlu1 %v1525_v19  ;;  %v1530_v33 = vshll.u32 %v1529_v62, 16 }
0x1f14   :  { %v1527_v22 = vpop.xlane.xlu1 %1526 }
0x1f15   :  { %v1528_v32 = vcvt.f32.s32 %v1527_v22 }
0x1f17   :  { %v1531_v27 = vadd.s32 %v1530_v33, %v1528_v32 }
0x1f19   :  { %v1532_v47 = vrot.slane %v1531_v27, 4 }
0x1f1b   :  { %vm1533_vm13 = vcmp.lt.s32.totalorder %v1531_v27, %v1532_v47 }
0x1f1c   :  { %v1534_v60 = vsel %vm1533_vm13, %v1531_v27, %v1532_v47  ;;  %vm1500_vm13 = vcmp.eq.s32.totalorder %v4619_v17, %v1499_v59 }
0x1f1d   :  { %v1535_v51 = vrot.slane %v1534_v60, 2 }
0x1f1f   :  { %vm1536_vm15 = vcmp.lt.s32.totalorder %v1534_v60, %v1535_v51 }
0x1f20   :  { %v1537_v52 = vsel %vm1536_vm15, %v1534_v60, %v1535_v51  ;;  %vm1359_vm15 = vmand %vm476_vm2, %vm1358_vm3 }
0x1f21   :  { %v1538_v54 = vrot.slane %v1537_v52, 1  ;;  %vm1501_vm3 = vmand %vm483_vm6, %vm1500_vm13  ;;  %v1360_v23 = vsel %vm1359_vm15, 1.0, %v4305_v50  ;;  %vm6571_vm15 = vcmp.eq.s32.totalorder %v4619_v17, 15 }
0x1f23   :  { %vm1539_vm10 = vcmp.lt.s32.totalorder %v1537_v52, %v1538_v54 }
0x1f24   :  { %v1540_v56 = vsel %vm1539_vm10, %v1537_v52, %v1538_v54  ;;  %vm5322_vm10 = vmand %vm481_vm5, %vm1429_vm9 }
0x1f25   :  { %4095 = vpush %v1540_v56  ;;  %v1431_v13 = vsel %vm5322_vm10, 1.0, %v1360_v23 }
0x1f26   :  { %v1502_v7 = vsel %vm1501_vm3, 1.0, %v1431_v13 }
0x1f56   :  { %s4096_s21 = spop %4095 }
0x1f57   :  { %s1543_s25 = sand.u32 127, %s4096_s21  ;;  %s1545_s29 = sshra.s32 %s4096_s21, 7 }
0x1f58   :  { %s6719_s25 = smov (!%p1542_p4, %s1543_s25), 0  ;;  %s6721_s29 = smov (!%p1542_p4, %s1545_s29), 0 }
0x1f59   :  { %s1558_s27 = scvt.s32.f32 %s6719_s25  ;;  %v1570_v12 = vstv %s6719_s25  ;;  %p1548_p10 = scmp.eq.s32.totalorder %s6721_s29, 2 }
0x1f5a   :  { %vm1571_vm9 = vcmp.eq.s32.totalorder %v4619_v17, %v1570_v12  ;;  %p1550_p7 = scmp.eq.s32.totalorder %s6721_s29, 1  ;;  %p1552_p11 = scmp.eq.s32.totalorder %s6721_s29, 0 }
0x1f5b   :  { %v1559_v16 = vstv %s1558_s27  ;;  %vm1572_vm13 = vmand %vm485_vm7, %vm1571_vm9  ;;  %s6723_s5 = smov (!%p1548_p10, %s6697_s5), %s6699_s26  ;;  %s1561_s24 = scvt.s32.f32 %s6721_s29 }
0x1f5c   :  { %v1560_v20 = vsel %vm835_vm4, %v1559_v16, %v1557_v46  ;;  %v1573_v25 = vsel %vm1572_vm13, 1.0, %v1502_v7  ;;  %s6725_s17 = smov (!%p1550_p7, %s6695_s17), %s6723_s5  ;;  %p1566_p8 = scmp.eq.s32.totalorder %s6719_s25, 127 }
0x1f5d   :  { %3707 = vmatmul.mubr.f32.vlgmr.msra.gmra.mrb[18].mxu0 %v1573_v25  ;;  %s6727_s13 = smov (!%p1552_p11, %s6693_s13), %s6725_s17  ;;  %v1562_v26 = vstv %s1561_s24  ;;  %p1496_p10 = pneg %p1471_p2 }
0x1f5e   :  { %3979 = vmatpush3.bf16.msra.mxu0 %v4557_v38  ;;  %3776 = vmatprep.mubr.msk.f32.mxu0 %vm4304_vm1, %v4305_v50  ;;  %s1554_s28 = ssub.f32 %s5288_s2, %s6727_s13  ;;  %v1563_v29 = vsel %vm839_vm12, %v1562_v26, %v1560_v20  ;;  %p1426_p7 = por %p1425_p6, %p1424_p3 }
0x1f5f   :  { %3980 = vmatprep.subr.bf16.mxu0 %v4303_v49  ;;  %p1567_p11 = pneg %p1542_p4  ;;  %p1497_p1 = por %p1496_p10, %p1495_p0 }
0x1f60   :  { %s6729_s28 = smov (!%p1542_p4, %s1554_s28), 0.0  ;;  %s6733_s15 = smov (%p1426_p7, %s5216_s15), -inf }
0x1f61   :  { %v1564_v48 = vstv %s6729_s28  ;;  %p1568_p13 = por %p1567_p11, %p1566_p8  ;;  %s6735_s1 = smov (%p1497_p1, %s5264_s1), -inf  ;;  %v1577_v10 = vstv %s6733_s15 }
0x1f62   :  { %3982 = vmatpush3.bf16.msra.mxu0 %v4567_v0  ;;  %v1565_v30 = vsel %vm6571_vm15, %v1564_v48, %v1563_v29  ;;  %v1579_v35 = vstv %s6735_s1 }
0x1f63   :  { %3983 = vmatprep.subr.bf16.mxu0 %v4303_v49  ;;  %v5370_v53 = vsel %vm483_vm6, %v1565_v30, %v5125_v9  ;;  %s6737_s16 = smov (%p1568_p13, %s5310_s16), -inf  ;;  %v1575_v9 = vstv %s6731_s6 }
0x1f64   :  { %v1576_v11 = vsel %vm476_vm2, %v1575_v9, -inf  ;;  %v1581_v36 = vstv %s6737_s16 }
0x1f65   :  { %v1578_v37 = vsel %vm481_vm5, %v1577_v10, %v1576_v11 }
0x1f66   :  { %3985 = vmatpush3.bf16.msra.mxu0 %v4577_v2  ;;  %v1580_v55 = vsel %vm483_vm6, %v1579_v35, %v1578_v37 }
0x1f67   :  { %3986 = vmatprep.subr.bf16.mxu0 %v4303_v49  ;;  %v1582_v24 = vsel %vm485_vm7, %v1581_v36, %v1580_v55 }
0x1f6a   :  { %3988 = vmatpush3.bf16.msra.mxu0 %v4587_v6 }
0x1f6b   :  { %3989 = vmatprep.subr.bf16.mxu0 %v4303_v49 }
0x1f6e   :  { %3991 = vmatpush3.bf16.msra.mxu0 %v4597_v31 }
0x1f6f   :  { %3992 = vmatprep.subr.bf16.mxu0 %v4303_v49 }
0x1f72   :  { %3994 = vmatpush3.bf16.msra.mxu0 %v4607_v1 }
0x1f73   :  { %3995 = vmatprep.subr.bf16.mxu0 %v4303_v49 }
0x1f76   :  { %3997 = vmatpush3.bf16.msra.mxu0 %v4621_v45 }
0x1f77   :  { %3998 = vmatprep.subr.bf16.mxu0 %v4303_v49 }
0x1f7a   :  { %4000 = vmatpush3.bf16.msra.mxu0 %v4632_v21 }
0x1f7b   :  { %4025 = vmatprep.subr.bf16.mxu0 %v4303_v49 }
0x2030   :  { %v1649_v40 = vpop.f32.mrb[18].mxu0 }
0x2031   :  { %v1650_v14 = vadd.f32 %v1649_v40, %v1582_v24  ;;  %v3708_v42 = vpop.f32.mrb[19].mxu0 }
0x2033   :  { %1653 = vmax.xlane.f32.xlu0 %v1650_v14 }
0x20c0   :  { %v1654_v15 = vpop.xlane.xlu0 %1653 }
0x20c1   :  { %v1655_v28 = vrot.slane %v1654_v15, 4 }
0x20c3   :  { %v1656_v43 = vmax.f32 %v1654_v15, %v1655_v28 }
0x20c5   :  { %v1657_v44 = vrot.slane %v1656_v43, 2 }
0x20c7   :  { %v1658_v5 = vmax.f32 %v1656_v43, %v1657_v44 }
0x20c9   :  { %v1659_v18 = vrot.slane %v1658_v5, 1 }
0x20cb   :  { %v1660_v19 = vmax.f32 %v1658_v5, %v1659_v18 }
0x20cd   :  { %4097 = vpush %v1660_v19 }
0x20fe   :  { %s5418_s13 = spop %4097 }
0x20ff   :  { %v1662_v62 = vstv %s5418_s13  ;;  %p1689_p2 = scmp.gt.f32.partialorder %s5418_s13, -inf }
0x2100   :  { %vm1663_vm10 = vcmp.eq.f32.partialorder %v1650_v14, %v1662_v62 }
0x2101   :  { %v1664_v22 = vsel %vm1663_vm10, %v4671_v63, 1024  ;;  %s5450_s23 = scalar_select %p1689_p2, %s5418_s13, -inf }
0x2102   :  { %v1666_v33 = vshra.s32 %v1664_v22, 16  ;;  %v1665_v27 = vand.u32 65535, %v1664_v22 }
0x2103   :  { %v1703_v5 = vstv %s5450_s23 }
0x2104   :  { %v1668_v32 = vcvt.s32.f32 %v1666_v33  ;;  %v1667_v60 = vcvt.s32.f32 %v1665_v27  ;;  %v1704_v19 = vsel %vm619_vm8, %v1703_v5, 0.0 }
0x2106   :  { %1669 = vmin.xlane.f32.xlu1 %v1668_v32 }
0x2193   :  { %v1670_v47 = vpop.xlane.xlu1 %1669 }
0x2194   :  { %vm1671_vm3 = vcmp.eq.f32.partialorder %v1668_v32, %v1670_v47  ;;  %v1676_v52 = vcvt.f32.s32 %v1670_v47 }
0x2195   :  { %v1672_v51 = vsel %vm1671_vm3, %v1667_v60, inf }
0x2196   :  { %1673 = vmin.xlane.f32.xlu0 %v1672_v51  ;;  %v1677_v56 = vshll.u32 %v1676_v52, 16 }
0x2223   :  { %v1674_v54 = vpop.xlane.xlu0 %1673 }
0x2224   :  { %v1675_v57 = vcvt.f32.s32 %v1674_v54 }
0x2226   :  { %v1678_v34 = vadd.s32 %v1677_v56, %v1675_v57 }
0x2228   :  { %v1679_v59 = vrot.slane %v1678_v34, 4 }
0x222a   :  { %vm1680_vm9 = vcmp.lt.s32.totalorder %v1678_v34, %v1679_v59 }
0x222b   :  { %v1681_v39 = vsel %vm1680_vm9, %v1678_v34, %v1679_v59 }
0x222c   :  { %v1682_v61 = vrot.slane %v1681_v39, 2 }
0x222e   :  { %vm1683_vm13 = vcmp.lt.s32.totalorder %v1681_v39, %v1682_v61 }
0x222f   :  { %v1684_v3 = vsel %vm1683_vm13, %v1681_v39, %v1682_v61 }
0x2230   :  { %v1685_v4 = vrot.slane %v1684_v3, 1 }
0x2232   :  { %vm1686_vm15 = vcmp.lt.s32.totalorder %v1684_v3, %v1685_v4 }
0x2233   :  { %v1687_v8 = vsel %vm1686_vm15, %v1684_v3, %v1685_v4 }
0x2234   :  { %4099 = vpush %v1687_v8 }
0x2265   :  { %s5422_s17 = spop %4099 }
0x2266   :  { %v1721_v23 = vstv %s5422_s17  ;;  %s1692_s26 = sshra.s32 %s5422_s17, 7  ;;  %s1690_s20 = sand.u32 127, %s5422_s17 }
0x2267   :  { %vm1722_vm10 = vcmp.eq.s32.totalorder %v4671_v63, %v1721_v23  ;;  %s6739_s26 = smov (!%p1689_p2, %s1692_s26), 0  ;;  %s6741_s20 = smov (!%p1689_p2, %s1690_s20), 0 }
0x2268   :  { %v5426_v12 = vsel %vm1722_vm10, -inf, %v1650_v14  ;;  %p1695_p4 = scmp.eq.s32.totalorder %s6739_s26, 2  ;;  %p1697_p12 = scmp.eq.s32.totalorder %s6739_s26, 1 }
0x2269   :  { %1724 = vmax.xlane.f32.xlu1 %v5426_v12  ;;  %p1699_p3 = scmp.eq.s32.totalorder %s6739_s26, 0  ;;  %s1705_s30 = scvt.s32.f32 %s6741_s20 }
0x226a   :  { %s1696_s7 = scalar_select %p1695_p4, %s6735_s1, %s6737_s16 }
0x226b   :  { %s1708_s0 = scvt.s32.f32 %s6739_s26  ;;  %v1706_v18 = vstv %s1705_s30 }
0x226c   :  { %s1698_s9 = scalar_select %p1697_p12, %s6733_s15, %s1696_s7 }
0x226d   :  { %v1709_v22 = vstv %s1708_s0 }
0x226e   :  { %s1700_s18 = scalar_select %p1699_p3, %s6731_s6, %s1698_s9 }
0x226f   :  { %p1713_p3 = scmp.eq.s32.totalorder %s6741_s20, 127 }
0x2270   :  { %s1701_s8 = ssub.f32 %s5418_s13, %s1700_s18 }
0x2272   :  { %s6743_s8 = smov (!%p1689_p2, %s1701_s8), 0.0 }
0x2273   :  { %v1711_v32 = vstv %s6743_s8 }
0x22f6   :  { %v1725_v41 = vpop.xlane.xlu1 %1724 }
0x22f7   :  { %v1726_v13 = vrot.slane %v1725_v41, 4 }
0x22f9   :  { %v1727_v46 = vmax.f32 %v1725_v41, %v1726_v13 }
0x22fb   :  { %v1728_v16 = vrot.slane %v1727_v46, 2 }
0x22fd   :  { %v1729_v7 = vmax.f32 %v1727_v46, %v1728_v16 }
0x22ff   :  { %v1730_v20 = vrot.slane %v1729_v7, 1 }
0x2301   :  { %v1731_v25 = vmax.f32 %v1729_v7, %v1730_v20 }
0x2303   :  { %4101 = vpush %v1731_v25 }
0x2334   :  { %s5429_s5 = spop %4101 }
0x2335   :  { %v1733_v26 = vstv %s5429_s5  ;;  %p1760_p5 = scmp.gt.f32.partialorder %s5429_s5, -inf }
0x2336   :  { %vm1734_vm3 = vcmp.eq.f32.partialorder %v5426_v12, %v1733_v26 }
0x2337   :  { %v1735_v29 = vsel %vm1734_vm3, %v4671_v63, 1024  ;;  %s5461_s11 = scalar_select %p1760_p5, %s5429_s5, -inf  ;;  %vm6572_vm3 = vcmp.eq.s32.totalorder %v4619_v17, 4 }
0x2338   :  { %v1737_v48 = vshra.s32 %v1735_v29, 16  ;;  %v1736_v9 = vand.u32 65535, %v1735_v29  ;;  %v1707_v62 = vsel %vm6572_vm3, %v1706_v18, %v1704_v19  ;;  %vm6576_vm3 = vcmp.eq.s32.totalorder %v4619_v17, 5 }
0x2339   :  { %v1774_v27 = vstv %s5461_s11 }
0x233a   :  { %v1739_v30 = vcvt.s32.f32 %v1737_v48  ;;  %v1738_v35 = vcvt.s32.f32 %v1736_v9 }
0x233c   :  { %1740 = vmin.xlane.f32.xlu0 %v1739_v30 }
0x23c9   :  { %v1741_v10 = vpop.xlane.xlu0 %1740 }
0x23ca   :  { %vm1742_vm9 = vcmp.eq.f32.partialorder %v1739_v30, %v1741_v10  ;;  %v1747_v36 = vcvt.f32.s32 %v1741_v10 }
0x23cb   :  { %v1743_v11 = vsel %vm1742_vm9, %v1738_v35, inf }
0x23cc   :  { %1744 = vmin.xlane.f32.xlu1 %v1743_v11  ;;  %v1748_v55 = vshll.u32 %v1747_v36, 16 }
0x2459   :  { %v1745_v37 = vpop.xlane.xlu1 %1744 }
0x245a   :  { %v1746_v24 = vcvt.f32.s32 %v1745_v37 }
0x245c   :  { %v1749_v40 = vadd.s32 %v1748_v55, %v1746_v24 }
0x245e   :  { %v1750_v14 = vrot.slane %v1749_v40, 4 }
0x2460   :  { %vm1751_vm13 = vcmp.lt.s32.totalorder %v1749_v40, %v1750_v14 }
0x2461   :  { %v1752_v42 = vsel %vm1751_vm13, %v1749_v40, %v1750_v14  ;;  %vm6573_vm13 = vcmp.eq.s32.totalorder %v4619_v17, 8 }
0x2462   :  { %v1753_v15 = vrot.slane %v1752_v42, 2  ;;  %v1710_v60 = vsel %vm6573_vm13, %v1709_v22, %v1707_v62 }
0x2464   :  { %vm1754_vm15 = vcmp.lt.s32.totalorder %v1752_v42, %v1753_v15 }
0x2465   :  { %v1755_v28 = vsel %vm1754_vm15, %v1752_v42, %v1753_v15  ;;  %vm6574_vm15 = vcmp.eq.s32.totalorder %v4619_v17, 12 }
0x2466   :  { %v1756_v43 = vrot.slane %v1755_v28, 1  ;;  %v1712_v51 = vsel %vm6574_vm15, %v1711_v32, %v1710_v60 }
0x2468   :  { %vm1757_vm10 = vcmp.lt.s32.totalorder %v1755_v28, %v1756_v43 }
0x2469   :  { %v1758_v44 = vsel %vm1757_vm10, %v1755_v28, %v1756_v43  ;;  %vm6575_vm10 = vcmp.eq.s32.totalorder %v4619_v17, 1 }
0x246a   :  { %4103 = vpush %v1758_v44  ;;  %v1775_v52 = vsel %vm6575_vm10, %v1774_v27, %v1712_v51 }
0x249b   :  { %s5465_s2 = spop %4103 }
0x249c   :  { %s1761_s3 = sand.u32 127, %s5465_s2  ;;  %v1792_v33 = vstv %s5465_s2  ;;  %s1763_s10 = sshra.s32 %s5465_s2, 7 }
0x249d   :  { %s6745_s3 = smov (!%p1760_p5, %s1761_s3), 0  ;;  %vm1793_vm9 = vcmp.eq.s32.totalorder %v4671_v63, %v1792_v33  ;;  %s6747_s10 = smov (!%p1760_p5, %s1763_s10), 0 }
0x249e   :  { %v5478_v47 = vsel %vm1793_vm9, -inf, %v5426_v12  ;;  %s1776_s19 = scvt.s32.f32 %s6745_s3  ;;  %p1766_p0 = scmp.eq.s32.totalorder %s6747_s10, 2 }
0x249f   :  { %1795 = vmax.xlane.f32.xlu0 %v5478_v47  ;;  %p1768_p6 = scmp.eq.s32.totalorder %s6747_s10, 1  ;;  %p1770_p8 = scmp.eq.s32.totalorder %s6747_s10, 0 }
0x24a0   :  { %v1777_v54 = vstv %s1776_s19  ;;  %s1767_s12 = scalar_select %p1766_p0, %s6735_s1, %s6737_s16 }
0x24a1   :  { %v1778_v56 = vsel %vm6576_vm3, %v1777_v54, %v1775_v52  ;;  %s1779_s29 = scvt.s32.f32 %s6747_s10  ;;  %p1784_p0 = scmp.eq.s32.totalorder %s6745_s3, 127 }
0x24a2   :  { %s1769_s14 = scalar_select %p1768_p6, %s6733_s15, %s1767_s12 }
0x24a3   :  { %v1780_v37 = vstv %s1779_s29  ;;  %p1714_p6 = pneg %p1689_p2 }
0x24a4   :  { %s1771_s21 = scalar_select %p1770_p8, %s6731_s6, %s1769_s14 }
0x24a6   :  { %s1772_s25 = ssub.f32 %s5429_s5, %s1771_s21 }
0x24a8   :  { %s6749_s25 = smov (!%p1760_p5, %s1772_s25), 0.0 }
0x24a9   :  { %v1782_v24 = vstv %s6749_s25 }
0x252c   :  { %v1796_v57 = vpop.xlane.xlu0 %1795 }
0x252d   :  { %v1797_v34 = vrot.slane %v1796_v57, 4 }
0x252f   :  { %v1798_v59 = vmax.f32 %v1796_v57, %v1797_v34 }
0x2531   :  { %v1799_v39 = vrot.slane %v1798_v59, 2 }
0x2533   :  { %v1800_v61 = vmax.f32 %v1798_v59, %v1799_v39 }
0x2535   :  { %v1801_v3 = vrot.slane %v1800_v61, 1 }
0x2537   :  { %v1802_v4 = vmax.f32 %v1800_v61, %v1801_v3 }
0x2539   :  { %4105 = vpush %v1802_v4 }
0x256a   :  { %s5490_s22 = spop %4105 }
0x256b   :  { %v1804_v8 = vstv %s5490_s22  ;;  %p1831_p9 = scmp.gt.f32.partialorder %s5490_s22, -inf }
0x256c   :  { %vm1805_vm9 = vcmp.eq.f32.partialorder %v5478_v47, %v1804_v8 }
0x256d   :  { %v1806_v23 = vsel %vm1805_vm9, %v4671_v63, 1024  ;;  %s5509_s27 = scalar_select %p1831_p9, %s5490_s22, -inf }
0x256e   :  { %v1808_v12 = vshra.s32 %v1806_v23, 16  ;;  %v1807_v13 = vand.u32 65535, %v1806_v23 }
0x256f   :  { %v1845_v40 = vstv %s5509_s27 }
0x2570   :  { %v1810_v41 = vcvt.s32.f32 %v1808_v12  ;;  %v1809_v16 = vcvt.s32.f32 %v1807_v13 }
0x2572   :  { %1811 = vmin.xlane.f32.xlu1 %v1810_v41 }
0x25ff   :  { %v1812_v46 = vpop.xlane.xlu1 %1811 }
0x2600   :  { %vm1813_vm13 = vcmp.eq.f32.partialorder %v1810_v41, %v1812_v46  ;;  %v1818_v20 = vcvt.f32.s32 %v1812_v46  ;;  %v1717_v46 = vstv %s6741_s20 }
0x2601   :  { %v1814_v7 = vsel %vm1813_vm13, %v1809_v16, inf  ;;  %vm6577_vm13 = vcmp.eq.s32.totalorder %v4619_v17, 9  ;;  %v1788_v16 = vstv %s6745_s3 }
0x2602   :  { %1815 = vmin.xlane.f32.xlu0 %v1814_v7  ;;  %v1819_v26 = vshll.u32 %v1818_v20, 16  ;;  %v1781_v42 = vsel %vm6577_vm13, %v1780_v37, %v1778_v56 }
0x268f   :  { %v1816_v25 = vpop.xlane.xlu0 %1815 }
0x2690   :  { %v1817_v29 = vcvt.f32.s32 %v1816_v25 }
0x2692   :  { %v1820_v48 = vadd.s32 %v1819_v26, %v1817_v29 }
0x2694   :  { %v1821_v30 = vrot.slane %v1820_v48, 4 }
0x2696   :  { %vm1822_vm15 = vcmp.lt.s32.totalorder %v1820_v48, %v1821_v30 }
0x2697   :  { %v1823_v9 = vsel %vm1822_vm15, %v1820_v48, %v1821_v30  ;;  %vm6578_vm15 = vcmp.eq.s32.totalorder %v4619_v17, 13 }
0x2698   :  { %v1824_v10 = vrot.slane %v1823_v9, 2  ;;  %v1783_v15 = vsel %vm6578_vm15, %v1782_v24, %v1781_v42 }
0x269a   :  { %vm1825_vm10 = vcmp.lt.s32.totalorder %v1823_v9, %v1824_v10 }
0x269b   :  { %v1826_v35 = vsel %vm1825_vm10, %v1823_v9, %v1824_v10  ;;  %vm6579_vm10 = vcmp.eq.s32.totalorder %v4619_v17, 2 }
0x269c   :  { %v1827_v11 = vrot.slane %v1826_v35, 1  ;;  %v1846_v28 = vsel %vm6579_vm10, %v1845_v40, %v1783_v15 }
0x269e   :  { %vm1828_vm3 = vcmp.lt.s32.totalorder %v1826_v35, %v1827_v11 }
0x269f   :  { %v1829_v36 = vsel %vm1828_vm3, %v1826_v35, %v1827_v11  ;;  %vm6580_vm3 = vcmp.eq.s32.totalorder %v4619_v17, 6 }
0x26a0   :  { %4107 = vpush %v1829_v36 }
0x26d1   :  { %s5511_s24 = spop %4107 }
0x26d2   :  { %s1832_s28 = sand.u32 127, %s5511_s24  ;;  %v1863_v55 = vstv %s5511_s24  ;;  %s1834_s7 = sshra.s32 %s5511_s24, 7 }
0x26d3   :  { %s6751_s28 = smov (!%p1831_p9, %s1832_s28), 0  ;;  %vm1864_vm9 = vcmp.eq.s32.totalorder %v4671_v63, %v1863_v55  ;;  %s6753_s7 = smov (!%p1831_p9, %s1834_s7), 0 }
0x26d4   :  { %v1865_v14 = vsel %vm1864_vm9, -inf, %v5478_v47  ;;  %s1847_s17 = scvt.s32.f32 %s6751_s28  ;;  %p1837_p10 = scmp.eq.s32.totalorder %s6753_s7, 2  ;;  %v1859_v7 = vstv %s6751_s28 }
0x26d5   :  { %1866 = vmax.xlane.f32.xlu1 %v1865_v14  ;;  %p1839_p7 = scmp.eq.s32.totalorder %s6753_s7, 1  ;;  %p1841_p11 = scmp.eq.s32.totalorder %s6753_s7, 0 }
0x26d6   :  { %v1848_v43 = vstv %s1847_s17  ;;  %s1838_s9 = scalar_select %p1837_p10, %s6735_s1, %s6737_s16 }
0x26d7   :  { %v5531_v44 = vsel %vm6580_vm3, %v1848_v43, %v1846_v28  ;;  %s1850_s0 = scvt.s32.f32 %s6753_s7  ;;  %p1855_p8 = scmp.eq.s32.totalorder %s6751_s28, 127 }
0x26d8   :  { %s1840_s18 = scalar_select %p1839_p7, %s6733_s15, %s1838_s9 }
0x26d9   :  { %v1851_v20 = vstv %s1850_s0  ;;  %p1785_p10 = pneg %p1760_p5 }
0x26da   :  { %s1842_s30 = scalar_select %p1841_p11, %s6731_s6, %s1840_s18  ;;  %v1852_v48 = vsel %vm768_vm0, %v1851_v20, %v5531_v44 }
0x26db   :  { %p1715_p11 = por %p1714_p6, %p1713_p3 }
0x26dc   :  { %s1843_s8 = ssub.f32 %s5490_s22, %s1842_s30 }
0x26dd   :  { %s6769_s23 = smov (%p1715_p11, %s5450_s23), -inf }
0x26de   :  { %s6755_s8 = smov (!%p1831_p9, %s1843_s8), 0.0 }
0x26df   :  { %v1853_v25 = vstv %s6755_s8 }
0x26e0   :  { %v1854_v10 = vsel %vm772_vm14, %v1853_v25, %v1852_v48 }
0x2762   :  { %v1867_v5 = vpop.xlane.xlu1 %1866 }
0x2763   :  { %v1868_v18 = vrot.slane %v1867_v5, 4 }
0x2765   :  { %v1869_v19 = vmax.f32 %v1867_v5, %v1868_v18 }
0x2767   :  { %v1870_v62 = vrot.slane %v1869_v19, 2 }
0x2769   :  { %v1871_v22 = vmax.f32 %v1869_v19, %v1870_v62 }
0x276b   :  { %v1872_v33 = vrot.slane %v1871_v22, 1 }
0x276d   :  { %v1873_v32 = vmax.f32 %v1871_v22, %v1872_v33 }
0x276f   :  { %4109 = vpush %v1873_v32 }
0x27a0   :  { %s5533_s26 = spop %4109 }
0x27a1   :  { %v1875_v27 = vstv %s5533_s26  ;;  %p1902_p1 = scmp.gt.f32.partialorder %s5533_s26, -inf }
0x27a2   :  { %vm1876_vm9 = vcmp.eq.f32.partialorder %v1865_v14, %v1875_v27 }
0x27a3   :  { %v1877_v47 = vsel %vm1876_vm9, %v4671_v63, 1024  ;;  %vm1718_vm9 = vcmp.eq.s32.totalorder %v4619_v17, %v1717_v46  ;;  %s5555_s2 = scalar_select %p1902_p1, %s5533_s26, -inf }
0x27a4   :  { %v1879_v60 = vshra.s32 %v1877_v47, 16  ;;  %v1878_v52 = vand.u32 65535, %v1877_v47 }
0x27a5   :  { %v1916_v29 = vstv %s5555_s2 }
0x27a6   :  { %v1881_v51 = vcvt.s32.f32 %v1879_v60  ;;  %v1880_v56 = vcvt.s32.f32 %v1878_v52  ;;  %v1917_v11 = vsel %vm832_vm11, %v1916_v29, %v1854_v10 }
0x27a8   :  { %1882 = vmin.xlane.f32.xlu0 %v1881_v51 }
0x2835   :  { %v1883_v54 = vpop.xlane.xlu0 %1882 }
0x2836   :  { %vm1884_vm13 = vcmp.eq.f32.partialorder %v1881_v51, %v1883_v54  ;;  %v1889_v34 = vcvt.f32.s32 %v1883_v54 }
0x2837   :  { %v1885_v57 = vsel %vm1884_vm13, %v1880_v56, inf  ;;  %vm1789_vm13 = vcmp.eq.s32.totalorder %v4619_v17, %v1788_v16 }
0x2838   :  { %1886 = vmin.xlane.f32.xlu1 %v1885_v57  ;;  %v1890_v39 = vshll.u32 %v1889_v34, 16 }
0x28c5   :  { %v1887_v59 = vpop.xlane.xlu1 %1886 }
0x28c6   :  { %v1888_v61 = vcvt.f32.s32 %v1887_v59 }
0x28c8   :  { %v1891_v3 = vadd.s32 %v1890_v39, %v1888_v61 }
0x28ca   :  { %v1892_v4 = vrot.slane %v1891_v3, 4 }
0x28cc   :  { %vm1893_vm15 = vcmp.lt.s32.totalorder %v1891_v3, %v1892_v4 }
0x28cd   :  { %v1894_v8 = vsel %vm1893_vm15, %v1891_v3, %v1892_v4  ;;  %vm1860_vm15 = vcmp.eq.s32.totalorder %v4619_v17, %v1859_v7 }
0x28ce   :  { %v1895_v23 = vrot.slane %v1894_v8, 2 }
0x28d0   :  { %vm1896_vm10 = vcmp.lt.s32.totalorder %v1894_v8, %v1895_v23 }
0x28d1   :  { %v1897_v12 = vsel %vm1896_vm10, %v1894_v8, %v1895_v23  ;;  %vm1719_vm10 = vmand %vm476_vm2, %vm1718_vm9 }
0x28d2   :  { %v1898_v41 = vrot.slane %v1897_v12, 1  ;;  %vm1861_vm9 = vmand %vm483_vm6, %vm1860_vm15  ;;  %v1720_v30 = vsel %vm1719_vm10, 1.0, %v4305_v50  ;;  %vm6583_vm10 = vcmp.eq.s32.totalorder %v4619_v17, 15 }
0x28d4   :  { %vm1899_vm3 = vcmp.lt.s32.totalorder %v1897_v12, %v1898_v41 }
0x28d5   :  { %v1900_v13 = vsel %vm1899_vm3, %v1897_v12, %v1898_v41  ;;  %vm5567_vm3 = vmand %vm481_vm5, %vm1789_vm13 }
0x28d6   :  { %4111 = vpush %v1900_v13  ;;  %v1791_v35 = vsel %vm5567_vm3, 1.0, %v1720_v30 }
0x28d7   :  { %v1862_v37 = vsel %vm1861_vm9, 1.0, %v1791_v35 }
0x2907   :  { %s4112_s19 = spop %4111 }
0x2908   :  { %s1903_s10 = sand.u32 127, %s4112_s19  ;;  %s1905_s12 = sshra.s32 %s4112_s19, 7 }
0x2909   :  { %s6757_s10 = smov (!%p1902_p1, %s1903_s10), 0  ;;  %s6759_s12 = smov (!%p1902_p1, %s1905_s12), 0 }
0x290a   :  { %s1918_s14 = scvt.s32.f32 %s6757_s10  ;;  %v1930_v9 = vstv %s6757_s10  ;;  %p1908_p13 = scmp.eq.s32.totalorder %s6759_s12, 2 }
0x290b   :  { %vm1931_vm13 = vcmp.eq.s32.totalorder %v4619_v17, %v1930_v9  ;;  %p1910_p4 = scmp.eq.s32.totalorder %s6759_s12, 1  ;;  %p1912_p12 = scmp.eq.s32.totalorder %s6759_s12, 0 }
0x290c   :  { %v1919_v36 = vstv %s1918_s14  ;;  %vm1932_vm15 = vmand %vm485_vm7, %vm1931_vm13  ;;  %s6761_s1 = smov (!%p1908_p13, %s6735_s1), %s6737_s16  ;;  %s1921_s21 = scvt.s32.f32 %s6759_s12 }
0x290d   :  { %v1920_v55 = vsel %vm835_vm4, %v1919_v36, %v1917_v11  ;;  %v1933_v24 = vsel %vm1932_vm15, 1.0, %v1862_v37  ;;  %s6763_s15 = smov (!%p1910_p4, %s6733_s15), %s6761_s1  ;;  %p1926_p7 = scmp.eq.s32.totalorder %s6757_s10, 127 }
0x290e   :  { %3742 = vmatmul.mubr.f32.vlgmr.msra.gmra.mrb[4].mxu1 %v1933_v24  ;;  %s6765_s6 = smov (!%p1912_p12, %s6731_s6), %s6763_s15  ;;  %v1922_v40 = vstv %s1921_s21  ;;  %p1856_p13 = pneg %p1831_p9 }
0x290f   :  { %4003 = vmatpush3.bf16.msra.mxu1 %v4557_v38  ;;  %3811 = vmatprep.mubr.msk.f32.mxu1 %vm4304_vm1, %v4305_v50  ;;  %s1914_s25 = ssub.f32 %s5533_s26, %s6765_s6  ;;  %v1923_v14 = vsel %vm839_vm12, %v1922_v40, %v1920_v55  ;;  %p1786_p4 = por %p1785_p10, %p1784_p0 }
0x2910   :  { %4004 = vmatprep.subr.bf16.mxu1 %v4303_v49  ;;  %p1927_p12 = pneg %p1902_p1  ;;  %p1857_p2 = por %p1856_p13, %p1855_p8 }
0x2911   :  { %s6767_s25 = smov (!%p1902_p1, %s1914_s25), 0.0  ;;  %s6771_s11 = smov (%p1786_p4, %s5461_s11), -inf }
0x2912   :  { %v1924_v42 = vstv %s6767_s25  ;;  %p1928_p5 = por %p1927_p12, %p1926_p7  ;;  %s6773_s27 = smov (%p1857_p2, %s5509_s27), -inf  ;;  %v1937_v43 = vstv %s6771_s11 }
0x2913   :  { %4006 = vmatpush3.bf16.msra.mxu1 %v4567_v0  ;;  %v1925_v15 = vsel %vm6583_vm10, %v1924_v42, %v1923_v14  ;;  %v1939_v44 = vstv %s6773_s27 }
0x2914   :  { %4007 = vmatprep.subr.bf16.mxu1 %v4303_v49  ;;  %v5615_v28 = vsel %vm485_vm7, %v1925_v15, %v5370_v53  ;;  %s6775_s2 = smov (%p1928_p5, %s5555_s2), -inf  ;;  %v1935_v53 = vstv %s6769_s23 }
0x2915   :  { %v1936_v5 = vsel %vm476_vm2, %v1935_v53, -inf  ;;  %v1941_v18 = vstv %s6775_s2 }
0x2916   :  { %v1938_v19 = vsel %vm481_vm5, %v1937_v43, %v1936_v5 }
0x2917   :  { %4009 = vmatpush3.bf16.msra.mxu1 %v4577_v2  ;;  %v1940_v62 = vsel %vm483_vm6, %v1939_v44, %v1938_v19 }
0x2918   :  { %4010 = vmatprep.subr.bf16.mxu1 %v4303_v49  ;;  %v1942_v22 = vsel %vm485_vm7, %v1941_v18, %v1940_v62 }
0x291b   :  { %4012 = vmatpush3.bf16.msra.mxu1 %v4587_v6 }
0x291c   :  { %4013 = vmatprep.subr.bf16.mxu1 %v4303_v49 }
0x291f   :  { %4015 = vmatpush3.bf16.msra.mxu1 %v4597_v31 }
0x2920   :  { %4016 = vmatprep.subr.bf16.mxu1 %v4303_v49 }
0x2923   :  { %4018 = vmatpush3.bf16.msra.mxu1 %v4607_v1 }
0x2924   :  { %4019 = vmatprep.subr.bf16.mxu1 %v4303_v49 }
0x2927   :  { %4021 = vmatpush3.bf16.msra.mxu1 %v4621_v45 }
0x2928   :  { %4022 = vmatprep.subr.bf16.mxu1 %v4303_v49 }
0x292b   :  { %4024 = vmatpush3.bf16.msra.mxu1 %v4632_v21 }
0x29e1   :  { %v2009_v33 = vpop.f32.mrb[4].mxu1 }
0x29e2   :  { %v2010_v32 = vadd.f32 %v2009_v33, %v1942_v22  ;;  %v3743_v27 = vpop.f32.mrb[5].mxu1 }
0x29e4   :  { %2013 = vmax.xlane.f32.xlu0 %v2010_v32 }
0x2a71   :  { %v2014_v47 = vpop.xlane.xlu0 %2013 }
0x2a72   :  { %v2015_v60 = vrot.slane %v2014_v47, 4 }
0x2a74   :  { %v2016_v51 = vmax.f32 %v2014_v47, %v2015_v60 }
0x2a76   :  { %v2017_v52 = vrot.slane %v2016_v51, 2 }
0x2a78   :  { %v2018_v54 = vmax.f32 %v2016_v51, %v2017_v52 }
0x2a7a   :  { %v2019_v56 = vrot.slane %v2018_v54, 1 }
0x2a7c   :  { %v2020_v57 = vmax.f32 %v2018_v54, %v2019_v56 }
0x2a7e   :  { %4113 = vpush %v2020_v57 }
0x2aaf   :  { %s5662_s6 = spop %4113 }
0x2ab0   :  { %v2022_v34 = vstv %s5662_s6  ;;  %p2049_p9 = scmp.gt.f32.partialorder %s5662_s6, -inf }
0x2ab1   :  { %vm2023_vm3 = vcmp.eq.f32.partialorder %v2010_v32, %v2022_v34 }
0x2ab2   :  { %v2024_v59 = vsel %vm2023_vm3, %v4671_v63, 1024  ;;  %s5694_s22 = scalar_select %p2049_p9, %s5662_s6, -inf }
0x2ab3   :  { %v2026_v39 = vshra.s32 %v2024_v59, 16  ;;  %v2025_v3 = vand.u32 65535, %v2024_v59 }
0x2ab4   :  { %v2063_v54 = vstv %s5694_s22 }
0x2ab5   :  { %v2028_v61 = vcvt.s32.f32 %v2026_v39  ;;  %v2027_v8 = vcvt.s32.f32 %v2025_v3  ;;  %v2064_v57 = vsel %vm619_vm8, %v2063_v54, 0.0 }
0x2ab7   :  { %2029 = vmin.xlane.f32.xlu1 %v2028_v61 }
0x2b44   :  { %v2030_v4 = vpop.xlane.xlu1 %2029 }
0x2b45   :  { %vm2031_vm9 = vcmp.eq.f32.partialorder %v2028_v61, %v2030_v4  ;;  %v2036_v12 = vcvt.f32.s32 %v2030_v4 }
0x2b46   :  { %v2032_v23 = vsel %vm2031_vm9, %v2027_v8, inf }
0x2b47   :  { %2033 = vmin.xlane.f32.xlu0 %v2032_v23  ;;  %v2037_v13 = vshll.u32 %v2036_v12, 16 }
0x2bd4   :  { %v2034_v41 = vpop.xlane.xlu0 %2033 }
0x2bd5   :  { %v2035_v46 = vcvt.f32.s32 %v2034_v41 }
0x2bd7   :  { %v2038_v16 = vadd.s32 %v2037_v13, %v2035_v46 }
0x2bd9   :  { %v2039_v7 = vrot.slane %v2038_v16, 4 }
0x2bdb   :  { %vm2040_vm13 = vcmp.lt.s32.totalorder %v2038_v16, %v2039_v7 }
0x2bdc   :  { %v2041_v20 = vsel %vm2040_vm13, %v2038_v16, %v2039_v7 }
0x2bdd   :  { %v2042_v25 = vrot.slane %v2041_v20, 2 }
0x2bdf   :  { %vm2043_vm15 = vcmp.lt.s32.totalorder %v2041_v20, %v2042_v25 }
0x2be0   :  { %v2044_v26 = vsel %vm2043_vm15, %v2041_v20, %v2042_v25 }
0x2be1   :  { %v2045_v29 = vrot.slane %v2044_v26, 1 }
0x2be3   :  { %vm2046_vm10 = vcmp.lt.s32.totalorder %v2044_v26, %v2045_v29 }
0x2be4   :  { %v2047_v48 = vsel %vm2046_vm10, %v2044_v26, %v2045_v29 }
0x2be5   :  { %4115 = vpush %v2047_v48 }
0x2c16   :  { %s5666_s15 = spop %4115 }
0x2c17   :  { %v2081_v30 = vstv %s5666_s15  ;;  %s2052_s16 = sshra.s32 %s5666_s15, 7  ;;  %s2050_s5 = sand.u32 127, %s5666_s15 }
0x2c18   :  { %vm2082_vm3 = vcmp.eq.s32.totalorder %v4671_v63, %v2081_v30  ;;  %s6777_s16 = smov (!%p2049_p9, %s2052_s16), 0  ;;  %s6779_s5 = smov (!%p2049_p9, %s2050_s5), 0 }
0x2c19   :  { %v5670_v9 = vsel %vm2082_vm3, -inf, %v2010_v32  ;;  %p2055_p1 = scmp.eq.s32.totalorder %s6777_s16, 2  ;;  %p2057_p3 = scmp.eq.s32.totalorder %s6777_s16, 1 }
0x2c1a   :  { %2084 = vmax.xlane.f32.xlu1 %v5670_v9  ;;  %p2059_p0 = scmp.eq.s32.totalorder %s6777_s16, 0  ;;  %s2065_s29 = scvt.s32.f32 %s6779_s5 }
0x2c1b   :  { %s2056_s13 = scalar_select %p2055_p1, %s6773_s27, %s6775_s2 }
0x2c1c   :  { %s2068_s28 = scvt.s32.f32 %s6777_s16  ;;  %v2066_v56 = vstv %s2065_s29 }
0x2c1d   :  { %s2058_s20 = scalar_select %p2057_p3, %s6771_s11, %s2056_s13 }
0x2c1e   :  { %v2069_v59 = vstv %s2068_s28 }
0x2c1f   :  { %s2060_s3 = scalar_select %p2059_p0, %s6769_s23, %s2058_s20 }
0x2c20   :  { %p2073_p0 = scmp.eq.s32.totalorder %s6779_s5, 127 }
0x2c21   :  { %s2061_s24 = ssub.f32 %s5662_s6, %s2060_s3 }
0x2c23   :  { %s6781_s24 = smov (!%p2049_p9, %s2061_s24), 0.0 }
0x2c24   :  { %v2071_v61 = vstv %s6781_s24 }
0x2ca7   :  { %v2085_v10 = vpop.xlane.xlu1 %2084 }
0x2ca8   :  { %v2086_v35 = vrot.slane %v2085_v10, 4 }
0x2caa   :  { %v2087_v11 = vmax.f32 %v2085_v10, %v2086_v35 }
0x2cac   :  { %v2088_v36 = vrot.slane %v2087_v11, 2 }
0x2cae   :  { %v2089_v37 = vmax.f32 %v2087_v11, %v2088_v36 }
0x2cb0   :  { %v2090_v55 = vrot.slane %v2089_v37, 1 }
0x2cb2   :  { %v2091_v24 = vmax.f32 %v2089_v37, %v2090_v55 }
0x2cb4   :  { %4117 = vpush %v2091_v24 }
0x2ce5   :  { %s5673_s1 = spop %4117 }
0x2ce6   :  { %v2093_v40 = vstv %s5673_s1  ;;  %p2120_p6 = scmp.gt.f32.partialorder %s5673_s1, -inf }
0x2ce7   :  { %vm2094_vm9 = vcmp.eq.f32.partialorder %v5670_v9, %v2093_v40 }
0x2ce8   :  { %v2095_v14 = vsel %vm2094_vm9, %v4671_v63, 1024  ;;  %s5705_s17 = scalar_select %p2120_p6, %s5673_s1, -inf  ;;  %vm6584_vm9 = vcmp.eq.s32.totalorder %v4619_v17, 4 }
0x2ce9   :  { %v2097_v42 = vshra.s32 %v2095_v14, 16  ;;  %v2096_v53 = vand.u32 65535, %v2095_v14  ;;  %v2067_v34 = vsel %vm6584_vm9, %v2066_v56, %v2064_v57  ;;  %vm6588_vm9 = vcmp.eq.s32.totalorder %v4619_v17, 5 }
0x2cea   :  { %v2134_v3 = vstv %s5705_s17 }
0x2ceb   :  { %v2099_v15 = vcvt.s32.f32 %v2097_v42  ;;  %v2098_v44 = vcvt.s32.f32 %v2096_v53 }
0x2ced   :  { %2100 = vmin.xlane.f32.xlu0 %v2099_v15 }
0x2d7a   :  { %v2101_v43 = vpop.xlane.xlu0 %2100 }
0x2d7b   :  { %vm2102_vm13 = vcmp.eq.f32.partialorder %v2099_v15, %v2101_v43  ;;  %v2107_v18 = vcvt.f32.s32 %v2101_v43 }
0x2d7c   :  { %v2103_v5 = vsel %vm2102_vm13, %v2098_v44, inf }
0x2d7d   :  { %2104 = vmin.xlane.f32.xlu1 %v2103_v5  ;;  %v2108_v62 = vshll.u32 %v2107_v18, 16 }
0x2e0a   :  { %v2105_v19 = vpop.xlane.xlu1 %2104 }
0x2e0b   :  { %v2106_v22 = vcvt.f32.s32 %v2105_v19 }
0x2e0d   :  { %v2109_v33 = vadd.s32 %v2108_v62, %v2106_v22 }
0x2e0f   :  { %v2110_v32 = vrot.slane %v2109_v33, 4 }
0x2e11   :  { %vm2111_vm15 = vcmp.lt.s32.totalorder %v2109_v33, %v2110_v32 }
0x2e12   :  { %v2112_v27 = vsel %vm2111_vm15, %v2109_v33, %v2110_v32  ;;  %vm6585_vm15 = vcmp.eq.s32.totalorder %v4619_v17, 8 }
0x2e13   :  { %v2113_v47 = vrot.slane %v2112_v27, 2  ;;  %v2070_v8 = vsel %vm6585_vm15, %v2069_v59, %v2067_v34 }
0x2e15   :  { %vm2114_vm10 = vcmp.lt.s32.totalorder %v2112_v27, %v2113_v47 }
0x2e16   :  { %v2115_v60 = vsel %vm2114_vm10, %v2112_v27, %v2113_v47  ;;  %vm6586_vm10 = vcmp.eq.s32.totalorder %v4619_v17, 12 }
0x2e17   :  { %v2116_v51 = vrot.slane %v2115_v60, 1  ;;  %v2072_v23 = vsel %vm6586_vm10, %v2071_v61, %v2070_v8 }
0x2e19   :  { %vm2117_vm3 = vcmp.lt.s32.totalorder %v2115_v60, %v2116_v51 }
0x2e1a   :  { %v2118_v52 = vsel %vm2117_vm3, %v2115_v60, %v2116_v51  ;;  %vm6587_vm3 = vcmp.eq.s32.totalorder %v4619_v17, 1 }
0x2e1b   :  { %4119 = vpush %v2118_v52  ;;  %v2135_v12 = vsel %vm6587_vm3, %v2134_v3, %v2072_v23 }
0x2e4c   :  { %s5709_s26 = spop %4119 }
0x2e4d   :  { %s2121_s7 = sand.u32 127, %s5709_s26  ;;  %v2152_v39 = vstv %s5709_s26  ;;  %s2123_s30 = sshra.s32 %s5709_s26, 7 }
0x2e4e   :  { %s6783_s7 = smov (!%p2120_p6, %s2121_s7), 0  ;;  %vm2153_vm13 = vcmp.eq.s32.totalorder %v4671_v63, %v2152_v39  ;;  %s6785_s30 = smov (!%p2120_p6, %s2123_s30), 0 }
0x2e4f   :  { %v5722_v4 = vsel %vm2153_vm13, -inf, %v5670_v9  ;;  %s2136_s9 = scvt.s32.f32 %s6783_s7  ;;  %p2126_p8 = scmp.eq.s32.totalorder %s6785_s30, 2 }
0x2e50   :  { %2155 = vmax.xlane.f32.xlu0 %v5722_v4  ;;  %p2128_p10 = scmp.eq.s32.totalorder %s6785_s30, 1  ;;  %p2130_p7 = scmp.eq.s32.totalorder %s6785_s30, 0 }
0x2e51   :  { %v2137_v41 = vstv %s2136_s9  ;;  %s2127_s8 = scalar_select %p2126_p8, %s6773_s27, %s6775_s2 }
0x2e52   :  { %v2138_v13 = vsel %vm6588_vm9, %v2137_v41, %v2135_v12  ;;  %s2139_s12 = scvt.s32.f32 %s6785_s30  ;;  %p2144_p8 = scmp.eq.s32.totalorder %s6783_s7, 127 }
0x2e53   :  { %s2129_s0 = scalar_select %p2128_p10, %s6771_s11, %s2127_s8 }
0x2e54   :  { %v2140_v19 = vstv %s2139_s12  ;;  %p2074_p10 = pneg %p2049_p9 }
0x2e55   :  { %s2131_s19 = scalar_select %p2130_p7, %s6769_s23, %s2129_s0 }
0x2e57   :  { %s2132_s10 = ssub.f32 %s5673_s1, %s2131_s19 }
0x2e59   :  { %s6787_s10 = smov (!%p2120_p6, %s2132_s10), 0.0 }
0x2e5a   :  { %v2142_v22 = vstv %s6787_s10 }
0x2edd   :  { %v2156_v46 = vpop.xlane.xlu0 %2155 }
0x2ede   :  { %v2157_v16 = vrot.slane %v2156_v46, 4 }
0x2ee0   :  { %v2158_v7 = vmax.f32 %v2156_v46, %v2157_v16 }
0x2ee2   :  { %v2159_v20 = vrot.slane %v2158_v7, 2 }
0x2ee4   :  { %v2160_v25 = vmax.f32 %v2158_v7, %v2159_v20 }
0x2ee6   :  { %v2161_v26 = vrot.slane %v2160_v25, 1 }
0x2ee8   :  { %v2162_v29 = vmax.f32 %v2160_v25, %v2161_v26 }
0x2eea   :  { %4121 = vpush %v2162_v29 }
0x2f1b   :  { %s5734_s18 = spop %4121 }
0x2f1c   :  { %v2164_v48 = vstv %s5734_s18  ;;  %p2191_p11 = scmp.gt.f32.partialorder %s5734_s18, -inf }
0x2f1d   :  { %vm2165_vm13 = vcmp.eq.f32.partialorder %v5722_v4, %v2164_v48 }
0x2f1e   :  { %v2166_v30 = vsel %vm2165_vm13, %v4671_v63, 1024  ;;  %s5753_s14 = scalar_select %p2191_p11, %s5734_s18, -inf }
0x2f1f   :  { %v2168_v9 = vshra.s32 %v2166_v30, 16  ;;  %v2167_v35 = vand.u32 65535, %v2166_v30 }
0x2f20   :  { %v2205_v33 = vstv %s5753_s14 }
0x2f21   :  { %v2170_v10 = vcvt.s32.f32 %v2168_v9  ;;  %v2169_v36 = vcvt.s32.f32 %v2167_v35 }
0x2f23   :  { %2171 = vmin.xlane.f32.xlu1 %v2170_v10 }
0x2fb0   :  { %v2172_v11 = vpop.xlane.xlu1 %2171 }
0x2fb1   :  { %vm2173_vm15 = vcmp.eq.f32.partialorder %v2170_v10, %v2172_v11  ;;  %v2178_v55 = vcvt.f32.s32 %v2172_v11  ;;  %v2077_v11 = vstv %s6779_s5 }
0x2fb2   :  { %v2174_v37 = vsel %vm2173_vm15, %v2169_v36, inf  ;;  %vm6589_vm15 = vcmp.eq.s32.totalorder %v4619_v17, 9  ;;  %v2148_v36 = vstv %s6783_s7 }
0x2fb3   :  { %2175 = vmin.xlane.f32.xlu0 %v2174_v37  ;;  %v2179_v40 = vshll.u32 %v2178_v55, 16  ;;  %v2141_v27 = vsel %vm6589_vm15, %v2140_v19, %v2138_v13 }
0x3040   :  { %v2176_v24 = vpop.xlane.xlu0 %2175 }
0x3041   :  { %v2177_v14 = vcvt.f32.s32 %v2176_v24 }
0x3043   :  { %v2180_v42 = vadd.s32 %v2179_v40, %v2177_v14 }
0x3045   :  { %v2181_v15 = vrot.slane %v2180_v42, 4 }
0x3047   :  { %vm2182_vm10 = vcmp.lt.s32.totalorder %v2180_v42, %v2181_v15 }
0x3048   :  { %v2183_v53 = vsel %vm2182_vm10, %v2180_v42, %v2181_v15  ;;  %vm6590_vm10 = vcmp.eq.s32.totalorder %v4619_v17, 13 }
0x3049   :  { %v2184_v43 = vrot.slane %v2183_v53, 2  ;;  %v2143_v47 = vsel %vm6590_vm10, %v2142_v22, %v2141_v27 }
0x304b   :  { %vm2185_vm3 = vcmp.lt.s32.totalorder %v2183_v53, %v2184_v43 }
0x304c   :  { %v2186_v44 = vsel %vm2185_vm3, %v2183_v53, %v2184_v43  ;;  %vm6591_vm3 = vcmp.eq.s32.totalorder %v4619_v17, 2 }
0x304d   :  { %v2187_v5 = vrot.slane %v2186_v44, 1  ;;  %v2206_v60 = vsel %vm6591_vm3, %v2205_v33, %v2143_v47 }
0x304f   :  { %vm2188_vm9 = vcmp.lt.s32.totalorder %v2186_v44, %v2187_v5 }
0x3050   :  { %v2189_v18 = vsel %vm2188_vm9, %v2186_v44, %v2187_v5  ;;  %vm6592_vm9 = vcmp.eq.s32.totalorder %v4619_v17, 6 }
0x3051   :  { %4123 = vpush %v2189_v18 }
0x3082   :  { %s5755_s21 = spop %4123 }
0x3083   :  { %s2192_s25 = sand.u32 127, %s5755_s21  ;;  %v2223_v62 = vstv %s5755_s21  ;;  %s2194_s13 = sshra.s32 %s5755_s21, 7 }
0x3084   :  { %s6789_s25 = smov (!%p2191_p11, %s2192_s25), 0  ;;  %vm2224_vm13 = vcmp.eq.s32.totalorder %v4671_v63, %v2223_v62  ;;  %s6791_s13 = smov (!%p2191_p11, %s2194_s13), 0 }
0x3085   :  { %v2225_v32 = vsel %vm2224_vm13, -inf, %v5722_v4  ;;  %s2207_s15 = scvt.s32.f32 %s6789_s25  ;;  %p2197_p13 = scmp.eq.s32.totalorder %s6791_s13, 2  ;;  %v2219_v37 = vstv %s6789_s25 }
0x3086   :  { %2226 = vmax.xlane.f32.xlu1 %v2225_v32  ;;  %p2199_p4 = scmp.eq.s32.totalorder %s6791_s13, 1  ;;  %p2201_p12 = scmp.eq.s32.totalorder %s6791_s13, 0 }
0x3087   :  { %v2208_v51 = vstv %s2207_s15  ;;  %s2198_s20 = scalar_select %p2197_p13, %s6773_s27, %s6775_s2 }
0x3088   :  { %v5775_v52 = vsel %vm6592_vm9, %v2208_v51, %v2206_v60  ;;  %s2210_s28 = scvt.s32.f32 %s6791_s13  ;;  %p2215_p7 = scmp.eq.s32.totalorder %s6789_s25, 127 }
0x3089   :  { %s2200_s3 = scalar_select %p2199_p4, %s6771_s11, %s2198_s20 }
0x308a   :  { %v2211_v55 = vstv %s2210_s28  ;;  %p2145_p13 = pneg %p2120_p6 }
0x308b   :  { %s2202_s29 = scalar_select %p2201_p12, %s6769_s23, %s2200_s3  ;;  %v2212_v42 = vsel %vm768_vm0, %v2211_v55, %v5775_v52 }
0x308c   :  { %p2075_p12 = por %p2074_p10, %p2073_p0 }
0x308d   :  { %s2203_s24 = ssub.f32 %s5734_s18, %s2202_s29 }
0x308e   :  { %s6807_s22 = smov (%p2075_p12, %s5694_s22), -inf }
0x308f   :  { %s6793_s24 = smov (!%p2191_p11, %s2203_s24), 0.0 }
0x3090   :  { %v2213_v24 = vstv %s6793_s24 }
0x3091   :  { %v2214_v43 = vsel %vm772_vm14, %v2213_v24, %v2212_v42 }
0x3113   :  { %v2227_v54 = vpop.xlane.xlu1 %2226 }
0x3114   :  { %v2228_v56 = vrot.slane %v2227_v54, 4 }
0x3116   :  { %v2229_v57 = vmax.f32 %v2227_v54, %v2228_v56 }
0x3118   :  { %v2230_v34 = vrot.slane %v2229_v57, 2 }
0x311a   :  { %v2231_v59 = vmax.f32 %v2229_v57, %v2230_v34 }
0x311c   :  { %v2232_v39 = vrot.slane %v2231_v59, 1 }
0x311e   :  { %v2233_v61 = vmax.f32 %v2231_v59, %v2232_v39 }
0x3120   :  { %4125 = vpush %v2233_v61 }
0x3151   :  { %s5777_s16 = spop %4125 }
0x3152   :  { %v2235_v3 = vstv %s5777_s16  ;;  %p2262_p2 = scmp.gt.f32.partialorder %s5777_s16, -inf }
0x3153   :  { %vm2236_vm13 = vcmp.eq.f32.partialorder %v2225_v32, %v2235_v3 }
0x3154   :  { %v2237_v4 = vsel %vm2236_vm13, %v4671_v63, 1024  ;;  %vm2078_vm13 = vcmp.eq.s32.totalorder %v4619_v17, %v2077_v11  ;;  %s5799_s26 = scalar_select %p2262_p2, %s5777_s16, -inf }
0x3155   :  { %v2239_v8 = vshra.s32 %v2237_v4, 16  ;;  %v2238_v12 = vand.u32 65535, %v2237_v4 }
0x3156   :  { %v2276_v14 = vstv %s5799_s26 }
0x3157   :  { %v2241_v23 = vcvt.s32.f32 %v2239_v8  ;;  %v2240_v13 = vcvt.s32.f32 %v2238_v12  ;;  %v2277_v5 = vsel %vm832_vm11, %v2276_v14, %v2214_v43 }
0x3159   :  { %2242 = vmin.xlane.f32.xlu0 %v2241_v23 }
0x31e6   :  { %v2243_v41 = vpop.xlane.xlu0 %2242 }
0x31e7   :  { %vm2244_vm15 = vcmp.eq.f32.partialorder %v2241_v23, %v2243_v41  ;;  %v2249_v16 = vcvt.f32.s32 %v2243_v41 }
0x31e8   :  { %v2245_v46 = vsel %vm2244_vm15, %v2240_v13, inf  ;;  %vm2149_vm15 = vcmp.eq.s32.totalorder %v4619_v17, %v2148_v36 }
0x31e9   :  { %2246 = vmin.xlane.f32.xlu1 %v2245_v46  ;;  %v2250_v20 = vshll.u32 %v2249_v16, 16 }
0x3276   :  { %v2247_v7 = vpop.xlane.xlu1 %2246 }
0x3277   :  { %v2248_v25 = vcvt.f32.s32 %v2247_v7 }
0x3279   :  { %v2251_v26 = vadd.s32 %v2250_v20, %v2248_v25 }
0x327b   :  { %v2252_v29 = vrot.slane %v2251_v26, 4 }
0x327d   :  { %vm2253_vm10 = vcmp.lt.s32.totalorder %v2251_v26, %v2252_v29 }
0x327e   :  { %v2254_v48 = vsel %vm2253_vm10, %v2251_v26, %v2252_v29  ;;  %vm2220_vm10 = vcmp.eq.s32.totalorder %v4619_v17, %v2219_v37 }
0x327f   :  { %v2255_v30 = vrot.slane %v2254_v48, 2 }
0x3281   :  { %vm2256_vm3 = vcmp.lt.s32.totalorder %v2254_v48, %v2255_v30 }
0x3282   :  { %v2257_v9 = vsel %vm2256_vm3, %v2254_v48, %v2255_v30  ;;  %vm2079_vm3 = vmand %vm476_vm2, %vm2078_vm13 }
0x3283   :  { %v2258_v10 = vrot.slane %v2257_v9, 1  ;;  %vm2221_vm13 = vmand %vm483_vm6, %vm2220_vm10  ;;  %v2080_v15 = vsel %vm2079_vm3, 1.0, %v4305_v50  ;;  %vm2294_vm3 = vcmp.eq.s32.totalorder %v4617_v58, 4 }
0x3285   :  { %vm2259_vm9 = vcmp.lt.s32.totalorder %v2257_v9, %v2258_v10 }
0x3286   :  { %v2260_v35 = vsel %vm2259_vm9, %v2257_v9, %v2258_v10  ;;  %vm5811_vm9 = vmand %vm481_vm5, %vm2149_vm15 }
0x3287   :  { %4127 = vpush %v2260_v35  ;;  %v2151_v44 = vsel %vm5811_vm9, 1.0, %v2080_v15 }
0x3288   :  { %v2222_v19 = vsel %vm2221_vm13, 1.0, %v2151_v44 }
0x32b8   :  { %s4128_s9 = spop %4127 }
0x32b9   :  { %s2263_s30 = sand.u32 127, %s4128_s9  ;;  %s2265_s8 = sshra.s32 %s4128_s9, 7 }
0x32ba   :  { %s6795_s30 = smov (!%p2262_p2, %s2263_s30), 0  ;;  %s6797_s8 = smov (!%p2262_p2, %s2265_s8), 0 }
0x32bb   :  { %s2278_s0 = scvt.s32.f32 %s6795_s30  ;;  %v2290_v53 = vstv %s6795_s30  ;;  %p2268_p5 = scmp.eq.s32.totalorder %s6797_s8, 2 }
0x32bc   :  { %vm2291_vm15 = vcmp.eq.s32.totalorder %v4619_v17, %v2290_v53  ;;  %p2270_p1 = scmp.eq.s32.totalorder %s6797_s8, 1  ;;  %p2272_p3 = scmp.eq.s32.totalorder %s6797_s8, 0 }
0x32bd   :  { %v2279_v18 = vstv %s2278_s0  ;;  %vm2292_vm10 = vmand %vm485_vm7, %vm2291_vm15  ;;  %s6799_s27 = smov (!%p2268_p5, %s6773_s27), %s6775_s2  ;;  %s2281_s19 = scvt.s32.f32 %s6797_s8 }
0x32be   :  { %v2280_v62 = vsel %vm835_vm4, %v2279_v18, %v2277_v5  ;;  %v2293_v22 = vsel %vm2292_vm10, 1.0, %v2222_v19  ;;  %s6801_s11 = smov (!%p2270_p1, %s6771_s11), %s6799_s27  ;;  %p2286_p4 = scmp.eq.s32.totalorder %s6795_s30, 127 }
0x32bf   :  { %3777 = vmatmul.mubr.f32.vlgmr.msra.gmra.mrb[20].mxu0 %v2293_v22  ;;  %s6803_s23 = smov (!%p2272_p3, %s6769_s23), %s6801_s11  ;;  %v2282_v33 = vstv %s2281_s19  ;;  %p2216_p5 = pneg %p2191_p11 }
0x32c0   :  { %4027 = vmatpush3.bf16.msra.mxu0 %v4557_v38  ;;  %3846 = vmatprep.mubr.msk.f32.mxu0 %vm4304_vm1, %v4305_v50  ;;  %s2274_s10 = ssub.f32 %s5777_s16, %s6803_s23  ;;  %v2283_v38 = vsel %vm839_vm12, %v2282_v33, %v2280_v62  ;;  %vm6595_vm1 = vcmp.eq.s32.totalorder %v4619_v17, 15  ;;  %p2146_p1 = por %p2145_p13, %p2144_p8 }
0x32c1   :  { %4028 = vmatprep.subr.bf16.mxu0 %v4303_v49  ;;  %p2287_p3 = pneg %p2262_p2  ;;  %p2217_p9 = por %p2216_p5, %p2215_p7 }
0x32c2   :  { %s6805_s10 = smov (!%p2262_p2, %s2274_s10), 0.0  ;;  %s6809_s17 = smov (%p2146_p1, %s5705_s17), -inf }
0x32c3   :  { %v2284_v32 = vstv %s6805_s10  ;;  %p2288_p6 = por %p2287_p3, %p2286_p4  ;;  %s6811_s14 = smov (%p2217_p9, %s5753_s14), -inf }
0x32c4   :  { %4030 = vmatpush3.bf16.msra.mxu0 %v4567_v0  ;;  %v2285_v0 = vsel %vm6595_vm1, %v2284_v32, %v2283_v38 }
0x32c5   :  { %4031 = vmatprep.subr.bf16.mxu0 %v4303_v49  ;;  %v5858_v27 = vsel %vm2294_vm3, %v2285_v0, %v5615_v28  ;;  %s6813_s26 = smov (%p2288_p6, %s5799_s26), -inf }
0x32c8   :  { %4033 = vmatpush3.bf16.msra.mxu0 %v4577_v2  ;;  %v2298_v2 = vstv %s6809_s17 }
0x32c9   :  { %4034 = vmatprep.subr.bf16.mxu0 %v4303_v49 }
0x32cc   :  { %4036 = vmatpush3.bf16.msra.mxu0 %v4587_v6  ;;  %v2300_v6 = vstv %s6811_s14 }
0x32cd   :  { %4037 = vmatprep.subr.bf16.mxu0 %v4303_v49 }
0x32d0   :  { %4039 = vmatpush3.bf16.msra.mxu0 %v4597_v31 }
0x32d1   :  { %4040 = vmatprep.subr.bf16.mxu0 %v4303_v49 }
0x32d4   :  { %4042 = vmatpush3.bf16.msra.mxu0 %v4607_v1  ;;  %v2302_v1 = vstv %s6813_s26 }
0x32d5   :  { %4043 = vmatprep.subr.bf16.mxu0 %v4303_v49 }
0x32d8   :  { %4045 = vmatpush3.bf16.msra.mxu0 %v4621_v45 }
0x32d9   :  { %4046 = vmatprep.subr.bf16.mxu0 %v4303_v49  ;;  %v2296_v49 = vstv %s6807_s22 }
0x32da   :  { %v2297_v31 = vsel %vm476_vm2, %v2296_v49, -inf }
0x32db   :  { %v2299_v45 = vsel %vm481_vm5, %v2298_v2, %v2297_v31 }
0x32dc   :  { %4048 = vmatpush3.bf16.msra.mxu0 %v4632_v21  ;;  %v2301_v21 = vsel %vm483_vm6, %v2300_v6, %v2299_v45 }
0x32dd   :  { %v2303_v28 = vsel %vm485_vm7, %v2302_v1, %v2301_v21 }
0x3392   :  { %v2370_v47 = vpop.f32.mrb[20].mxu0 }
0x3393   :  { %v2371_v60 = vadd.f32 %v2370_v47, %v2303_v28  ;;  %v3778_v51 = vpop.f32.mrb[21].mxu0 }
0x3395   :  { %2374 = vmax.xlane.f32.xlu0 %v2371_v60 }
0x3422   :  { %v2375_v52 = vpop.xlane.xlu0 %2374 }
0x3423   :  { %v2376_v54 = vrot.slane %v2375_v52, 4 }
0x3425   :  { %v2377_v56 = vmax.f32 %v2375_v52, %v2376_v54 }
0x3427   :  { %v2378_v57 = vrot.slane %v2377_v56, 2 }
0x3429   :  { %v2379_v34 = vmax.f32 %v2377_v56, %v2378_v57 }
0x342b   :  { %v2380_v59 = vrot.slane %v2379_v34, 1 }
0x342d   :  { %v2381_v39 = vmax.f32 %v2379_v34, %v2380_v59 }
0x342f   :  { %4129 = vpush %v2381_v39 }
0x3460   :  { %s5905_s23 = spop %4129 }
0x3461   :  { %v2383_v61 = vstv %s5905_s23  ;;  %p2410_p11 = scmp.gt.f32.partialorder %s5905_s23, -inf }
0x3462   :  { %vm2384_vm9 = vcmp.eq.f32.partialorder %v2371_v60, %v2383_v61 }
0x3463   :  { %v2385_v3 = vsel %vm2384_vm9, %v4671_v63, 1024  ;;  %s5937_s18 = scalar_select %p2410_p11, %s5905_s23, -inf }
0x3464   :  { %v2387_v4 = vshra.s32 %v2385_v3, 16  ;;  %v2386_v23 = vand.u32 65535, %v2385_v3 }
0x3465   :  { %v2424_v21 = vstv %s5937_s18 }
0x3466   :  { %v2389_v8 = vcvt.s32.f32 %v2387_v4  ;;  %v2388_v41 = vcvt.s32.f32 %v2386_v23  ;;  %v2425_v47 = vsel %vm619_vm8, %v2424_v21, 0.0 }
0x3468   :  { %2390 = vmin.xlane.f32.xlu1 %v2389_v8 }
0x34f5   :  { %v2391_v12 = vpop.xlane.xlu1 %2390 }
0x34f6   :  { %vm2392_vm13 = vcmp.eq.f32.partialorder %v2389_v8, %v2391_v12  ;;  %v2397_v46 = vcvt.f32.s32 %v2391_v12 }
0x34f7   :  { %v2393_v13 = vsel %vm2392_vm13, %v2388_v41, inf }
0x34f8   :  { %2394 = vmin.xlane.f32.xlu0 %v2393_v13  ;;  %v2398_v7 = vshll.u32 %v2397_v46, 16 }
0x3585   :  { %v2395_v16 = vpop.xlane.xlu0 %2394 }
0x3586   :  { %v2396_v20 = vcvt.f32.s32 %v2395_v16 }
0x3588   :  { %v2399_v25 = vadd.s32 %v2398_v7, %v2396_v20 }
0x358a   :  { %v2400_v26 = vrot.slane %v2399_v25, 4 }
0x358c   :  { %vm2401_vm15 = vcmp.lt.s32.totalorder %v2399_v25, %v2400_v26 }
0x358d   :  { %v2402_v29 = vsel %vm2401_vm15, %v2399_v25, %v2400_v26 }
0x358e   :  { %v2403_v48 = vrot.slane %v2402_v29, 2 }
0x3590   :  { %vm2404_vm10 = vcmp.lt.s32.totalorder %v2402_v29, %v2403_v48 }
0x3591   :  { %v2405_v30 = vsel %vm2404_vm10, %v2402_v29, %v2403_v48 }
0x3592   :  { %v2406_v9 = vrot.slane %v2405_v30, 1 }
0x3594   :  { %vm2407_vm3 = vcmp.lt.s32.totalorder %v2405_v30, %v2406_v9 }
0x3595   :  { %v2408_v10 = vsel %vm2407_vm3, %v2405_v30, %v2406_v9 }
0x3596   :  { %4131 = vpush %v2408_v10 }
0x35c7   :  { %s5909_s11 = spop %4131 }
0x35c8   :  { %v2442_v35 = vstv %s5909_s11  ;;  %s2413_s2 = sshra.s32 %s5909_s11, 7  ;;  %s2411_s1 = sand.u32 127, %s5909_s11 }
0x35c9   :  { %vm2443_vm1 = vcmp.eq.s32.totalorder %v4671_v63, %v2442_v35  ;;  %s6815_s2 = smov (!%p2410_p11, %s2413_s2), 0  ;;  %s6817_s1 = smov (!%p2410_p11, %s2411_s1), 0 }
0x35ca   :  { %v5913_v11 = vsel %vm2443_vm1, -inf, %v2371_v60  ;;  %p2416_p2 = scmp.eq.s32.totalorder %s6815_s2, 2  ;;  %p2418_p0 = scmp.eq.s32.totalorder %s6815_s2, 1  ;;  %vm6596_vm1 = vcmp.eq.s32.totalorder %v4619_v17, 4 }
0x35cb   :  { %2445 = vmax.xlane.f32.xlu1 %v5913_v11  ;;  %p2420_p8 = scmp.eq.s32.totalorder %s6815_s2, 0  ;;  %s2426_s12 = scvt.s32.f32 %s6817_s1 }
0x35cc   :  { %s2417_s6 = scalar_select %p2416_p2, %s6811_s14, %s6813_s26 }
0x35cd   :  { %s2429_s25 = scvt.s32.f32 %s6815_s2  ;;  %v2427_v28 = vstv %s2426_s12 }
0x35ce   :  { %s2419_s5 = scalar_select %p2418_p0, %s6809_s17, %s2417_s6  ;;  %v2428_v60 = vsel %vm6596_vm1, %v2427_v28, %v2425_v47 }
0x35cf   :  { %v2430_v51 = vstv %s2429_s25 }
0x35d0   :  { %s2421_s7 = scalar_select %p2420_p8, %s6807_s22, %s2419_s5 }
0x35d1   :  { %p2434_p8 = scmp.eq.s32.totalorder %s6817_s1, 127 }
0x35d2   :  { %s2422_s21 = ssub.f32 %s5905_s23, %s2421_s7 }
0x35d4   :  { %s6819_s21 = smov (!%p2410_p11, %s2422_s21), 0.0 }
0x35d5   :  { %v2432_v54 = vstv %s6819_s21 }
0x3658   :  { %v2446_v36 = vpop.xlane.xlu1 %2445 }
0x3659   :  { %v2447_v37 = vrot.slane %v2446_v36, 4 }
0x365b   :  { %v2448_v55 = vmax.f32 %v2446_v36, %v2447_v37 }
0x365d   :  { %v2449_v24 = vrot.slane %v2448_v55, 2 }
0x365f   :  { %v2450_v40 = vmax.f32 %v2448_v55, %v2449_v24 }
0x3661   :  { %v2451_v14 = vrot.slane %v2450_v40, 1 }
0x3663   :  { %v2452_v42 = vmax.f32 %v2450_v40, %v2451_v14 }
0x3665   :  { %4133 = vpush %v2452_v42 }
0x3696   :  { %s5916_s27 = spop %4133 }
0x3697   :  { %v2454_v15 = vstv %s5916_s27  ;;  %p2481_p10 = scmp.gt.f32.partialorder %s5916_s27, -inf }
0x3698   :  { %vm2455_vm9 = vcmp.eq.f32.partialorder %v5913_v11, %v2454_v15 }
0x3699   :  { %v2456_v53 = vsel %vm2455_vm9, %v4671_v63, 1024  ;;  %s5948_s15 = scalar_select %p2481_p10, %s5916_s27, -inf }
0x369a   :  { %v2458_v43 = vshra.s32 %v2456_v53, 16  ;;  %v2457_v5 = vand.u32 65535, %v2456_v53 }
0x369b   :  { %v2495_v56 = vstv %s5948_s15 }
0x369c   :  { %v2460_v44 = vcvt.s32.f32 %v2458_v43  ;;  %v2459_v19 = vcvt.s32.f32 %v2457_v5 }
0x369e   :  { %2461 = vmin.xlane.f32.xlu0 %v2460_v44 }
0x372b   :  { %v2462_v18 = vpop.xlane.xlu0 %2461 }
0x372c   :  { %vm2463_vm13 = vcmp.eq.f32.partialorder %v2460_v44, %v2462_v18  ;;  %v2468_v22 = vcvt.f32.s32 %v2462_v18 }
0x372d   :  { %v2464_v62 = vsel %vm2463_vm13, %v2459_v19, inf  ;;  %vm6597_vm13 = vcmp.eq.s32.totalorder %v4619_v17, 8 }
0x372e   :  { %2465 = vmin.xlane.f32.xlu1 %v2464_v62  ;;  %v2469_v38 = vshll.u32 %v2468_v22, 16  ;;  %v2431_v34 = vsel %vm6597_vm13, %v2430_v51, %v2428_v60 }
0x37bb   :  { %v2466_v33 = vpop.xlane.xlu1 %2465 }
0x37bc   :  { %v2467_v32 = vcvt.f32.s32 %v2466_v33 }
0x37be   :  { %v2470_v0 = vadd.s32 %v2469_v38, %v2467_v32 }
0x37c0   :  { %v2471_v49 = vrot.slane %v2470_v0, 4 }
0x37c2   :  { %vm2472_vm15 = vcmp.lt.s32.totalorder %v2470_v0, %v2471_v49 }
0x37c3   :  { %v2473_v2 = vsel %vm2472_vm15, %v2470_v0, %v2471_v49  ;;  %vm6598_vm15 = vcmp.eq.s32.totalorder %v4619_v17, 12 }
0x37c4   :  { %v2474_v6 = vrot.slane %v2473_v2, 2  ;;  %v2433_v59 = vsel %vm6598_vm15, %v2432_v54, %v2431_v34 }
0x37c6   :  { %vm2475_vm10 = vcmp.lt.s32.totalorder %v2473_v2, %v2474_v6 }
0x37c7   :  { %v2476_v31 = vsel %vm2475_vm10, %v2473_v2, %v2474_v6  ;;  %vm6599_vm10 = vcmp.eq.s32.totalorder %v4619_v17, 1 }
0x37c8   :  { %v2477_v1 = vrot.slane %v2476_v31, 1  ;;  %v2496_v39 = vsel %vm6599_vm10, %v2495_v56, %v2433_v59 }
0x37ca   :  { %vm2478_vm3 = vcmp.lt.s32.totalorder %v2476_v31, %v2477_v1 }
0x37cb   :  { %v2479_v45 = vsel %vm2478_vm3, %v2476_v31, %v2477_v1  ;;  %vm6600_vm3 = vcmp.eq.s32.totalorder %v4619_v17, 5 }
0x37cc   :  { %4135 = vpush %v2479_v45 }
0x37fd   :  { %s5952_s16 = spop %4135 }
0x37fe   :  { %s2482_s13 = sand.u32 127, %s5952_s16  ;;  %v2513_v52 = vstv %s5952_s16  ;;  %s2484_s29 = sshra.s32 %s5952_s16, 7 }
0x37ff   :  { %s6821_s13 = smov (!%p2481_p10, %s2482_s13), 0  ;;  %vm2514_vm9 = vcmp.eq.s32.totalorder %v4671_v63, %v2513_v52  ;;  %s6823_s29 = smov (!%p2481_p10, %s2484_s29), 0 }
0x3800   :  { %v5965_v57 = vsel %vm2514_vm9, -inf, %v5913_v11  ;;  %s2497_s20 = scvt.s32.f32 %s6821_s13  ;;  %p2487_p7 = scmp.eq.s32.totalorder %s6823_s29, 2 }
0x3801   :  { %2516 = vmax.xlane.f32.xlu0 %v5965_v57  ;;  %p2489_p13 = scmp.eq.s32.totalorder %s6823_s29, 1  ;;  %p2491_p4 = scmp.eq.s32.totalorder %s6823_s29, 0 }
0x3802   :  { %v2498_v61 = vstv %s2497_s20  ;;  %s2488_s24 = scalar_select %p2487_p7, %s6811_s14, %s6813_s26 }
0x3803   :  { %v2499_v3 = vsel %vm6600_vm3, %v2498_v61, %v2496_v39  ;;  %s2500_s8 = scvt.s32.f32 %s6823_s29  ;;  %p2505_p7 = scmp.eq.s32.totalorder %s6821_s13, 127 }
0x3804   :  { %s2490_s28 = scalar_select %p2489_p13, %s6809_s17, %s2488_s24 }
0x3805   :  { %v2501_v15 = vstv %s2500_s8  ;;  %p2435_p13 = pneg %p2410_p11 }
0x3806   :  { %s2492_s9 = scalar_select %p2491_p4, %s6807_s22, %s2490_s28 }
0x3808   :  { %s2493_s30 = ssub.f32 %s5916_s27, %s2492_s9 }
0x380a   :  { %s6825_s30 = smov (!%p2481_p10, %s2493_s30), 0.0 }
0x380b   :  { %v2503_v43 = vstv %s6825_s30 }
0x388e   :  { %v2517_v4 = vpop.xlane.xlu0 %2516 }
0x388f   :  { %v2518_v8 = vrot.slane %v2517_v4, 4 }
0x3891   :  { %v2519_v23 = vmax.f32 %v2517_v4, %v2518_v8 }
0x3893   :  { %v2520_v12 = vrot.slane %v2519_v23, 2 }
0x3895   :  { %v2521_v41 = vmax.f32 %v2519_v23, %v2520_v12  ;;  %v2438_v12 = vstv %s6817_s1 }
0x3897   :  { %v2522_v13 = vrot.slane %v2521_v41, 1 }
0x3899   :  { %v2523_v46 = vmax.f32 %v2521_v41, %v2522_v13  ;;  %v2509_v41 = vstv %s6821_s13 }
0x389b   :  { %4137 = vpush %v2523_v46 }
0x38cc   :  { %s5977_s3 = spop %4137 }
0x38cd   :  { %v2525_v16 = vstv %s5977_s3  ;;  %p2552_p12 = scmp.gt.f32.partialorder %s5977_s3, -inf }
0x38ce   :  { %vm2526_vm1 = vcmp.eq.f32.partialorder %v5965_v57, %v2525_v16 }
0x38cf   :  { %v2527_v7 = vsel %vm2526_vm1, %v4671_v63, 1024  ;;  %s5996_s0 = scalar_select %p2552_p12, %s5977_s3, -inf  ;;  %vm6601_vm1 = vcmp.eq.s32.totalorder %v4619_v17, 9 }
0x38d0   :  { %v2529_v20 = vshra.s32 %v2527_v7, 16  ;;  %v2528_v26 = vand.u32 65535, %v2527_v7  ;;  %v2502_v18 = vsel %vm6601_vm1, %v2501_v15, %v2499_v3 }
0x38d1   :  { %v2566_v44 = vstv %s5996_s0 }
0x38d2   :  { %v2531_v25 = vcvt.s32.f32 %v2529_v20  ;;  %v2530_v48 = vcvt.s32.f32 %v2528_v26 }
0x38d4   :  { %2532 = vmin.xlane.f32.xlu1 %v2531_v25 }
0x3961   :  { %v2533_v29 = vpop.xlane.xlu1 %2532 }
0x3962   :  { %vm2534_vm9 = vcmp.eq.f32.partialorder %v2531_v25, %v2533_v29  ;;  %v2539_v9 = vcvt.f32.s32 %v2533_v29 }
0x3963   :  { %v2535_v30 = vsel %vm2534_vm9, %v2530_v48, inf  ;;  %vm6602_vm9 = vcmp.eq.s32.totalorder %v4619_v17, 13 }
0x3964   :  { %2536 = vmin.xlane.f32.xlu0 %v2535_v30  ;;  %v2540_v35 = vshll.u32 %v2539_v9, 16  ;;  %v2504_v19 = vsel %vm6602_vm9, %v2503_v43, %v2502_v18 }
0x39f1   :  { %v2537_v10 = vpop.xlane.xlu0 %2536 }
0x39f2   :  { %v2538_v11 = vcvt.f32.s32 %v2537_v10 }
0x39f4   :  { %v2541_v36 = vadd.s32 %v2540_v35, %v2538_v11 }
0x39f6   :  { %v2542_v37 = vrot.slane %v2541_v36, 4 }
0x39f8   :  { %vm2543_vm13 = vcmp.lt.s32.totalorder %v2541_v36, %v2542_v37 }
0x39f9   :  { %v2544_v55 = vsel %vm2543_vm13, %v2541_v36, %v2542_v37  ;;  %vm6603_vm13 = vcmp.eq.s32.totalorder %v4619_v17, 2 }
0x39fa   :  { %v2545_v24 = vrot.slane %v2544_v55, 2  ;;  %v2567_v62 = vsel %vm6603_vm13, %v2566_v44, %v2504_v19 }
0x39fc   :  { %vm2546_vm15 = vcmp.lt.s32.totalorder %v2544_v55, %v2545_v24 }
0x39fd   :  { %v2547_v40 = vsel %vm2546_vm15, %v2544_v55, %v2545_v24  ;;  %vm6604_vm15 = vcmp.eq.s32.totalorder %v4619_v17, 6 }
0x39fe   :  { %v2548_v14 = vrot.slane %v2547_v40, 1 }
0x3a00   :  { %vm2549_vm10 = vcmp.lt.s32.totalorder %v2547_v40, %v2548_v14 }
0x3a01   :  { %v2550_v42 = vsel %vm2549_vm10, %v2547_v40, %v2548_v14 }
0x3a02   :  { %4139 = vpush %v2550_v42 }
0x3a33   :  { %s5998_s19 = spop %4139 }
0x3a34   :  { %s2553_s10 = sand.u32 127, %s5998_s19  ;;  %v2584_v53 = vstv %s5998_s19  ;;  %s2555_s6 = sshra.s32 %s5998_s19, 7 }
0x3a35   :  { %s6827_s10 = smov (!%p2552_p12, %s2553_s10), 0  ;;  %vm2585_vm3 = vcmp.eq.s32.totalorder %v4671_v63, %v2584_v53  ;;  %s6829_s6 = smov (!%p2552_p12, %s2555_s6), 0 }
0x3a36   :  { %v2586_v5 = vsel %vm2585_vm3, -inf, %v5965_v57  ;;  %s2568_s11 = scvt.s32.f32 %s6827_s10  ;;  %p2558_p5 = scmp.eq.s32.totalorder %s6829_s6, 2  ;;  %v2580_v13 = vstv %s6827_s10 }
0x3a37   :  { %2587 = vmax.xlane.f32.xlu1 %v2586_v5  ;;  %p2560_p1 = scmp.eq.s32.totalorder %s6829_s6, 1  ;;  %p2562_p3 = scmp.eq.s32.totalorder %s6829_s6, 0 }
0x3a38   :  { %v2569_v22 = vstv %s2568_s11  ;;  %s2559_s5 = scalar_select %p2558_p5, %s6811_s14, %s6813_s26 }
0x3a39   :  { %v6018_v33 = vsel %vm6604_vm15, %v2569_v22, %v2567_v62  ;;  %s2571_s25 = scvt.s32.f32 %s6829_s6  ;;  %vm2439_vm15 = vcmp.eq.s32.totalorder %v4619_v17, %v2438_v12  ;;  %p2576_p4 = scmp.eq.s32.totalorder %s6827_s10, 127 }
0x3a3a   :  { %s2561_s7 = scalar_select %p2560_p1, %s6809_s17, %s2559_s5 }
0x3a3b   :  { %v2572_v46 = vstv %s2571_s25  ;;  %p2506_p5 = pneg %p2481_p10 }
0x3a3c   :  { %s2563_s12 = scalar_select %p2562_p3, %s6807_s22, %s2561_s7  ;;  %v2573_v25 = vsel %vm768_vm0, %v2572_v46, %v6018_v33 }
0x3a3d   :  { %p2436_p3 = por %p2435_p13, %p2434_p8 }
0x3a3e   :  { %s2564_s21 = ssub.f32 %s5977_s3, %s2563_s12 }
0x3a3f   :  { %s6845_s18 = smov (%p2436_p3, %s5937_s18), -inf }
0x3a40   :  { %s6831_s21 = smov (!%p2552_p12, %s2564_s21), 0.0 }
0x3a41   :  { %v2574_v16 = vstv %s6831_s21 }
0x3a42   :  { %v2575_v48 = vsel %vm772_vm14, %v2574_v16, %v2573_v25 }
0x3ac4   :  { %v2588_v38 = vpop.xlane.xlu1 %2587 }
0x3ac5   :  { %v2589_v32 = vrot.slane %v2588_v38, 4 }
0x3ac7   :  { %v2590_v0 = vmax.f32 %v2588_v38, %v2589_v32 }
0x3ac9   :  { %v2591_v49 = vrot.slane %v2590_v0, 2 }
0x3acb   :  { %v2592_v2 = vmax.f32 %v2590_v0, %v2591_v49 }
0x3acd   :  { %v2593_v6 = vrot.slane %v2592_v2, 1 }
0x3acf   :  { %v2594_v31 = vmax.f32 %v2592_v2, %v2593_v6 }
0x3ad1   :  { %4141 = vpush %v2594_v31 }
0x3b02   :  { %s6020_s2 = spop %4141 }
0x3b03   :  { %v2596_v1 = vstv %s6020_s2  ;;  %p2623_p9 = scmp.gt.f32.partialorder %s6020_s2, -inf }
0x3b04   :  { %vm2597_vm10 = vcmp.eq.f32.partialorder %v2586_v5, %v2596_v1 }
0x3b05   :  { %v2598_v45 = vsel %vm2597_vm10, %v4671_v63, 1024  ;;  %s6042_s16 = scalar_select %p2623_p9, %s6020_s2, -inf  ;;  %vm2510_vm10 = vcmp.eq.s32.totalorder %v4619_v17, %v2509_v41 }
0x3b06   :  { %v2600_v21 = vshra.s32 %v2598_v45, 16  ;;  %v2599_v47 = vand.u32 65535, %v2598_v45 }
0x3b07   :  { %v2637_v20 = vstv %s6042_s16 }
0x3b08   :  { %v2602_v28 = vcvt.s32.f32 %v2600_v21  ;;  %v2601_v51 = vcvt.s32.f32 %v2599_v47  ;;  %v2638_v9 = vsel %vm832_vm11, %v2637_v20, %v2575_v48 }
0x3b0a   :  { %2603 = vmin.xlane.f32.xlu0 %v2602_v28 }
0x3b97   :  { %v2604_v60 = vpop.xlane.xlu0 %2603 }
0x3b98   :  { %vm2605_vm3 = vcmp.eq.f32.partialorder %v2602_v28, %v2604_v60  ;;  %v2610_v54 = vcvt.f32.s32 %v2604_v60 }
0x3b99   :  { %v2606_v52 = vsel %vm2605_vm3, %v2601_v51, inf  ;;  %vm2581_vm3 = vcmp.eq.s32.totalorder %v4619_v17, %v2580_v13 }
0x3b9a   :  { %2607 = vmin.xlane.f32.xlu1 %v2606_v52  ;;  %v2611_v57 = vshll.u32 %v2610_v54, 16 }
0x3c27   :  { %v2608_v56 = vpop.xlane.xlu1 %2607 }
0x3c28   :  { %v2609_v34 = vcvt.f32.s32 %v2608_v56 }
0x3c2a   :  { %v2612_v59 = vadd.s32 %v2611_v57, %v2609_v34 }
0x3c2c   :  { %v2613_v39 = vrot.slane %v2612_v59, 4 }
0x3c2e   :  { %vm2614_vm1 = vcmp.lt.s32.totalorder %v2612_v59, %v2613_v39 }
0x3c2f   :  { %v2615_v61 = vsel %vm2614_vm1, %v2612_v59, %v2613_v39  ;;  %vm2440_vm1 = vmand %vm476_vm2, %vm2439_vm15 }
0x3c30   :  { %v2616_v3 = vrot.slane %v2615_v61, 2  ;;  %v2441_v26 = vsel %vm2440_vm1, 1.0, %v4305_v50  ;;  %vm6607_vm1 = vcmp.eq.s32.totalorder %v4619_v17, 15 }
0x3c32   :  { %vm2617_vm9 = vcmp.lt.s32.totalorder %v2615_v61, %v2616_v3 }
0x3c33   :  { %v2618_v4 = vsel %vm2617_vm9, %v2615_v61, %v2616_v3  ;;  %vm6054_vm9 = vmand %vm481_vm5, %vm2510_vm10 }
0x3c34   :  { %v2619_v8 = vrot.slane %v2618_v4, 1  ;;  %v2512_v30 = vsel %vm6054_vm9, 1.0, %v2441_v26 }
0x3c36   :  { %vm2620_vm13 = vcmp.lt.s32.totalorder %v2618_v4, %v2619_v8 }
0x3c37   :  { %v2621_v23 = vsel %vm2620_vm13, %v2618_v4, %v2619_v8  ;;  %vm2582_vm13 = vmand %vm483_vm6, %vm2581_vm3  ;;  %vm2655_vm3 = vcmp.eq.s32.totalorder %v4617_v58, 5 }
0x3c38   :  { %4143 = vpush %v2621_v23  ;;  %v2583_v35 = vsel %vm2582_vm13, 1.0, %v2512_v30 }
0x3c69   :  { %s4144_s20 = spop %4143 }
0x3c6a   :  { %s2624_s29 = sand.u32 127, %s4144_s20  ;;  %s2626_s24 = sshra.s32 %s4144_s20, 7 }
0x3c6b   :  { %s6833_s29 = smov (!%p2623_p9, %s2624_s29), 0  ;;  %s6835_s24 = smov (!%p2623_p9, %s2626_s24), 0 }
0x3c6c   :  { %s2639_s28 = scvt.s32.f32 %s6833_s29  ;;  %v2651_v29 = vstv %s6833_s29  ;;  %p2629_p6 = scmp.eq.s32.totalorder %s6835_s24, 2 }
0x3c6d   :  { %vm2652_vm15 = vcmp.eq.s32.totalorder %v4619_v17, %v2651_v29  ;;  %p2631_p2 = scmp.eq.s32.totalorder %s6835_s24, 1  ;;  %p2633_p0 = scmp.eq.s32.totalorder %s6835_s24, 0 }
0x3c6e   :  { %v2640_v10 = vstv %s2639_s28  ;;  %vm2653_vm10 = vmand %vm485_vm7, %vm2652_vm15  ;;  %s6837_s14 = smov (!%p2629_p6, %s6811_s14), %s6813_s26  ;;  %s2642_s9 = scvt.s32.f32 %s6835_s24 }
0x3c6f   :  { %v2641_v11 = vsel %vm835_vm4, %v2640_v10, %v2638_v9  ;;  %v2654_v36 = vsel %vm2653_vm10, 1.0, %v2583_v35  ;;  %s6839_s17 = smov (!%p2631_p2, %s6809_s17), %s6837_s14  ;;  %p2647_p1 = scmp.eq.s32.totalorder %s6833_s29, 127 }
0x3c70   :  { %3812 = vmatmul.mubr.f32.vlgmr.msra.gmra.mrb[6].mxu1 %v2654_v36  ;;  %s6841_s22 = smov (!%p2633_p0, %s6807_s22), %s6839_s17  ;;  %v2643_v37 = vstv %s2642_s9  ;;  %p2577_p6 = pneg %p2552_p12 }
0x3c71   :  { %s2635_s30 = ssub.f32 %s6020_s2, %s6841_s22  ;;  %v2644_v55 = vsel %vm839_vm12, %v2643_v37, %v2641_v11  ;;  %p2507_p2 = por %p2506_p5, %p2505_p7 }
0x3c72   :  { %p2648_p0 = pneg %p2623_p9  ;;  %p2578_p11 = por %p2577_p6, %p2576_p4 }
0x3c73   :  { %s6843_s30 = smov (!%p2623_p9, %s2635_s30), 0.0  ;;  %s6847_s15 = smov (%p2507_p2, %s5948_s15), -inf }
0x3c74   :  { %v2645_v24 = vstv %s6843_s30  ;;  %p2649_p10 = por %p2648_p0, %p2647_p1  ;;  %s6849_s0 = smov (%p2578_p11, %s5996_s0), -inf  ;;  %v2659_v42 = vstv %s6847_s15 }
0x3c75   :  { %v2646_v40 = vsel %vm6607_vm1, %v2645_v24, %v2644_v55  ;;  %v2661_v15 = vstv %s6849_s0 }
0x3c76   :  { %v6093_v14 = vsel %vm2655_vm3, %v2646_v40, %v5858_v27  ;;  %s6851_s16 = smov (%p2649_p10, %s6042_s16), -inf  ;;  %v2657_v27 = vstv %s6845_s18 }
0x3c77   :  { %v2658_v53 = vsel %vm476_vm2, %v2657_v27, -inf  ;;  %v2663_v43 = vstv %s6851_s16 }
0x3c78   :  { %v2660_v44 = vsel %vm481_vm5, %v2659_v42, %v2658_v53 }
0x3c79   :  { %v2662_v5 = vsel %vm483_vm6, %v2661_v15, %v2660_v44 }
0x3c7a   :  { %v2664_v18 = vsel %vm485_vm7, %v2663_v43, %v2662_v5 }
0x3d43   :  { %v2731_v19 = vpop.f32.mrb[6].mxu1 }
0x3d44   :  { %v2732_v62 = vadd.f32 %v2731_v19, %v2664_v18  ;;  %v3813_v22 = vpop.f32.mrb[7].mxu1 }
0x3d46   :  { %2735 = vmax.xlane.f32.xlu0 %v2732_v62 }
0x3dd3   :  { %v2736_v33 = vpop.xlane.xlu0 %2735 }
0x3dd4   :  { %v2737_v38 = vrot.slane %v2736_v33, 4 }
0x3dd6   :  { %v2738_v32 = vmax.f32 %v2736_v33, %v2737_v38 }
0x3dd8   :  { %v2739_v0 = vrot.slane %v2738_v32, 2 }
0x3dda   :  { %v2740_v49 = vmax.f32 %v2738_v32, %v2739_v0 }
0x3ddc   :  { %v2741_v2 = vrot.slane %v2740_v49, 1 }
0x3dde   :  { %v2742_v6 = vmax.f32 %v2740_v49, %v2741_v2 }
0x3de0   :  { %4145 = vpush %v2742_v6 }
0x3e11   :  { %s6131_s22 = spop %4145 }
0x3e12   :  { %v2744_v31 = vstv %s6131_s22  ;;  %p2771_p12 = scmp.gt.f32.partialorder %s6131_s22, -inf }
0x3e13   :  { %vm2745_vm9 = vcmp.eq.f32.partialorder %v2732_v62, %v2744_v31 }
0x3e14   :  { %v2746_v1 = vsel %vm2745_vm9, %v4671_v63, 1024  ;;  %s6163_s3 = scalar_select %p2771_p12, %s6131_s22, -inf }
0x3e15   :  { %v2748_v45 = vshra.s32 %v2746_v1, 16  ;;  %v2747_v28 = vand.u32 65535, %v2746_v1 }
0x3e16   :  { %v2785_v5 = vstv %s6163_s3 }
0x3e17   :  { %v2750_v21 = vcvt.s32.f32 %v2748_v45  ;;  %v2749_v60 = vcvt.s32.f32 %v2747_v28  ;;  %v2786_v19 = vsel %vm619_vm8, %v2785_v5, 0.0 }
0x3e19   :  { %2751 = vmin.xlane.f32.xlu1 %v2750_v21 }
0x3ea6   :  { %v2752_v47 = vpop.xlane.xlu1 %2751 }
0x3ea7   :  { %vm2753_vm13 = vcmp.eq.f32.partialorder %v2750_v21, %v2752_v47  ;;  %v2758_v52 = vcvt.f32.s32 %v2752_v47 }
0x3ea8   :  { %v2754_v51 = vsel %vm2753_vm13, %v2749_v60, inf }
0x3ea9   :  { %2755 = vmin.xlane.f32.xlu0 %v2754_v51  ;;  %v2759_v56 = vshll.u32 %v2758_v52, 16 }
0x3f36   :  { %v2756_v54 = vpop.xlane.xlu0 %2755 }
0x3f37   :  { %v2757_v57 = vcvt.f32.s32 %v2756_v54 }
0x3f39   :  { %v2760_v34 = vadd.s32 %v2759_v56, %v2757_v57 }
0x3f3b   :  { %v2761_v59 = vrot.slane %v2760_v34, 4 }
0x3f3d   :  { %vm2762_vm15 = vcmp.lt.s32.totalorder %v2760_v34, %v2761_v59 }
0x3f3e   :  { %v2763_v39 = vsel %vm2762_vm15, %v2760_v34, %v2761_v59 }
0x3f3f   :  { %v2764_v61 = vrot.slane %v2763_v39, 2 }
0x3f41   :  { %vm2765_vm10 = vcmp.lt.s32.totalorder %v2763_v39, %v2764_v61 }
0x3f42   :  { %v2766_v3 = vsel %vm2765_vm10, %v2763_v39, %v2764_v61 }
0x3f43   :  { %v2767_v4 = vrot.slane %v2766_v3, 1 }
0x3f45   :  { %vm2768_vm3 = vcmp.lt.s32.totalorder %v2766_v3, %v2767_v4 }
0x3f46   :  { %v2769_v8 = vsel %vm2768_vm3, %v2766_v3, %v2767_v4 }
0x3f47   :  { %4147 = vpush %v2769_v8 }
0x3f78   :  { %s6135_s17 = spop %4147 }
0x3f79   :  { %v2803_v23 = vstv %s6135_s17  ;;  %s2774_s26 = sshra.s32 %s6135_s17, 7  ;;  %s2772_s27 = sand.u32 127, %s6135_s17 }
0x3f7a   :  { %vm2804_vm1 = vcmp.eq.s32.totalorder %v4671_v63, %v2803_v23  ;;  %s6853_s26 = smov (!%p2771_p12, %s2774_s26), 0  ;;  %s6855_s27 = smov (!%p2771_p12, %s2772_s27), 0 }
0x3f7b   :  { %v6139_v12 = vsel %vm2804_vm1, -inf, %v2732_v62  ;;  %p2777_p9 = scmp.eq.s32.totalorder %s6853_s26, 2  ;;  %p2779_p8 = scmp.eq.s32.totalorder %s6853_s26, 1  ;;  %vm6608_vm1 = vcmp.eq.s32.totalorder %v4619_v17, 4 }
0x3f7c   :  { %2806 = vmax.xlane.f32.xlu1 %v6139_v12  ;;  %p2781_p7 = scmp.eq.s32.totalorder %s6853_s26, 0  ;;  %s2787_s8 = scvt.s32.f32 %s6855_s27 }
0x3f7d   :  { %s2778_s23 = scalar_select %p2777_p9, %s6849_s0, %s6851_s16 }
0x3f7e   :  { %s2790_s10 = scvt.s32.f32 %s6853_s26  ;;  %v2788_v18 = vstv %s2787_s8 }
0x3f7f   :  { %s2780_s1 = scalar_select %p2779_p8, %s6847_s15, %s2778_s23  ;;  %v2789_v62 = vsel %vm6608_vm1, %v2788_v18, %v2786_v19 }
0x3f80   :  { %v2791_v22 = vstv %s2790_s10 }
0x3f81   :  { %s2782_s13 = scalar_select %p2781_p7, %s6845_s18, %s2780_s1 }
0x3f82   :  { %p2795_p7 = scmp.eq.s32.totalorder %s6855_s27, 127 }
0x3f83   :  { %s2783_s19 = ssub.f32 %s6131_s22, %s2782_s13 }
0x3f85   :  { %s6857_s19 = smov (!%p2771_p12, %s2783_s19), 0.0 }
0x3f86   :  { %v2793_v38 = vstv %s6857_s19 }
0x4009   :  { %v2807_v41 = vpop.xlane.xlu1 %2806 }
0x400a   :  { %v2808_v13 = vrot.slane %v2807_v41, 4 }
0x400c   :  { %v2809_v46 = vmax.f32 %v2807_v41, %v2808_v13 }
0x400e   :  { %v2810_v16 = vrot.slane %v2809_v46, 2 }
0x4010   :  { %v2811_v7 = vmax.f32 %v2809_v46, %v2810_v16 }
0x4012   :  { %v2812_v20 = vrot.slane %v2811_v7, 1 }
0x4014   :  { %v2813_v25 = vmax.f32 %v2811_v7, %v2812_v20 }
0x4016   :  { %4149 = vpush %v2813_v25 }
0x4047   :  { %s6142_s14 = spop %4149 }
0x4048   :  { %v2815_v26 = vstv %s6142_s14  ;;  %p2842_p13 = scmp.gt.f32.partialorder %s6142_s14, -inf }
0x4049   :  { %vm2816_vm9 = vcmp.eq.f32.partialorder %v6139_v12, %v2815_v26 }
0x404a   :  { %v2817_v29 = vsel %vm2816_vm9, %v4671_v63, 1024  ;;  %s6174_s11 = scalar_select %p2842_p13, %s6142_s14, -inf }
0x404b   :  { %v2819_v48 = vshra.s32 %v2817_v29, 16  ;;  %v2818_v9 = vand.u32 65535, %v2817_v29 }
0x404c   :  { %v2856_v32 = vstv %s6174_s11 }
0x404d   :  { %v2821_v30 = vcvt.s32.f32 %v2819_v48  ;;  %v2820_v35 = vcvt.s32.f32 %v2818_v9 }
0x404f   :  { %2822 = vmin.xlane.f32.xlu0 %v2821_v30 }
0x40dc   :  { %v2823_v10 = vpop.xlane.xlu0 %2822 }
0x40dd   :  { %vm2824_vm13 = vcmp.eq.f32.partialorder %v2821_v30, %v2823_v10  ;;  %v2829_v36 = vcvt.f32.s32 %v2823_v10 }
0x40de   :  { %v2825_v11 = vsel %vm2824_vm13, %v2820_v35, inf  ;;  %vm6609_vm13 = vcmp.eq.s32.totalorder %v4619_v17, 8 }
0x40df   :  { %2826 = vmin.xlane.f32.xlu1 %v2825_v11  ;;  %v2830_v55 = vshll.u32 %v2829_v36, 16  ;;  %v2792_v49 = vsel %vm6609_vm13, %v2791_v22, %v2789_v62 }
0x416c   :  { %v2827_v37 = vpop.xlane.xlu1 %2826 }
0x416d   :  { %v2828_v24 = vcvt.f32.s32 %v2827_v37 }
0x416f   :  { %v2831_v40 = vadd.s32 %v2830_v55, %v2828_v24 }
0x4171   :  { %v2832_v27 = vrot.slane %v2831_v40, 4 }
0x4173   :  { %vm2833_vm15 = vcmp.lt.s32.totalorder %v2831_v40, %v2832_v27 }
0x4174   :  { %v2834_v42 = vsel %vm2833_vm15, %v2831_v40, %v2832_v27  ;;  %vm6610_vm15 = vcmp.eq.s32.totalorder %v4619_v17, 12 }
0x4175   :  { %v2835_v15 = vrot.slane %v2834_v42, 2  ;;  %v2794_v2 = vsel %vm6610_vm15, %v2793_v38, %v2792_v49 }
0x4177   :  { %vm2836_vm10 = vcmp.lt.s32.totalorder %v2834_v42, %v2835_v15 }
0x4178   :  { %v2837_v53 = vsel %vm2836_vm10, %v2834_v42, %v2835_v15  ;;  %vm6611_vm10 = vcmp.eq.s32.totalorder %v4619_v17, 1 }
0x4179   :  { %v2838_v43 = vrot.slane %v2837_v53, 1  ;;  %v2857_v6 = vsel %vm6611_vm10, %v2856_v32, %v2794_v2 }
0x417b   :  { %vm2839_vm3 = vcmp.lt.s32.totalorder %v2837_v53, %v2838_v43 }
0x417c   :  { %v2840_v44 = vsel %vm2839_vm3, %v2837_v53, %v2838_v43  ;;  %vm6612_vm3 = vcmp.eq.s32.totalorder %v4619_v17, 5 }
0x417d   :  { %4151 = vpush %v2840_v44 }
0x41ae   :  { %s6178_s2 = spop %4151 }
0x41af   :  { %s2843_s6 = sand.u32 127, %s6178_s2  ;;  %v2874_v33 = vstv %s6178_s2  ;;  %s2845_s12 = sshra.s32 %s6178_s2, 7 }
0x41b0   :  { %s6859_s6 = smov (!%p2842_p13, %s2843_s6), 0  ;;  %vm2875_vm9 = vcmp.eq.s32.totalorder %v4671_v63, %v2874_v33  ;;  %s6861_s12 = smov (!%p2842_p13, %s2845_s12), 0 }
0x41b1   :  { %v6191_v0 = vsel %vm2875_vm9, -inf, %v6139_v12  ;;  %s2858_s5 = scvt.s32.f32 %s6859_s6  ;;  %p2848_p4 = scmp.eq.s32.totalorder %s6861_s12, 2 }
0x41b2   :  { %2877 = vmax.xlane.f32.xlu0 %v6191_v0  ;;  %p2850_p5 = scmp.eq.s32.totalorder %s6861_s12, 1  ;;  %p2852_p1 = scmp.eq.s32.totalorder %s6861_s12, 0 }
0x41b3   :  { %v2859_v31 = vstv %s2858_s5  ;;  %s2849_s21 = scalar_select %p2848_p4, %s6849_s0, %s6851_s16 }
0x41b4   :  { %v2860_v1 = vsel %vm6612_vm3, %v2859_v31, %v2857_v6  ;;  %s2861_s24 = scvt.s32.f32 %s6861_s12  ;;  %p2866_p4 = scmp.eq.s32.totalorder %s6859_s6, 127 }
0x41b5   :  { %s2851_s25 = scalar_select %p2850_p5, %s6847_s15, %s2849_s21 }
0x41b6   :  { %v2862_v26 = vstv %s2861_s24  ;;  %p2796_p5 = pneg %p2771_p12 }
0x41b7   :  { %s2853_s20 = scalar_select %p2852_p1, %s6845_s18, %s2851_s25 }
0x41b9   :  { %s2854_s29 = ssub.f32 %s6142_s14, %s2853_s20 }
0x41bb   :  { %s6863_s29 = smov (!%p2842_p13, %s2854_s29), 0.0 }
0x41bc   :  { %v2864_v48 = vstv %s6863_s29 }
0x423f   :  { %v2878_v45 = vpop.xlane.xlu0 %2877 }
0x4240   :  { %v2879_v21 = vrot.slane %v2878_v45, 4 }
0x4242   :  { %v2880_v28 = vmax.f32 %v2878_v45, %v2879_v21 }
0x4244   :  { %v2881_v47 = vrot.slane %v2880_v28, 2 }
0x4246   :  { %v2882_v60 = vmax.f32 %v2880_v28, %v2881_v47  ;;  %v2799_v47 = vstv %s6855_s27 }
0x4248   :  { %v2883_v51 = vrot.slane %v2882_v60, 1 }
0x424a   :  { %v2884_v52 = vmax.f32 %v2882_v60, %v2883_v51  ;;  %v2870_v60 = vstv %s6859_s6 }
0x424c   :  { %4153 = vpush %v2884_v52 }
0x427d   :  { %s6203_s7 = spop %4153 }
0x427e   :  { %v2886_v54 = vstv %s6203_s7  ;;  %p2913_p3 = scmp.gt.f32.partialorder %s6203_s7, -inf }
0x427f   :  { %vm2887_vm1 = vcmp.eq.f32.partialorder %v6191_v0, %v2886_v54 }
0x4280   :  { %v2888_v56 = vsel %vm2887_vm1, %v4671_v63, 1024  ;;  %s6222_s28 = scalar_select %p2913_p3, %s6203_s7, -inf  ;;  %vm6613_vm1 = vcmp.eq.s32.totalorder %v4619_v17, 9 }
0x4281   :  { %v2890_v57 = vshra.s32 %v2888_v56, 16  ;;  %v2889_v59 = vand.u32 65535, %v2888_v56  ;;  %v2863_v10 = vsel %vm6613_vm1, %v2862_v26, %v2860_v1 }
0x4282   :  { %v2927_v30 = vstv %s6222_s28 }
0x4283   :  { %v2892_v34 = vcvt.s32.f32 %v2890_v57  ;;  %v2891_v61 = vcvt.s32.f32 %v2889_v59 }
0x4285   :  { %2893 = vmin.xlane.f32.xlu1 %v2892_v34 }
0x4312   :  { %v2894_v39 = vpop.xlane.xlu1 %2893 }
0x4313   :  { %vm2895_vm9 = vcmp.eq.f32.partialorder %v2892_v34, %v2894_v39  ;;  %v2900_v4 = vcvt.f32.s32 %v2894_v39 }
0x4314   :  { %v2896_v3 = vsel %vm2895_vm9, %v2891_v61, inf  ;;  %vm6614_vm9 = vcmp.eq.s32.totalorder %v4619_v17, 13 }
0x4315   :  { %2897 = vmin.xlane.f32.xlu0 %v2896_v3  ;;  %v2901_v23 = vshll.u32 %v2900_v4, 16  ;;  %v2865_v35 = vsel %vm6614_vm9, %v2864_v48, %v2863_v10 }
0x43a2   :  { %v2898_v8 = vpop.xlane.xlu0 %2897 }
0x43a3   :  { %v2899_v12 = vcvt.f32.s32 %v2898_v8 }
0x43a5   :  { %v2902_v41 = vadd.s32 %v2901_v23, %v2899_v12 }
0x43a7   :  { %v2903_v13 = vrot.slane %v2902_v41, 4 }
0x43a9   :  { %vm2904_vm13 = vcmp.lt.s32.totalorder %v2902_v41, %v2903_v13 }
0x43aa   :  { %v2905_v46 = vsel %vm2904_vm13, %v2902_v41, %v2903_v13  ;;  %vm6615_vm13 = vcmp.eq.s32.totalorder %v4619_v17, 2 }
0x43ab   :  { %v2906_v16 = vrot.slane %v2905_v46, 2  ;;  %v2928_v11 = vsel %vm6615_vm13, %v2927_v30, %v2865_v35 }
0x43ad   :  { %vm2907_vm15 = vcmp.lt.s32.totalorder %v2905_v46, %v2906_v16 }
0x43ae   :  { %v2908_v7 = vsel %vm2907_vm15, %v2905_v46, %v2906_v16  ;;  %vm6616_vm15 = vcmp.eq.s32.totalorder %v4619_v17, 6 }
0x43af   :  { %v2909_v20 = vrot.slane %v2908_v7, 1 }
0x43b1   :  { %vm2910_vm10 = vcmp.lt.s32.totalorder %v2908_v7, %v2909_v20 }
0x43b2   :  { %v2911_v25 = vsel %vm2910_vm10, %v2908_v7, %v2909_v20 }
0x43b3   :  { %4155 = vpush %v2911_v25 }
0x43e4   :  { %s6224_s9 = spop %4155 }
0x43e5   :  { %s2914_s30 = sand.u32 127, %s6224_s9  ;;  %v2945_v29 = vstv %s6224_s9  ;;  %s2916_s23 = sshra.s32 %s6224_s9, 7 }
0x43e6   :  { %s6865_s30 = smov (!%p2913_p3, %s2914_s30), 0  ;;  %vm2946_vm3 = vcmp.eq.s32.totalorder %v4671_v63, %v2945_v29  ;;  %s6867_s23 = smov (!%p2913_p3, %s2916_s23), 0 }
0x43e7   :  { %v2947_v9 = vsel %vm2946_vm3, -inf, %v6191_v0  ;;  %s2929_s17 = scvt.s32.f32 %s6865_s30  ;;  %p2919_p6 = scmp.eq.s32.totalorder %s6867_s23, 2  ;;  %v2941_v51 = vstv %s6865_s30 }
0x43e8   :  { %2948 = vmax.xlane.f32.xlu1 %v2947_v9  ;;  %p2921_p2 = scmp.eq.s32.totalorder %s6867_s23, 1  ;;  %p2923_p0 = scmp.eq.s32.totalorder %s6867_s23, 0 }
0x43e9   :  { %v2930_v36 = vstv %s2929_s17  ;;  %s2920_s1 = scalar_select %p2919_p6, %s6849_s0, %s6851_s16 }
0x43ea   :  { %v6244_v37 = vsel %vm6616_vm15, %v2930_v36, %v2928_v11  ;;  %s2932_s10 = scvt.s32.f32 %s6867_s23  ;;  %vm2800_vm15 = vcmp.eq.s32.totalorder %v4619_v17, %v2799_v47  ;;  %p2937_p1 = scmp.eq.s32.totalorder %s6865_s30, 127 }
0x43eb   :  { %s2922_s13 = scalar_select %p2921_p2, %s6847_s15, %s2920_s1 }
0x43ec   :  { %v2933_v52 = vstv %s2932_s10  ;;  %p2867_p6 = pneg %p2842_p13 }
0x43ed   :  { %s2924_s8 = scalar_select %p2923_p0, %s6845_s18, %s2922_s13  ;;  %v2934_v34 = vsel %vm768_vm0, %v2933_v52, %v6244_v37 }
0x43ee   :  { %p2797_p0 = por %p2796_p5, %p2795_p7 }
0x43ef   :  { %s2925_s19 = ssub.f32 %s6203_s7, %s2924_s8 }
0x43f0   :  { %s6883_s3 = smov (%p2797_p0, %s6163_s3), -inf }
0x43f1   :  { %s6869_s19 = smov (!%p2913_p3, %s2925_s19), 0.0 }
0x43f2   :  { %v2935_v54 = vstv %s6869_s19 }
0x43f3   :  { %v2936_v61 = vsel %vm772_vm14, %v2935_v54, %v2934_v34 }
0x4475   :  { %v2949_v55 = vpop.xlane.xlu1 %2948 }
0x4476   :  { %v2950_v24 = vrot.slane %v2949_v55, 4 }
0x4478   :  { %v2951_v40 = vmax.f32 %v2949_v55, %v2950_v24 }
0x447a   :  { %v2952_v27 = vrot.slane %v2951_v40, 2 }
0x447c   :  { %v2953_v42 = vmax.f32 %v2951_v40, %v2952_v27 }
0x447e   :  { %v2954_v15 = vrot.slane %v2953_v42, 1 }
0x4480   :  { %v2955_v53 = vmax.f32 %v2953_v42, %v2954_v15 }
0x4482   :  { %4157 = vpush %v2955_v53 }
0x44b3   :  { %s6246_s26 = spop %4157 }
0x44b4   :  { %v2957_v43 = vstv %s6246_s26  ;;  %p2984_p11 = scmp.gt.f32.partialorder %s6246_s26, -inf }
0x44b5   :  { %vm2958_vm10 = vcmp.eq.f32.partialorder %v2947_v9, %v2957_v43 }
0x44b6   :  { %v2959_v44 = vsel %vm2958_vm10, %v4671_v63, 1024  ;;  %s6268_s2 = scalar_select %p2984_p11, %s6246_s26, -inf  ;;  %vm2871_vm10 = vcmp.eq.s32.totalorder %v4619_v17, %v2870_v60 }
0x44b7   :  { %v2961_v5 = vshra.s32 %v2959_v44, 16  ;;  %v2960_v19 = vand.u32 65535, %v2959_v44 }
0x44b8   :  { %v2998_v57 = vstv %s6268_s2 }
0x44b9   :  { %v2963_v18 = vcvt.s32.f32 %v2961_v5  ;;  %v2962_v22 = vcvt.s32.f32 %v2960_v19  ;;  %v2999_v4 = vsel %vm832_vm11, %v2998_v57, %v2936_v61 }
0x44bb   :  { %2964 = vmin.xlane.f32.xlu0 %v2963_v18 }
0x4548   :  { %v2965_v62 = vpop.xlane.xlu0 %2964 }
0x4549   :  { %vm2966_vm3 = vcmp.eq.f32.partialorder %v2963_v18, %v2965_v62  ;;  %v2971_v38 = vcvt.f32.s32 %v2965_v62 }
0x454a   :  { %v2967_v33 = vsel %vm2966_vm3, %v2962_v22, inf  ;;  %vm2942_vm3 = vcmp.eq.s32.totalorder %v4619_v17, %v2941_v51 }
0x454b   :  { %2968 = vmin.xlane.f32.xlu1 %v2967_v33  ;;  %v2972_v0 = vshll.u32 %v2971_v38, 16 }
0x45d8   :  { %v2969_v32 = vpop.xlane.xlu1 %2968 }
0x45d9   :  { %v2970_v49 = vcvt.f32.s32 %v2969_v32 }
0x45db   :  { %v2973_v2 = vadd.s32 %v2972_v0, %v2970_v49 }
0x45dd   :  { %v2974_v6 = vrot.slane %v2973_v2, 4 }
0x45df   :  { %vm2975_vm1 = vcmp.lt.s32.totalorder %v2973_v2, %v2974_v6 }
0x45e0   :  { %v2976_v31 = vsel %vm2975_vm1, %v2973_v2, %v2974_v6  ;;  %vm2801_vm1 = vmand %vm476_vm2, %vm2800_vm15 }
0x45e1   :  { %v2977_v1 = vrot.slane %v2976_v31, 2  ;;  %v2802_v59 = vsel %vm2801_vm1, 1.0, %v4305_v50  ;;  %vm6619_vm1 = vcmp.eq.s32.totalorder %v4619_v17, 15 }
0x45e3   :  { %vm2978_vm9 = vcmp.lt.s32.totalorder %v2976_v31, %v2977_v1 }
0x45e4   :  { %v2979_v45 = vsel %vm2978_vm9, %v2976_v31, %v2977_v1  ;;  %vm6280_vm9 = vmand %vm481_vm5, %vm2871_vm10 }
0x45e5   :  { %v2980_v21 = vrot.slane %v2979_v45, 1  ;;  %v2873_v3 = vsel %vm6280_vm9, 1.0, %v2802_v59 }
0x45e7   :  { %vm2981_vm13 = vcmp.lt.s32.totalorder %v2979_v45, %v2980_v21 }
0x45e8   :  { %v2982_v28 = vsel %vm2981_vm13, %v2979_v45, %v2980_v21  ;;  %vm2943_vm13 = vmand %vm483_vm6, %vm2942_vm3  ;;  %vm3016_vm3 = vcmp.eq.s32.totalorder %v4617_v58, 6 }
0x45e9   :  { %4159 = vpush %v2982_v28  ;;  %v2944_v50 = vsel %vm2943_vm13, 1.0, %v2873_v3 }
0x461a   :  { %s4160_s5 = spop %4159 }
0x461b   :  { %s2985_s12 = sand.u32 127, %s4160_s5  ;;  %s2987_s21 = sshra.s32 %s4160_s5, 7 }
0x461c   :  { %s6871_s12 = smov (!%p2984_p11, %s2985_s12), 0  ;;  %s6873_s21 = smov (!%p2984_p11, %s2987_s21), 0 }
0x461d   :  { %s3000_s25 = scvt.s32.f32 %s6871_s12  ;;  %v3012_v39 = vstv %s6871_s12  ;;  %p2990_p10 = scmp.eq.s32.totalorder %s6873_s21, 2 }
0x461e   :  { %vm3013_vm15 = vcmp.eq.s32.totalorder %v4619_v17, %v3012_v39  ;;  %p2992_p9 = scmp.eq.s32.totalorder %s6873_s21, 1  ;;  %p2994_p8 = scmp.eq.s32.totalorder %s6873_s21, 0 }
0x461f   :  { %v3001_v8 = vstv %s3000_s25  ;;  %vm3014_vm10 = vmand %vm485_vm7, %vm3013_vm15  ;;  %s6875_s0 = smov (!%p2990_p10, %s6849_s0), %s6851_s16  ;;  %s3003_s20 = scvt.s32.f32 %s6873_s21 }
0x4620   :  { %v3002_v23 = vsel %vm835_vm4, %v3001_v8, %v2999_v4  ;;  %v3015_v12 = vsel %vm3014_vm10, 1.0, %v2944_v50  ;;  %s6877_s15 = smov (!%p2992_p9, %s6847_s15), %s6875_s0  ;;  %p3008_p2 = scmp.eq.s32.totalorder %s6871_s12, 127 }
0x4621   :  { %3847 = vmatmul.mubr.f32.vlgmr.msra.gmra.mrb[22].mxu0 %v3015_v12  ;;  %s6879_s18 = smov (!%p2994_p8, %s6845_s18), %s6877_s15  ;;  %v3004_v41 = vstv %s3003_s20  ;;  %p2938_p10 = pneg %p2913_p3 }
0x4622   :  { %s2996_s29 = ssub.f32 %s6246_s26, %s6879_s18  ;;  %v3005_v13 = vsel %vm839_vm12, %v3004_v41, %v3002_v23  ;;  %p2868_p9 = por %p2867_p6, %p2866_p4 }
0x4623   :  { %p3009_p8 = pneg %p2984_p11  ;;  %p2939_p12 = por %p2938_p10, %p2937_p1 }
0x4624   :  { %s6881_s29 = smov (!%p2984_p11, %s2996_s29), 0.0  ;;  %s6885_s11 = smov (%p2868_p9, %s6174_s11), -inf }
0x4625   :  { %v3006_v46 = vstv %s6881_s29  ;;  %p3010_p13 = por %p3009_p8, %p3008_p2  ;;  %s6887_s28 = smov (%p2939_p12, %s6222_s28), -inf  ;;  %v3020_v20 = vstv %s6885_s11 }
0x4626   :  { %v3007_v16 = vsel %vm6619_vm1, %v3006_v46, %v3005_v13  ;;  %v3022_v25 = vstv %s6887_s28 }
0x4627   :  { %v6319_v7 = vsel %vm3016_vm3, %v3007_v16, %v6093_v14  ;;  %s6889_s2 = smov (%p3010_p13, %s6268_s2), -inf  ;;  %v3018_v14 = vstv %s6883_s3 }
0x4628   :  { %v3019_v26 = vsel %vm476_vm2, %v3018_v14, -inf  ;;  %v3024_v29 = vstv %s6889_s2 }
0x4629   :  { %v3021_v48 = vsel %vm481_vm5, %v3020_v20, %v3019_v26 }
0x462a   :  { %v3023_v30 = vsel %vm483_vm6, %v3022_v25, %v3021_v48 }
0x462b   :  { %v3025_v9 = vsel %vm485_vm7, %v3024_v29, %v3023_v30 }
0x46f4   :  { %v3092_v10 = vpop.f32.mrb[22].mxu0 }
0x46f5   :  { %v3093_v35 = vadd.f32 %v3092_v10, %v3025_v9  ;;  %v3848_v11 = vpop.f32.mrb[23].mxu0 }
0x46f7   :  { %3096 = vmax.xlane.f32.xlu0 %v3093_v35 }
0x4784   :  { %v3097_v36 = vpop.xlane.xlu0 %3096 }
0x4785   :  { %v3098_v37 = vrot.slane %v3097_v36, 4 }
0x4787   :  { %v3099_v55 = vmax.f32 %v3097_v36, %v3098_v37 }
0x4789   :  { %v3100_v24 = vrot.slane %v3099_v55, 2 }
0x478b   :  { %v3101_v40 = vmax.f32 %v3099_v55, %v3100_v24 }
0x478d   :  { %v3102_v27 = vrot.slane %v3101_v40, 1 }
0x478f   :  { %v3103_v42 = vmax.f32 %v3101_v40, %v3102_v27 }
0x4791   :  { %4161 = vpush %v3103_v42 }
0x47c2   :  { %s6357_s18 = spop %4161 }
0x47c3   :  { %v3105_v15 = vstv %s6357_s18  ;;  %p3132_p3 = scmp.gt.f32.partialorder %s6357_s18, -inf }
0x47c4   :  { %vm3106_vm2 = vcmp.eq.f32.partialorder %v3093_v35, %v3105_v15 }
0x47c5   :  { %v3107_v53 = vsel %vm3106_vm2, %v4671_v63, 1024  ;;  %s6401_s30 = scalar_select %p3132_p3, %s6357_s18, -inf }
0x47c6   :  { %v3109_v43 = vshra.s32 %v3107_v53, 16  ;;  %v3108_v5 = vand.u32 65535, %v3107_v53 }
0x47c8   :  { %v3111_v44 = vcvt.s32.f32 %v3109_v43  ;;  %v3110_v19 = vcvt.s32.f32 %v3108_v5 }
0x47ca   :  { %3112 = vmin.xlane.f32.xlu1 %v3111_v44 }
0x4857   :  { %v3113_v18 = vpop.xlane.xlu1 %3112 }
0x4858   :  { %vm3114_vm5 = vcmp.eq.f32.partialorder %v3111_v44, %v3113_v18  ;;  %v3119_v22 = vcvt.f32.s32 %v3113_v18 }
0x4859   :  { %v3115_v62 = vsel %vm3114_vm5, %v3110_v19, inf }
0x485a   :  { %3116 = vmin.xlane.f32.xlu0 %v3115_v62  ;;  %v3120_v38 = vshll.u32 %v3119_v22, 16 }
0x48e7   :  { %v3117_v33 = vpop.xlane.xlu0 %3116 }
0x48e8   :  { %v3118_v32 = vcvt.f32.s32 %v3117_v33 }
0x48ea   :  { %v3121_v0 = vadd.s32 %v3120_v38, %v3118_v32 }
0x48ec   :  { %v3122_v49 = vrot.slane %v3121_v0, 4 }
0x48ee   :  { %vm3123_vm6 = vcmp.lt.s32.totalorder %v3121_v0, %v3122_v49 }
0x48ef   :  { %v3124_v2 = vsel %vm3123_vm6, %v3121_v0, %v3122_v49 }
0x48f0   :  { %v3125_v6 = vrot.slane %v3124_v2, 2 }
0x48f2   :  { %vm3126_vm7 = vcmp.lt.s32.totalorder %v3124_v2, %v3125_v6 }
0x48f3   :  { %v3127_v31 = vsel %vm3126_vm7, %v3124_v2, %v3125_v6 }
0x48f4   :  { %v3128_v1 = vrot.slane %v3127_v31, 1 }
0x48f6   :  { %vm3129_vm9 = vcmp.lt.s32.totalorder %v3127_v31, %v3128_v1 }
0x48f7   :  { %v3130_v45 = vsel %vm3129_vm9, %v3127_v31, %v3128_v1 }
0x48f8   :  { %4163 = vpush %v3130_v45 }
0x4929   :  { %s6361_s15 = spop %4163 }
0x492a   :  { %v3156_v21 = vstv %s6361_s15  ;;  %s3135_s6 = sshra.s32 %s6361_s15, 7  ;;  %s3133_s9 = sand.u32 127, %s6361_s15 }
0x492b   :  { %vm3157_vm13 = vcmp.eq.s32.totalorder %v4671_v63, %v3156_v21  ;;  %s6891_s6 = smov (!%p3132_p3, %s3135_s6), 0  ;;  %s6893_s9 = smov (!%p3132_p3, %s3133_s9), 0 }
0x492c   :  { %v3158_v28 = vsel %vm3157_vm13, -inf, %v3093_v35  ;;  %p3138_p11 = scmp.eq.s32.totalorder %s6891_s6, 2  ;;  %p3140_p7 = scmp.eq.s32.totalorder %s6891_s6, 1 }
0x492d   :  { %3159 = vmax.xlane.f32.xlu1 %v3158_v28  ;;  %p3142_p4 = scmp.eq.s32.totalorder %s6891_s6, 0  ;;  %s3148_s25 = scvt.s32.f32 %s6893_s9 }
0x492e   :  { %s3139_s7 = scalar_select %p3138_p11, %s6887_s28, %s6889_s2 }
0x4930   :  { %s3141_s24 = scalar_select %p3140_p7, %s6885_s11, %s3139_s7 }
0x4932   :  { %s3143_s17 = scalar_select %p3142_p4, %s6883_s3, %s3141_s24 }
0x4934   :  { %s3144_s23 = ssub.f32 %s6357_s18, %s3143_s17  ;;  %s3151_s18 = scvt.s32.f32 %s6891_s6 }
0x4936   :  { %s6897_s23 = smov (!%p3132_p3, %s3144_s23), 0.0 }
0x49ba   :  { %v3160_v47 = vpop.xlane.xlu1 %3159 }
0x49bb   :  { %v3161_v60 = vrot.slane %v3160_v47, 4 }
0x49bd   :  { %v3162_v51 = vmax.f32 %v3160_v47, %v3161_v60 }
0x49bf   :  { %v3163_v52 = vrot.slane %v3162_v51, 2 }
0x49c1   :  { %v3164_v54 = vmax.f32 %v3162_v51, %v3163_v52 }
0x49c3   :  { %v3165_v56 = vrot.slane %v3164_v54, 1 }
0x49c5   :  { %v3166_v57 = vmax.f32 %v3164_v54, %v3165_v56 }
0x49c7   :  { %4165 = vpush %v3166_v57 }
0x49f8   :  { %s6365_s0 = spop %4165 }
0x49f9   :  { %v3168_v34 = vstv %s6365_s0  ;;  %p3195_p5 = scmp.gt.f32.partialorder %s6365_s0, -inf }
0x49fa   :  { %vm3169_vm15 = vcmp.eq.f32.partialorder %v3158_v28, %v3168_v34 }
0x49fb   :  { %v3170_v59 = vsel %vm3169_vm15, %v4671_v63, 1024  ;;  %s6429_s13 = scalar_select %p3195_p5, %s6365_s0, -inf }
0x49fc   :  { %v3172_v39 = vshra.s32 %v3170_v59, 16  ;;  %v3171_v3 = vand.u32 65535, %v3170_v59 }
0x49fe   :  { %v3174_v61 = vcvt.s32.f32 %v3172_v39  ;;  %v3173_v8 = vcvt.s32.f32 %v3171_v3 }
0x4a00   :  { %3175 = vmin.xlane.f32.xlu0 %v3174_v61 }
0x4a8d   :  { %v3176_v4 = vpop.xlane.xlu0 %3175 }
0x4a8e   :  { %vm3177_vm10 = vcmp.eq.f32.partialorder %v3174_v61, %v3176_v4  ;;  %v3182_v23 = vcvt.f32.s32 %v3176_v4 }
0x4a8f   :  { %v3178_v50 = vsel %vm3177_vm10, %v3173_v8, inf }
0x4a90   :  { %3179 = vmin.xlane.f32.xlu1 %v3178_v50  ;;  %v3183_v41 = vshll.u32 %v3182_v23, 16 }
0x4b1d   :  { %v3180_v12 = vpop.xlane.xlu1 %3179 }
0x4b1e   :  { %v3181_v13 = vcvt.f32.s32 %v3180_v12 }
0x4b20   :  { %v3184_v46 = vadd.s32 %v3183_v41, %v3181_v13 }
0x4b22   :  { %v3185_v16 = vrot.slane %v3184_v46, 4 }
0x4b24   :  { %vm3186_vm3 = vcmp.lt.s32.totalorder %v3184_v46, %v3185_v16 }
0x4b25   :  { %v3187_v14 = vsel %vm3186_vm3, %v3184_v46, %v3185_v16 }
0x4b26   :  { %v3188_v20 = vrot.slane %v3187_v14, 2 }
0x4b28   :  { %vm3189_vm1 = vcmp.lt.s32.totalorder %v3187_v14, %v3188_v20 }
0x4b29   :  { %v3190_v25 = vsel %vm3189_vm1, %v3187_v14, %v3188_v20  ;;  %v3146_v14 = vstv %s6401_s30  ;;  %v3149_v20 = vstv %s3148_s25 }
0x4b2a   :  { %v3191_v26 = vrot.slane %v3190_v25, 1 }
0x4b2c   :  { %vm3192_vm2 = vcmp.lt.s32.totalorder %v3190_v25, %v3191_v26 }
0x4b2d   :  { %v3193_v29 = vsel %vm3192_vm2, %v3190_v25, %v3191_v26  ;;  %v3147_v25 = vsel %vm619_vm8, %v3146_v14, 0.0  ;;  %vm6622_vm8 = vcmp.eq.s32.totalorder %v4619_v17, 12 }
0x4b2e   :  { %4167 = vpush %v3193_v29  ;;  %v3152_v29 = vstv %s3151_s18 }
0x4b5f   :  { %s6369_s16 = spop %4167 }
0x4b60   :  { %v3219_v48 = vstv %s6369_s16  ;;  %s3198_s26 = sshra.s32 %s6369_s16, 7  ;;  %s3196_s8 = sand.u32 127, %s6369_s16 }
0x4b61   :  { %vm3220_vm5 = vcmp.eq.s32.totalorder %v4671_v63, %v3219_v48  ;;  %s6895_s26 = smov (!%p3195_p5, %s3198_s26), 0  ;;  %s6901_s8 = smov (!%p3195_p5, %s3196_s8), 0  ;;  %v3154_v48 = vstv %s6897_s23 }
0x4b62   :  { %v3221_v30 = vsel %vm3220_vm5, -inf, %v3158_v28  ;;  %p3201_p6 = scmp.eq.s32.totalorder %s6895_s26, 2  ;;  %p3203_p0 = scmp.eq.s32.totalorder %s6895_s26, 1 }
0x4b63   :  { %3222 = vmax.xlane.f32.xlu0 %v3221_v30  ;;  %p3205_p9 = scmp.eq.s32.totalorder %s6895_s26, 0  ;;  %s3211_s16 = scvt.s32.f32 %s6901_s8 }
0x4b64   :  { %s3202_s19 = scalar_select %p3201_p6, %s6887_s28, %s6889_s2 }
0x4b65   :  { %s3214_s7 = scvt.s32.f32 %s6895_s26 }
0x4b66   :  { %s3204_s5 = scalar_select %p3203_p0, %s6885_s11, %s3202_s19 }
0x4b68   :  { %s3206_s21 = scalar_select %p3205_p9, %s6883_s3, %s3204_s5 }
0x4b6a   :  { %s3207_s15 = ssub.f32 %s6365_s0, %s3206_s21 }
0x4b6c   :  { %s6905_s15 = smov (!%p3195_p5, %s3207_s15), 0.0 }
0x4bf0   :  { %v3223_v9 = vpop.xlane.xlu0 %3222 }
0x4bf1   :  { %v3224_v10 = vrot.slane %v3223_v9, 4 }
0x4bf3   :  { %v3225_v35 = vmax.f32 %v3223_v9, %v3224_v10  ;;  %v3212_v10 = vstv %s3211_s16 }
0x4bf5   :  { %v3226_v11 = vrot.slane %v3225_v35, 2 }
0x4bf7   :  { %v3227_v36 = vmax.f32 %v3225_v35, %v3226_v11 }
0x4bf9   :  { %v3228_v37 = vrot.slane %v3227_v36, 1 }
0x4bfb   :  { %v3229_v55 = vmax.f32 %v3227_v36, %v3228_v37  ;;  %v3215_v37 = vstv %s3214_s7 }
0x4bfd   :  { %4169 = vpush %v3229_v55  ;;  %v3217_v55 = vstv %s6905_s15 }
0x4c2e   :  { %s6373_s22 = spop %4169 }
0x4c2f   :  { %v3231_v24 = vstv %s6373_s22  ;;  %p3258_p1 = scmp.gt.f32.partialorder %s6373_s22, -inf }
0x4c30   :  { %vm3232_vm6 = vcmp.eq.f32.partialorder %v3221_v30, %v3231_v24 }
0x4c31   :  { %v3233_v40 = vsel %vm3232_vm6, %v4671_v63, 1024 }
0x4c32   :  { %v3235_v27 = vshra.s32 %v3233_v40, 16  ;;  %v3234_v15 = vand.u32 65535, %v3233_v40 }
0x4c34   :  { %v3237_v42 = vcvt.s32.f32 %v3235_v27  ;;  %v3236_v43 = vcvt.s32.f32 %v3234_v15 }
0x4c36   :  { %3238 = vmin.xlane.f32.xlu1 %v3237_v42 }
0x4cc3   :  { %v3239_v53 = vpop.xlane.xlu1 %3238 }
0x4cc4   :  { %vm3240_vm7 = vcmp.eq.f32.partialorder %v3237_v42, %v3239_v53  ;;  %v3245_v5 = vcvt.f32.s32 %v3239_v53 }
0x4cc5   :  { %v3241_v44 = vsel %vm3240_vm7, %v3236_v43, inf  ;;  %vm6620_vm7 = vcmp.eq.s32.totalorder %v4619_v17, 4 }
0x4cc6   :  { %3242 = vmin.xlane.f32.xlu0 %v3241_v44  ;;  %v3246_v19 = vshll.u32 %v3245_v5, 16  ;;  %v3150_v26 = vsel %vm6620_vm7, %v3149_v20, %v3147_v25 }
0x4d53   :  { %v3243_v18 = vpop.xlane.xlu0 %3242 }
0x4d54   :  { %v3244_v62 = vcvt.f32.s32 %v3243_v18 }
0x4d56   :  { %v3247_v22 = vadd.s32 %v3246_v19, %v3244_v62 }
0x4d58   :  { %v3248_v33 = vrot.slane %v3247_v22, 4 }
0x4d5a   :  { %vm3249_vm9 = vcmp.lt.s32.totalorder %v3247_v22, %v3248_v33 }
0x4d5b   :  { %v3250_v38 = vsel %vm3249_vm9, %v3247_v22, %v3248_v33  ;;  %vm6621_vm9 = vcmp.eq.s32.totalorder %v4619_v17, 8 }
0x4d5c   :  { %v3251_v32 = vrot.slane %v3250_v38, 2  ;;  %v3153_v9 = vsel %vm6621_vm9, %v3152_v29, %v3150_v26 }
0x4d5d   :  { %v3155_v35 = vsel %vm6622_vm8, %v3154_v48, %v3153_v9 }
0x4d5e   :  { %vm3252_vm13 = vcmp.lt.s32.totalorder %v3250_v38, %v3251_v32 }
0x4d5f   :  { %v3253_v0 = vsel %vm3252_vm13, %v3250_v38, %v3251_v32  ;;  %vm6623_vm13 = vcmp.eq.s32.totalorder %v4619_v17, 1 }
0x4d60   :  { %v3254_v49 = vrot.slane %v3253_v0, 1 }
0x4d62   :  { %vm3255_vm15 = vcmp.lt.s32.totalorder %v3253_v0, %v3254_v49 }
0x4d63   :  { %v3256_v2 = vsel %vm3255_vm15, %v3253_v0, %v3254_v49  ;;  %vm6624_vm15 = vcmp.eq.s32.totalorder %v4619_v17, 5 }
0x4d64   :  { %4171 = vpush %v3256_v2 }
0x4d95   :  { %s6377_s14 = spop %4171 }
0x4d96   :  { %v3282_v6 = vstv %s6377_s14  ;;  %s3261_s1 = sshra.s32 %s6377_s14, 7  ;;  %s3259_s20 = sand.u32 127, %s6377_s14 }
0x4d97   :  { %vm3283_vm10 = vcmp.eq.s32.totalorder %v4671_v63, %v3282_v6  ;;  %s6899_s1 = smov (!%p3258_p1, %s3261_s1), 0  ;;  %s6903_s20 = smov (!%p3258_p1, %s3259_s20), 0 }
0x4d98   :  { %v3284_v31 = vsel %vm3283_vm10, -inf, %v3221_v30  ;;  %p3264_p2 = scmp.eq.s32.totalorder %s6899_s1, 2  ;;  %p3266_p10 = scmp.eq.s32.totalorder %s6899_s1, 1  ;;  %v3209_v30 = vstv %s6429_s13  ;;  %vm6625_vm10 = vcmp.eq.s32.totalorder %v4619_v17, 9 }
0x4d99   :  { %3285 = vmax.xlane.f32.xlu1 %v3284_v31  ;;  %p3268_p8 = scmp.eq.s32.totalorder %s6899_s1, 0  ;;  %s3274_s6 = scvt.s32.f32 %s6903_s20  ;;  %v3210_v11 = vsel %vm6623_vm13, %v3209_v30, %v3155_v35 }
0x4d9a   :  { %s3265_s10 = scalar_select %p3264_p2, %s6887_s28, %s6889_s2  ;;  %v3213_v36 = vsel %vm6624_vm15, %v3212_v10, %v3210_v11 }
0x4d9b   :  { %s3263_s14 = scalar_select %p3258_p1, %s6373_s22, -inf  ;;  %v3216_v40 = vsel %vm6625_vm10, %v3215_v37, %v3213_v36  ;;  %v3275_v27 = vstv %s3274_s6 }
0x4d9c   :  { %s3267_s12 = scalar_select %p3266_p10, %s6885_s11, %s3265_s10 }
0x4d9d   :  { %s3277_s9 = scvt.s32.f32 %s6899_s1  ;;  %v3272_v24 = vstv %s3263_s14  ;;  %s4308_s1 = smov [#allocation3]  }
0x4d9e   :  { %s3269_s29 = scalar_select %p3268_p8, %s6883_s3, %s3267_s12 }
0x4d9f   :  { %v3278_v43 = vstv %s3277_s9 }
0x4da0   :  { %s3270_s24 = ssub.f32 %s6373_s22, %s3269_s29 }
0x4da2   :  { %s6907_s24 = smov (!%p3258_p1, %s3270_s24), 0.0 }
0x4da3   :  { %v3280_v44 = vstv %s6907_s24 }
0x4e26   :  { %v3286_v1 = vpop.xlane.xlu1 %3285 }
0x4e27   :  { %v3287_v45 = vrot.slane %v3286_v1, 4 }
0x4e29   :  { %v3288_v21 = vmax.f32 %v3286_v1, %v3287_v45 }
0x4e2b   :  { %v3289_v28 = vrot.slane %v3288_v21, 2 }
0x4e2d   :  { %v3290_v47 = vmax.f32 %v3288_v21, %v3289_v28 }
0x4e2f   :  { %v3291_v60 = vrot.slane %v3290_v47, 1 }
0x4e31   :  { %v3292_v51 = vmax.f32 %v3290_v47, %v3291_v60 }
0x4e33   :  { %4173 = vpush %v3292_v51 }
0x4e64   :  { %s6381_s27 = spop %4173 }
0x4e65   :  { %v3294_v52 = vstv %s6381_s27  ;;  %p3321_p12 = scmp.gt.f32.partialorder %s6381_s27, -inf }
0x4e66   :  { %vm3295_vm3 = vcmp.eq.f32.partialorder %v3284_v31, %v3294_v52 }
0x4e67   :  { %v3296_v54 = vsel %vm3295_vm3, %v4671_v63, 1024  ;;  %s3326_s22 = scalar_select %p3321_p12, %s6381_s27, -inf  ;;  %vm6626_vm3 = vcmp.eq.s32.totalorder %v4619_v17, 13 }
0x4e68   :  { %v3298_v56 = vshra.s32 %v3296_v54, 16  ;;  %v3297_v34 = vand.u32 65535, %v3296_v54  ;;  %v3218_v42 = vsel %vm6626_vm3, %v3217_v55, %v3216_v40 }
0x4e69   :  { %v3335_v5 = vstv %s3326_s22 }
0x4e6a   :  { %v3300_v57 = vcvt.s32.f32 %v3298_v56  ;;  %v3299_v39 = vcvt.s32.f32 %v3297_v34 }
0x4e6c   :  { %3301 = vmin.xlane.f32.xlu0 %v3300_v57 }
0x4ef9   :  { %v3302_v59 = vpop.xlane.xlu0 %3301 }
0x4efa   :  { %vm3303_vm1 = vcmp.eq.f32.partialorder %v3300_v57, %v3302_v59  ;;  %v3308_v3 = vcvt.f32.s32 %v3302_v59 }
0x4efb   :  { %v3304_v61 = vsel %vm3303_vm1, %v3299_v39, inf  ;;  %vm6627_vm1 = vcmp.eq.s32.totalorder %v4619_v17, 2 }
0x4efc   :  { %3305 = vmin.xlane.f32.xlu1 %v3304_v61  ;;  %v3309_v8 = vshll.u32 %v3308_v3, 16  ;;  %v3273_v15 = vsel %vm6627_vm1, %v3272_v24, %v3218_v42 }
0x4f89   :  { %v3306_v4 = vpop.xlane.xlu1 %3305 }
0x4f8a   :  { %v3307_v50 = vcvt.f32.s32 %v3306_v4 }
0x4f8c   :  { %v3310_v23 = vadd.s32 %v3309_v8, %v3307_v50 }
0x4f8e   :  { %v3311_v63 = vrot.slane %v3310_v23, 4 }
0x4f90   :  { %vm3312_vm2 = vcmp.lt.s32.totalorder %v3310_v23, %v3311_v63 }
0x4f91   :  { %v3313_v12 = vsel %vm3312_vm2, %v3310_v23, %v3311_v63  ;;  %vm6628_vm2 = vcmp.eq.s32.totalorder %v4619_v17, 6 }
0x4f92   :  { %v3314_v41 = vrot.slane %v3313_v12, 2  ;;  %v3276_v53 = vsel %vm6628_vm2, %v3275_v27, %v3273_v15 }
0x4f93   :  { %v3279_v18 = vsel %vm768_vm0, %v3278_v43, %v3276_v53 }
0x4f94   :  { %vm3315_vm5 = vcmp.lt.s32.totalorder %v3313_v12, %v3314_v41  ;;  %v3281_v62 = vsel %vm772_vm14, %v3280_v44, %v3279_v18  ;;  %vm6629_vm14 = vcmp.eq.s32.totalorder %v4619_v17, 15 }
0x4f95   :  { %v3316_v13 = vsel %vm3315_vm5, %v3313_v12, %v3314_v41  ;;  %v3336_v22 = vsel %vm832_vm11, %v3335_v5, %v3281_v62  ;;  %vm3345_vm5 = vcmp.eq.s32.totalorder %v4617_v58, 7 }
0x4f96   :  { %v3317_v46 = vrot.slane %v3316_v13, 1 }
0x4f98   :  { %vm3318_vm6 = vcmp.lt.s32.totalorder %v3316_v13, %v3317_v46 }
0x4f99   :  { %v3319_v16 = vsel %vm3318_vm6, %v3316_v13, %v3317_v46 }
0x4f9a   :  { %4175 = vpush %v3319_v16 }
0x4fcb   :  { %s4176_s0 = spop %4175 }
0x4fcc   :  { %s3322_s30 = sand.u32 127, %s4176_s0  ;;  %s3324_s17 = sshra.s32 %s4176_s0, 7 }
0x4fcd   :  { %s6909_s30 = smov (!%p3321_p12, %s3322_s30), 0  ;;  %s6911_s17 = smov (!%p3321_p12, %s3324_s17), 0 }
0x4fce   :  { %p3327_p13 = scmp.eq.s32.totalorder %s6911_s17, 2  ;;  %p3329_p3 = scmp.eq.s32.totalorder %s6911_s17, 1 }
0x4fcf   :  { %s3337_s26 = scvt.s32.f32 %s6909_s30  ;;  %p3331_p11 = scmp.eq.s32.totalorder %s6911_s17, 0 }
0x4fd0   :  { %s6913_s28 = smov (!%p3327_p13, %s6887_s28), %s6889_s2  ;;  %s3340_s23 = scvt.s32.f32 %s6911_s17 }
0x4fd1   :  { %s6915_s11 = smov (!%p3329_p3, %s6885_s11), %s6913_s28  ;;  %v3338_v19 = vstv %s3337_s26  ;;  %s3354_s28 = sshll.u32 %s4308_s1, 4  ;;  %s3355_s28 = int_to_ptr.vmem [resolvable:$true] %s3354_s28 }
0x4fd2   :  { %s6917_s3 = smov (!%p3331_p11, %s6883_s3), %s6915_s11  ;;  %v3339_v33 = vsel %vm835_vm4, %v3338_v19, %v3336_v22  ;;  %v3341_v38 = vstv %s3340_s23  ;;  %p4284_p4 = scmp.lt.s32.totalorder %s3355_s28, %s3355_s28 }
0x4fd3   :  { %s3333_s2 = ssub.f32 %s6381_s27, %s6917_s3  ;;  %v3342_v32 = vsel %vm839_vm12, %v3341_v38, %v3339_v33  ;;  %s4279_s3 = scalar_lea.vmem %s3355_s28, 128 }
0x4fd4   :  { %p4280_p7 = scmp.ne.s32.totalorder %s3355_s28, %s4279_s3  ;;  %p4285_p5 = scmp.lt.s32.totalorder %s4279_s3, %s4279_s3 }
0x4fd5   :  { %s6919_s2 = smov (!%p3321_p12, %s3333_s2), 0.0 }
0x4fd6   :  { %v3343_v0 = vstv %s6919_s2  ;;  %p4286_p1 = por %p4285_p5, %p4284_p4 }
0x4fd7   :  { %v3344_v49 = vsel %vm6629_vm14, %v3343_v0, %v3342_v32 }
0x4fd8   :  { %v3346_v2 = vsel %vm3345_vm5, %v3344_v49, %v6319_v7  ;;  %p4287_p6 = pnand %p4286_p1, %p4280_p7 }
0x4fd9   :  { %3347 = vst [vmem:[#allocation3] sm:$0xff] %v3346_v2 }
0x4fda   :  { %4290 = shalt.err (!%p4287_p6)
}
0x4fdb   :  { %s4291_s13 = scalar_lea.hbm %s6540_s4, 128 }
0x4fdc   :  { %p4292_p2 = scmp.ne.s32.totalorder %s6540_s4, %s4291_s13  ;;  %p4295_p0 = scmp.lt.u32.totalorder %s4291_s13, %s6540_s4 }
0x4fde   :  { %p4297_p10 = pnand %p4295_p0, %p4292_p2 }
0x4fe0   :  { %4300 = shalt.err (!%p4297_p10)
}
0x4fe1   :  { %3357 = dma.vmem_to_hbm [thread:$0]  %s3355_s28, 128, %s6540_s4, [#allocation4]  }
0x4fe2   :  { %4301 = dma.done.wait [#allocation4], 128  }
0x4fe3   :  { %4302 = vsyncadd [#allocation4], 4294967168 }
0x4fe4   :  { %3361 = vsyncpa [#allocation4], 1 }

</bundles_post_ra>
